<compile_context>
chip_gen: v6e
topology: v6e:2x2x1
jax: 0.10.0
libtpu: 0.0.40
codegen_flags: <defaults>
</compile_context>

<pallas_src>
import jax
import jax.numpy as jnp
from jax.experimental import pallas as pl
from jax.experimental.pallas import tpu as pltpu

# Model hyper-parameters (mirrors MyResGCN(in, hidden, out, num_layers,
# dropout, bn=False, activation='Tanh')).
IN_CHANNELS = 16
HIDDEN_CHANNELS = 32
OUT_CHANNELS = 8
NUM_LAYERS = 3
DROPOUT = 0.5            # inference mode -> dropout is identity
NUM_NODES = 64           # nodes per graph
NUM_EDGES = 128          # edges per graph
NUM_GRAPHS = 64          # graphs batched per forward call
GRAPHS_PER_BLOCK = 8     # graphs processed per grid step -> gn_block = 512


def resgcn_kernel(x_ref, a_ref, w_in_ref, b_in_ref, w_c_ref, b_c_ref,
                  w_out_t_ref, b_out_t_ref, o_ref):
    # x_ref: (gn_block, C_in) bf16        a_ref: (gn_block, gn_block) bf16
    x = x_ref[...]
    a_blk = a_ref[...]

    # inProj: Linear(in_channels -> hidden). bf16 x bf16 -> f32 accumulate.
    h = jnp.dot(x, w_in_ref[...],
                preferred_element_type=jnp.float32) + b_in_ref[...]
    last = h

    for i in range(NUM_LAYERS):
        # GCNConv(hidden -> hidden): A_blk @ (H @ W_i) + b_i.
        hw = jnp.dot(h.astype(jnp.bfloat16), w_c_ref[i],
                     preferred_element_type=jnp.float32)          # (512, 32)
        agg = jnp.dot(a_blk, hw.astype(jnp.bfloat16),
                      preferred_element_type=jnp.float32)         # (512, 32)
        # activation = 'Tanh'; dropout(training=False) and bn=False elided.
        h = jnp.tanh(agg + b_c_ref[i])
        h = h + last                                              # residual
        last = h

    # outProj computed transposed -> (C_out, gn_block): store is lane-dense
    # (8, 512), last dim multiple of 128 -> unmasked vst.
    logits_t = jnp.einsum('ch,nh->cn', w_out_t_ref[...],
                          h.astype(jnp.bfloat16),
                          preferred_element_type=jnp.float32) + b_out_t_ref[...]

    # log_softmax over the class axis (axis 0 after the transpose), stable.
    m = jnp.max(logits_t, axis=0, keepdims=True)
    z = logits_t - m
    lse = jnp.log(jnp.sum(jnp.exp(z), axis=0, keepdims=True))
    o_ref[...] = z - lse


def resgcn_forward(x, a_hat, w_in, b_in, w_convs, b_convs, w_out, b_out):
    bf = jnp.bfloat16
    b, n, cin = x.shape
    hid = w_in.shape[1]
    cout = w_out.shape[1]
    assert b % GRAPHS_PER_BLOCK == 0
    gn_block = GRAPHS_PER_BLOCK * n
    num_blocks = b // GRAPHS_PER_BLOCK
    gn_total = b * n

    # ---- Wrapper-side layout plumbing (free / contiguous reshapes). ----
    # Node features flattened to 2D; reshape done here, not in the kernel.
    x2 = x.reshape(gn_total, cin).astype(bf)

    # Block-diagonal adjacency: A_blk[blk] = blockdiag(a_hat[blk*GPB:(blk+1)*GPB]).
    eye = jnp.eye(GRAPHS_PER_BLOCK, dtype=a_hat.dtype)
    a4 = a_hat.reshape(num_blocks, GRAPHS_PER_BLOCK, n, n)
    a_blk = jnp.einsum('bgnm,gh->bgnhm', a4, eye).reshape(
        num_blocks * gn_block, gn_block).astype(bf)

    # MXU operands in bf16 at the boundary; biases stay f32.
    w_in_bf = w_in.astype(bf)
    w_c_bf = w_convs.astype(bf)
    w_out_t_bf = w_out.T.astype(bf)                     # (C_out, hidden)
    b_out_t = b_out.reshape(cout, 1).astype(jnp.float32)

    # Advisory cost estimate so XLA can overlap this call in bigger graphs.
    flops = (2 * gn_total * cin * hid
             + NUM_LAYERS * (2 * gn_total * hid * hid
                             + 2 * gn_total * gn_block * hid)
             + 2 * gn_total * hid * cout)
    transcendentals = NUM_LAYERS * gn_total * hid + gn_total * cout
    bytes_accessed = (x2.size * 2 + a_blk.size * 2
                      + w_in_bf.size * 2 + w_c_bf.size * 2 + w_out_t_bf.size * 2
                      + b_in.size * 4 + b_convs.size * 4 + b_out_t.size * 4
                      + gn_total * cout * 4)

    out_t = pl.pallas_call(
        resgcn_kernel,
        out_shape=jax.ShapeDtypeStruct((cout, gn_total), jnp.float32),
        grid=(num_blocks,),
        in_specs=[
            pl.BlockSpec((gn_block, cin), lambda g: (g, 0)),
            pl.BlockSpec((gn_block, gn_block), lambda g: (g, 0)),
            # Weights/biases: constant index_map -> stay resident in VMEM.
            pl.BlockSpec((cin, hid), lambda g: (0, 0)),
            pl.BlockSpec((1, hid), lambda g: (0, 0)),
            pl.BlockSpec((NUM_LAYERS, hid, hid), lambda g: (0, 0, 0)),
            pl.BlockSpec((NUM_LAYERS, 1, hid), lambda g: (0, 0, 0)),
            pl.BlockSpec((cout, hid), lambda g: (0, 0)),
            pl.BlockSpec((cout, 1), lambda g: (0, 0)),
        ],
        # Lane-dense output: (8, 512) block, last dim multiple of 128.
        out_specs=pl.BlockSpec((cout, gn_block), lambda g: (0, g)),
        compiler_params=pltpu.CompilerParams(
            dimension_semantics=("parallel",)),
        cost_estimate=pl.CostEstimate(
            flops=flops, transcendentals=transcendentals,
            bytes_accessed=bytes_accessed),
    )(x2, a_blk, w_in_bf, b_in, w_c_bf, b_convs, w_out_t_bf, b_out_t)

    # (C_out, B*N) -> (B, N, C_out): layout plumbing outside the kernel.
    return out_t.reshape(cout, b, n).transpose(1, 2, 0)


def reference_forward(x, a_hat, w_in, b_in, w_convs, b_convs, w_out, b_out):
    # Pure-JAX reference with the same bf16-operand / f32-accumulate scheme.
    bf = jnp.bfloat16
    h = jnp.einsum('bni,ih->bnh', x.astype(bf), w_in.astype(bf),
                   preferred_element_type=jnp.float32) + b_in
    last = h
    for i in range(NUM_LAYERS):
        hw = jnp.einsum('bnh,hk->bnk', h.astype(bf), w_convs[i].astype(bf),
                        preferred_element_type=jnp.float32)
        agg = jnp.einsum('bnm,bmk->bnk', a_hat.astype(bf), hw.astype(bf),
                         preferred_element_type=jnp.float32)
        h = jnp.tanh(agg + b_convs[i]) + last
        last = h
    logits = jnp.einsum('bnh,hc->bnc', h.astype(bf), w_out.astype(bf),
                        preferred_element_type=jnp.float32) + b_out
    return jax.nn.log_softmax(logits, axis=-1)


def build_normalized_adjacency(src, dst, num_nodes):
    # Dense equivalent of PyG gcn_norm: A_hat = D^{-1/2} (A + I) D^{-1/2}
    a = jnp.zeros((num_nodes, num_nodes), jnp.float32).at[dst, src].set(1.0)
    a = jnp.maximum(a, a.T)                        # undirected graph
    a = a + jnp.eye(num_nodes, dtype=jnp.float32)  # self loops (deg >= 1)
    deg = jnp.sum(a, axis=1)
    dinv = jax.lax.rsqrt(deg)
    return dinv[:, None] * a * dinv[None, :]


if __name__ == "__main__":
    key = jax.random.PRNGKey(0)
    keys = jax.random.split(key, 10)

    # Deterministic synthetic batch of graphs: features + random edge_index.
    x = jax.random.normal(keys[0], (NUM_GRAPHS, NUM_NODES, IN_CHANNELS),
                          jnp.float32)
    src = jax.random.randint(keys[1], (NUM_GRAPHS, NUM_EDGES), 0, NUM_NODES)
    dst = jax.random.randint(keys[2], (NUM_GRAPHS, NUM_EDGES), 0, NUM_NODES)
    a_hat = jax.vmap(
        lambda s, d: build_normalized_adjacency(s, d, NUM_NODES))(src, dst)

    # Deterministic parameter init (shapes follow the module's __init__).
    def glorot(k, shape):
        fan_in, fan_out = shape[-2], shape[-1]
        lim = jnp.sqrt(6.0 / (fan_in + fan_out))
        return jax.random.uniform(k, shape, jnp.float32, -lim, lim)

    w_in = glorot(keys[3], (IN_CHANNELS, HIDDEN_CHANNELS))
    b_in = 0.01 * jax.random.normal(keys[4], (1, HIDDEN_CHANNELS), jnp.float32)
    w_convs = glorot(keys[5], (NUM_LAYERS, HIDDEN_CHANNELS, HIDDEN_CHANNELS))
    b_convs = 0.01 * jax.random.normal(keys[6],
                                       (NUM_LAYERS, 1, HIDDEN_CHANNELS),
                                       jnp.float32)
    w_out = glorot(keys[7], (HIDDEN_CHANNELS, OUT_CHANNELS))
    b_out = 0.01 * jax.random.normal(keys[8], (1, OUT_CHANNELS), jnp.float32)

    out = resgcn_forward(x, a_hat, w_in, b_in, w_convs, b_convs, w_out, b_out)
    out = jax.block_until_ready(out)

    ref = reference_forward(x, a_hat, w_in, b_in, w_convs, b_convs,
                            w_out, b_out)
    assert out.shape == (NUM_GRAPHS, NUM_NODES, OUT_CHANNELS)
    assert jnp.allclose(out, ref, atol=1e-2, rtol=1e-2), \
        float(jnp.max(jnp.abs(out - ref)))

    print("KERNEL_OK")
</pallas_src>

<mosaic_0001>
module attributes {stable_mosaic.version = 11 : i64} {
  func.func @resgcn_kernel(%arg0: i32, %arg1: memref<512x16xbf16, #tpu.memory_space<vmem>>, %arg2: memref<512x512xbf16, #tpu.memory_space<vmem>>, %arg3: memref<16x32xbf16, #tpu.memory_space<vmem>>, %arg4: memref<1x32xf32, #tpu.memory_space<vmem>>, %arg5: memref<3x32x32xbf16, #tpu.memory_space<vmem>>, %arg6: memref<3x1x32xf32, #tpu.memory_space<vmem>>, %arg7: memref<8x32xbf16, #tpu.memory_space<vmem>>, %arg8: memref<8x1xf32, #tpu.memory_space<vmem>>, %arg9: memref<8x512xf32, #tpu.memory_space<vmem>>) attributes {dimension_semantics = [#tpu.dimension_semantics<parallel>], iteration_bounds = array<i64: 8>, scalar_prefetch = 0 : i64, scratch_operands = 0 : i64, tpu.core_type = #tpu.core_type<tc>, window_params = [{transform_indices = @transform_0, window_bounds = array<i64: 512, 16>}, {transform_indices = @transform_1, window_bounds = array<i64: 512, 512>}, {pipeline_mode = #tpu.pipeline_mode<synchronous>, transform_indices = @transform_2, window_bounds = array<i64: 16, 32>}, {pipeline_mode = #tpu.pipeline_mode<synchronous>, transform_indices = @transform_3, window_bounds = array<i64: 1, 32>}, {pipeline_mode = #tpu.pipeline_mode<synchronous>, transform_indices = @transform_4, window_bounds = array<i64: 3, 32, 32>}, {pipeline_mode = #tpu.pipeline_mode<synchronous>, transform_indices = @transform_5, window_bounds = array<i64: 3, 1, 32>}, {pipeline_mode = #tpu.pipeline_mode<synchronous>, transform_indices = @transform_6, window_bounds = array<i64: 8, 32>}, {pipeline_mode = #tpu.pipeline_mode<synchronous>, transform_indices = @transform_7, window_bounds = array<i64: 8, 1>}, {transform_indices = @transform_8, window_bounds = array<i64: 8, 512>}]} {
    %c0 = arith.constant 0 : index
    %c0_0 = arith.constant 0 : index
    %0 = vector.load %arg1[%c0, %c0_0] : memref<512x16xbf16, #tpu.memory_space<vmem>>, vector<512x16xbf16>
    %c0_1 = arith.constant 0 : index
    %c0_2 = arith.constant 0 : index
    %1 = vector.load %arg2[%c0_1, %c0_2] : memref<512x512xbf16, #tpu.memory_space<vmem>>, vector<512x512xbf16>
    %c0_3 = arith.constant 0 : index
    %c0_4 = arith.constant 0 : index
    %2 = vector.load %arg3[%c0_3, %c0_4] : memref<16x32xbf16, #tpu.memory_space<vmem>>, vector<16x32xbf16>
    %cst = arith.constant dense<0.000000e+00> : vector<512x32xf32>
    %3 = tpu.matmul %0, %2, %cst {dimension_numbers = #tpu.dot_dimension_numbers<[1], [0], [0], [1], [0, 0, 1, 1], [], []>} : vector<512x16xbf16>, vector<16x32xbf16>, vector<512x32xf32> -> vector<512x32xf32>
    %c0_5 = arith.constant 0 : index
    %c0_6 = arith.constant 0 : index
    %4 = vector.load %arg4[%c0_5, %c0_6] : memref<1x32xf32, #tpu.memory_space<vmem>>, vector<1x32xf32>
    %5 = vector.broadcast %4 : vector<1x32xf32> to vector<512x32xf32>
    %6 = arith.addf %3, %5 : vector<512x32xf32>
    %7 = arith.truncf %6 : vector<512x32xf32> to vector<512x32xbf16>
    %c0_7 = arith.constant 0 : index
    %c0_8 = arith.constant 0 : index
    %c0_9 = arith.constant 0 : index
    %8 = vector.load %arg5[%c0_7, %c0_8, %c0_9] : memref<3x32x32xbf16, #tpu.memory_space<vmem>>, vector<1x32x32xbf16>
    %9 = vector.shape_cast %8 : vector<1x32x32xbf16> to vector<32x32xbf16>
    %cst_10 = arith.constant dense<0.000000e+00> : vector<512x32xf32>
    %10 = tpu.matmul %7, %9, %cst_10 {dimension_numbers = #tpu.dot_dimension_numbers<[1], [0], [0], [1], [0, 0, 1, 1], [], []>} : vector<512x32xbf16>, vector<32x32xbf16>, vector<512x32xf32> -> vector<512x32xf32>
    %11 = arith.truncf %10 : vector<512x32xf32> to vector<512x32xbf16>
    %cst_11 = arith.constant dense<0.000000e+00> : vector<512x32xf32>
    %12 = tpu.matmul %1, %11, %cst_11 {dimension_numbers = #tpu.dot_dimension_numbers<[1], [0], [0], [1], [0, 0, 1, 1], [], []>} : vector<512x512xbf16>, vector<512x32xbf16>, vector<512x32xf32> -> vector<512x32xf32>
    %c0_12 = arith.constant 0 : index
    %c0_13 = arith.constant 0 : index
    %c0_14 = arith.constant 0 : index
    %13 = vector.load %arg6[%c0_12, %c0_13, %c0_14] : memref<3x1x32xf32, #tpu.memory_space<vmem>>, vector<1x1x32xf32>
    %14 = vector.shape_cast %13 : vector<1x1x32xf32> to vector<1x32xf32>
    %15 = vector.broadcast %14 : vector<1x32xf32> to vector<512x32xf32>
    %16 = arith.addf %12, %15 : vector<512x32xf32>
    %17 = math.tanh %16 : vector<512x32xf32>
    %18 = arith.addf %17, %6 : vector<512x32xf32>
    %19 = arith.truncf %18 : vector<512x32xf32> to vector<512x32xbf16>
    %c1 = arith.constant 1 : index
    %c0_15 = arith.constant 0 : index
    %c0_16 = arith.constant 0 : index
    %20 = vector.load %arg5[%c1, %c0_15, %c0_16] : memref<3x32x32xbf16, #tpu.memory_space<vmem>>, vector<1x32x32xbf16>
    %21 = vector.shape_cast %20 : vector<1x32x32xbf16> to vector<32x32xbf16>
    %cst_17 = arith.constant dense<0.000000e+00> : vector<512x32xf32>
    %22 = tpu.matmul %19, %21, %cst_17 {dimension_numbers = #tpu.dot_dimension_numbers<[1], [0], [0], [1], [0, 0, 1, 1], [], []>} : vector<512x32xbf16>, vector<32x32xbf16>, vector<512x32xf32> -> vector<512x32xf32>
    %23 = arith.truncf %22 : vector<512x32xf32> to vector<512x32xbf16>
    %cst_18 = arith.constant dense<0.000000e+00> : vector<512x32xf32>
    %24 = tpu.matmul %1, %23, %cst_18 {dimension_numbers = #tpu.dot_dimension_numbers<[1], [0], [0], [1], [0, 0, 1, 1], [], []>} : vector<512x512xbf16>, vector<512x32xbf16>, vector<512x32xf32> -> vector<512x32xf32>
    %c1_19 = arith.constant 1 : index
    %c0_20 = arith.constant 0 : index
    %c0_21 = arith.constant 0 : index
    %25 = vector.load %arg6[%c1_19, %c0_20, %c0_21] : memref<3x1x32xf32, #tpu.memory_space<vmem>>, vector<1x1x32xf32>
    %26 = vector.shape_cast %25 : vector<1x1x32xf32> to vector<1x32xf32>
    %27 = vector.broadcast %26 : vector<1x32xf32> to vector<512x32xf32>
    %28 = arith.addf %24, %27 : vector<512x32xf32>
    %29 = math.tanh %28 : vector<512x32xf32>
    %30 = arith.addf %29, %18 : vector<512x32xf32>
    %31 = arith.truncf %30 : vector<512x32xf32> to vector<512x32xbf16>
    %c2 = arith.constant 2 : index
    %c0_22 = arith.constant 0 : index
    %c0_23 = arith.constant 0 : index
    %32 = vector.load %arg5[%c2, %c0_22, %c0_23] : memref<3x32x32xbf16, #tpu.memory_space<vmem>>, vector<1x32x32xbf16>
    %33 = vector.shape_cast %32 : vector<1x32x32xbf16> to vector<32x32xbf16>
    %cst_24 = arith.constant dense<0.000000e+00> : vector<512x32xf32>
    %34 = tpu.matmul %31, %33, %cst_24 {dimension_numbers = #tpu.dot_dimension_numbers<[1], [0], [0], [1], [0, 0, 1, 1], [], []>} : vector<512x32xbf16>, vector<32x32xbf16>, vector<512x32xf32> -> vector<512x32xf32>
    %35 = arith.truncf %34 : vector<512x32xf32> to vector<512x32xbf16>
    %cst_25 = arith.constant dense<0.000000e+00> : vector<512x32xf32>
    %36 = tpu.matmul %1, %35, %cst_25 {dimension_numbers = #tpu.dot_dimension_numbers<[1], [0], [0], [1], [0, 0, 1, 1], [], []>} : vector<512x512xbf16>, vector<512x32xbf16>, vector<512x32xf32> -> vector<512x32xf32>
    %c2_26 = arith.constant 2 : index
    %c0_27 = arith.constant 0 : index
    %c0_28 = arith.constant 0 : index
    %37 = vector.load %arg6[%c2_26, %c0_27, %c0_28] : memref<3x1x32xf32, #tpu.memory_space<vmem>>, vector<1x1x32xf32>
    %38 = vector.shape_cast %37 : vector<1x1x32xf32> to vector<1x32xf32>
    %39 = vector.broadcast %38 : vector<1x32xf32> to vector<512x32xf32>
    %40 = arith.addf %36, %39 : vector<512x32xf32>
    %41 = math.tanh %40 : vector<512x32xf32>
    %42 = arith.addf %41, %30 : vector<512x32xf32>
    %c0_29 = arith.constant 0 : index
    %c0_30 = arith.constant 0 : index
    %43 = vector.load %arg7[%c0_29, %c0_30] : memref<8x32xbf16, #tpu.memory_space<vmem>>, vector<8x32xbf16>
    %44 = arith.truncf %42 : vector<512x32xf32> to vector<512x32xbf16>
    "tpu.trace_start"() <{level = 10 : i32, message = "ch,nh->cn"}> : () -> ()
    %cst_31 = arith.constant dense<0.000000e+00> : vector<8x512xf32>
    %45 = tpu.matmul %43, %44, %cst_31 {dimension_numbers = #tpu.dot_dimension_numbers<[1], [1], [0], [0], [0, 0, 1, 0], [], []>} : vector<8x32xbf16>, vector<512x32xbf16>, vector<8x512xf32> -> vector<8x512xf32>
    "tpu.trace_stop"() : () -> ()
    %c0_32 = arith.constant 0 : index
    %c0_33 = arith.constant 0 : index
    %46 = vector.load %arg8[%c0_32, %c0_33] : memref<8x1xf32, #tpu.memory_space<vmem>>, vector<8x1xf32>
    %47 = vector.broadcast %46 : vector<8x1xf32> to vector<8x512xf32>
    %48 = arith.addf %45, %47 : vector<8x512xf32>
    %cst_34 = arith.constant dense<0xFF800000> : vector<512xf32>
    %49 = vector.multi_reduction <maximumf>, %48, %cst_34 [0] : vector<8x512xf32> to vector<512xf32>
    %50 = vector.shape_cast %49 : vector<512xf32> to vector<1x512xf32>
    %51 = vector.broadcast %50 : vector<1x512xf32> to vector<8x512xf32>
    %52 = arith.subf %48, %51 : vector<8x512xf32>
    %53 = math.exp %52 : vector<8x512xf32>
    %cst_35 = arith.constant dense<0.000000e+00> : vector<512xf32>
    %54 = vector.multi_reduction <add>, %53, %cst_35 [0] : vector<8x512xf32> to vector<512xf32>
    %55 = vector.shape_cast %54 : vector<512xf32> to vector<1x512xf32>
    %56 = math.log %55 : vector<1x512xf32>
    %57 = vector.broadcast %56 : vector<1x512xf32> to vector<8x512xf32>
    %58 = arith.subf %52, %57 : vector<8x512xf32>
    %c0_36 = arith.constant 0 : index
    %c0_37 = arith.constant 0 : index
    %59 = vector.load %arg9[%c0_36, %c0_37] : memref<8x512xf32, #tpu.memory_space<vmem>>, vector<8x512xf32>
    tpu.vector_store %arg9[%c0_36, %c0_37], %58 {strides = array<i32>} : memref<8x512xf32, #tpu.memory_space<vmem>>, vector<8x512xf32>,
    return
  }
  func.func @transform_0(%arg0: i32) -> (i32, i32) {
    %c0_i32 = arith.constant 0 : i32
    %c0_i32_0 = arith.constant 0 : i32
    return %arg0, %c0_i32 : i32, i32
  }
  func.func @transform_1(%arg0: i32) -> (i32, i32) {
    %c0_i32 = arith.constant 0 : i32
    %c0_i32_0 = arith.constant 0 : i32
    return %arg0, %c0_i32 : i32, i32
  }
  func.func @transform_2(%arg0: i32) -> (i32, i32) {
    %c0_i32 = arith.constant 0 : i32
    %c0_i32_0 = arith.constant 0 : i32
    %c0_i32_1 = arith.constant 0 : i32
    return %c0_i32, %c0_i32_0 : i32, i32
  }
  func.func @transform_3(%arg0: i32) -> (i32, i32) {
    %c0_i32 = arith.constant 0 : i32
    %c0_i32_0 = arith.constant 0 : i32
    %c0_i32_1 = arith.constant 0 : i32
    return %c0_i32, %c0_i32_0 : i32, i32
  }
  func.func @transform_4(%arg0: i32) -> (i32, i32, i32) {
    %c0_i32 = arith.constant 0 : i32
    %c0_i32_0 = arith.constant 0 : i32
    %c0_i32_1 = arith.constant 0 : i32
    %c0_i32_2 = arith.constant 0 : i32
    return %c0_i32, %c0_i32_0, %c0_i32_1 : i32, i32, i32
  }
  func.func @transform_5(%arg0: i32) -> (i32, i32, i32) {
    %c0_i32 = arith.constant 0 : i32
    %c0_i32_0 = arith.constant 0 : i32
    %c0_i32_1 = arith.constant 0 : i32
    %c0_i32_2 = arith.constant 0 : i32
    return %c0_i32, %c0_i32_0, %c0_i32_1 : i32, i32, i32
  }
  func.func @transform_6(%arg0: i32) -> (i32, i32) {
    %c0_i32 = arith.constant 0 : i32
    %c0_i32_0 = arith.constant 0 : i32
    %c0_i32_1 = arith.constant 0 : i32
    return %c0_i32, %c0_i32_0 : i32, i32
  }
  func.func @transform_7(%arg0: i32) -> (i32, i32) {
    %c0_i32 = arith.constant 0 : i32
    %c0_i32_0 = arith.constant 0 : i32
    %c0_i32_1 = arith.constant 0 : i32
    return %c0_i32, %c0_i32_0 : i32, i32
  }
  func.func @transform_8(%arg0: i32) -> (i32, i32) {
    %c0_i32 = arith.constant 0 : i32
    %c0_i32_0 = arith.constant 0 : i32
    return %c0_i32, %arg0 : i32, i32
  }
}

</mosaic_0001>

<bundles_post_ra>
// kernel: tpu_custom_call.1
= control target key start
LH: loop header
LB: loop body
LE: loop exit
PB: predicated region body
PF: predicated region fallthrough
CT: control target
= control target key end

     0   :  { %s10716_s0 = inlined_call_operand.vmem [shape: bf16[4096,16], index: 0, kind: input, shape index: {}]   ;;  %s10717_s1 = inlined_call_operand.hbm [shape: bf16[4096,512], index: 1, kind: input, shape index: {}]   ;;  %s10718_s2 = inlined_call_operand.hbm [shape: bf16[16,32], index: 2, kind: input, shape index: {}]   ;;  %s10719_s3 = inlined_call_operand.hbm [shape: f32[1,32], index: 3, kind: input, shape index: {}]   ;;  %s10720_s4 = inlined_call_operand.hbm [shape: bf16[3,32,32], index: 4, kind: input, shape index: {}]   ;;  %s10721_s5 = inlined_call_operand.hbm [shape: f32[3,1,32], index: 5, kind: input, shape index: {}]   ;;  %s10722_s6 = inlined_call_operand.hbm [shape: bf16[8,32], index: 6, kind: input, shape index: {}]   ;;  %s10723_s7 = inlined_call_operand.vmem [shape: f32[8,1], index: 7, kind: input, shape index: {}]   ;;  %s10724_s8 = inlined_call_operand.hbm [shape: f32[8,4096], index: 8, kind: output, shape index: {}]  }
   0x1   :  { %10857 = sst [smem:[#allocation73_spill]] %s10718_s2 }
   0x2   :  { %10858 = sst [smem:[#allocation74_spill]] %s10719_s3 }
   0x3   :  { %13 = vsyncpa [#allocation3], 0 }
   0x4   :  { %15 = vsyncpa [#allocation3 + $0x1], 0 }
   0x5   :  { %16 = vsyncpa [#allocation6], 0 }
   0x6   :  { %17 = vsyncpa [#allocation9], 0 }
   0x7   :  { %18 = vsyncpa [#allocation12], 0 }
   0x8   :  { %19 = vsyncpa [#allocation4], 0 }
   0x9   :  { %21 = vsyncpa [#allocation4 + $0x1], 0  ;;  %s7868_s27 = smov 0   ;;  %s7870_s28 = smov 0  }
   0xa   :  { %s7872_s29 = smov 0   ;;  %s7874_s30 = smov 0  }
   0xb LB: > { %s7810_s9 = smov [#allocation5]   ;;  %s7889_s11 = sadd.s32 4294967295, %s7808_s30   ;;  %s7808_s30 = sphi %s7874_s30, %s11182_s30   ;;  %s7804_s29 = sphi %s7872_s29, %s11181_s29   ;;  %s7800_s28 = sphi %s7870_s28, %s11180_s28   ;;  %s7796_s27 = sphi %s7868_s27, %s11179_s27  }
   0xc   : > { %s248_s10 = sshll.u32 %s7810_s9, 4  ;;  %p5793_p0 = scmp.ge.s32.totalorder %s7808_s30, 1  ;;  %s249_s10 = int_to_ptr.vmem [resolvable:$true] %s248_s10 }
   0xd   : > { %p10726_p1 = scmp.eq.s32.totalorder %s7889_s11, 0  ;;  %p236_p2 = scmp.lt.s32.totalorder %s7808_s30, 9 }
   0xe   : > { %s7811_s13 = smov [#allocation8]   ;;  %s7812_s16 = smov [#allocation7]  }
   0xf   : > { %p7894_p3 = pnand %p5793_p0, %p236_p2  ;;  %s272_s14 = sshll.u32 %s7811_s13, 4  ;;  %s7906_s14 = int_to_ptr.vmem [resolvable:$true] %s272_s14 }
  0x10   : > { %s262_s17 = sshll.u32 %s7812_s16, 4  ;;  %s7585_s19 = scalar_lea.vmem %s249_s10, 128  ;;  %s7908_s17 = int_to_ptr.vmem [resolvable:$true] %s262_s17 }
  0x11   : > { %s10859_s12 = scalar_select %p7894_p3, 1, 0 }
  0x12   : > { %p6604_p4 = pneg %p7894_p3  ;;  %p7586_p7 = scmp.ne.s32.totalorder %s249_s10, %s7585_s19 }
  0x13   : > { %p7593_p10 = scmp.lt.s32.totalorder %s249_s10, %s249_s10  ;;  %p7594_p11 = scmp.lt.s32.totalorder %s7585_s19, %s7585_s19 }
  0x14   : > { %p7902_p5 = pnand %p6604_p4, %p10726_p1 }
  0x15   : > { %p7595_p12 = por %p7594_p11, %p7593_p10 }
  0x16   : > { %p7912_p6 = pneg %p7902_p5 }
  0x18   : > { %p7588_p8 = pnand %p7586_p7, %p7912_p6 }
  0x1a   : > { %p7589_p9 = pneg %p7588_p8 }
  0x1c   : > { %p7596_p13 = pnand %p7595_p12, %p7589_p9 }
  0x1e   : > { %7599 = shalt.err (!%p7596_p13)
}
  0x1f   : > { %s7813_s20 = smov 64   ;;  %s7814_s21 = smov 4  }
  0x20   : > { %s10862_s2 = sld [smem:[#allocation73_spill]]  ;;  %s7611_s24 = scalar_lea.vmem %s7906_s14, 768 }
  0x21   : > { %p7612_p0 = scmp.ne.s32.totalorder %s7906_s14, %s7611_s24  ;;  %p7619_p7 = scmp.lt.s32.totalorder %s7906_s14, %s7906_s14 }
  0x22   : > { %p7620_p8 = scmp.lt.s32.totalorder %s7611_s24, %s7611_s24 }
  0x23   : > { %p7614_p2 = pnand %p7612_p0, %p7912_p6 }
  0x24   : > { %p7621_p9 = por %p7620_p8, %p7619_p7 }
  0x25   : > { %p7615_p4 = pneg %p7614_p2 }
  0x26   : > { %6607 = dma.hbm_to_vmem [thread:$0]  (!%p7902_p5), %s10862_s2, 128, %s249_s10, [#allocation6], %s7813_s20, %s7813_s20, %s7814_s21  }
  0x27   : > { %p7622_p10 = pnand %p7621_p9, %p7615_p4 }
  0x29   : > { %7625 = shalt.err (!%p7622_p10)
}
  0x2a   : > { %6613 = dma.hbm_to_vmem [thread:$0]  (!%p7902_p5), %s10720_s4, 768, %s7906_s14, [#allocation9], %s7813_s20, %s7813_s20, %s7814_s21  }
  0x2b   : > { %s7637_s9 = scalar_lea.vmem %s7908_s17, 16  ;;  %s7644_s10 = scalar_lea.vmem %s7908_s17, 32 }
  0x2c   : > { %p7638_p11 = scmp.ne.s32.totalorder %s7908_s17, %s7637_s9  ;;  %p7645_p0 = scmp.lt.s32.totalorder %s7908_s17, %s7908_s17 }
  0x2d   : > { %p7646_p2 = scmp.lt.s32.totalorder %s7644_s10, %s7637_s9 }
  0x2e   : > { %p7640_p12 = pnand %p7638_p11, %p7912_p6 }
  0x2f   : > { %p7647_p4 = por %p7646_p2, %p7645_p0 }
  0x30   : > { %p7641_p13 = pneg %p7640_p12 }
  0x32   : > { %p7648_p7 = pnand %p7647_p4, %p7641_p13 }
  0x34   : > { %7651 = shalt.err (!%p7648_p7)
}
  0x35   : > { %s10863_s3 = sld [smem:[#allocation74_spill]]  ;;  %s7815_s14 = smov [#allocation10]  }
  0x36   : > { %s285_s19 = sshll.u32 %s7815_s14, 4  ;;  %s286_s19 = int_to_ptr.vmem [resolvable:$true] %s285_s19 }
  0x37   : > { %s7663_s20 = scalar_lea.vmem %s286_s19, 48  ;;  %s7670_s21 = scalar_lea.vmem %s286_s19, 64 }
  0x38   : > { %p7664_p8 = scmp.ne.s32.totalorder %s286_s19, %s7663_s20  ;;  %p7671_p11 = scmp.lt.s32.totalorder %s286_s19, %s286_s19 }
  0x39   : > { %p7672_p12 = scmp.lt.s32.totalorder %s7670_s21, %s7663_s20 }
  0x3a   : > { %p7666_p9 = pnand %p7664_p8, %p7912_p6 }
  0x3b   : > { %6610 = dma.hbm_to_vmem [thread:$0]  (!%p7902_p5), %s10863_s3, 16, %s7908_s17, [#allocation6]  }
  0x3c   : > { %p7667_p10 = pneg %p7666_p9  ;;  %p7673_p13 = por %p7672_p12, %p7671_p11 }
  0x3e   : > { %p7674_p0 = pnand %p7673_p13, %p7667_p10 }
  0x40   : > { %7677 = shalt.err (!%p7674_p0)
}
  0x41   : > { %s10725_s22 = smov 16   ;;  %s7817_s23 = smov 1  }
  0x42   : > { %6616 = dma.hbm_to_vmem [thread:$0]  (!%p7902_p5), %s10721_s5, 48, %s286_s19, [#allocation9], %s10725_s22, %s10725_s22, %s7817_s23  }
  0x43   : > { %s7818_s25 = smov [#allocation11]  }
  0x44   : > { %s299_s26 = sshll.u32 %s7818_s25, 4  ;;  %s300_s26 = int_to_ptr.vmem [resolvable:$true] %s299_s26 }
  0x45   : > { %s7689_s9 = scalar_lea.vmem %s300_s26, 64  ;;  %p7697_p8 = scmp.lt.s32.totalorder %s300_s26, %s300_s26 }
  0x46   : > { %p7690_p2 = scmp.ne.s32.totalorder %s300_s26, %s7689_s9  ;;  %p7698_p9 = scmp.lt.s32.totalorder %s7689_s9, %s7689_s9 }
  0x48   : > { %p7692_p4 = pnand %p7690_p2, %p7912_p6  ;;  %p7699_p10 = por %p7698_p9, %p7697_p8 }
  0x4a   : > { %p7693_p7 = pneg %p7692_p4 }
  0x4c   : > { %p7700_p11 = pnand %p7699_p10, %p7693_p7 }
  0x4e   : > { %7703 = shalt.err (!%p7700_p11)
}
  0x4f   : > { %6619 = dma.hbm_to_vmem [thread:$0]  (!%p7902_p5), %s10722_s6, 64, %s300_s26, [#allocation12]  }
  0x50   : > { %s5792_s18 = sadd.s32 4294967294, %s7808_s30   ;;  %s7966_s15 = sadd.s32 1, %s7808_s30  }
  0x51   : > { %s60_s16 = sadd.s32 1, %s7804_s29  ;;  %s57_s14 = ssub.s32 %s7808_s30, %s7966_s15 }
  0x52   : > { %p67_p6 = scmp.ne.s32.totalorder %s7804_s29, %s7800_s28  ;;  %p58_p12 = scmp.eq.s32.totalorder %s57_s14, 0 }
  0x53   : > { %p68_p13 = scmp.eq.s32.totalorder %s7808_s30, 0  ;;  %p73_p0 = scmp.ne.s32.totalorder %s7800_s28, %s7796_s27 }
  0x54   : > { %p223_p2 = scmp.eq.s32.totalorder %s7889_s11, 7  ;;  %p229_p8 = scmp.eq.s32.totalorder %s5792_s18, 7 }
  0x55   : > { %s7978_s19 = scalar_select %p58_p12, %s7804_s29, %s60_s16  }
  0x56   : > { %p69_p4 = por %p68_p13, %p67_p6  ;;  %p7982_p7 = por %p10726_p1, %p73_p0 }
  0x57   : > { %p7986_p5 = por %p223_p2, %p67_p6  ;;  %p6633_p9 = scmp.lt.s32.totalorder %s7808_s30, 8 }
  0x58   : > { %s10864_s20 = scalar_select %p7982_p7, 1, 0 }
  0x59   : > { %s10865_s21 = scalar_select %p7986_p5, 1, 0 }
  0x5a   : > { %s322_s23 = sand.u32 1, %s7804_s29   ;;  %p7992_p10 = por %p229_p8, %p73_p0 }
  0x5b   : > { %s5800_s24 = sshll.u32 %s322_s23, 10  ;;  %s6121_s25 = sshll.u32 %s7808_s30, 14 }
  0x5c   : > { %s10866_s17 = scalar_select %p7992_p10, 1, 0 }
  0x5d   : > { %s8000_s10 = scalar_lea.hbm %s10717_s1, %s6121_s25  ;;  %s326_s13 = scalar_lea.vmem [#allocation2], %s5800_s24 }
  0x5e   : > { %s334_s16 = sshll.u32 %s326_s13, 4  ;;  %p8002_p11 = pnand %p6633_p9, %p69_p4  ;;  %s8006_s16 = int_to_ptr.vmem [resolvable:$true] %s334_s16 }
  0x5f   : > { %s8008_s14 = scalar_lea.sflag [#allocation3], %s322_s23  ;;  %s7704_s22 = scalar_lea.hbm %s8000_s10, 16384 }
  0x60   : > { %p7705_p6 = scmp.ne.s32.totalorder %s8000_s10, %s7704_s22  ;;  %p7706_p12 = pneg %p8002_p11 }
  0x61   : > { %s7709_s24 = scalar_lea.hbm %s10717_s1, 131072  ;;  %p7710_p2 = scmp.lt.s32.totalorder %s8000_s10, %s10717_s1 }
  0x62   : > { %p7707_p13 = pnand %p7706_p12, %p7705_p6  ;;  %p7711_p4 = scmp.lt.s32.totalorder %s7709_s24, %s7704_s22 }
  0x64   : > { %p7708_p0 = pneg %p7707_p13  ;;  %p7712_p8 = por %p7711_p4, %p7710_p2 }
  0x66   : > { %p7713_p9 = pnand %p7712_p8, %p7708_p0 }
  0x68   : > { %7716 = shalt.err (!%p7713_p9)
}
  0x69   : > { %s7717_s23 = scalar_lea.vmem %s8006_s16, 16384  ;;  %s7819_s2 = smov [#allocation2]  }
  0x6a   : > { %p7718_p1 = scmp.ne.s32.totalorder %s8006_s16, %s7717_s23  ;;  %s7722_s3 = sshll.u32 %s7819_s2, 4  ;;  %s7723_s3 = int_to_ptr.vmem [resolvable:$false] %s7722_s3 }
  0x6b   : > { %s7724_s25 = scalar_lea.vmem %s7723_s3, 32768  ;;  %p7725_p13 = scmp.lt.s32.totalorder %s8006_s16, %s7723_s3 }
  0x6c   : > { %p7720_p10 = pnand %p7718_p1, %p7706_p12  ;;  %p7726_p5 = scmp.lt.s32.totalorder %s7724_s25, %s7717_s23 }
  0x6e   : > { %p7721_p6 = pneg %p7720_p10  ;;  %p7727_p7 = por %p7726_p5, %p7725_p13 }
  0x70   : > { %p7728_p3 = pnand %p7727_p7, %p7721_p6 }
  0x72   : > { %7731 = shalt.err (!%p7728_p3)
}
  0x73   : > { %s7820_s22 = smov 256   ;;  %s10868_s26 = smov 16  }
  0x74   : > { %6623 = dma.hbm_to_vmem [thread:$0]  (!%p8002_p11), %s8000_s10, 16384, %s8006_s16, %s8008_s14, %s7820_s22, %s7820_s22, %s10868_s26  }
  0x75   : > { %p10869_p1 = scmp.ne.s32.totalorder %s10859_s12, 0 }
  0x77   : > { %346 = sbr.rel (%p10869_p1) target bundleno = 2889 (0xb49), region = 52 }
  0x7c   : > { %s8033_s2 = sand.u32 1, %s7800_s28   ;;  %p10870_p3 = scmp.ne.s32.totalorder %s10864_s20, 0 }
  0x7d   : > { %s5805_s3 = sshll.u32 %s8033_s2, 10  ;;  %s349_s24 = scalar_lea.sflag [#allocation3], %s8033_s2 }
  0x7e   : > { %s8037_s9 = scalar_lea.vmem [#allocation2], %s5805_s3 }
  0x7f   : > { %7775 = dma.done.wait (%p10870_p3), %s349_s24, 16384  }
  0x80   : > { %7777 = vsyncadd (%p10870_p3), %s349_s24, 4294950912  ;;  %p10871_p7 = scmp.eq.s32.totalorder %s7889_s11, 0 }
  0x82   : > { %7779 = dma.done.wait (%p10871_p7), [#allocation6], 144   ;;  %p10872_p5 = pmov %p10871_p7 }
  0x84   : > { %7781 = vsyncadd (%p10872_p5), [#allocation6], 4294967152  ;;  %p10873_p10 = pmov %p10872_p5 }
  0x85   : > { %p10874_p11 = pmov %p10872_p5 }
  0x86   : > { %7783 = dma.done.wait (%p10873_p10), [#allocation9], 816  }
  0x87   : > { %7785 = vsyncadd (%p10874_p11), [#allocation9], 4294966480  ;;  %p10875_p12 = pmov %p10872_p5 }
  0x88   : > { %p10876_p0 = pmov %p10872_p5 }
  0x89   : > { %7787 = dma.done.wait (%p10875_p12), [#allocation12], 64  }
  0x8a   : > { %7789 = vsyncadd (%p10876_p0), [#allocation12], 4294967232  ;;  %s5812_s12 = sshll.u32 %s7889_s11, 6  ;;  %v6684_v0 = vld [vmem:[#allocation5] sm:$0xff]   ;;  %vm786_vm0 = vcmask 130048   ;;  %v6717_v21 = vld [vmem:[#allocation8 + $0x8] sm:$0xff]  }
  0x8b   : > { %p411_p2 = scmp.lt.s32.totalorder %s5812_s12, 511  ;;  %6294 = vmatprep.subr.bf16.mxu0 %v6684_v0  ;;  %6360 = vmatprep.subr.bf16.mxu1 %v6717_v21  ;;  %v6718_v23 = vld [vmem:[#allocation8] sm:$0xff]   ;;  %v8125_v38 = vld [vmem:[#allocation7] ss:$0 sm:$0xff]  ;;  %vm1220_vm1 = vcmask 261120   ;;  %s5811_s23 = sshll.u32 %s8033_s2, 5 }
  0x8c   : > { %6295 = vmatpush3.bf16.msra.mxu0 %v6684_v0  ;;  %6361 = vmatpush3.bf16.msra.mxu1 %v6717_v21  ;;  %s10675_s25 = scalar_lea.vmem [#allocation13], %s5811_s23  ;;  %s6122_s22 = sshll.u32 %s7889_s11, 9 }
  0x8d   : > { %s11184_s12 = smov (!%p411_p2, %s5812_s12), 511  ;;  %6362 = vmatprep.subr.bf16.mxu1 %v6718_v23  ;;  %s5662_s26 = sshll.u32 %s10675_s25, 4  ;;  %s5663_s26 = int_to_ptr.vmem [resolvable:$true] %s5662_s26 }
  0x8e   : > { %s5813_s20 = sshll.u32 %s11184_s12, 2  ;;  %s5648_s12 = scalar_lea.sflag [#allocation4], %s8033_s2 }
  0x8f   : > { %s8059_s18 = scalar_lea.vmem %s10716_s0, %s5813_s20  ;;  %s7732_s20 = scalar_lea.vmem %s5663_s26, 512 }
  0x90   : > { %v6685_v1 = vld [vmem:[%s8059_s18] sm:$0xff]   ;;  %v6686_v2 = vld [vmem:[%s8059_s18 + $0x8] sm:$0xff]   ;;  %v6687_v3 = vld [vmem:[%s8059_s18 + $0x10] sm:$0xff]   ;;  %6363 = vmatpush3.bf16.msra.mxu1 %v6718_v23  ;;  %p7733_p4 = scmp.ne.s32.totalorder %s5663_s26, %s7732_s20  ;;  %p11177_p8 = scmp.ne.s32.totalorder %s10865_s21, 0 }
  0x91   : > { %6296 = vmatprep.mubr.msk.bf16.mxu0 %vm786_vm0, %v6685_v1  ;;  %v6688_v4 = vld [vmem:[%s8059_s18 + $0x18] sm:$0xff]   ;;  %v6689_v5 = vld [vmem:[%s8059_s18 + $0x20] sm:$0xff]   ;;  %v6690_v6 = vld [vmem:[%s8059_s18 + $0x28] sm:$0xff]   ;;  %s7822_s10 = smov [#allocation13]  }
  0x92   : > { %6297 = vmatmul.mubr.msk.bf16.vlgmr.msra.gmra.mxu0 %vm786_vm0, %v6686_v2  ;;  %v6691_v7 = vld [vmem:[%s8059_s18 + $0x30] sm:$0xff]   ;;  %v6692_v8 = vld [vmem:[%s8059_s18 + $0x38] sm:$0xff]   ;;  %v6693_v9 = vld [vmem:[%s8059_s18 + $0x40] sm:$0xff]   ;;  %p7734_p9 = pnand %p7733_p4, %p11177_p8  ;;  %s7736_s16 = sshll.u32 %s7822_s10, 4  ;;  %s7737_s16 = int_to_ptr.vmem [resolvable:$false] %s7736_s16 }
  0x93   : > { %6300 = vmatprep.mubr.msk.bf16.mxu0 %vm786_vm0, %v6687_v3  ;;  %v6694_v10 = vld [vmem:[%s8059_s18 + $0x48] sm:$0xff]   ;;  %v6695_v11 = vld [vmem:[%s8059_s18 + $0x50] sm:$0xff]   ;;  %v6696_v12 = vld [vmem:[%s8059_s18 + $0x58] sm:$0xff]   ;;  %s7738_s11 = scalar_lea.vmem %s7737_s16, 1024  ;;  %p7739_p13 = scmp.lt.s32.totalorder %s5663_s26, %s7737_s16 }
  0x94   : > { %v6697_v13 = vld [vmem:[%s8059_s18 + $0x60] sm:$0xff]   ;;  %v6698_v14 = vld [vmem:[%s8059_s18 + $0x68] sm:$0xff]   ;;  %v6699_v15 = vld [vmem:[%s8059_s18 + $0x70] sm:$0xff]   ;;  %p7735_p6 = pneg %p7734_p9  ;;  %p7740_p1 = scmp.lt.s32.totalorder %s7738_s11, %s7732_s20 }
  0x95   : > { %v6700_v16 = vld [vmem:[%s8059_s18 + $0x78] sm:$0xff]   ;;  %v6701_v17 = vld [vmem:[%s8059_s18 + $0x80] sm:$0xff]   ;;  %v6702_v18 = vld [vmem:[%s8059_s18 + $0x88] sm:$0xff]  }
  0x96   : > { %v6703_v19 = vld [vmem:[%s8059_s18 + $0x90] sm:$0xff]   ;;  %v6704_v20 = vld [vmem:[%s8059_s18 + $0x98] sm:$0xff]   ;;  %v6705_v22 = vld [vmem:[%s8059_s18 + $0xa0] sm:$0xff]   ;;  %p7741_p3 = por %p7740_p1, %p7739_p13 }
  0x97   : > { %v6706_v24 = vld [vmem:[%s8059_s18 + $0xa8] sm:$0xff]   ;;  %v6707_v25 = vld [vmem:[%s8059_s18 + $0xb0] sm:$0xff]   ;;  %v6708_v26 = vld [vmem:[%s8059_s18 + $0xb8] sm:$0xff]  }
  0x98   : > { %v6709_v27 = vld [vmem:[%s8059_s18 + $0xc0] sm:$0xff]   ;;  %v6710_v28 = vld [vmem:[%s8059_s18 + $0xc8] sm:$0xff]   ;;  %v6711_v29 = vld [vmem:[%s8059_s18 + $0xd0] sm:$0xff]   ;;  %p7742_p7 = pnand %p7741_p3, %p7735_p6 }
  0x99   : > { %v6712_v30 = vld [vmem:[%s8059_s18 + $0xd8] sm:$0xff]   ;;  %v6713_v31 = vld [vmem:[%s8059_s18 + $0xe0] sm:$0xff]   ;;  %v6714_v32 = vld [vmem:[%s8059_s18 + $0xe8] sm:$0xff]  }
  0x9a   : > { %6301 = vmatmul.mubr.msk.bf16.gmra.mxu0 %vm786_vm0, %v6688_v4  ;;  %v6715_v33 = vld [vmem:[%s8059_s18 + $0xf0] sm:$0xff]   ;;  %v6716_v34 = vld [vmem:[%s8059_s18 + $0xf8] sm:$0xff]  }
  0x9b   : > { %6304 = vmatprep.mubr.msk.bf16.mxu0 %vm786_vm0, %v6689_v5 }
  0xa2   : > { %6305 = vmatmul.mubr.msk.bf16.gmra.mxu0 %vm786_vm0, %v6690_v6 }
  0xa3   : > { %6308 = vmatprep.mubr.msk.bf16.mxu0 %vm786_vm0, %v6691_v7 }
  0xaa   : > { %6309 = vmatmul.mubr.msk.bf16.gmra.mxu0 %vm786_vm0, %v6692_v8 }
  0xab   : > { %6312 = vmatprep.mubr.msk.bf16.mxu0 %vm786_vm0, %v6693_v9 }
  0xb2   : > { %6313 = vmatmul.mubr.msk.bf16.gmra.mxu0 %vm786_vm0, %v6694_v10 }
  0xb3   : > { %6316 = vmatprep.mubr.msk.bf16.mxu0 %vm786_vm0, %v6695_v11 }
  0xba   : > { %6317 = vmatmul.mubr.msk.bf16.gmra.mxu0 %vm786_vm0, %v6696_v12 }
  0xbb   : > { %6320 = vmatprep.mubr.msk.bf16.mxu0 %vm786_vm0, %v6697_v13 }
  0xc2   : > { %6321 = vmatmul.mubr.msk.bf16.gmra.mxu0 %vm786_vm0, %v6698_v14 }
  0xc3   : > { %6324 = vmatprep.mubr.msk.bf16.mxu0 %vm786_vm0, %v6699_v15 }
  0xca   : > { %6325 = vmatmul.mubr.msk.bf16.gmra.mxu0 %vm786_vm0, %v6700_v16 }
  0xcb   : > { %6328 = vmatprep.mubr.msk.bf16.mxu0 %vm786_vm0, %v6701_v17 }
  0xd2   : > { %6329 = vmatmul.mubr.msk.bf16.gmra.mxu0 %vm786_vm0, %v6702_v18 }
  0xd3   : > { %6332 = vmatprep.mubr.msk.bf16.mxu0 %vm786_vm0, %v6703_v19 }
  0xda   : > { %6333 = vmatmul.mubr.msk.bf16.gmra.mxu0 %vm786_vm0, %v6704_v20 }
  0xdb   : > { %6336 = vmatprep.mubr.msk.bf16.mxu0 %vm786_vm0, %v6705_v22 }
  0xe2   : > { %6337 = vmatmul.mubr.msk.bf16.gmra.mxu0 %vm786_vm0, %v6706_v24 }
  0xe3   : > { %6340 = vmatprep.mubr.msk.bf16.mxu0 %vm786_vm0, %v6707_v25 }
  0xea   : > { %6341 = vmatmul.mubr.msk.bf16.gmra.mxu0 %vm786_vm0, %v6708_v26 }
  0xeb   : > { %6344 = vmatprep.mubr.msk.bf16.mxu0 %vm786_vm0, %v6709_v27 }
  0xf2   : > { %6345 = vmatmul.mubr.msk.bf16.gmra.mxu0 %vm786_vm0, %v6710_v28 }
  0xf3   : > { %6348 = vmatprep.mubr.msk.bf16.mxu0 %vm786_vm0, %v6711_v29 }
  0xfa   : > { %6349 = vmatmul.mubr.msk.bf16.gmra.mxu0 %vm786_vm0, %v6712_v30 }
  0xfb   : > { %6352 = vmatprep.mubr.msk.bf16.mxu0 %vm786_vm0, %v6713_v31 }
 0x102   : > { %6353 = vmatmul.mubr.msk.bf16.gmra.mxu0 %vm786_vm0, %v6714_v32 }
 0x103   : > { %6356 = vmatprep.mubr.msk.bf16.mxu0 %vm786_vm0, %v6715_v33 }
 0x10a   : > { %6357 = vmatmul.mubr.msk.bf16.gmra.mxu0 %vm786_vm0, %v6716_v34 }
 0x152   : > { %v6298_v35 = vpop.f32.mrf.mxu0 }
 0x153   : > { %v8137_v43 = vadd.f32 %v6298_v35, %v8125_v38 }
 0x154   : > { %v917_v36 = vpop.f32.mrf.mxu0 }
 0x155   : > { %v8131_v41 = vadd.f32 %v8125_v38, %v917_v36 }
 0x156   : > { %v6299_v37 = vpop.f32.mrf.mxu0 }
 0x157   : > { %v8128_v39 = vadd.f32 %v6299_v37, %v8125_v38 }
 0x158   : > { %v920_v40 = vpop.f32.mrf.mxu0 }
 0x159   : > { %v8134_v42 = vadd.f32 %v8125_v38, %v920_v40  ;;  %v1173_v46 = vpack.c.bf16 %v8128_v39, %v8137_v43 }
 0x15a   : > { %v6302_v44 = vpop.f32.mrf.mxu0 }
 0x15b   : > { %v1172_v45 = vpack.c.bf16 %v8134_v42, %v8131_v41  ;;  %v8155_v53 = vadd.f32 %v6302_v44, %v8125_v38 }
 0x15c   : > { %v933_v47 = vpop.f32.mrf.mxu0 }
 0x15d   : > { %6364 = vmatprep.mubr.msk.bf16.mxu1 %vm1220_vm1, %v1172_v45  ;;  %v8149_v51 = vadd.f32 %v8125_v38, %v933_v47 }
 0x15e   : > { %v6303_v48 = vpop.f32.mrf.mxu0  ;;  %6365 = vmatmul.mubr.msk.bf16.vlgmr.msra.gmra.mxu1 %vm1220_vm1, %v1173_v46 }
 0x15f   : > { %v8146_v49 = vadd.f32 %v6303_v48, %v8125_v38 }
 0x160   : > { %v936_v50 = vpop.f32.mrf.mxu0 }
 0x161   : > { %v8152_v52 = vadd.f32 %v8125_v38, %v936_v50  ;;  %v1175_v56 = vpack.c.bf16 %v8146_v49, %v8155_v53 }
 0x162   : > { %v6306_v54 = vpop.f32.mrf.mxu0 }
 0x163   : > { %v1174_v55 = vpack.c.bf16 %v8152_v52, %v8149_v51  ;;  %v8173_v63 = vadd.f32 %v6306_v54, %v8125_v38 }
 0x164   : > { %v949_v57 = vpop.f32.mrf.mxu0 }
 0x165   : > { %6368 = vmatprep.mubr.msk.bf16.mxu1 %vm1220_vm1, %v1174_v55  ;;  %v8167_v61 = vadd.f32 %v8125_v38, %v949_v57 }
 0x166   : > { %v6307_v58 = vpop.f32.mrf.mxu0  ;;  %6369 = vmatmul.mubr.msk.bf16.gmra.mxu1 %vm1220_vm1, %v1175_v56 }
 0x167   : > { %v8164_v59 = vadd.f32 %v6307_v58, %v8125_v38 }
 0x168   : > { %v952_v60 = vpop.f32.mrf.mxu0 }
 0x169   : > { %v8170_v62 = vadd.f32 %v8125_v38, %v952_v60  ;;  %v1177_v2 = vpack.c.bf16 %v8164_v59, %v8173_v63 }
 0x16a   : > { %v6310_v0 = vpop.f32.mrf.mxu0 }
 0x16b   : > { %v1176_v1 = vpack.c.bf16 %v8170_v62, %v8167_v61  ;;  %v8191_v9 = vadd.f32 %v6310_v0, %v8125_v38 }
 0x16c   : > { %v965_v3 = vpop.f32.mrf.mxu0 }
 0x16d   : > { %6372 = vmatprep.mubr.msk.bf16.mxu1 %vm1220_vm1, %v1176_v1  ;;  %v8185_v7 = vadd.f32 %v8125_v38, %v965_v3 }
 0x16e   : > { %v6311_v4 = vpop.f32.mrf.mxu0  ;;  %6373 = vmatmul.mubr.msk.bf16.gmra.mxu1 %vm1220_vm1, %v1177_v2 }
 0x16f   : > { %v8182_v5 = vadd.f32 %v6311_v4, %v8125_v38 }
 0x170   : > { %v968_v6 = vpop.f32.mrf.mxu0 }
 0x171   : > { %v8188_v8 = vadd.f32 %v8125_v38, %v968_v6  ;;  %v1179_v12 = vpack.c.bf16 %v8182_v5, %v8191_v9 }
 0x172   : > { %v6314_v10 = vpop.f32.mrf.mxu0 }
 0x173   : > { %v1178_v11 = vpack.c.bf16 %v8188_v8, %v8185_v7  ;;  %v8209_v19 = vadd.f32 %v6314_v10, %v8125_v38 }
 0x174   : > { %v981_v13 = vpop.f32.mrf.mxu0 }
 0x175   : > { %6376 = vmatprep.mubr.msk.bf16.mxu1 %vm1220_vm1, %v1178_v11  ;;  %v8203_v17 = vadd.f32 %v8125_v38, %v981_v13 }
 0x176   : > { %v6315_v14 = vpop.f32.mrf.mxu0  ;;  %6377 = vmatmul.mubr.msk.bf16.gmra.mxu1 %vm1220_vm1, %v1179_v12 }
 0x177   : > { %v8200_v15 = vadd.f32 %v6315_v14, %v8125_v38 }
 0x178   : > { %v984_v16 = vpop.f32.mrf.mxu0 }
 0x179   : > { %v8206_v18 = vadd.f32 %v8125_v38, %v984_v16  ;;  %v1181_v22 = vpack.c.bf16 %v8200_v15, %v8209_v19 }
 0x17a   : > { %v6318_v20 = vpop.f32.mrf.mxu0 }
 0x17b   : > { %v1180_v21 = vpack.c.bf16 %v8206_v18, %v8203_v17  ;;  %v8227_v29 = vadd.f32 %v6318_v20, %v8125_v38 }
 0x17c   : > { %v997_v23 = vpop.f32.mrf.mxu0 }
 0x17d   : > { %6380 = vmatprep.mubr.msk.bf16.mxu1 %vm1220_vm1, %v1180_v21  ;;  %v8221_v27 = vadd.f32 %v8125_v38, %v997_v23 }
 0x17e   : > { %v6319_v24 = vpop.f32.mrf.mxu0  ;;  %6381 = vmatmul.mubr.msk.bf16.gmra.mxu1 %vm1220_vm1, %v1181_v22 }
 0x17f   : > { %v8218_v25 = vadd.f32 %v6319_v24, %v8125_v38 }
 0x180   : > { %v1000_v26 = vpop.f32.mrf.mxu0 }
 0x181   : > { %v8224_v28 = vadd.f32 %v8125_v38, %v1000_v26  ;;  %v1183_v32 = vpack.c.bf16 %v8218_v25, %v8227_v29 }
 0x182   : > { %v6322_v30 = vpop.f32.mrf.mxu0 }
 0x183   : > { %v1182_v31 = vpack.c.bf16 %v8224_v28, %v8221_v27  ;;  %v8245_v44 = vadd.f32 %v6322_v30, %v8125_v38 }
 0x184   : > { %v1013_v33 = vpop.f32.mrf.mxu0 }
 0x185   : > { %6384 = vmatprep.mubr.msk.bf16.mxu1 %vm1220_vm1, %v1182_v31  ;;  %v8239_v37 = vadd.f32 %v8125_v38, %v1013_v33 }
 0x186   : > { %v6323_v34 = vpop.f32.mrf.mxu0  ;;  %6385 = vmatmul.mubr.msk.bf16.gmra.mxu1 %vm1220_vm1, %v1183_v32 }
 0x187   : > { %v8236_v35 = vadd.f32 %v6323_v34, %v8125_v38 }
 0x188   : > { %v1016_v36 = vpop.f32.mrf.mxu0 }
 0x189   : > { %v8242_v40 = vadd.f32 %v8125_v38, %v1016_v36  ;;  %v1185_v47 = vpack.c.bf16 %v8236_v35, %v8245_v44 }
 0x18a   : > { %v6326_v45 = vpop.f32.mrf.mxu0 }
 0x18b   : > { %v1184_v46 = vpack.c.bf16 %v8242_v40, %v8239_v37  ;;  %v8263_v58 = vadd.f32 %v6326_v45, %v8125_v38 }
 0x18c   : > { %v1029_v48 = vpop.f32.mrf.mxu0 }
 0x18d   : > { %6388 = vmatprep.mubr.msk.bf16.mxu1 %vm1220_vm1, %v1184_v46  ;;  %v8257_v56 = vadd.f32 %v8125_v38, %v1029_v48 }
 0x18e   : > { %v6327_v50 = vpop.f32.mrf.mxu0  ;;  %6389 = vmatmul.mubr.msk.bf16.gmra.mxu1 %vm1220_vm1, %v1185_v47 }
 0x18f   : > { %v8254_v54 = vadd.f32 %v6327_v50, %v8125_v38 }
 0x190   : > { %v1032_v55 = vpop.f32.mrf.mxu0 }
 0x191   : > { %10877 = vst [vmem:[#allocation19_spill] sm:$0xff] %v8254_v54  ;;  %v8260_v57 = vadd.f32 %v8125_v38, %v1032_v55  ;;  %v1187_v1 = vpack.c.bf16 %v8254_v54, %v8263_v58  ;;  %v6890_v54 = vld [vmem:[%s8037_s9 + $0x348] ss:$16 sps:$4 sm:$0xff]  }
 0x192   : > { %v6330_v60 = vpop.f32.mrf.mxu0 }
 0x193   : > { %v1186_v0 = vpack.c.bf16 %v8260_v57, %v8257_v56  ;;  %v8281_v12 = vadd.f32 %v6330_v60, %v8125_v38 }
 0x194   : > { %v1045_v2 = vpop.f32.mrf.mxu0 }
 0x195   : > { %6392 = vmatprep.mubr.msk.bf16.mxu1 %vm1220_vm1, %v1186_v0  ;;  %v8275_v10 = vadd.f32 %v8125_v38, %v1045_v2  ;;  %10881 = vst [vmem:[#allocation23_spill] sm:$0xff] %v8281_v12 }
 0x196   : > { %v6331_v3 = vpop.f32.mrf.mxu0  ;;  %6393 = vmatmul.mubr.msk.bf16.gmra.mxu1 %vm1220_vm1, %v1187_v1 }
 0x197   : > { %v8272_v4 = vadd.f32 %v6331_v3, %v8125_v38  ;;  %10879 = vst [vmem:[#allocation21_spill] sm:$0xff] %v8275_v10 }
 0x198   : > { %v1048_v6 = vpop.f32.mrf.mxu0 }
 0x199   : > { %10878 = vst [vmem:[#allocation20_spill] sm:$0xff] %v8272_v4  ;;  %v8278_v11 = vadd.f32 %v8125_v38, %v1048_v6  ;;  %v1189_v16 = vpack.c.bf16 %v8272_v4, %v8281_v12  ;;  %v6884_v4 = vld [vmem:[%s8037_s9 + $0x328] ss:$16 sps:$4 sm:$0xff]  }
 0x19a   : > { %v6334_v13 = vpop.f32.mrf.mxu0 }
 0x19b   : > { %10880 = vst [vmem:[#allocation22_spill] sm:$0xff] %v8278_v11  ;;  %v1188_v14 = vpack.c.bf16 %v8278_v11, %v8275_v10  ;;  %v8299_v30 = vadd.f32 %v6334_v13, %v8125_v38 }
 0x19c   : > { %v1061_v20 = vpop.f32.mrf.mxu0 }
 0x19d   : > { %6396 = vmatprep.mubr.msk.bf16.mxu1 %vm1220_vm1, %v1188_v14  ;;  %v8293_v24 = vadd.f32 %v8125_v38, %v1061_v20  ;;  %10885 = vst [vmem:[#allocation27_spill] sm:$0xff] %v8299_v30 }
 0x19e   : > { %v6335_v21 = vpop.f32.mrf.mxu0  ;;  %6397 = vmatmul.mubr.msk.bf16.gmra.mxu1 %vm1220_vm1, %v1189_v16 }
 0x19f   : > { %v8290_v22 = vadd.f32 %v6335_v21, %v8125_v38  ;;  %10883 = vst [vmem:[#allocation25_spill] sm:$0xff] %v8293_v24 }
 0x1a0   : > { %v1064_v23 = vpop.f32.mrf.mxu0 }
 0x1a1   : > { %10882 = vst [vmem:[#allocation24_spill] sm:$0xff] %v8290_v22  ;;  %v8296_v26 = vadd.f32 %v8125_v38, %v1064_v23  ;;  %v1191_v33 = vpack.c.bf16 %v8290_v22, %v8299_v30 }
 0x1a2   : > { %v6338_v31 = vpop.f32.mrf.mxu0 }
 0x1a3   : > { %10884 = vst [vmem:[#allocation26_spill] sm:$0xff] %v8296_v26  ;;  %v1190_v32 = vpack.c.bf16 %v8296_v26, %v8293_v24  ;;  %v8317_v50 = vadd.f32 %v6338_v31, %v8125_v38 }
 0x1a4   : > { %v1077_v34 = vpop.f32.mrf.mxu0 }
 0x1a5   : > { %6400 = vmatprep.mubr.msk.bf16.mxu1 %vm1220_vm1, %v1190_v32  ;;  %v8311_v47 = vadd.f32 %v8125_v38, %v1077_v34  ;;  %10889 = vst [vmem:[#allocation31_spill] sm:$0xff] %v8317_v50 }
 0x1a6   : > { %v6339_v36 = vpop.f32.mrf.mxu0  ;;  %6401 = vmatmul.mubr.msk.bf16.gmra.mxu1 %vm1220_vm1, %v1191_v33 }
 0x1a7   : > { %v8308_v45 = vadd.f32 %v6339_v36, %v8125_v38  ;;  %10887 = vst [vmem:[#allocation29_spill] sm:$0xff] %v8311_v47 }
 0x1a8   : > { %v1080_v46 = vpop.f32.mrf.mxu0 }
 0x1a9   : > { %10886 = vst [vmem:[#allocation28_spill] sm:$0xff] %v8308_v45  ;;  %v8314_v48 = vadd.f32 %v8125_v38, %v1080_v46  ;;  %v1193_v0 = vpack.c.bf16 %v8308_v45, %v8317_v50 }
 0x1aa   : > { %v6342_v55 = vpop.f32.mrf.mxu0 }
 0x1ab   : > { %10888 = vst [vmem:[#allocation30_spill] sm:$0xff] %v8314_v48  ;;  %v1192_v60 = vpack.c.bf16 %v8314_v48, %v8311_v47  ;;  %v8335_v16 = vadd.f32 %v6342_v55, %v8125_v38 }
 0x1ac   : > { %v1093_v1 = vpop.f32.mrf.mxu0 }
 0x1ad   : > { %6404 = vmatprep.mubr.msk.bf16.mxu1 %vm1220_vm1, %v1192_v60  ;;  %v8329_v13 = vadd.f32 %v8125_v38, %v1093_v1  ;;  %10893 = vst [vmem:[#allocation35_spill] sm:$0xff] %v8335_v16 }
 0x1ae   : > { %v6343_v2 = vpop.f32.mrf.mxu0  ;;  %6405 = vmatmul.mubr.msk.bf16.gmra.mxu1 %vm1220_vm1, %v1193_v0 }
 0x1af   : > { %v8326_v3 = vadd.f32 %v6343_v2, %v8125_v38  ;;  %10891 = vst [vmem:[#allocation33_spill] sm:$0xff] %v8329_v13 }
 0x1b0   : > { %v1096_v6 = vpop.f32.mrf.mxu0 }
 0x1b1   : > { %10890 = vst [vmem:[#allocation32_spill] sm:$0xff] %v8326_v3  ;;  %v8332_v14 = vadd.f32 %v8125_v38, %v1096_v6  ;;  %v1195_v23 = vpack.c.bf16 %v8326_v3, %v8335_v16  ;;  %v10731_v6 = vmov 0  }
 0x1b2   : > { %v6346_v20 = vpop.f32.mrf.mxu0  ;;  %2285 = vmatprep.subr.bf16.mxu0 %v10731_v6  ;;  %2574 = vmatprep.subr.bf16.mxu1 %v10731_v6 }
 0x1b3   : > { %10892 = vst [vmem:[#allocation34_spill] sm:$0xff] %v8332_v14  ;;  %v1194_v21 = vpack.c.bf16 %v8332_v14, %v8329_v13  ;;  %v8353_v55 = vadd.f32 %v6346_v20, %v8125_v38  ;;  %6683 = vset.pattern.permute.xlu0 %v10731_v6  ;;  %v10910_v13 = vmov 0  }
 0x1b4   : > { %v1109_v31 = vpop.f32.mrf.mxu0 }
 0x1b5   : > { %6408 = vmatprep.mubr.msk.bf16.mxu1 %vm1220_vm1, %v1194_v21  ;;  %v8347_v36 = vadd.f32 %v8125_v38, %v1109_v31  ;;  %10897 = vst [vmem:[#allocation39_spill] sm:$0xff] %v8353_v55 }
 0x1b6   : > { %v6347_v32 = vpop.f32.mrf.mxu0  ;;  %6409 = vmatmul.mubr.msk.bf16.gmra.mxu1 %vm1220_vm1, %v1195_v23 }
 0x1b7   : > { %v8344_v33 = vadd.f32 %v6347_v32, %v8125_v38  ;;  %10895 = vst [vmem:[#allocation37_spill] sm:$0xff] %v8347_v36 }
 0x1b8   : > { %v1112_v34 = vpop.f32.mrf.mxu0 }
 0x1b9   : > { %10894 = vst [vmem:[#allocation36_spill] sm:$0xff] %v8344_v33  ;;  %v8350_v46 = vadd.f32 %v8125_v38, %v1112_v34  ;;  %v1197_v1 = vpack.c.bf16 %v8344_v33, %v8353_v55 }
 0x1ba   : > { %v6350_v60 = vpop.f32.mrf.mxu0 }
 0x1bb   : > { %10896 = vst [vmem:[#allocation38_spill] sm:$0xff] %v8350_v46  ;;  %v1196_v0 = vpack.c.bf16 %v8350_v46, %v8347_v36  ;;  %v8374_v34 = vadd.f32 %v6350_v60, %v8125_v38 }
 0x1bc   : > { %v1125_v2 = vpop.f32.mrf.mxu0 }
 0x1bd   : > { %6412 = vmatprep.mubr.msk.bf16.mxu1 %vm1220_vm1, %v1196_v0  ;;  %v8368_v31 = vadd.f32 %v8125_v38, %v1125_v2  ;;  %10901 = vst [vmem:[#allocation43_spill] sm:$0xff] %v8374_v34 }
 0x1be   : > { %v6351_v21 = vpop.f32.mrf.mxu0  ;;  %6413 = vmatmul.mubr.msk.bf16.gmra.mxu1 %vm1220_vm1, %v1197_v1 }
 0x1bf   : > { %v8365_v20 = vadd.f32 %v6351_v21, %v8125_v38  ;;  %10899 = vst [vmem:[#allocation41_spill] sm:$0xff] %v8368_v31 }
 0x1c0   : > { %v1128_v23 = vpop.f32.mrf.mxu0 }
 0x1c1   : > { %10898 = vst [vmem:[#allocation40_spill] sm:$0xff] %v8365_v20  ;;  %v8371_v32 = vadd.f32 %v8125_v38, %v1128_v23  ;;  %v1199_v1 = vpack.c.bf16 %v8365_v20, %v8374_v34 }
 0x1c2   : > { %v6354_v33 = vpop.f32.mrf.mxu0 }
 0x1c3   : > { %10900 = vst [vmem:[#allocation42_spill] sm:$0xff] %v8371_v32  ;;  %v1198_v0 = vpack.c.bf16 %v8371_v32, %v8368_v31  ;;  %v8392_v32 = vadd.f32 %v6354_v33, %v8125_v38 }
 0x1c4   : > { %v1141_v6 = vpop.f32.mrf.mxu0 }
 0x1c5   : > { %6416 = vmatprep.mubr.msk.bf16.mxu1 %vm1220_vm1, %v1198_v0  ;;  %v8386_v60 = vadd.f32 %v8125_v38, %v1141_v6  ;;  %10905 = vst [vmem:[#allocation47_spill] sm:$0xff] %v8392_v32 }
 0x1c6   : > { %v6355_v21 = vpop.f32.mrf.mxu0  ;;  %6417 = vmatmul.mubr.msk.bf16.gmra.mxu1 %vm1220_vm1, %v1199_v1 }
 0x1c7   : > { %v8383_v2 = vadd.f32 %v6355_v21, %v8125_v38  ;;  %10903 = vst [vmem:[#allocation45_spill] sm:$0xff] %v8386_v60 }
 0x1c8   : > { %v1144_v23 = vpop.f32.mrf.mxu0 }
 0x1c9   : > { %10902 = vst [vmem:[#allocation44_spill] sm:$0xff] %v8383_v2  ;;  %v8389_v55 = vadd.f32 %v8125_v38, %v1144_v23  ;;  %v1201_v1 = vpack.c.bf16 %v8383_v2, %v8392_v32 }
 0x1ca   : > { %v6358_v20 = vpop.f32.mrf.mxu0 }
 0x1cb   : > { %10904 = vst [vmem:[#allocation46_spill] sm:$0xff] %v8389_v55  ;;  %v1200_v0 = vpack.c.bf16 %v8389_v55, %v8386_v60  ;;  %v8410_v55 = vadd.f32 %v6358_v20, %v8125_v38 }
 0x1cc   : > { %v1157_v21 = vpop.f32.mrf.mxu0 }
 0x1cd   : > { %6420 = vmatprep.mubr.msk.bf16.mxu1 %vm1220_vm1, %v1200_v0  ;;  %v8404_v33 = vadd.f32 %v8125_v38, %v1157_v21  ;;  %10909 = vst [vmem:[#allocation51_spill] sm:$0xff] %v8410_v55 }
 0x1ce   : > { %v6359_v34 = vpop.f32.mrf.mxu0  ;;  %6421 = vmatmul.mubr.msk.bf16.gmra.mxu1 %vm1220_vm1, %v1201_v1 }
 0x1cf   : > { %v8401_v6 = vadd.f32 %v6359_v34, %v8125_v38  ;;  %10907 = vst [vmem:[#allocation49_spill] sm:$0xff] %v8404_v33  ;;  %v6721_v34 = vld [vmem:[%s8037_s9 + $0x4] ss:$16 sps:$4 sm:$0xff]  }
 0x1d0   : > { %v1160_v23 = vpop.f32.mrf.mxu0  ;;  %2317 = vmatprep.mubr.bf16.mxu0 %v6721_v34 }
 0x1d1   : > { %10906 = vst [vmem:[#allocation48_spill] sm:$0xff] %v8401_v6  ;;  %v8407_v31 = vadd.f32 %v8125_v38, %v1160_v23  ;;  %v1203_v0 = vpack.c.bf16 %v8401_v6, %v8410_v55 }
 0x1d3   : > { %10908 = vst [vmem:[#allocation50_spill] sm:$0xff] %v8407_v31  ;;  %v1202_v2 = vpack.c.bf16 %v8407_v31, %v8404_v33 }
 0x1d5   : > { %6424 = vmatprep.mubr.msk.bf16.mxu1 %vm1220_vm1, %v1202_v2  ;;  %v6735_v2 = vld [vmem:[%s8037_s9 + $0xc] ss:$16 sps:$4 sm:$0xff]  }
 0x1d6   : > { %6425 = vmatmul.mubr.msk.bf16.gmra.mxu1 %vm1220_vm1, %v1203_v0 }
 0x1d7   : > { %2606 = vmatprep.mubr.bf16.mxu1 %v6735_v2 }
 0x21e   : > { %v6366_v1 = vpop.f32.mrf.mxu1 }
 0x220   : > { %v1351_v21 = vpop.f32.mrf.mxu1 }
 0x222   : > { %v6367_v23 = vpop.f32.mrf.mxu1 }
 0x224   : > { %v1354_v32 = vpop.f32.mrf.mxu1 }
 0x226   : > { %v6370_v60 = vpop.f32.mrf.mxu1 }
 0x228   : > { %v1367_v38 = vpop.f32.mrf.mxu1 }
 0x22a   : > { %v6371_v20 = vpop.f32.mrf.mxu1 }
 0x22c   : > { %v1370_v46 = vpop.f32.mrf.mxu1 }
 0x22d   : > { %v1608_v30 = vpack.c.bf16 %v1370_v46, %v1367_v38 }
 0x22e   : > { %v6374_v36 = vpop.f32.mrf.mxu1 }
 0x230   : > { %v1383_v31 = vpop.f32.mrf.mxu1 }
 0x232   : > { %v6375_v33 = vpop.f32.mrf.mxu1 }
 0x233   : > { %v1611_v47 = vpack.c.bf16 %v6375_v33, %v6374_v36 }
 0x234   : > { %v1386_v3 = vpop.f32.mrf.mxu1 }
 0x236   : > { %v6378_v6 = vpop.f32.mrf.mxu1 }
 0x238   : > { %v1399_v55 = vpop.f32.mrf.mxu1 }
 0x23a   : > { %v6379_v16 = vpop.f32.mrf.mxu1 }
 0x23b   : > { %v1613_v0 = vpack.c.bf16 %v6379_v16, %v6378_v6  ;;  %v1610_v6 = vpack.c.bf16 %v1386_v3, %v1383_v31  ;;  %v1606_v31 = vpack.c.bf16 %v1354_v32, %v1351_v21 }
 0x23c   : > { %v1402_v14 = vpop.f32.mrf.mxu1 }
 0x23d   : > { %2286 = vmatpush1.bf16.msra.mxu0 %v1613_v0  ;;  %v1612_v45 = vpack.c.bf16 %v1402_v14, %v1399_v55  ;;  %v1609_v14 = vpack.c.bf16 %v6371_v20, %v6370_v60 }
 0x23e   : > { %v8420_v34 = vpop.f32.mrf.mxu1  ;;  %2287 = vmatprep.subr.bf16.mxu0 %v10910_v13 }
 0x240   : > { %v8423_v50 = vpop.f32.mrf.mxu1 }
 0x241   : > { %2288 = vmatpush1.bf16.msra.mxu0 %v1612_v45 }
 0x242   : > { %v8425_v48 = vpop.f32.mrf.mxu1  ;;  %2289 = vmatprep.subr.bf16.mxu0 %v10910_v13 }
 0x244   : > { %v8428_v22 = vpop.f32.mrf.mxu1 }
 0x245   : > { %2290 = vmatpush1.bf16.msra.mxu0 %v1611_v47  ;;  %v1607_v47 = vpack.c.bf16 %v6367_v23, %v6366_v1 }
 0x246   : > { %v6386_v16 = vpop.f32.mrf.mxu1  ;;  %2291 = vmatprep.subr.bf16.mxu0 %v10910_v13 }
 0x248   : > { %v1431_v2 = vpop.f32.mrf.mxu1 }
 0x249   : > { %2292 = vmatpush1.bf16.msra.mxu0 %v1610_v6 }
 0x24a   : > { %v6387_v0 = vpop.f32.mrf.mxu1  ;;  %2293 = vmatprep.subr.bf16.mxu0 %v10910_v13 }
 0x24c   : > { %v1434_v55 = vpop.f32.mrf.mxu1 }
 0x24d   : > { %2294 = vmatpush1.bf16.msra.mxu0 %v1609_v14 }
 0x24e   : > { %v6390_v45 = vpop.f32.mrf.mxu1  ;;  %2295 = vmatprep.subr.bf16.mxu0 %v10910_v13 }
 0x250   : > { %v1447_v36 = vpop.f32.mrf.mxu1 }
 0x251   : > { %2296 = vmatpush1.bf16.msra.mxu0 %v1608_v30 }
 0x252   : > { %v6391_v33 = vpop.f32.mrf.mxu1  ;;  %2297 = vmatprep.subr.bf16.mxu0 %v10910_v13 }
 0x253   : > { %v1619_v32 = vpack.c.bf16 %v6391_v33, %v6390_v45  ;;  %v1616_v45 = vpack.c.bf16 %v1434_v55, %v1431_v2  ;;  %v6719_v2 = vld [vmem:[%s8037_s9] ss:$16 sps:$4 sm:$0xff]   ;;  %v6722_v55 = vld [vmem:[%s8037_s9 + $0x24] ss:$16 sps:$4 sm:$0xff]  }
 0x254   : > { %v1450_v26 = vpop.f32.mrf.mxu1 }
 0x255   : > { %2298 = vmatpush1.bf16.msra.mxu0 %v1607_v47  ;;  %v1618_v47 = vpack.c.bf16 %v1450_v26, %v1447_v36  ;;  %v1615_v26 = vpack.c.bf16 %v8425_v48, %v8420_v34 }
 0x256   : > { %v6394_v3 = vpop.f32.mrf.mxu1  ;;  %2299 = vmatprep.subr.bf16.mxu0 %v10910_v13 }
 0x258   : > { %v1463_v6 = vpop.f32.mrf.mxu1 }
 0x259   : > { %2300 = vmatpush1.bf16.msra.mxu0 %v1606_v31 }
 0x25a   : > { %v6395_v60 = vpop.f32.mrf.mxu1  ;;  %2301 = vmatprep.subr.bf16.mxu0 %v10910_v13 }
 0x25b   : > { %v1621_v20 = vpack.c.bf16 %v6395_v60, %v6394_v3 }
 0x25c   : > { %v1466_v14 = vpop.f32.mrf.mxu1 }
 0x25d   : > { %2302 = vmatpush2.bf16.msra.mxu0 %v1621_v20  ;;  %v1620_v30 = vpack.c.bf16 %v1466_v14, %v1463_v6  ;;  %v1617_v6 = vpack.c.bf16 %v6387_v0, %v6386_v16  ;;  %v1614_v16 = vpack.c.bf16 %v8428_v22, %v8423_v50  ;;  %v6724_v22 = vld [vmem:[%s8037_s9 + $0x20] ss:$16 sps:$4 sm:$0xff]   ;;  %v6725_v50 = vld [vmem:[%s8037_s9 + $0x44] ss:$16 sps:$4 sm:$0xff]  }
 0x25e   : > { %v8436_v46 = vpop.f32.mrf.mxu1  ;;  %2303 = vmatprep.subr.bf16.mxu0 %v10910_v13 }
 0x260   : > { %v8439_v1 = vpop.f32.mrf.mxu1 }
 0x261   : > { %2304 = vmatpush2.bf16.msra.mxu0 %v1620_v30 }
 0x262   : > { %v8441_v23 = vpop.f32.mrf.mxu1  ;;  %2305 = vmatprep.subr.bf16.mxu0 %v10910_v13 }
 0x264   : > { %v8444_v21 = vpop.f32.mrf.mxu1 }
 0x265   : > { %2306 = vmatpush2.bf16.msra.mxu0 %v1619_v32 }
 0x266   : > { %v6402_v38 = vpop.f32.mrf.mxu1  ;;  %2307 = vmatprep.subr.bf16.mxu0 %v10910_v13 }
 0x268   : > { %v8447_v3 = vpop.f32.mrf.mxu1 }
 0x269   : > { %2308 = vmatpush2.bf16.msra.mxu0 %v1618_v47 }
 0x26a   : > { %v6403_v31 = vpop.f32.mrf.mxu1  ;;  %2309 = vmatprep.subr.bf16.mxu0 %v10910_v13 }
 0x26c   : > { %v1498_v60 = vpop.f32.mrf.mxu1 }
 0x26d   : > { %2310 = vmatpush2.bf16.msra.mxu0 %v1617_v6 }
 0x26e   : > { %v6406_v20 = vpop.f32.mrf.mxu1  ;;  %2311 = vmatprep.subr.bf16.mxu0 %v10910_v13 }
 0x270   : > { %v1511_v33 = vpop.f32.mrf.mxu1 }
 0x271   : > { %2312 = vmatpush2.bf16.msra.mxu0 %v1616_v45 }
 0x272   : > { %v6407_v14 = vpop.f32.mrf.mxu1  ;;  %2313 = vmatprep.subr.bf16.mxu0 %v10910_v13 }
 0x274   : > { %v1514_v36 = vpop.f32.mrf.mxu1 }
 0x275   : > { %2314 = vmatpush2.bf16.msra.mxu0 %v1615_v26 }
 0x276   : > { %v6410_v30 = vpop.f32.mrf.mxu1  ;;  %2315 = vmatprep.subr.bf16.mxu0 %v10910_v13 }
 0x278   : > { %v1527_v0 = vpop.f32.mrf.mxu1 }
 0x279   : > { %2316 = vmatpush2.bf16.msra.mxu0 %v1614_v16 }
 0x27a   : > { %v6411_v32 = vpop.f32.mrf.mxu1 }
 0x27b   : > { %v1629_v47 = vpack.c.bf16 %v6411_v32, %v6410_v30  ;;  %v1627_v30 = vpack.c.bf16 %v6407_v14, %v6406_v20  ;;  %v6727_v32 = vld [vmem:[%s8037_s9 + $0x40] ss:$16 sps:$4 sm:$0xff]  }
 0x27c   : > { %v1530_v6 = vpop.f32.mrf.mxu1  ;;  %2318 = vmatmul.mubr.bf16.vlgmr.msra.gmra.mxu0 %v6719_v2 }
 0x27d   : > { %2575 = vmatpush1.bf16.msra.mxu1 %v1629_v47  ;;  %2325 = vmatprep.mubr.bf16.mxu0 %v6722_v55  ;;  %v1628_v34 = vpack.c.bf16 %v1530_v6, %v1527_v0  ;;  %v1626_v0 = vpack.c.bf16 %v1514_v36, %v1511_v33  ;;  %v6728_v47 = vld [vmem:[%s8037_s9 + $0x64] ss:$16 sps:$4 sm:$0xff]   ;;  %v6730_v36 = vld [vmem:[%s8037_s9 + $0x60] ss:$16 sps:$4 sm:$0xff]  }
 0x27e   : > { %v8459_v48 = vpop.f32.mrf.mxu1  ;;  %2576 = vmatprep.subr.bf16.mxu1 %v10910_v13 }
 0x280   : > { %v8462_v45 = vpop.f32.mrf.mxu1 }
 0x281   : > { %2577 = vmatpush1.bf16.msra.mxu1 %v1628_v34  ;;  %v1625_v34 = vpack.c.bf16 %v6403_v31, %v6402_v38  ;;  %v1623_v38 = vpack.c.bf16 %v8441_v23, %v8436_v46 }
 0x282   : > { %v8466_v26 = vpop.f32.mrf.mxu1  ;;  %2578 = vmatprep.subr.bf16.mxu1 %v10910_v13 }
 0x284   : > { %v8469_v16 = vpop.f32.mrf.mxu1  ;;  %2326 = vmatmul.mubr.bf16.gmra.mxu0 %v6724_v22  ;;  %v1624_v22 = vpack.c.bf16 %v1498_v60, %v8447_v3  ;;  %v1622_v3 = vpack.c.bf16 %v8444_v21, %v8439_v1  ;;  %v6743_v1 = vld [vmem:[%s8037_s9 + $0xc4] ss:$16 sps:$4 sm:$0xff]  }
 0x285   : > { %2579 = vmatpush1.bf16.msra.mxu1 %v1627_v30  ;;  %2333 = vmatprep.mubr.bf16.mxu0 %v6725_v50  ;;  %v6731_v50 = vld [vmem:[%s8037_s9 + $0x84] ss:$16 sps:$4 sm:$0xff]  }
 0x286   : > { %v6418_v2 = vpop.f32.mrf.mxu1  ;;  %2580 = vmatprep.subr.bf16.mxu1 %v10910_v13 }
 0x288   : > { %v1559_v55 = vpop.f32.mrf.mxu1 }
 0x289   : > { %2581 = vmatpush1.bf16.msra.mxu1 %v1626_v0 }
 0x28a   : > { %v6419_v6 = vpop.f32.mrf.mxu1  ;;  %2582 = vmatprep.subr.bf16.mxu1 %v10910_v13 }
 0x28c   : > { %v1562_v20 = vpop.f32.mrf.mxu1  ;;  %2334 = vmatmul.mubr.bf16.gmra.mxu0 %v6727_v32  ;;  %v6736_v32 = vld [vmem:[%s8037_s9 + $0x80] ss:$16 sps:$4 sm:$0xff]  }
 0x28d   : > { %2583 = vmatpush1.bf16.msra.mxu1 %v1625_v34  ;;  %2341 = vmatprep.mubr.bf16.mxu0 %v6728_v47  ;;  %v6737_v47 = vld [vmem:[%s8037_s9 + $0xa4] ss:$16 sps:$4 sm:$0xff]  }
 0x28e   : > { %v6422_v14 = vpop.f32.mrf.mxu1  ;;  %2584 = vmatprep.subr.bf16.mxu1 %v10910_v13 }
 0x290   : > { %v1575_v33 = vpop.f32.mrf.mxu1 }
 0x291   : > { %2585 = vmatpush1.bf16.msra.mxu1 %v1624_v22 }
 0x292   : > { %v6423_v30 = vpop.f32.mrf.mxu1  ;;  %2586 = vmatprep.subr.bf16.mxu1 %v10910_v13 }
 0x293   : > { %v1635_v21 = vpack.c.bf16 %v6423_v30, %v6422_v14  ;;  %v1632_v14 = vpack.c.bf16 %v1562_v20, %v1559_v55  ;;  %v6753_v30 = vld [vmem:[%s8037_s9 + $0xe0] ss:$16 sps:$4 sm:$0xff]   ;;  %v6733_v55 = vld [vmem:[%s8037_s9 + $0x8] ss:$16 sps:$4 sm:$0xff]   ;;  %v6739_v20 = vld [vmem:[%s8037_s9 + $0x2c] ss:$16 sps:$4 sm:$0xff]  }
 0x294   : > { %v1578_v31 = vpop.f32.mrf.mxu1  ;;  %2342 = vmatmul.mubr.bf16.gmra.mxu0 %v6730_v36  ;;  %v6741_v36 = vld [vmem:[%s8037_s9 + $0xa0] ss:$16 sps:$4 sm:$0xff]  }
 0x295   : > { %2587 = vmatpush1.bf16.msra.mxu1 %v1623_v38  ;;  %2349 = vmatprep.mubr.bf16.mxu0 %v6731_v50  ;;  %v1634_v50 = vpack.c.bf16 %v1578_v31, %v1575_v33  ;;  %v6747_v38 = vld [vmem:[%s8037_s9 + $0xc0] ss:$16 sps:$4 sm:$0xff]   ;;  %v1631_v33 = vpack.c.bf16 %v8466_v26, %v8459_v48  ;;  %v6761_v31 = vld [vmem:[%s8037_s9 + $0x124] ss:$16 sps:$4 sm:$0xff]   ;;  %v6742_v48 = vld [vmem:[%s8037_s9 + $0x28] ss:$16 sps:$4 sm:$0xff]  }
 0x296   : > { %v6426_v0 = vpop.f32.mrf.mxu1  ;;  %2588 = vmatprep.subr.bf16.mxu1 %v10910_v13  ;;  %v6765_v26 = vld [vmem:[%s8037_s9 + $0x120] ss:$16 sps:$4 sm:$0xff]  }
 0x298   : > { %v1591_v60 = vpop.f32.mrf.mxu1 }
 0x299   : > { %2589 = vmatpush1.bf16.msra.mxu1 %v1622_v3  ;;  %v1633_v3 = vpack.c.bf16 %v6419_v6, %v6418_v2  ;;  %v1630_v2 = vpack.c.bf16 %v8469_v16, %v8462_v45  ;;  %v6759_v6 = vld [vmem:[%s8037_s9 + $0x100] ss:$16 sps:$4 sm:$0xff]   ;;  %v6745_v45 = vld [vmem:[%s8037_s9 + $0x4c] ss:$16 sps:$4 sm:$0xff]   ;;  %v6767_v16 = vld [vmem:[%s8037_s9 + $0x144] ss:$16 sps:$4 sm:$0xff]  }
 0x29a   : > { %v6427_v34 = vpop.f32.mrf.mxu1  ;;  %2590 = vmatprep.subr.bf16.mxu1 %v10910_v13 }
 0x29b   : > { %v1637_v46 = vpack.c.bf16 %v6427_v34, %v6426_v0  ;;  %v6749_v0 = vld [vmem:[%s8037_s9 + $0xe4] ss:$16 sps:$4 sm:$0xff]   ;;  %v6751_v34 = vld [vmem:[%s8037_s9 + $0x6c] ss:$16 sps:$4 sm:$0xff]  }
 0x29c   : > { %v1594_v23 = vpop.f32.mrf.mxu1  ;;  %2350 = vmatmul.mubr.bf16.gmra.mxu0 %v6736_v32  ;;  %v6748_v32 = vld [vmem:[%s8037_s9 + $0x48] ss:$16 sps:$4 sm:$0xff]  }
 0x29d   : > { %2591 = vmatpush2.bf16.msra.mxu1 %v1637_v46  ;;  %2357 = vmatprep.mubr.bf16.mxu0 %v6737_v47  ;;  %v1636_v22 = vpack.c.bf16 %v1594_v23, %v1591_v60  ;;  %v6755_v60 = vld [vmem:[%s8037_s9 + $0x104] ss:$16 sps:$4 sm:$0xff]   ;;  %v6771_v47 = vld [vmem:[%s8037_s9 + $0x140] ss:$16 sps:$4 sm:$0xff]   ;;  %v6754_v23 = vld [vmem:[%s8037_s9 + $0x68] ss:$16 sps:$4 sm:$0xff]  }
 0x29e   : > { %2592 = vmatprep.subr.bf16.mxu1 %v10910_v13  ;;  %v6773_v46 = vld [vmem:[%s8037_s9 + $0x164] ss:$16 sps:$4 sm:$0xff]  }
 0x2a1   : > { %2593 = vmatpush2.bf16.msra.mxu1 %v1636_v22  ;;  %v6777_v22 = vld [vmem:[%s8037_s9 + $0x160] ss:$16 sps:$4 sm:$0xff]  }
 0x2a2   : > { %2594 = vmatprep.subr.bf16.mxu1 %v10910_v13 }
 0x2a4   : > { %2358 = vmatmul.mubr.bf16.gmra.mxu0 %v6741_v36  ;;  %v6757_v36 = vld [vmem:[%s8037_s9 + $0x8c] ss:$16 sps:$4 sm:$0xff]  }
 0x2a5   : > { %2595 = vmatpush2.bf16.msra.mxu1 %v1635_v21  ;;  %2365 = vmatprep.mubr.bf16.mxu0 %v6743_v1  ;;  %v6781_v1 = vld [vmem:[%s8037_s9 + $0x184] ss:$16 sps:$4 sm:$0xff]   ;;  %v6760_v21 = vld [vmem:[%s8037_s9 + $0x88] ss:$16 sps:$4 sm:$0xff]  }
 0x2a6   : > { %2596 = vmatprep.subr.bf16.mxu1 %v10910_v13 }
 0x2a9   : > { %2597 = vmatpush2.bf16.msra.mxu1 %v1634_v50  ;;  %v6779_v50 = vld [vmem:[%s8037_s9 + $0x180] ss:$16 sps:$4 sm:$0xff]  }
 0x2aa   : > { %2598 = vmatprep.subr.bf16.mxu1 %v10910_v13 }
 0x2ac   : > { %2366 = vmatmul.mubr.bf16.gmra.mxu0 %v6747_v38  ;;  %v6763_v38 = vld [vmem:[%s8037_s9 + $0xac] ss:$16 sps:$4 sm:$0xff]  }
 0x2ad   : > { %2599 = vmatpush2.bf16.msra.mxu1 %v1633_v3  ;;  %2373 = vmatprep.mubr.bf16.mxu0 %v6749_v0  ;;  %v6787_v0 = vld [vmem:[%s8037_s9 + $0x1a4] ss:$16 sps:$4 sm:$0xff]   ;;  %v6766_v3 = vld [vmem:[%s8037_s9 + $0xa8] ss:$16 sps:$4 sm:$0xff]  }
 0x2ae   : > { %2600 = vmatprep.subr.bf16.mxu1 %v10910_v13 }
 0x2b1   : > { %2601 = vmatpush2.bf16.msra.mxu1 %v1632_v14  ;;  %v6785_v14 = vld [vmem:[%s8037_s9 + $0x1a0] ss:$16 sps:$4 sm:$0xff]  }
 0x2b2   : > { %2602 = vmatprep.subr.bf16.mxu1 %v10910_v13 }
 0x2b4   : > { %2374 = vmatmul.mubr.bf16.gmra.mxu0 %v6753_v30  ;;  %v6769_v30 = vld [vmem:[%s8037_s9 + $0xcc] ss:$16 sps:$4 sm:$0xff]  }
 0x2b5   : > { %2603 = vmatpush2.bf16.msra.mxu1 %v1631_v33  ;;  %2381 = vmatprep.mubr.bf16.mxu0 %v6755_v60  ;;  %v6793_v60 = vld [vmem:[%s8037_s9 + $0x1c4] ss:$16 sps:$4 sm:$0xff]   ;;  %v6772_v33 = vld [vmem:[%s8037_s9 + $0xc8] ss:$16 sps:$4 sm:$0xff]  }
 0x2b6   : > { %2604 = vmatprep.subr.bf16.mxu1 %v10910_v13 }
 0x2b9   : > { %2605 = vmatpush2.bf16.msra.mxu1 %v1630_v2  ;;  %v6791_v2 = vld [vmem:[%s8037_s9 + $0x1c0] ss:$16 sps:$4 sm:$0xff]  }
 0x2ba   : > { %3465 = vmatprep.subr.bf16.mxu1 %v10910_v13 }
 0x2bc   : > { %2607 = vmatmul.mubr.bf16.vlgmr.msra.gmra.mxu1 %v6733_v55  ;;  %2382 = vmatmul.mubr.bf16.gmra.mxu0 %v6759_v6  ;;  %v6775_v55 = vld [vmem:[%s8037_s9 + $0xec] ss:$16 sps:$4 sm:$0xff]   ;;  %v6799_v6 = vld [vmem:[%s8037_s9 + $0x1e4] ss:$16 sps:$4 sm:$0xff]  }
 0x2bd   : > { %2614 = vmatprep.mubr.bf16.mxu1 %v6739_v20  ;;  %2389 = vmatprep.mubr.bf16.mxu0 %v6761_v31  ;;  %v6778_v20 = vld [vmem:[%s8037_s9 + $0xe8] ss:$16 sps:$4 sm:$0xff]   ;;  %v6797_v31 = vld [vmem:[%s8037_s9 + $0x1e0] ss:$16 sps:$4 sm:$0xff]  }
 0x2c4   : > { %2615 = vmatmul.mubr.bf16.gmra.mxu1 %v6742_v48  ;;  %2390 = vmatmul.mubr.bf16.gmra.mxu0 %v6765_v26  ;;  %v6782_v48 = vld [vmem:[%s8037_s9 + $0x10c] ss:$16 sps:$4 sm:$0xff]   ;;  %v6805_v26 = vld [vmem:[%s8037_s9 + $0x204] ss:$16 sps:$4 sm:$0xff]  }
 0x2c5   : > { %2622 = vmatprep.mubr.bf16.mxu1 %v6745_v45  ;;  %2397 = vmatprep.mubr.bf16.mxu0 %v6767_v16  ;;  %v6784_v45 = vld [vmem:[%s8037_s9 + $0x108] ss:$16 sps:$4 sm:$0xff]   ;;  %v6803_v16 = vld [vmem:[%s8037_s9 + $0x200] ss:$16 sps:$4 sm:$0xff]  }
 0x2cc   : > { %2623 = vmatmul.mubr.bf16.gmra.mxu1 %v6748_v32  ;;  %2398 = vmatmul.mubr.bf16.gmra.mxu0 %v6771_v47  ;;  %v6788_v32 = vld [vmem:[%s8037_s9 + $0x12c] ss:$16 sps:$4 sm:$0xff]   ;;  %v6811_v47 = vld [vmem:[%s8037_s9 + $0x224] ss:$16 sps:$4 sm:$0xff]  }
 0x2cd   : > { %2630 = vmatprep.mubr.bf16.mxu1 %v6751_v34  ;;  %2405 = vmatprep.mubr.bf16.mxu0 %v6773_v46  ;;  %v6790_v34 = vld [vmem:[%s8037_s9 + $0x128] ss:$16 sps:$4 sm:$0xff]   ;;  %v6809_v46 = vld [vmem:[%s8037_s9 + $0x220] ss:$16 sps:$4 sm:$0xff]  }
 0x2d4   : > { %2631 = vmatmul.mubr.bf16.gmra.mxu1 %v6754_v23  ;;  %2406 = vmatmul.mubr.bf16.gmra.mxu0 %v6777_v22  ;;  %v6794_v23 = vld [vmem:[%s8037_s9 + $0x14c] ss:$16 sps:$4 sm:$0xff]   ;;  %v6817_v22 = vld [vmem:[%s8037_s9 + $0x244] ss:$16 sps:$4 sm:$0xff]  }
 0x2d5   : > { %2638 = vmatprep.mubr.bf16.mxu1 %v6757_v36  ;;  %2413 = vmatprep.mubr.bf16.mxu0 %v6781_v1  ;;  %v6796_v36 = vld [vmem:[%s8037_s9 + $0x148] ss:$16 sps:$4 sm:$0xff]   ;;  %v6815_v1 = vld [vmem:[%s8037_s9 + $0x240] ss:$16 sps:$4 sm:$0xff]  }
 0x2dc   : > { %2639 = vmatmul.mubr.bf16.gmra.mxu1 %v6760_v21  ;;  %2414 = vmatmul.mubr.bf16.gmra.mxu0 %v6779_v50  ;;  %v6800_v21 = vld [vmem:[%s8037_s9 + $0x16c] ss:$16 sps:$4 sm:$0xff]   ;;  %v6823_v50 = vld [vmem:[%s8037_s9 + $0x264] ss:$16 sps:$4 sm:$0xff]  }
 0x2dd   : > { %2646 = vmatprep.mubr.bf16.mxu1 %v6763_v38  ;;  %2421 = vmatprep.mubr.bf16.mxu0 %v6787_v0  ;;  %v6802_v38 = vld [vmem:[%s8037_s9 + $0x168] ss:$16 sps:$4 sm:$0xff]   ;;  %v6821_v0 = vld [vmem:[%s8037_s9 + $0x260] ss:$16 sps:$4 sm:$0xff]  }
 0x2e4   : > { %2647 = vmatmul.mubr.bf16.gmra.mxu1 %v6766_v3  ;;  %2422 = vmatmul.mubr.bf16.gmra.mxu0 %v6785_v14  ;;  %v6808_v3 = vld [vmem:[%s8037_s9 + $0x18c] ss:$16 sps:$4 sm:$0xff]   ;;  %v6829_v14 = vld [vmem:[%s8037_s9 + $0x284] ss:$16 sps:$4 sm:$0xff]  }
 0x2e5   : > { %2654 = vmatprep.mubr.bf16.mxu1 %v6769_v30  ;;  %2429 = vmatprep.mubr.bf16.mxu0 %v6793_v60  ;;  %v6899_v30 = vld [vmem:[#allocation8 + $0x18] sm:$0xff]   ;;  %v6900_v60 = vld [vmem:[#allocation8 + $0x10] sm:$0xff]  }
 0x2e6   : > { %6428 = vmatprep.subr.bf16.mxu0 %v6899_v30 }
 0x2e7   : > { %6429 = vmatpush3.bf16.msra.mxu0 %v6899_v30  ;;  %v6857_v30 = vld [vmem:[%s8037_s9 + $0x320] ss:$16 sps:$4 sm:$0xff]  }
 0x2e8   : > { %6430 = vmatprep.subr.bf16.mxu0 %v6900_v60 }
 0x2eb   : > { %6431 = vmatpush3.bf16.msra.mxu0 %v6900_v60  ;;  %v6844_v60 = vld [vmem:[%s8037_s9 + $0x24c] ss:$16 sps:$4 sm:$0xff]  }
 0x2ec   : > { %2655 = vmatmul.mubr.bf16.gmra.mxu1 %v6772_v33  ;;  %2430 = vmatmul.mubr.bf16.gmra.mxu0 %v6791_v2  ;;  %v6806_v33 = vld [vmem:[%s8037_s9 + $0x188] ss:$16 sps:$4 sm:$0xff]   ;;  %v6827_v2 = vld [vmem:[%s8037_s9 + $0x280] ss:$16 sps:$4 sm:$0xff]  }
 0x2ed   : > { %2662 = vmatprep.mubr.bf16.mxu1 %v6775_v55  ;;  %2437 = vmatprep.mubr.bf16.mxu0 %v6799_v6  ;;  %v6814_v55 = vld [vmem:[%s8037_s9 + $0x1ac] ss:$16 sps:$4 sm:$0xff]   ;;  %v6835_v6 = vld [vmem:[%s8037_s9 + $0x2a4] ss:$16 sps:$4 sm:$0xff]  }
 0x2ee   : > { %3754 = vmatprep.subr.bf16.mxu0 %v10910_v13 }
 0x2f4   : > { %2663 = vmatmul.mubr.bf16.gmra.mxu1 %v6778_v20  ;;  %2438 = vmatmul.mubr.bf16.gmra.mxu0 %v6797_v31  ;;  %v6812_v20 = vld [vmem:[%s8037_s9 + $0x1a8] ss:$16 sps:$4 sm:$0xff]   ;;  %v6833_v31 = vld [vmem:[%s8037_s9 + $0x2a0] ss:$16 sps:$4 sm:$0xff]  }
 0x2f5   : > { %2670 = vmatprep.mubr.bf16.mxu1 %v6782_v48  ;;  %2445 = vmatprep.mubr.bf16.mxu0 %v6805_v26  ;;  %v6820_v48 = vld [vmem:[%s8037_s9 + $0x1cc] ss:$16 sps:$4 sm:$0xff]   ;;  %v6841_v26 = vld [vmem:[%s8037_s9 + $0x2c4] ss:$16 sps:$4 sm:$0xff]  }
 0x2fc   : > { %2671 = vmatmul.mubr.bf16.gmra.mxu1 %v6784_v45  ;;  %2446 = vmatmul.mubr.bf16.gmra.mxu0 %v6803_v16  ;;  %v6818_v45 = vld [vmem:[%s8037_s9 + $0x1c8] ss:$16 sps:$4 sm:$0xff]   ;;  %v6839_v16 = vld [vmem:[%s8037_s9 + $0x2c0] ss:$16 sps:$4 sm:$0xff]  }
 0x2fd   : > { %2678 = vmatprep.mubr.bf16.mxu1 %v6788_v32  ;;  %2453 = vmatprep.mubr.bf16.mxu0 %v6811_v47  ;;  %v6826_v32 = vld [vmem:[%s8037_s9 + $0x1ec] ss:$16 sps:$4 sm:$0xff]   ;;  %v6847_v47 = vld [vmem:[%s8037_s9 + $0x2e4] ss:$16 sps:$4 sm:$0xff]  }
 0x304   : > { %2679 = vmatmul.mubr.bf16.gmra.mxu1 %v6790_v34  ;;  %2454 = vmatmul.mubr.bf16.gmra.mxu0 %v6809_v46  ;;  %v6824_v34 = vld [vmem:[%s8037_s9 + $0x1e8] ss:$16 sps:$4 sm:$0xff]   ;;  %v6845_v46 = vld [vmem:[%s8037_s9 + $0x2e0] ss:$16 sps:$4 sm:$0xff]  }
 0x305   : > { %2686 = vmatprep.mubr.bf16.mxu1 %v6794_v23  ;;  %2461 = vmatprep.mubr.bf16.mxu0 %v6817_v22  ;;  %v6832_v23 = vld [vmem:[%s8037_s9 + $0x20c] ss:$16 sps:$4 sm:$0xff]   ;;  %v6853_v22 = vld [vmem:[%s8037_s9 + $0x304] ss:$16 sps:$4 sm:$0xff]  }
 0x30c   : > { %2687 = vmatmul.mubr.bf16.gmra.mxu1 %v6796_v36  ;;  %2462 = vmatmul.mubr.bf16.gmra.mxu0 %v6815_v1  ;;  %v6830_v36 = vld [vmem:[%s8037_s9 + $0x208] ss:$16 sps:$4 sm:$0xff]   ;;  %v6851_v1 = vld [vmem:[%s8037_s9 + $0x300] ss:$16 sps:$4 sm:$0xff]  }
 0x30d   : > { %2694 = vmatprep.mubr.bf16.mxu1 %v6800_v21  ;;  %2469 = vmatprep.mubr.bf16.mxu0 %v6823_v50  ;;  %v6838_v21 = vld [vmem:[%s8037_s9 + $0x22c] ss:$16 sps:$4 sm:$0xff]   ;;  %v6859_v50 = vld [vmem:[%s8037_s9 + $0x324] ss:$16 sps:$4 sm:$0xff]  }
 0x314   : > { %2695 = vmatmul.mubr.bf16.gmra.mxu1 %v6802_v38  ;;  %2470 = vmatmul.mubr.bf16.gmra.mxu0 %v6821_v0 }
 0x315   : > { %2702 = vmatprep.mubr.bf16.mxu1 %v6808_v3  ;;  %2477 = vmatprep.mubr.bf16.mxu0 %v6829_v14  ;;  %v6836_v3 = vld [vmem:[%s8037_s9 + $0x228] ss:$16 sps:$4 sm:$0xff]  }
 0x31c   : > { %2703 = vmatmul.mubr.bf16.gmra.mxu1 %v6806_v33  ;;  %2478 = vmatmul.mubr.bf16.gmra.mxu0 %v6827_v2  ;;  %v6865_v33 = vld [vmem:[%s8037_s9 + $0x344] ss:$16 sps:$4 sm:$0xff]  }
 0x31d   : > { %2710 = vmatprep.mubr.bf16.mxu1 %v6814_v55  ;;  %2485 = vmatprep.mubr.bf16.mxu0 %v6835_v6 }
 0x324   : > { %2711 = vmatmul.mubr.bf16.gmra.mxu1 %v6812_v20  ;;  %2486 = vmatmul.mubr.bf16.gmra.mxu0 %v6833_v31  ;;  %v6842_v20 = vld [vmem:[%s8037_s9 + $0x248] ss:$16 sps:$4 sm:$0xff]  }
 0x325   : > { %2718 = vmatprep.mubr.bf16.mxu1 %v6820_v48  ;;  %2493 = vmatprep.mubr.bf16.mxu0 %v6841_v26  ;;  %v6863_v48 = vld [vmem:[%s8037_s9 + $0x340] ss:$16 sps:$4 sm:$0xff]   ;;  %v6850_v26 = vld [vmem:[%s8037_s9 + $0x26c] ss:$16 sps:$4 sm:$0xff]  }
 0x32c   : > { %2719 = vmatmul.mubr.bf16.gmra.mxu1 %v6818_v45  ;;  %2494 = vmatmul.mubr.bf16.gmra.mxu0 %v6839_v16  ;;  %v6871_v45 = vld [vmem:[%s8037_s9 + $0x364] ss:$16 sps:$4 sm:$0xff]  }
 0x32d   : > { %2726 = vmatprep.mubr.bf16.mxu1 %v6826_v32  ;;  %2501 = vmatprep.mubr.bf16.mxu0 %v6847_v47 }
 0x334   : > { %2727 = vmatmul.mubr.bf16.gmra.mxu1 %v6824_v34  ;;  %2502 = vmatmul.mubr.bf16.gmra.mxu0 %v6845_v46  ;;  %v6848_v34 = vld [vmem:[%s8037_s9 + $0x268] ss:$16 sps:$4 sm:$0xff]  }
 0x335   : > { %2734 = vmatprep.mubr.bf16.mxu1 %v6832_v23  ;;  %2509 = vmatprep.mubr.bf16.mxu0 %v6853_v22  ;;  %v6869_v23 = vld [vmem:[%s8037_s9 + $0x360] ss:$16 sps:$4 sm:$0xff]   ;;  %v6856_v22 = vld [vmem:[%s8037_s9 + $0x28c] ss:$16 sps:$4 sm:$0xff]  }
 0x33c   : > { %2735 = vmatmul.mubr.bf16.gmra.mxu1 %v6830_v36  ;;  %2510 = vmatmul.mubr.bf16.gmra.mxu0 %v6851_v1  ;;  %v8575_v38 = vpop.f32.mrf.mxu0  ;;  %v6877_v36 = vld [vmem:[%s8037_s9 + $0x384] ss:$16 sps:$4 sm:$0xff]  }
 0x33d   : > { %2742 = vmatprep.mubr.bf16.mxu1 %v6838_v21  ;;  %2517 = vmatprep.mubr.bf16.mxu0 %v6859_v50 }
 0x33e   : > { %v2321_v0 = vpop.f32.mrf.mxu0 }
 0x33f   : > { %v6854_v0 = vld [vmem:[%s8037_s9 + $0x288] ss:$16 sps:$4 sm:$0xff]  }
 0x340   : > { %v8578_v14 = vpop.f32.mrf.mxu0 }
 0x342   : > { %v2324_v2 = vpop.f32.mrf.mxu0 }
 0x344   : > { %2743 = vmatmul.mubr.bf16.gmra.mxu1 %v6836_v3  ;;  %2518 = vmatmul.mubr.bf16.gmra.mxu0 %v6857_v30  ;;  %v8583_v55 = vpop.f32.mrf.mxu0  ;;  %v6875_v30 = vld [vmem:[%s8037_s9 + $0x380] ss:$16 sps:$4 sm:$0xff]  }
 0x345   : > { %2750 = vmatprep.mubr.bf16.mxu1 %v6844_v60  ;;  %2525 = vmatprep.mubr.bf16.mxu0 %v6865_v33  ;;  %v6862_v60 = vld [vmem:[%s8037_s9 + $0x2ac] ss:$16 sps:$4 sm:$0xff]   ;;  %v6883_v33 = vld [vmem:[%s8037_s9 + $0x3a4] ss:$16 sps:$4 sm:$0xff]  }
 0x346   : > { %v2329_v6 = vpop.f32.mrf.mxu0 }
 0x348   : > { %v8586_v31 = vpop.f32.mrf.mxu0 }
 0x34a   : > { %v2332_v16 = vpop.f32.mrf.mxu0 }
 0x34b   : > { %v6868_v16 = vld [vmem:[%s8037_s9 + $0x2cc] ss:$16 sps:$4 sm:$0xff]  }
 0x34c   : > { %2751 = vmatmul.mubr.bf16.gmra.mxu1 %v6842_v20  ;;  %2526 = vmatmul.mubr.bf16.gmra.mxu0 %v6863_v48  ;;  %v8591_v32 = vpop.f32.mrf.mxu0  ;;  %v6860_v48 = vld [vmem:[%s8037_s9 + $0x2a8] ss:$16 sps:$4 sm:$0xff]  }
 0x34d   : > { %2758 = vmatprep.mubr.bf16.mxu1 %v6850_v26  ;;  %2533 = vmatprep.mubr.bf16.mxu0 %v6871_v45  ;;  %v6881_v45 = vld [vmem:[%s8037_s9 + $0x3a0] ss:$16 sps:$4 sm:$0xff]  }
 0x34e   : > { %v2337_v47 = vpop.f32.mrf.mxu0 }
 0x34f   : > { %v6889_v47 = vld [vmem:[%s8037_s9 + $0x3c4] ss:$16 sps:$4 sm:$0xff]  }
 0x350   : > { %v8594_v46 = vpop.f32.mrf.mxu0 }
 0x352   : > { %v2340_v1 = vpop.f32.mrf.mxu0 }
 0x354   : > { %2759 = vmatmul.mubr.bf16.gmra.mxu1 %v6848_v34  ;;  %2534 = vmatmul.mubr.bf16.gmra.mxu0 %v6869_v23  ;;  %v8599_v21 = vpop.f32.mrf.mxu0 }
 0x355   : > { %2766 = vmatprep.mubr.bf16.mxu1 %v6856_v22  ;;  %2541 = vmatprep.mubr.bf16.mxu0 %v6877_v36  ;;  %v6866_v36 = vld [vmem:[%s8037_s9 + $0x2c8] ss:$16 sps:$4 sm:$0xff]  }
 0x356   : > { %v2345_v50 = vpop.f32.mrf.mxu0 }
 0x357   : > { %v6887_v50 = vld [vmem:[%s8037_s9 + $0x3c0] ss:$16 sps:$4 sm:$0xff]  }
 0x358   : > { %v8602_v3 = vpop.f32.mrf.mxu0 }
 0x35a   : > { %v2348_v2 = vpop.f32.mrf.mxu0 }
 0x35c   : > { %2767 = vmatmul.mubr.bf16.gmra.mxu1 %v6854_v0  ;;  %2542 = vmatmul.mubr.bf16.gmra.mxu0 %v6875_v30  ;;  %v8607_v6 = vpop.f32.mrf.mxu0  ;;  %v6874_v0 = vld [vmem:[%s8037_s9 + $0x2ec] ss:$16 sps:$4 sm:$0xff]   ;;  %v6895_v30 = vld [vmem:[%s8037_s9 + $0x3e4] ss:$16 sps:$4 sm:$0xff]  }
 0x35d   : > { %2774 = vmatprep.mubr.bf16.mxu1 %v6862_v60  ;;  %2549 = vmatprep.mubr.bf16.mxu0 %v6883_v33 }
 0x35e   : > { %v2353_v20 = vpop.f32.mrf.mxu0 }
 0x35f   : > { %v6872_v20 = vld [vmem:[%s8037_s9 + $0x2e8] ss:$16 sps:$4 sm:$0xff]  }
 0x360   : > { %v8610_v26 = vpop.f32.mrf.mxu0 }
 0x362   : > { %v2356_v34 = vpop.f32.mrf.mxu0 }
 0x364   : > { %2775 = vmatmul.mubr.bf16.gmra.mxu1 %v6860_v48  ;;  %2550 = vmatmul.mubr.bf16.gmra.mxu0 %v6881_v45  ;;  %v8615_v23 = vpop.f32.mrf.mxu0  ;;  %v6893_v45 = vld [vmem:[%s8037_s9 + $0x3e0] ss:$16 sps:$4 sm:$0xff]  }
 0x365   : > { %2782 = vmatprep.mubr.bf16.mxu1 %v6868_v16  ;;  %2557 = vmatprep.mubr.bf16.mxu0 %v6889_v47  ;;  %v6880_v16 = vld [vmem:[%s8037_s9 + $0x30c] ss:$16 sps:$4 sm:$0xff]  }
 0x366   : > { %v2361_v22 = vpop.f32.mrf.mxu0 }
 0x367   : > { %v8632_v22 = vld [vmem:[#allocation10] ss:$0 sm:$0xff] }
 0x368   : > { %v8618_v1 = vpop.f32.mrf.mxu0 }
 0x36a   : > { %v2364_v60 = vpop.f32.mrf.mxu0 }
 0x36b   : > { %v6886_v60 = vld [vmem:[%s8037_s9 + $0x32c] ss:$16 sps:$4 sm:$0xff]  }
 0x36c   : > { %2783 = vmatmul.mubr.bf16.gmra.mxu1 %v6866_v36  ;;  %2558 = vmatmul.mubr.bf16.gmra.mxu0 %v6887_v50  ;;  %v8623_v33 = vpop.f32.mrf.mxu0  ;;  %v6878_v50 = vld [vmem:[%s8037_s9 + $0x308] ss:$16 sps:$4 sm:$0xff]  }
 0x36d   : > { %2790 = vmatprep.mubr.bf16.mxu1 %v6874_v0  ;;  %2565 = vmatprep.mubr.bf16.mxu0 %v6895_v30  ;;  %v2320_v30 = vadd.f32 %v8632_v22, %v8575_v38  ;;  %v2328_v38 = vadd.f32 %v8632_v22, %v8583_v55 }
 0x36e   : > { %v2369_v2 = vpop.f32.mrf.mxu0 }
 0x370   : > { %v8626_v48 = vpop.f32.mrf.mxu0 }
 0x372   : > { %v2372_v47 = vpop.f32.mrf.mxu0 }
 0x374   : > { %2791 = vmatmul.mubr.bf16.gmra.mxu1 %v6872_v20  ;;  %2566 = vmatmul.mubr.bf16.gmra.mxu0 %v6893_v45  ;;  %v8630_v34 = vpop.f32.mrf.mxu0 }
 0x375   : > { %2798 = vmatprep.mubr.bf16.mxu1 %v6880_v16 }
 0x376   : > { %v2377_v36 = vpop.f32.mrf.mxu0 }
 0x377   : > { %v2323_v36 = vadd.f32 %v8632_v22, %v8578_v14 }
 0x378   : > { %v8635_v0 = vpop.f32.mrf.mxu0 }
 0x37a   : > { %v2380_v2 = vpop.f32.mrf.mxu0 }
 0x37c   : > { %v2608_v13 = vpop.f32.mrf.mxu1  ;;  %2799 = vmatmul.mubr.bf16.gmra.mxu1 %v6878_v50  ;;  %v8640_v20 = vpop.f32.mrf.mxu0  ;;  %v6892_v50 = vld [vmem:[%s8037_s9 + $0x34c] ss:$16 sps:$4 sm:$0xff]  }
 0x37d   : > { %v2609_v45 = vadd.f32 %v2608_v13, %v2320_v30  ;;  %2806 = vmatprep.mubr.bf16.mxu1 %v6886_v60 }
 0x37e   : > { %v2610_v16 = vpop.f32.mrf.mxu1  ;;  %v2385_v47 = vpop.f32.mrf.mxu0 }
 0x37f   : > { %6915 = vtanh.f32 %v2609_v45  ;;  %v2331_v47 = vadd.f32 %v8632_v22, %v8586_v31 }
 0x380   : > { %v2611_v24 = vpop.f32.mrf.mxu1  ;;  %v8645_v12 = vpop.f32.mrf.mxu0 }
 0x381   : > { %v2612_v2 = vadd.f32 %v2611_v24, %v2323_v36  ;;  %v6898_v24 = vld [vmem:[%s8037_s9 + $0x36c] ss:$16 sps:$4 sm:$0xff]  }
 0x382   : > { %v2613_v11 = vpop.f32.mrf.mxu1  ;;  %v2388_v10 = vpop.f32.mrf.mxu0 }
 0x383   : > { %6917 = vtanh.f32 %v2612_v2  ;;  %v2336_v10 = vadd.f32 %v8632_v22, %v8591_v32  ;;  %v2339_v32 = vadd.f32 %v8632_v22, %v8594_v46 }
 0x384   : > { %v2616_v13 = vpop.f32.mrf.mxu1  ;;  %2807 = vmatmul.mubr.bf16.gmra.mxu1 %v6884_v4  ;;  %v8650_v30 = vpop.f32.mrf.mxu0 }
 0x385   : > { %v2617_v14 = vadd.f32 %v2616_v13, %v2328_v38  ;;  %2814 = vmatprep.mubr.bf16.mxu1 %v6892_v50 }
 0x386   : > { %v2618_v60 = vpop.f32.mrf.mxu1  ;;  %v2393_v16 = vpop.f32.mrf.mxu0 }
 0x387   : > { %6919 = vtanh.f32 %v2617_v14  ;;  %v2344_v16 = vadd.f32 %v8632_v22, %v8599_v21 }
 0x388   : > { %v2619_v55 = vpop.f32.mrf.mxu1  ;;  %v8655_v45 = vpop.f32.mrf.mxu0 }
 0x389   : > { %v2620_v11 = vadd.f32 %v2619_v55, %v2331_v47  ;;  %v6896_v55 = vld [vmem:[%s8037_s9 + $0x368] ss:$16 sps:$4 sm:$0xff]  }
 0x38a   : > { %v2621_v4 = vpop.f32.mrf.mxu1  ;;  %v2396_v36 = vpop.f32.mrf.mxu0 }
 0x38b   : > { %6921 = vtanh.f32 %v2620_v11 }
 0x38c   : > { %v2624_v38 = vpop.f32.mrf.mxu1  ;;  %2815 = vmatmul.mubr.bf16.gmra.mxu1 %v6890_v54  ;;  %v8660_v2 = vpop.f32.mrf.mxu0 }
 0x38d   : > { %v2625_v31 = vadd.f32 %v2624_v38, %v2336_v10  ;;  %2822 = vmatprep.mubr.bf16.mxu1 %v6898_v24  ;;  %v6916_v50 = vpop.eup %6915  ;;  %v6903_v24 = vld [vmem:[%s8037_s9 + $0x38c] ss:$16 sps:$4 sm:$0xff]  }
 0x38e   : > { %v2626_v13 = vpop.f32.mrf.mxu1  ;;  %v2401_v60 = vpop.f32.mrf.mxu0  ;;  %v8670_v4 = vadd.f32 %v6916_v50, %v8131_v41 }
 0x38f   : > { %6923 = vtanh.f32 %v2625_v31  ;;  %v2347_v60 = vadd.f32 %v8632_v22, %v8602_v3 }
 0x390   : > { %v6918_v14 = vpop.eup %6917  ;;  %v2627_v47 = vpop.f32.mrf.mxu1 }
 0x391   : > { %v8667_v11 = vpop.f32.mrf.mxu0  ;;  %v2628_v54 = vadd.f32 %v2627_v47, %v2339_v32  ;;  %v8673_v10 = vadd.f32 %v6918_v14, %v8134_v42  ;;  %v2352_v14 = vadd.f32 %v8632_v22, %v8607_v6 }
 0x392   : > { %v2629_v36 = vpop.f32.mrf.mxu1 }
 0x393   : > { %v2404_v38 = vpop.f32.mrf.mxu0  ;;  %6925 = vtanh.f32 %v2628_v54  ;;  %v2991_v46 = vpack.c.bf16 %v8673_v10, %v8670_v4  ;;  %v6901_v54 = vld [vmem:[%s8037_s9 + $0x388] ss:$16 sps:$4 sm:$0xff]  }
 0x394   : > { %v2632_v21 = vpop.f32.mrf.mxu1  ;;  %2823 = vmatmul.mubr.bf16.gmra.mxu1 %v6896_v55  ;;  %v6920_v41 = vpop.eup %6919  ;;  %v6906_v38 = vld [vmem:[%s8037_s9 + $0x3ac] ss:$16 sps:$4 sm:$0xff]  }
 0x395   : > { %v8678_v13 = vpop.f32.mrf.mxu0  ;;  %v2633_v31 = vadd.f32 %v2632_v21, %v2344_v16  ;;  %6432 = vmatprep.mubr.msk.bf16.mxu0 %vm1220_vm1, %v2991_v46  ;;  %2830 = vmatprep.mubr.bf16.mxu1 %v6903_v24  ;;  %v8689_v16 = vadd.f32 %v6920_v41, %v8137_v43  ;;  %v2355_v41 = vadd.f32 %v8632_v22, %v8610_v26 }
 0x396   : > { %v2634_v42 = vpop.f32.mrf.mxu1 }
 0x397   : > { %v2409_v50 = vpop.f32.mrf.mxu0  ;;  %6927 = vtanh.f32 %v2633_v31 }
 0x398   : > { %v6922_v32 = vpop.eup %6921  ;;  %v2635_v47 = vpop.f32.mrf.mxu1 }
 0x399   : > { %v8686_v55 = vpop.f32.mrf.mxu0  ;;  %v8692_v36 = vadd.f32 %v6922_v32, %v8128_v39  ;;  %v2636_v24 = vadd.f32 %v2635_v47, %v2347_v60  ;;  %v2360_v32 = vadd.f32 %v8632_v22, %v8615_v23 }
 0x39a   : > { %v2637_v46 = vpop.f32.mrf.mxu1 }
 0x39b   : > { %v2412_v21 = vpop.f32.mrf.mxu0  ;;  %v2992_v3 = vpack.c.bf16 %v8692_v36, %v8689_v16  ;;  %6929 = vtanh.f32 %v2636_v24  ;;  %v6904_v24 = vld [vmem:[%s8037_s9 + $0x3a8] ss:$16 sps:$4 sm:$0xff]  }
 0x39c   : > { %v2640_v6 = vpop.f32.mrf.mxu1  ;;  %2831 = vmatmul.mubr.bf16.gmra.mxu1 %v6901_v54  ;;  %v6924_v39 = vpop.eup %6923  ;;  %v6909_v21 = vld [vmem:[%s8037_s9 + $0x3cc] ss:$16 sps:$4 sm:$0xff]  }
 0x39d   : > { %v8697_v42 = vpop.f32.mrf.mxu0  ;;  %v2641_v50 = vadd.f32 %v2640_v6, %v2352_v14  ;;  %6433 = vmatmul.mubr.msk.bf16.vlgmr.msra.gmra.mxu0 %vm1220_vm1, %v2992_v3  ;;  %2838 = vmatprep.mubr.bf16.mxu1 %v6906_v38  ;;  %v8708_v46 = vadd.f32 %v6924_v39, %v8149_v51 }
 0x39e   : > { %v2642_v43 = vpop.f32.mrf.mxu1 }
 0x39f   : > { %v2417_v31 = vpop.f32.mrf.mxu0  ;;  %6931 = vtanh.f32 %v2641_v50 }
 0x3a0   : > { %v6926_v60 = vpop.eup %6925  ;;  %v2643_v47 = vpop.f32.mrf.mxu1  ;;  %v2363_v31 = vadd.f32 %v8632_v22, %v8618_v1 }
 0x3a1   : > { %v8705_v54 = vpop.f32.mrf.mxu0  ;;  %v2644_v14 = vadd.f32 %v2643_v47, %v2355_v41  ;;  %v8711_v38 = vadd.f32 %v6926_v60, %v8152_v52  ;;  %v2368_v60 = vadd.f32 %v8632_v22, %v8623_v33 }
 0x3a2   : > { %v2645_v3 = vpop.f32.mrf.mxu1 }
 0x3a3   : > { %v2420_v6 = vpop.f32.mrf.mxu0  ;;  %6933 = vtanh.f32 %v2644_v14  ;;  %v2993_v26 = vpack.c.bf16 %v8711_v38, %v8708_v46  ;;  %v6907_v14 = vld [vmem:[%s8037_s9 + $0x3c8] ss:$16 sps:$4 sm:$0xff]  }
 0x3a4   : > { %v2648_v23 = vpop.f32.mrf.mxu1  ;;  %2839 = vmatmul.mubr.bf16.gmra.mxu1 %v6904_v24  ;;  %v6928_v51 = vpop.eup %6927  ;;  %v6912_v6 = vld [vmem:[%s8037_s9 + $0x3ec] ss:$16 sps:$4 sm:$0xff]  }
 0x3a5   : > { %v8716_v43 = vpop.f32.mrf.mxu0  ;;  %v2649_v50 = vadd.f32 %v2648_v23, %v2360_v32  ;;  %6436 = vmatprep.mubr.msk.bf16.mxu0 %vm1220_vm1, %v2993_v26  ;;  %2846 = vmatprep.mubr.bf16.mxu1 %v6909_v21  ;;  %v8727_v3 = vadd.f32 %v6928_v51, %v8155_v53 }
 0x3a6   : > { %v2650_v52 = vpop.f32.mrf.mxu1 }
 0x3a7   : > { %v2425_v39 = vpop.f32.mrf.mxu0  ;;  %6935 = vtanh.f32 %v2649_v50 }
 0x3a8   : > { %v6930_v41 = vpop.eup %6929  ;;  %v2651_v47 = vpop.f32.mrf.mxu1  ;;  %v2371_v39 = vadd.f32 %v8632_v22, %v8626_v48 }
 0x3a9   : > { %v8724_v24 = vpop.f32.mrf.mxu0  ;;  %v2652_v32 = vadd.f32 %v2651_v47, %v2363_v31  ;;  %v8730_v21 = vadd.f32 %v6930_v41, %v8146_v49  ;;  %v2376_v41 = vadd.f32 %v8632_v22, %v8630_v34 }
 0x3aa   : > { %v2653_v26 = vpop.f32.mrf.mxu1 }
 0x3ab   : > { %v2428_v23 = vpop.f32.mrf.mxu0  ;;  %6937 = vtanh.f32 %v2652_v32  ;;  %v2994_v1 = vpack.c.bf16 %v8730_v21, %v8727_v3  ;;  %v6910_v32 = vld [vmem:[%s8037_s9 + $0x3e8] ss:$16 sps:$4 sm:$0xff]  }
 0x3ac   : > { %v2656_v33 = vpop.f32.mrf.mxu1  ;;  %2847 = vmatmul.mubr.bf16.gmra.mxu1 %v6907_v14  ;;  %v6932_v53 = vpop.eup %6931 }
 0x3ad   : > { %v8735_v52 = vpop.f32.mrf.mxu0  ;;  %v2657_v50 = vadd.f32 %v2656_v33, %v2368_v60  ;;  %6437 = vmatmul.mubr.msk.bf16.gmra.mxu0 %vm1220_vm1, %v2994_v1  ;;  %2854 = vmatprep.mubr.bf16.mxu1 %v6912_v6  ;;  %v8746_v26 = vadd.f32 %v6932_v53, %v8167_v61 }
 0x3ae   : > { %v2658_v51 = vpop.f32.mrf.mxu1 }
 0x3af   : > { %v2433_v49 = vpop.f32.mrf.mxu0  ;;  %6939 = vtanh.f32 %v2657_v50  ;;  %v7315_v50 = vld [vmem:[%s8037_s9 + $0x4] ss:$16 sps:$4 sm:$0xff]  }
 0x3b0   : > { %v6934_v31 = vpop.eup %6933  ;;  %v2659_v47 = vpop.f32.mrf.mxu1 }
 0x3b1   : > { %v8743_v14 = vpop.f32.mrf.mxu0  ;;  %v2660_v60 = vadd.f32 %v2659_v47, %v2371_v39  ;;  %v8749_v6 = vadd.f32 %v6934_v31, %v8170_v62  ;;  %v2379_v62 = vadd.f32 %v8632_v22, %v8635_v0  ;;  %v2384_v31 = vadd.f32 %v8632_v22, %v8640_v20 }
 0x3b2   : > { %v2661_v23 = vpop.f32.mrf.mxu1 }
 0x3b3   : > { %v2436_v1 = vpop.f32.mrf.mxu0  ;;  %6941 = vtanh.f32 %v2660_v60  ;;  %v2995_v48 = vpack.c.bf16 %v8749_v6, %v8746_v26 }
 0x3b4   : > { %v2664_v34 = vpop.f32.mrf.mxu1  ;;  %2855 = vmatmul.mubr.bf16.gmra.mxu1 %v6910_v32  ;;  %v6936_v61 = vpop.eup %6935 }
 0x3b5   : > { %v8753_v33 = vpop.f32.mrf.mxu0  ;;  %v2665_v51 = vadd.f32 %v2664_v34, %v2376_v41  ;;  %6440 = vmatprep.mubr.msk.bf16.mxu0 %vm1220_vm1, %v2995_v48  ;;  %3497 = vmatprep.mubr.bf16.mxu1 %v7315_v50  ;;  %v8764_v41 = vadd.f32 %v6936_v61, %v8173_v63  ;;  %v2387_v63 = vadd.f32 %v8632_v22, %v8645_v12 }
 0x3b6   : > { %v2666_v53 = vpop.f32.mrf.mxu1  ;;  %v2392_v61 = vadd.f32 %v8632_v22, %v8650_v30 }
 0x3b7   : > { %v2441_v49 = vpop.f32.mrf.mxu0  ;;  %6943 = vtanh.f32 %v2665_v51 }
 0x3b8   : > { %v6938_v39 = vpop.eup %6937  ;;  %v2667_v47 = vpop.f32.mrf.mxu1 }
 0x3b9   : > { %v8761_v60 = vpop.f32.mrf.mxu0  ;;  %v2668_v32 = vadd.f32 %v2667_v47, %v2379_v62  ;;  %v8767_v23 = vadd.f32 %v6938_v39, %v8164_v59 }
 0x3ba   : > { %v2669_v1 = vpop.f32.mrf.mxu1 }
 0x3bb   : > { %v2444_v48 = vpop.f32.mrf.mxu0  ;;  %6945 = vtanh.f32 %v2668_v32  ;;  %v2996_v0 = vpack.c.bf16 %v8767_v23, %v8764_v41 }
 0x3bc   : > { %v2672_v34 = vpop.f32.mrf.mxu1  ;;  %v6940_v51 = vpop.eup %6939 }
 0x3bd   : > { %v8771_v50 = vpop.f32.mrf.mxu0  ;;  %v2673_v20 = vadd.f32 %v2672_v34, %v2384_v31  ;;  %6441 = vmatmul.mubr.msk.bf16.gmra.mxu0 %vm1220_vm1, %v2996_v0  ;;  %v8781_v32 = vadd.f32 %v6940_v51, %v8185_v7  ;;  %v2395_v7 = vadd.f32 %v8632_v22, %v8655_v45  ;;  %v2400_v51 = vadd.f32 %v8632_v22, %v8660_v2 }
 0x3be   : > { %v2674_v53 = vpop.f32.mrf.mxu1 }
 0x3bf   : > { %v2449_v49 = vpop.f32.mrf.mxu0  ;;  %6947 = vtanh.f32 %v2673_v20 }
 0x3c0   : > { %v6942_v59 = vpop.eup %6941  ;;  %v2675_v62 = vpop.f32.mrf.mxu1 }
 0x3c1   : > { %v8778_v39 = vpop.f32.mrf.mxu0  ;;  %v2676_v47 = vadd.f32 %v2675_v62, %v2387_v63  ;;  %v8784_v31 = vadd.f32 %v6942_v59, %v8188_v8 }
 0x3c2   : > { %v2677_v1 = vpop.f32.mrf.mxu1 }
 0x3c3   : > { %v2452_v48 = vpop.f32.mrf.mxu0  ;;  %6949 = vtanh.f32 %v2676_v47  ;;  %v2997_v12 = vpack.c.bf16 %v8784_v31, %v8781_v32 }
 0x3c4   : > { %v2680_v0 = vpop.f32.mrf.mxu1  ;;  %v6944_v20 = vpop.eup %6943 }
 0x3c5   : > { %v8788_v34 = vpop.f32.mrf.mxu0  ;;  %v2681_v30 = vadd.f32 %v2680_v0, %v2392_v61  ;;  %6444 = vmatprep.mubr.msk.bf16.mxu0 %vm1220_vm1, %v2997_v12  ;;  %v8798_v47 = vadd.f32 %v6944_v20, %v8191_v9  ;;  %v2403_v9 = vadd.f32 %v8632_v22, %v8667_v11  ;;  %v2408_v20 = vadd.f32 %v8632_v22, %v8678_v13 }
 0x3c6   : > { %v2682_v53 = vpop.f32.mrf.mxu1 }
 0x3c7   : > { %v2457_v49 = vpop.f32.mrf.mxu0  ;;  %6951 = vtanh.f32 %v2681_v30 }
 0x3c8   : > { %v6946_v8 = vpop.eup %6945  ;;  %v2683_v63 = vpop.f32.mrf.mxu1 }
 0x3c9   : > { %v8795_v59 = vpop.f32.mrf.mxu0  ;;  %v2684_v62 = vadd.f32 %v2683_v63, %v2395_v7  ;;  %v8801_v61 = vadd.f32 %v6946_v8, %v8182_v5 }
 0x3ca   : > { %v2685_v1 = vpop.f32.mrf.mxu1 }
 0x3cb   : > { %v2460_v48 = vpop.f32.mrf.mxu0  ;;  %6953 = vtanh.f32 %v2684_v62  ;;  %v2998_v45 = vpack.c.bf16 %v8801_v61, %v8798_v47 }
 0x3cc   : > { %v2688_v12 = vpop.f32.mrf.mxu1  ;;  %v6948_v30 = vpop.eup %6947 }
 0x3cd   : > { %v8805_v0 = vpop.f32.mrf.mxu0  ;;  %v2689_v2 = vadd.f32 %v2688_v12, %v2400_v51  ;;  %6445 = vmatmul.mubr.msk.bf16.gmra.mxu0 %vm1220_vm1, %v2998_v45  ;;  %v8815_v62 = vadd.f32 %v6948_v30, %v8203_v17  ;;  %v2411_v17 = vadd.f32 %v8632_v22, %v8686_v55  ;;  %v2416_v30 = vadd.f32 %v8632_v22, %v8697_v42 }
 0x3ce   : > { %v2690_v53 = vpop.f32.mrf.mxu1 }
 0x3cf   : > { %v2465_v49 = vpop.f32.mrf.mxu0  ;;  %6955 = vtanh.f32 %v2689_v2 }
 0x3d0   : > { %v6950_v5 = vpop.eup %6949  ;;  %v2691_v7 = vpop.f32.mrf.mxu1 }
 0x3d1   : > { %v8812_v8 = vpop.f32.mrf.mxu0  ;;  %v2692_v63 = vadd.f32 %v2691_v7, %v2403_v9  ;;  %v8818_v51 = vadd.f32 %v6950_v5, %v8206_v18 }
 0x3d2   : > { %v2693_v1 = vpop.f32.mrf.mxu1 }
 0x3d3   : > { %v2468_v48 = vpop.f32.mrf.mxu0  ;;  %6957 = vtanh.f32 %v2692_v63  ;;  %v2999_v11 = vpack.c.bf16 %v8818_v51, %v8815_v62 }
 0x3d4   : > { %v2696_v45 = vpop.f32.mrf.mxu1  ;;  %v6952_v2 = vpop.eup %6951 }
 0x3d5   : > { %v8822_v12 = vpop.f32.mrf.mxu0  ;;  %v2697_v13 = vadd.f32 %v2696_v45, %v2408_v20  ;;  %6448 = vmatprep.mubr.msk.bf16.mxu0 %vm1220_vm1, %v2999_v11  ;;  %v8832_v63 = vadd.f32 %v6952_v2, %v8209_v19  ;;  %v2419_v19 = vadd.f32 %v8632_v22, %v8705_v54  ;;  %v2424_v2 = vadd.f32 %v8632_v22, %v8716_v43 }
 0x3d6   : > { %v2698_v53 = vpop.f32.mrf.mxu1 }
 0x3d7   : > { %v2473_v49 = vpop.f32.mrf.mxu0  ;;  %6959 = vtanh.f32 %v2697_v13 }
 0x3d8   : > { %v6954_v18 = vpop.eup %6953  ;;  %v2699_v9 = vpop.f32.mrf.mxu1 }
 0x3d9   : > { %v8829_v5 = vpop.f32.mrf.mxu0  ;;  %v2700_v7 = vadd.f32 %v2699_v9, %v2411_v17  ;;  %v8835_v20 = vadd.f32 %v6954_v18, %v8200_v15 }
 0x3da   : > { %v2701_v1 = vpop.f32.mrf.mxu1 }
 0x3db   : > { %v2476_v48 = vpop.f32.mrf.mxu0  ;;  %6961 = vtanh.f32 %v2700_v7  ;;  %v3000_v55 = vpack.c.bf16 %v8835_v20, %v8832_v63 }
 0x3dc   : > { %v2704_v11 = vpop.f32.mrf.mxu1  ;;  %v6956_v13 = vpop.eup %6955 }
 0x3dd   : > { %v8839_v45 = vpop.f32.mrf.mxu0  ;;  %v2705_v42 = vadd.f32 %v2704_v11, %v2416_v30  ;;  %6449 = vmatmul.mubr.msk.bf16.gmra.mxu0 %vm1220_vm1, %v3000_v55  ;;  %v8849_v7 = vadd.f32 %v6956_v13, %v8221_v27  ;;  %v2427_v27 = vadd.f32 %v8632_v22, %v8724_v24  ;;  %v2432_v13 = vadd.f32 %v8632_v22, %v8735_v52 }
 0x3de   : > { %v2706_v53 = vpop.f32.mrf.mxu1 }
 0x3df   : > { %v2481_v49 = vpop.f32.mrf.mxu0  ;;  %6963 = vtanh.f32 %v2705_v42 }
 0x3e0   : > { %v6958_v15 = vpop.eup %6957  ;;  %v2707_v17 = vpop.f32.mrf.mxu1 }
 0x3e1   : > { %v8846_v18 = vpop.f32.mrf.mxu0  ;;  %v2708_v9 = vadd.f32 %v2707_v17, %v2419_v19  ;;  %v8852_v30 = vadd.f32 %v6958_v15, %v8224_v28 }
 0x3e2   : > { %v2709_v1 = vpop.f32.mrf.mxu1 }
 0x3e3   : > { %v2484_v48 = vpop.f32.mrf.mxu0  ;;  %6965 = vtanh.f32 %v2708_v9  ;;  %v3001_v54 = vpack.c.bf16 %v8852_v30, %v8849_v7 }
 0x3e4   : > { %v2712_v55 = vpop.f32.mrf.mxu1  ;;  %v6960_v42 = vpop.eup %6959 }
 0x3e5   : > { %v8856_v11 = vpop.f32.mrf.mxu0  ;;  %v2713_v43 = vadd.f32 %v2712_v55, %v2424_v2  ;;  %6452 = vmatprep.mubr.msk.bf16.mxu0 %vm1220_vm1, %v3001_v54  ;;  %v8866_v9 = vadd.f32 %v6960_v42, %v8227_v29  ;;  %v2435_v29 = vadd.f32 %v8632_v22, %v8743_v14  ;;  %v2440_v42 = vadd.f32 %v8632_v22, %v8753_v33 }
 0x3e6   : > { %v2714_v53 = vpop.f32.mrf.mxu1 }
 0x3e7   : > { %v2489_v49 = vpop.f32.mrf.mxu0  ;;  %6967 = vtanh.f32 %v2713_v43  ;;  %10911 = vst [vmem:[#allocation52_spill] sm:$0xff] %v8866_v9 }
 0x3e8   : > { %v6962_v28 = vpop.eup %6961  ;;  %v2715_v19 = vpop.f32.mrf.mxu1 }
 0x3e9   : > { %v8863_v15 = vpop.f32.mrf.mxu0  ;;  %v2716_v17 = vadd.f32 %v2715_v19, %v2427_v27  ;;  %v8869_v2 = vadd.f32 %v6962_v28, %v8218_v25 }
 0x3ea   : > { %v2717_v1 = vpop.f32.mrf.mxu1 }
 0x3eb   : > { %10912 = vst [vmem:[#allocation53_spill] sm:$0xff] %v8869_v2  ;;  %v2492_v48 = vpop.f32.mrf.mxu0  ;;  %6969 = vtanh.f32 %v2716_v17  ;;  %v3002_v24 = vpack.c.bf16 %v8869_v2, %v8866_v9  ;;  %v7429_v2 = vld [vmem:[%s8037_s9 + $0x308] ss:$16 sps:$4 sm:$0xff]  }
 0x3ec   : > { %v2720_v54 = vpop.f32.mrf.mxu1  ;;  %v6964_v43 = vpop.eup %6963 }
 0x3ed   : > { %v8873_v55 = vpop.f32.mrf.mxu0  ;;  %v2721_v52 = vadd.f32 %v2720_v54, %v2432_v13  ;;  %6453 = vmatmul.mubr.msk.bf16.gmra.mxu0 %vm1220_vm1, %v3002_v24  ;;  %v8883_v17 = vadd.f32 %v6964_v43, %v8239_v37  ;;  %v2443_v37 = vadd.f32 %v8632_v22, %v8761_v60  ;;  %v2448_v43 = vadd.f32 %v8632_v22, %v8771_v50 }
 0x3ee   : > { %v2722_v53 = vpop.f32.mrf.mxu1 }
 0x3ef   : > { %v2497_v49 = vpop.f32.mrf.mxu0  ;;  %6971 = vtanh.f32 %v2721_v52  ;;  %10913 = vst [vmem:[#allocation54_spill] sm:$0xff] %v8883_v17 }
 0x3f0   : > { %v6966_v25 = vpop.eup %6965  ;;  %v2723_v27 = vpop.f32.mrf.mxu1 }
 0x3f1   : > { %v8880_v28 = vpop.f32.mrf.mxu0  ;;  %v2724_v19 = vadd.f32 %v2723_v27, %v2435_v29  ;;  %v8886_v13 = vadd.f32 %v6966_v25, %v8242_v40 }
 0x3f2   : > { %v2725_v1 = vpop.f32.mrf.mxu1 }
 0x3f3   : > { %10914 = vst [vmem:[#allocation55_spill] sm:$0xff] %v8886_v13  ;;  %v2500_v48 = vpop.f32.mrf.mxu0  ;;  %6973 = vtanh.f32 %v2724_v19  ;;  %v3003_v14 = vpack.c.bf16 %v8886_v13, %v8883_v17 }
 0x3f4   : > { %v2728_v24 = vpop.f32.mrf.mxu1  ;;  %v6968_v52 = vpop.eup %6967 }
 0x3f5   : > { %v8890_v54 = vpop.f32.mrf.mxu0  ;;  %v2729_v33 = vadd.f32 %v2728_v24, %v2440_v42  ;;  %6456 = vmatprep.mubr.msk.bf16.mxu0 %vm1220_vm1, %v3003_v14  ;;  %v8900_v19 = vadd.f32 %v6968_v52, %v8245_v44  ;;  %v2451_v44 = vadd.f32 %v8632_v22, %v8778_v39  ;;  %v2456_v52 = vadd.f32 %v8632_v22, %v8788_v34 }
 0x3f6   : > { %v2730_v53 = vpop.f32.mrf.mxu1 }
 0x3f7   : > { %v2505_v49 = vpop.f32.mrf.mxu0  ;;  %6975 = vtanh.f32 %v2729_v33  ;;  %10915 = vst [vmem:[#allocation56_spill] sm:$0xff] %v8900_v19 }
 0x3f8   : > { %v6970_v40 = vpop.eup %6969  ;;  %v2731_v29 = vpop.f32.mrf.mxu1 }
 0x3f9   : > { %v8897_v25 = vpop.f32.mrf.mxu0  ;;  %v2732_v27 = vadd.f32 %v2731_v29, %v2443_v37  ;;  %v8903_v42 = vadd.f32 %v6970_v40, %v8236_v35 }
 0x3fa   : > { %v2733_v1 = vpop.f32.mrf.mxu1 }
 0x3fb   : > { %10916 = vst [vmem:[#allocation57_spill] sm:$0xff] %v8903_v42  ;;  %v2508_v48 = vpop.f32.mrf.mxu0  ;;  %6977 = vtanh.f32 %v2732_v27  ;;  %v3004_v60 = vpack.c.bf16 %v8903_v42, %v8900_v19  ;;  %v7427_v19 = vld [vmem:[%s8037_s9 + $0x2e8] ss:$16 sps:$4 sm:$0xff]  }
 0x3fc   : > { %v2736_v14 = vpop.f32.mrf.mxu1  ;;  %v6972_v33 = vpop.eup %6971 }
 0x3fd   : > { %v8907_v24 = vpop.f32.mrf.mxu0  ;;  %v2737_v50 = vadd.f32 %v2736_v14, %v2448_v43  ;;  %6457 = vmatmul.mubr.msk.bf16.gmra.mxu0 %vm1220_vm1, %v3004_v60  ;;  %v8917_v27 = vadd.f32 %v6972_v33, %v8257_v56  ;;  %v2459_v56 = vadd.f32 %v8632_v22, %v8795_v59  ;;  %v2464_v33 = vadd.f32 %v8632_v22, %v8805_v0 }
 0x3fe   : > { %v2738_v53 = vpop.f32.mrf.mxu1 }
 0x3ff   : > { %v2513_v49 = vpop.f32.mrf.mxu0  ;;  %6979 = vtanh.f32 %v2737_v50  ;;  %10917 = vst [vmem:[#allocation58_spill] sm:$0xff] %v8917_v27 }
 0x400   : > { %v6974_v35 = vpop.eup %6973  ;;  %v2739_v37 = vpop.f32.mrf.mxu1 }
 0x401   : > { %v8914_v40 = vpop.f32.mrf.mxu0  ;;  %v2740_v29 = vadd.f32 %v2739_v37, %v2451_v44  ;;  %v8920_v43 = vadd.f32 %v6974_v35, %v8260_v57 }
 0x402   : > { %v2741_v1 = vpop.f32.mrf.mxu1 }
 0x403   : > { %10918 = vst [vmem:[#allocation59_spill] sm:$0xff] %v8920_v43  ;;  %v2516_v48 = vpop.f32.mrf.mxu0  ;;  %6981 = vtanh.f32 %v2740_v29  ;;  %v3005_v39 = vpack.c.bf16 %v8920_v43, %v8917_v27  ;;  %v7425_v27 = vld [vmem:[%s8037_s9 + $0x2c8] ss:$16 sps:$4 sm:$0xff]  }
 0x404   : > { %v2744_v60 = vpop.f32.mrf.mxu1  ;;  %v6976_v50 = vpop.eup %6975 }
 0x405   : > { %v8924_v14 = vpop.f32.mrf.mxu0  ;;  %v2745_v34 = vadd.f32 %v2744_v60, %v2456_v52  ;;  %6460 = vmatprep.mubr.msk.bf16.mxu0 %vm1220_vm1, %v3005_v39  ;;  %v8934_v29 = vadd.f32 %v6976_v50, %v8263_v58  ;;  %v10920_v52 = vld [vmem:[#allocation19_spill] sm:$0xff]  ;;  %v2467_v58 = vadd.f32 %v8632_v22, %v8812_v8 }
 0x406   : > { %v2746_v53 = vpop.f32.mrf.mxu1 }
 0x407   : > { %v2521_v49 = vpop.f32.mrf.mxu0  ;;  %6983 = vtanh.f32 %v2745_v34  ;;  %10919 = vst [vmem:[#allocation60_spill] sm:$0xff] %v8934_v29 }
 0x408   : > { %v6978_v57 = vpop.eup %6977  ;;  %v2747_v44 = vpop.f32.mrf.mxu1 }
 0x409   : > { %v8931_v35 = vpop.f32.mrf.mxu0  ;;  %v2748_v37 = vadd.f32 %v2747_v44, %v2459_v56  ;;  %v8937_v1 = vadd.f32 %v6978_v57, %v10920_v52  ;;  %v2472_v57 = vadd.f32 %v8632_v22, %v8822_v12 }
 0x40a   : > { %v2749_v48 = vpop.f32.mrf.mxu1 }
 0x40b   : > { %10921 = vst [vmem:[#allocation19_spill] sm:$0xff] %v8937_v1  ;;  %v2524_v39 = vpop.f32.mrf.mxu0  ;;  %6985 = vtanh.f32 %v2748_v37  ;;  %v3006_v59 = vpack.c.bf16 %v8937_v1, %v8934_v29  ;;  %v10922_v48 = vld [vmem:[#allocation21_spill] sm:$0xff] }
 0x40c   : > { %v2752_v60 = vpop.f32.mrf.mxu1  ;;  %v6980_v34 = vpop.eup %6979 }
 0x40d   : > { %v8941_v53 = vpop.f32.mrf.mxu0  ;;  %v2753_v0 = vadd.f32 %v2752_v60, %v2464_v33  ;;  %6461 = vmatmul.mubr.msk.bf16.gmra.mxu0 %vm1220_vm1, %v3006_v59  ;;  %v8951_v39 = vadd.f32 %v6980_v34, %v10922_v48  ;;  %v10924_v33 = vld [vmem:[#allocation22_spill] sm:$0xff]  ;;  %v2475_v34 = vadd.f32 %v8632_v22, %v8829_v5  ;;  %v2480_v48 = vadd.f32 %v8632_v22, %v8839_v45 }
 0x40e   : > { %v2754_v49 = vpop.f32.mrf.mxu1 }
 0x40f   : > { %v2529_v56 = vpop.f32.mrf.mxu0  ;;  %6987 = vtanh.f32 %v2753_v0  ;;  %10923 = vst [vmem:[#allocation21_spill] sm:$0xff] %v8951_v39 }
 0x410   : > { %v6982_v50 = vpop.eup %6981  ;;  %v2755_v44 = vpop.f32.mrf.mxu1 }
 0x411   : > { %v8948_v37 = vpop.f32.mrf.mxu0  ;;  %v2756_v52 = vadd.f32 %v2755_v44, %v2467_v58  ;;  %v8954_v59 = vadd.f32 %v6982_v50, %v10924_v33 }
 0x412   : > { %v2757_v60 = vpop.f32.mrf.mxu1 }
 0x413   : > { %10925 = vst [vmem:[#allocation22_spill] sm:$0xff] %v8954_v59  ;;  %v2532_v49 = vpop.f32.mrf.mxu0  ;;  %6989 = vtanh.f32 %v2756_v52  ;;  %v3007_v8 = vpack.c.bf16 %v8954_v59, %v8951_v39 }
 0x414   : > { %v2760_v56 = vpop.f32.mrf.mxu1  ;;  %v6984_v0 = vpop.eup %6983  ;;  %v10926_v49 = vld [vmem:[#allocation23_spill] sm:$0xff] }
 0x415   : > { %v8958_v1 = vpop.f32.mrf.mxu0  ;;  %v2761_v12 = vadd.f32 %v2760_v56, %v2472_v57  ;;  %6464 = vmatprep.mubr.msk.bf16.mxu0 %vm1220_vm1, %v3007_v8  ;;  %v8968_v59 = vadd.f32 %v6984_v0, %v10926_v49  ;;  %v10928_v57 = vld [vmem:[#allocation20_spill] sm:$0xff]  ;;  %v2483_v0 = vadd.f32 %v8632_v22, %v8846_v18  ;;  %v2488_v49 = vadd.f32 %v8632_v22, %v8856_v11 }
 0x416   : > { %v2762_v58 = vpop.f32.mrf.mxu1 }
 0x417   : > { %v2537_v44 = vpop.f32.mrf.mxu0  ;;  %6991 = vtanh.f32 %v2761_v12  ;;  %10927 = vst [vmem:[#allocation23_spill] sm:$0xff] %v8968_v59 }
 0x418   : > { %v6986_v50 = vpop.eup %6985  ;;  %v2763_v52 = vpop.f32.mrf.mxu1 }
 0x419   : > { %v8965_v33 = vpop.f32.mrf.mxu0  ;;  %v2764_v60 = vadd.f32 %v2763_v52, %v2475_v34  ;;  %v8971_v8 = vadd.f32 %v6986_v50, %v10928_v57 }
 0x41a   : > { %v2765_v56 = vpop.f32.mrf.mxu1 }
 0x41b   : > { %10929 = vst [vmem:[#allocation20_spill] sm:$0xff] %v8971_v8  ;;  %v2540_v58 = vpop.f32.mrf.mxu0  ;;  %6993 = vtanh.f32 %v2764_v60  ;;  %v3008_v5 = vpack.c.bf16 %v8971_v8, %v8968_v59 }
 0x41c   : > { %v2768_v44 = vpop.f32.mrf.mxu1  ;;  %v6988_v12 = vpop.eup %6987  ;;  %v10930_v58 = vld [vmem:[#allocation25_spill] sm:$0xff] }
 0x41d   : > { %v8975_v39 = vpop.f32.mrf.mxu0  ;;  %v2769_v45 = vadd.f32 %v2768_v44, %v2480_v48  ;;  %6465 = vmatmul.mubr.msk.bf16.gmra.mxu0 %vm1220_vm1, %v3008_v5  ;;  %v8985_v8 = vadd.f32 %v6988_v12, %v10930_v58  ;;  %v10932_v48 = vld [vmem:[#allocation26_spill] sm:$0xff]  ;;  %v2491_v12 = vadd.f32 %v8632_v22, %v8863_v15  ;;  %v2496_v58 = vadd.f32 %v8632_v22, %v8873_v55 }
 0x41e   : > { %v2770_v34 = vpop.f32.mrf.mxu1 }
 0x41f   : > { %v2545_v52 = vpop.f32.mrf.mxu0  ;;  %6995 = vtanh.f32 %v2769_v45  ;;  %10931 = vst [vmem:[#allocation25_spill] sm:$0xff] %v8985_v8 }
 0x420   : > { %v6990_v50 = vpop.eup %6989  ;;  %v2771_v60 = vpop.f32.mrf.mxu1 }
 0x421   : > { %v8982_v57 = vpop.f32.mrf.mxu0  ;;  %v2772_v56 = vadd.f32 %v2771_v60, %v2483_v0  ;;  %v8988_v5 = vadd.f32 %v6990_v50, %v10932_v48 }
 0x422   : > { %v2773_v44 = vpop.f32.mrf.mxu1 }
 0x423   : > { %10933 = vst [vmem:[#allocation26_spill] sm:$0xff] %v8988_v5  ;;  %v2548_v34 = vpop.f32.mrf.mxu0  ;;  %6997 = vtanh.f32 %v2772_v56  ;;  %v3009_v18 = vpack.c.bf16 %v8988_v5, %v8985_v8 }
 0x424   : > { %v2776_v52 = vpop.f32.mrf.mxu1  ;;  %v6992_v45 = vpop.eup %6991  ;;  %v10934_v34 = vld [vmem:[#allocation27_spill] sm:$0xff] }
 0x425   : > { %v8992_v59 = vpop.f32.mrf.mxu0  ;;  %v2777_v11 = vadd.f32 %v2776_v52, %v2488_v49  ;;  %6468 = vmatprep.mubr.msk.bf16.mxu0 %vm1220_vm1, %v3009_v18  ;;  %v9002_v5 = vadd.f32 %v6992_v45, %v10934_v34  ;;  %v10936_v49 = vld [vmem:[#allocation24_spill] sm:$0xff]  ;;  %v2499_v45 = vadd.f32 %v8632_v22, %v8880_v28  ;;  %v2504_v34 = vadd.f32 %v8632_v22, %v8890_v54 }
 0x426   : > { %v2778_v0 = vpop.f32.mrf.mxu1 }
 0x427   : > { %v2553_v60 = vpop.f32.mrf.mxu0  ;;  %6999 = vtanh.f32 %v2777_v11  ;;  %10935 = vst [vmem:[#allocation27_spill] sm:$0xff] %v9002_v5 }
 0x428   : > { %v6994_v50 = vpop.eup %6993  ;;  %v2779_v56 = vpop.f32.mrf.mxu1 }
 0x429   : > { %v8999_v48 = vpop.f32.mrf.mxu0  ;;  %v2780_v44 = vadd.f32 %v2779_v56, %v2491_v12  ;;  %v9005_v18 = vadd.f32 %v6994_v50, %v10936_v49 }
 0x42a   : > { %v2781_v52 = vpop.f32.mrf.mxu1 }
 0x42b   : > { %10937 = vst [vmem:[#allocation24_spill] sm:$0xff] %v9005_v18  ;;  %v2556_v0 = vpop.f32.mrf.mxu0  ;;  %7001 = vtanh.f32 %v2780_v44  ;;  %v3010_v15 = vpack.c.bf16 %v9005_v18, %v9002_v5 }
 0x42c   : > { %v2784_v60 = vpop.f32.mrf.mxu1  ;;  %v6996_v11 = vpop.eup %6995  ;;  %v10938_v0 = vld [vmem:[#allocation29_spill] sm:$0xff] }
 0x42d   : > { %v9009_v8 = vpop.f32.mrf.mxu0  ;;  %v2785_v55 = vadd.f32 %v2784_v60, %v2496_v58  ;;  %6469 = vmatmul.mubr.msk.bf16.gmra.mxu0 %vm1220_vm1, %v3010_v15  ;;  %v9019_v18 = vadd.f32 %v6996_v11, %v10938_v0  ;;  %v10940_v58 = vld [vmem:[#allocation30_spill] sm:$0xff]  ;;  %v2507_v11 = vadd.f32 %v8632_v22, %v8897_v25  ;;  %v2512_v0 = vadd.f32 %v8632_v22, %v8907_v24 }
 0x42e   : > { %v2786_v12 = vpop.f32.mrf.mxu1 }
 0x42f   : > { %v2561_v56 = vpop.f32.mrf.mxu0  ;;  %7003 = vtanh.f32 %v2785_v55  ;;  %10939 = vst [vmem:[#allocation29_spill] sm:$0xff] %v9019_v18 }
 0x430   : > { %v6998_v50 = vpop.eup %6997  ;;  %v2787_v44 = vpop.f32.mrf.mxu1 }
 0x431   : > { %v9016_v49 = vpop.f32.mrf.mxu0  ;;  %v2788_v52 = vadd.f32 %v2787_v44, %v2499_v45  ;;  %v9022_v15 = vadd.f32 %v6998_v50, %v10940_v58 }
 0x432   : > { %v2789_v60 = vpop.f32.mrf.mxu1 }
 0x433   : > { %10941 = vst [vmem:[#allocation30_spill] sm:$0xff] %v9022_v15  ;;  %v2564_v12 = vpop.f32.mrf.mxu0  ;;  %7005 = vtanh.f32 %v2788_v52  ;;  %v3011_v28 = vpack.c.bf16 %v9022_v15, %v9019_v18 }
 0x434   : > { %v2792_v56 = vpop.f32.mrf.mxu1  ;;  %v7000_v55 = vpop.eup %6999  ;;  %v10942_v12 = vld [vmem:[#allocation31_spill] sm:$0xff] }
 0x435   : > { %v9026_v5 = vpop.f32.mrf.mxu0  ;;  %v2793_v54 = vadd.f32 %v2792_v56, %v2504_v34  ;;  %6472 = vmatprep.mubr.msk.bf16.mxu0 %vm1220_vm1, %v3011_v28  ;;  %v9036_v15 = vadd.f32 %v7000_v55, %v10942_v12  ;;  %v10944_v34 = vld [vmem:[#allocation28_spill] sm:$0xff] }
 0x436   : > { %v2794_v45 = vpop.f32.mrf.mxu1 }
 0x437   : > { %v2569_v44 = vpop.f32.mrf.mxu0  ;;  %7007 = vtanh.f32 %v2793_v54  ;;  %10943 = vst [vmem:[#allocation31_spill] sm:$0xff] %v9036_v15  ;;  %v2515_v54 = vadd.f32 %v8632_v22, %v8914_v40 }
 0x438   : > { %v7002_v50 = vpop.eup %7001  ;;  %v2795_v52 = vpop.f32.mrf.mxu1 }
 0x439   : > { %v9033_v58 = vpop.f32.mrf.mxu0  ;;  %v2796_v60 = vadd.f32 %v2795_v52, %v2507_v11  ;;  %v9039_v28 = vadd.f32 %v7002_v50, %v10944_v34  ;;  %v2520_v11 = vadd.f32 %v8632_v22, %v8924_v14  ;;  %v10948_v34 = vld [vmem:[#allocation34_spill] sm:$0xff] }
 0x43a   : > { %v2797_v56 = vpop.f32.mrf.mxu1  ;;  %v9057_v14 = vld [vmem:[#allocation10] ss:$0 sm:$0xff] }
 0x43b   : > { %10945 = vst [vmem:[#allocation28_spill] sm:$0xff] %v9039_v28  ;;  %v2572_v45 = vpop.f32.mrf.mxu0  ;;  %7009 = vtanh.f32 %v2796_v60  ;;  %v3012_v25 = vpack.c.bf16 %v9039_v28, %v9036_v15  ;;  %v10946_v60 = vld [vmem:[#allocation33_spill] sm:$0xff] }
 0x43c   : > { %v2800_v44 = vpop.f32.mrf.mxu1  ;;  %v7004_v24 = vpop.eup %7003  ;;  %v7423_v15 = vld [vmem:[%s8037_s9 + $0x2a8] ss:$16 sps:$4 sm:$0xff]  }
 0x43d   : > { %v2801_v18 = vadd.f32 %v2800_v44, %v2512_v0  ;;  %6473 = vmatmul.mubr.msk.bf16.gmra.mxu0 %vm1220_vm1, %v3012_v25  ;;  %v9049_v12 = vadd.f32 %v7004_v24, %v10946_v60  ;;  %v2528_v24 = vadd.f32 %v9057_v14, %v8941_v53 }
 0x43e   : > { %v2802_v29 = vpop.f32.mrf.mxu1 }
 0x43f   : > { %7011 = vtanh.f32 %v2801_v18  ;;  %10947 = vst [vmem:[#allocation33_spill] sm:$0xff] %v9049_v12  ;;  %v2523_v18 = vadd.f32 %v9057_v14, %v8931_v35 }
 0x440   : > { %v7006_v55 = vpop.eup %7005  ;;  %v2803_v50 = vpop.f32.mrf.mxu1 }
 0x441   : > { %v2804_v52 = vadd.f32 %v2803_v50, %v2515_v54  ;;  %v9052_v56 = vadd.f32 %v7006_v55, %v10948_v34  ;;  %v10950_v50 = vld [vmem:[#allocation35_spill] sm:$0xff] }
 0x442   : > { %v2805_v0 = vpop.f32.mrf.mxu1 }
 0x443   : > { %10949 = vst [vmem:[#allocation34_spill] sm:$0xff] %v9052_v56  ;;  %7013 = vtanh.f32 %v2804_v52  ;;  %v3013_v29 = vpack.c.bf16 %v9052_v56, %v9049_v12  ;;  %v7421_v12 = vld [vmem:[%s8037_s9 + $0x288] ss:$16 sps:$4 sm:$0xff]  }
 0x444   : > { %v2808_v45 = vpop.f32.mrf.mxu1  ;;  %v7008_v25 = vpop.eup %7007 }
 0x445   : > { %v2809_v40 = vadd.f32 %v2808_v45, %v2520_v11  ;;  %6476 = vmatprep.mubr.msk.bf16.mxu0 %vm1220_vm1, %v3013_v29  ;;  %v9064_v52 = vadd.f32 %v7008_v25, %v10950_v50  ;;  %v10952_v11 = vld [vmem:[#allocation32_spill] sm:$0xff]  ;;  %v2536_v25 = vadd.f32 %v9057_v14, %v8958_v1  ;;  %v10956_v50 = vld [vmem:[#allocation38_spill] sm:$0xff] }
 0x446   : > { %v2810_v22 = vpop.f32.mrf.mxu1 }
 0x447   : > { %7015 = vtanh.f32 %v2809_v40  ;;  %10951 = vst [vmem:[#allocation35_spill] sm:$0xff] %v9064_v52  ;;  %v2531_v40 = vadd.f32 %v9057_v14, %v8948_v37 }
 0x448   : > { %v7010_v44 = vpop.eup %7009  ;;  %v2811_v54 = vpop.f32.mrf.mxu1 }
 0x449   : > { %v2812_v55 = vadd.f32 %v2811_v54, %v2523_v18  ;;  %v9067_v60 = vadd.f32 %v7010_v44, %v10952_v11  ;;  %v10954_v54 = vld [vmem:[#allocation37_spill] sm:$0xff] }
 0x44a   : > { %v2813_v34 = vpop.f32.mrf.mxu1 }
 0x44b   : > { %10953 = vst [vmem:[#allocation32_spill] sm:$0xff] %v9067_v60  ;;  %7017 = vtanh.f32 %v2812_v55  ;;  %v3014_v0 = vpack.c.bf16 %v9067_v60, %v9064_v52  ;;  %v7419_v52 = vld [vmem:[%s8037_s9 + $0x268] ss:$16 sps:$4 sm:$0xff]  }
 0x44c   : > { %v2816_v29 = vpop.f32.mrf.mxu1  ;;  %v7012_v45 = vpop.eup %7011 }
 0x44d   : > { %v2817_v35 = vadd.f32 %v2816_v29, %v2528_v24  ;;  %6477 = vmatmul.mubr.msk.bf16.gmra.mxu0 %vm1220_vm1, %v3014_v0  ;;  %v9077_v55 = vadd.f32 %v7012_v45, %v10954_v54  ;;  %v2544_v45 = vadd.f32 %v9057_v14, %v8975_v39  ;;  %v10960_v54 = vld [vmem:[#allocation36_spill] sm:$0xff] }
 0x44e   : > { %v2818_v53 = vpop.f32.mrf.mxu1 }
 0x44f   : > { %7019 = vtanh.f32 %v2817_v35  ;;  %10955 = vst [vmem:[#allocation37_spill] sm:$0xff] %v9077_v55  ;;  %v2539_v35 = vadd.f32 %v9057_v14, %v8965_v33 }
 0x450   : > { %v7014_v22 = vpop.eup %7013  ;;  %v2819_v18 = vpop.f32.mrf.mxu1 }
 0x451   : > { %v2820_v44 = vadd.f32 %v2819_v18, %v2531_v40  ;;  %v9080_v11 = vadd.f32 %v7014_v22, %v10956_v50  ;;  %v10958_v18 = vld [vmem:[#allocation39_spill] sm:$0xff] }
 0x452   : > { %v2821_v24 = vpop.f32.mrf.mxu1 }
 0x453   : > { %10957 = vst [vmem:[#allocation38_spill] sm:$0xff] %v9080_v11  ;;  %7021 = vtanh.f32 %v2820_v44  ;;  %v3015_v34 = vpack.c.bf16 %v9080_v11, %v9077_v55  ;;  %v7417_v55 = vld [vmem:[%s8037_s9 + $0x248] ss:$16 sps:$4 sm:$0xff]  }
 0x454   : > { %v2824_v0 = vpop.f32.mrf.mxu1  ;;  %v7016_v29 = vpop.eup %7015 }
 0x455   : > { %v2825_v37 = vadd.f32 %v2824_v0, %v2536_v25  ;;  %6480 = vmatprep.mubr.msk.bf16.mxu0 %vm1220_vm1, %v3015_v34  ;;  %v9090_v44 = vadd.f32 %v7016_v29, %v10958_v18  ;;  %v2552_v29 = vadd.f32 %v9057_v14, %v8992_v59  ;;  %v10964_v18 = vld [vmem:[#allocation42_spill] sm:$0xff] }
 0x456   : > { %v2826_v1 = vpop.f32.mrf.mxu1 }
 0x457   : > { %7023 = vtanh.f32 %v2825_v37  ;;  %10959 = vst [vmem:[#allocation39_spill] sm:$0xff] %v9090_v44  ;;  %v2547_v37 = vadd.f32 %v9057_v14, %v8982_v57 }
 0x458   : > { %v7018_v53 = vpop.eup %7017  ;;  %v2827_v40 = vpop.f32.mrf.mxu1 }
 0x459   : > { %v2828_v22 = vadd.f32 %v2827_v40, %v2539_v35  ;;  %v9093_v50 = vadd.f32 %v7018_v53, %v10960_v54  ;;  %v10962_v40 = vld [vmem:[#allocation41_spill] sm:$0xff] }
 0x45a   : > { %v2829_v25 = vpop.f32.mrf.mxu1 }
 0x45b   : > { %10961 = vst [vmem:[#allocation36_spill] sm:$0xff] %v9093_v50  ;;  %7025 = vtanh.f32 %v2828_v22  ;;  %v3016_v24 = vpack.c.bf16 %v9093_v50, %v9090_v44  ;;  %v10986_v44 = vmov 0  }
 0x45c   : > { %v2832_v34 = vpop.f32.mrf.mxu1  ;;  %v7020_v0 = vpop.eup %7019 }
 0x45d   : > { %v2833_v33 = vadd.f32 %v2832_v34, %v2544_v45  ;;  %6481 = vmatmul.mubr.msk.bf16.gmra.mxu0 %vm1220_vm1, %v3016_v24  ;;  %v9103_v22 = vadd.f32 %v7020_v0, %v10962_v40  ;;  %v9108_v25 = vpop.f32.mrf.mxu0  ;;  %v2555_v0 = vadd.f32 %v9057_v14, %v8999_v48  ;;  %v10966_v40 = vld [vmem:[#allocation43_spill] sm:$0xff] }
 0x45e   : > { %v2834_v39 = vpop.f32.mrf.mxu1 }
 0x45f   : > { %7027 = vtanh.f32 %v2833_v33  ;;  %10963 = vst [vmem:[#allocation41_spill] sm:$0xff] %v9103_v22  ;;  %v9115_v39 = vpop.f32.mrf.mxu0 }
 0x460   : > { %v7022_v1 = vpop.eup %7021  ;;  %v2835_v35 = vpop.f32.mrf.mxu1 }
 0x461   : > { %v2836_v53 = vadd.f32 %v2835_v35, %v2547_v37  ;;  %v9106_v54 = vadd.f32 %v7022_v1, %v10964_v18  ;;  %v2560_v1 = vadd.f32 %v9057_v14, %v9009_v8 }
 0x462   : > { %v2837_v45 = vpop.f32.mrf.mxu1 }
 0x463   : > { %10965 = vst [vmem:[#allocation42_spill] sm:$0xff] %v9106_v54  ;;  %7029 = vtanh.f32 %v2836_v53  ;;  %v3017_v57 = vpack.c.bf16 %v9106_v54, %v9103_v22 }
 0x464   : > { %v2840_v24 = vpop.f32.mrf.mxu1  ;;  %v7024_v59 = vpop.eup %7023 }
 0x465   : > { %v2841_v34 = vadd.f32 %v2840_v24, %v2552_v29  ;;  %6484 = vmatprep.mubr.msk.bf16.mxu0 %vm1220_vm1, %v3017_v57  ;;  %v9120_v18 = vadd.f32 %v7024_v59, %v10966_v40  ;;  %v10968_v29 = vld [vmem:[#allocation40_spill] sm:$0xff]  ;;  %v9125_v24 = vpop.f32.mrf.mxu0  ;;  %v2563_v59 = vadd.f32 %v9057_v14, %v9016_v49 }
 0x466   : > { %v2842_v33 = vpop.f32.mrf.mxu1 }
 0x467   : > { %7031 = vtanh.f32 %v2841_v34  ;;  %10967 = vst [vmem:[#allocation43_spill] sm:$0xff] %v9120_v18 }
 0x468   : > { %v7026_v37 = vpop.eup %7025  ;;  %v2843_v35 = vpop.f32.mrf.mxu1 }
 0x469   : > { %v2844_v53 = vadd.f32 %v2843_v35, %v2555_v0  ;;  %v9123_v45 = vadd.f32 %v7026_v37, %v10968_v29  ;;  %v9132_v0 = vpop.f32.mrf.mxu0  ;;  %v2568_v35 = vadd.f32 %v9057_v14, %v9026_v5 }
 0x46a   : > { %v2845_v57 = vpop.f32.mrf.mxu1 }
 0x46b   : > { %10969 = vst [vmem:[#allocation40_spill] sm:$0xff] %v9123_v45  ;;  %7033 = vtanh.f32 %v2844_v53  ;;  %v3018_v48 = vpack.c.bf16 %v9123_v45, %v9120_v18  ;;  %v10970_v57 = vld [vmem:[#allocation45_spill] sm:$0xff] }
 0x46c   : > { %v2848_v33 = vpop.f32.mrf.mxu1  ;;  %v7028_v8 = vpop.eup %7027 }
 0x46d   : > { %v2849_v54 = vadd.f32 %v2848_v33, %v2560_v1  ;;  %6485 = vmatmul.mubr.msk.bf16.gmra.mxu0 %vm1220_vm1, %v3018_v48  ;;  %v6438_v53 = vpop.f32.mrf.mxu0  ;;  %v9137_v45 = vadd.f32 %v7028_v8, %v10970_v57  ;;  %v10972_v1 = vld [vmem:[#allocation46_spill] sm:$0xff] }
 0x46e   : > { %v2850_v34 = vpop.f32.mrf.mxu1 }
 0x46f   : > { %7035 = vtanh.f32 %v2849_v54  ;;  %10971 = vst [vmem:[#allocation45_spill] sm:$0xff] %v9137_v45  ;;  %v3186_v18 = vpop.f32.mrf.mxu0 }
 0x470   : > { %v7030_v37 = vpop.eup %7029  ;;  %v2851_v40 = vpop.f32.mrf.mxu1 }
 0x471   : > { %v2852_v29 = vadd.f32 %v2851_v40, %v2563_v59  ;;  %v9140_v48 = vadd.f32 %v7030_v37, %v10972_v1  ;;  %v2571_v59 = vadd.f32 %v9057_v14, %v9033_v58  ;;  %v6439_v57 = vpop.f32.mrf.mxu0  ;;  %v10974_v1 = vld [vmem:[#allocation47_spill] sm:$0xff] }
 0x472   : > { %v2853_v33 = vpop.f32.mrf.mxu1 }
 0x473   : > { %10973 = vst [vmem:[#allocation46_spill] sm:$0xff] %v9140_v48  ;;  %7037 = vtanh.f32 %v2852_v29  ;;  %v3019_v49 = vpack.c.bf16 %v9140_v48, %v9137_v45  ;;  %v10976_v33 = vld [vmem:[#allocation44_spill] sm:$0xff] }
 0x474   : > { %v2856_v34 = vpop.f32.mrf.mxu1  ;;  %v7032_v5 = vpop.eup %7031 }
 0x475   : > { %v2857_v22 = vadd.f32 %v2856_v34, %v2568_v35  ;;  %6488 = vmatprep.mubr.msk.bf16.mxu0 %vm1220_vm1, %v3019_v49  ;;  %v9148_v29 = vadd.f32 %v7032_v5, %v10974_v1  ;;  %v3189_v49 = vpop.f32.mrf.mxu0  ;;  %v10980_v5 = vld [vmem:[#allocation50_spill] sm:$0xff] }
 0x476   : > { %v2858_v54 = vpop.f32.mrf.mxu1 }
 0x477   : > { %7039 = vtanh.f32 %v2857_v22  ;;  %10975 = vst [vmem:[#allocation47_spill] sm:$0xff] %v9148_v29  ;;  %v10978_v22 = vld [vmem:[#allocation49_spill] sm:$0xff] }
 0x478   : > { %v7034_v8 = vpop.eup %7033  ;;  %v2859_v40 = vpop.f32.mrf.mxu1 }
 0x479   : > { %v2860_v37 = vadd.f32 %v2859_v40, %v2571_v59  ;;  %v9151_v48 = vadd.f32 %v7034_v8, %v10976_v33  ;;  %v10982_v33 = vld [vmem:[#allocation51_spill] sm:$0xff] }
 0x47a   : > { %v2861_v45 = vpop.f32.mrf.mxu1 }
 0x47b   : > { %10977 = vst [vmem:[#allocation44_spill] sm:$0xff] %v9151_v48  ;;  %7041 = vtanh.f32 %v2860_v37  ;;  %v3020_v35 = vpack.c.bf16 %v9151_v48, %v9148_v29  ;;  %v10984_v48 = vld [vmem:[#allocation48_spill] sm:$0xff] }
 0x47c   : > { %v7036_v58 = vpop.eup %7035 }
 0x47d   : > { %6489 = vmatmul.mubr.msk.bf16.gmra.mxu0 %vm1220_vm1, %v3020_v35  ;;  %v6442_v14 = vpop.f32.mrf.mxu0  ;;  %v9157_v54 = vadd.f32 %v7036_v58, %v10978_v22 }
 0x47f   : > { %10979 = vst [vmem:[#allocation49_spill] sm:$0xff] %v9157_v54  ;;  %v3202_v8 = vpop.f32.mrf.mxu0 }
 0x480   : > { %v7038_v34 = vpop.eup %7037 }
 0x481   : > { %v9160_v59 = vadd.f32 %v7038_v34, %v10980_v5  ;;  %v6443_v37 = vpop.f32.mrf.mxu0  ;;  %v7317_v5 = vld [vmem:[%s8037_s9 + $0xc] ss:$16 sps:$4 sm:$0xff]  }
 0x483   : > { %10981 = vst [vmem:[#allocation50_spill] sm:$0xff] %v9160_v59  ;;  %v3021_v45 = vpack.c.bf16 %v9160_v59, %v9157_v54  ;;  %v3205_v58 = vpop.f32.mrf.mxu0 }
 0x484   : > { %v7040_v40 = vpop.eup %7039 }
 0x485   : > { %6492 = vmatprep.mubr.msk.bf16.mxu0 %vm1220_vm1, %v3021_v45  ;;  %v9166_v35 = vadd.f32 %v7040_v40, %v10982_v33  ;;  %v3428_v33 = vpack.c.bf16 %v6439_v57, %v6438_v53 }
 0x487   : > { %10983 = vst [vmem:[#allocation51_spill] sm:$0xff] %v9166_v35 }
 0x488   : > { %v7042_v1 = vpop.eup %7041 }
 0x489   : > { %v9169_v29 = vadd.f32 %v7042_v1, %v10984_v48  ;;  %v3430_v48 = vpack.c.bf16 %v6443_v37, %v6442_v14  ;;  %v3429_v1 = vpack.c.bf16 %v3205_v58, %v3202_v8 }
 0x48b   : > { %10985 = vst [vmem:[#allocation48_spill] sm:$0xff] %v9169_v29  ;;  %v3022_v34 = vpack.c.bf16 %v9169_v29, %v9166_v35  ;;  %v7415_v35 = vld [vmem:[%s8037_s9 + $0x228] ss:$16 sps:$4 sm:$0xff]  }
 0x48d   : > { %v6446_v22 = vpop.f32.mrf.mxu0  ;;  %6493 = vmatmul.mubr.msk.bf16.gmra.mxu0 %vm1220_vm1, %v3022_v34 }
 0x48e   : > { %3786 = vmatprep.mubr.bf16.mxu0 %v7317_v5 }
 0x48f   : > { %v3218_v59 = vpop.f32.mrf.mxu0 }
 0x491   : > { %v6447_v45 = vpop.f32.mrf.mxu0 }
 0x492   : > { %v3432_v54 = vpack.c.bf16 %v6447_v45, %v6446_v22 }
 0x493   : > { %v3221_v50 = vpop.f32.mrf.mxu0 }
 0x494   : > { %3466 = vmatpush1.bf16.msra.mxu1 %v3432_v54  ;;  %v3431_v40 = vpack.c.bf16 %v3221_v50, %v3218_v59  ;;  %v3427_v54 = vpack.c.bf16 %v3189_v49, %v3186_v18  ;;  %v3426_v50 = vpack.c.bf16 %v9125_v24, %v9108_v25  ;;  %v3425_v59 = vpack.c.bf16 %v9132_v0, %v9115_v39 }
 0x495   : > { %3467 = vmatprep.subr.bf16.mxu1 %v10986_v44 }
 0x498   : > { %3468 = vmatpush1.bf16.msra.mxu1 %v3431_v40 }
 0x499   : > { %3469 = vmatprep.subr.bf16.mxu1 %v10986_v44 }
 0x49c   : > { %3470 = vmatpush1.bf16.msra.mxu1 %v3430_v48 }
 0x49d   : > { %3471 = vmatprep.subr.bf16.mxu1 %v10986_v44  ;;  %v6450_v34 = vpop.f32.mrf.mxu0 }
 0x49f   : > { %v3234_v22 = vpop.f32.mrf.mxu0 }
 0x4a0   : > { %3472 = vmatpush1.bf16.msra.mxu1 %v3429_v1 }
 0x4a1   : > { %3473 = vmatprep.subr.bf16.mxu1 %v10986_v44  ;;  %v6451_v14 = vpop.f32.mrf.mxu0 }
 0x4a3   : > { %v3237_v53 = vpop.f32.mrf.mxu0 }
 0x4a4   : > { %3474 = vmatpush1.bf16.msra.mxu1 %v3428_v33 }
 0x4a5   : > { %3475 = vmatprep.subr.bf16.mxu1 %v10986_v44 }
 0x4a8   : > { %3476 = vmatpush1.bf16.msra.mxu1 %v3427_v54 }
 0x4a9   : > { %3477 = vmatprep.subr.bf16.mxu1 %v10986_v44 }
 0x4ac   : > { %3478 = vmatpush1.bf16.msra.mxu1 %v3426_v50 }
 0x4ad   : > { %3479 = vmatprep.subr.bf16.mxu1 %v10986_v44  ;;  %v6454_v57 = vpop.f32.mrf.mxu0 }
 0x4af   : > { %v3250_v18 = vpop.f32.mrf.mxu0 }
 0x4b0   : > { %3480 = vmatpush1.bf16.msra.mxu1 %v3425_v59 }
 0x4b1   : > { %3481 = vmatprep.subr.bf16.mxu1 %v10986_v44  ;;  %v6455_v49 = vpop.f32.mrf.mxu0 }
 0x4b2   : > { %v3436_v54 = vpack.c.bf16 %v6455_v49, %v6454_v57  ;;  %v3433_v57 = vpack.c.bf16 %v3237_v53, %v3234_v22 }
 0x4b3   : > { %v3253_v8 = vpop.f32.mrf.mxu0 }
 0x4b4   : > { %v3435_v59 = vpack.c.bf16 %v3253_v8, %v3250_v18  ;;  %v7318_v18 = vld [vmem:[%s8037_s9] ss:$16 sps:$4 sm:$0xff]   ;;  %v7319_v8 = vld [vmem:[%s8037_s9 + $0x24] ss:$16 sps:$4 sm:$0xff]  }
 0x4bd   : > { %v6458_v37 = vpop.f32.mrf.mxu0 }
 0x4bf   : > { %v3266_v58 = vpop.f32.mrf.mxu0 }
 0x4c1   : > { %v6459_v5 = vpop.f32.mrf.mxu0 }
 0x4c2   : > { %v3438_v0 = vpack.c.bf16 %v6459_v5, %v6458_v37  ;;  %v3434_v37 = vpack.c.bf16 %v6451_v14, %v6450_v34  ;;  %v7320_v14 = vld [vmem:[%s8037_s9 + $0x20] ss:$16 sps:$4 sm:$0xff]  }
 0x4c3   : > { %v3269_v45 = vpop.f32.mrf.mxu0 }
 0x4c4   : > { %v3437_v33 = vpack.c.bf16 %v3269_v45, %v3266_v58 }
 0x4cd   : > { %v6462_v25 = vpop.f32.mrf.mxu0 }
 0x4cf   : > { %v3282_v24 = vpop.f32.mrf.mxu0 }
 0x4d1   : > { %v6463_v40 = vpop.f32.mrf.mxu0 }
 0x4d2   : > { %v3440_v48 = vpack.c.bf16 %v6463_v40, %v6462_v25 }
 0x4d3   : > { %v3285_v1 = vpop.f32.mrf.mxu0 }
 0x4d4   : > { %3482 = vmatpush2.bf16.msra.mxu1 %v3440_v48  ;;  %v3439_v39 = vpack.c.bf16 %v3285_v1, %v3282_v24  ;;  %v7321_v24 = vld [vmem:[%s8037_s9 + $0x44] ss:$16 sps:$4 sm:$0xff]   ;;  %v7322_v48 = vld [vmem:[%s8037_s9 + $0x40] ss:$16 sps:$4 sm:$0xff]  }
 0x4d5   : > { %3483 = vmatprep.subr.bf16.mxu1 %v10986_v44  ;;  %v7323_v1 = vld [vmem:[%s8037_s9 + $0x64] ss:$16 sps:$4 sm:$0xff]  }
 0x4d8   : > { %3484 = vmatpush2.bf16.msra.mxu1 %v3439_v39 }
 0x4d9   : > { %3485 = vmatprep.subr.bf16.mxu1 %v10986_v44 }
 0x4dc   : > { %3486 = vmatpush2.bf16.msra.mxu1 %v3438_v0 }
 0x4dd   : > { %3487 = vmatprep.subr.bf16.mxu1 %v10986_v44  ;;  %v9191_v50 = vpop.f32.mrf.mxu0 }
 0x4df   : > { %v9194_v25 = vpop.f32.mrf.mxu0 }
 0x4e0   : > { %3488 = vmatpush2.bf16.msra.mxu1 %v3437_v33  ;;  %v7324_v33 = vld [vmem:[%s8037_s9 + $0x60] ss:$16 sps:$4 sm:$0xff]  }
 0x4e1   : > { %3489 = vmatprep.subr.bf16.mxu1 %v10986_v44  ;;  %v9197_v58 = vpop.f32.mrf.mxu0 }
 0x4e3   : > { %v9200_v49 = vpop.f32.mrf.mxu0 }
 0x4e4   : > { %3490 = vmatpush2.bf16.msra.mxu1 %v3436_v54  ;;  %v7325_v54 = vld [vmem:[%s8037_s9 + $0x84] ss:$16 sps:$4 sm:$0xff]  }
 0x4e5   : > { %3491 = vmatprep.subr.bf16.mxu1 %v10986_v44 }
 0x4e8   : > { %3492 = vmatpush2.bf16.msra.mxu1 %v3435_v59 }
 0x4e9   : > { %3493 = vmatprep.subr.bf16.mxu1 %v10986_v44 }
 0x4ec   : > { %3494 = vmatpush2.bf16.msra.mxu1 %v3434_v37 }
 0x4ed   : > { %3495 = vmatprep.subr.bf16.mxu1 %v10986_v44  ;;  %v6470_v5 = vpop.f32.mrf.mxu0 }
 0x4ef   : > { %v3314_v45 = vpop.f32.mrf.mxu0 }
 0x4f0   : > { %3496 = vmatpush2.bf16.msra.mxu1 %v3433_v57 }
 0x4f1   : > { %v6471_v34 = vpop.f32.mrf.mxu0 }
 0x4f3   : > { %3498 = vmatmul.mubr.bf16.vlgmr.msra.gmra.mxu1 %v7318_v18  ;;  %v3317_v40 = vpop.f32.mrf.mxu0 }
 0x4f4   : > { %3505 = vmatprep.mubr.bf16.mxu1 %v7319_v8 }
 0x4fb   : > { %3506 = vmatmul.mubr.bf16.gmra.mxu1 %v7320_v14  ;;  %v7326_v14 = vld [vmem:[%s8037_s9 + $0x80] ss:$16 sps:$4 sm:$0xff]  }
 0x4fc   : > { %3513 = vmatprep.mubr.bf16.mxu1 %v7321_v24  ;;  %v7327_v24 = vld [vmem:[%s8037_s9 + $0xa4] ss:$16 sps:$4 sm:$0xff]  }
 0x4fd   : > { %v6474_v22 = vpop.f32.mrf.mxu0 }
 0x4ff   : > { %v3330_v53 = vpop.f32.mrf.mxu0 }
 0x501   : > { %v6475_v39 = vpop.f32.mrf.mxu0 }
 0x503   : > { %3514 = vmatmul.mubr.bf16.gmra.mxu1 %v7322_v48  ;;  %v3333_v0 = vpop.f32.mrf.mxu0 }
 0x504   : > { %3521 = vmatprep.mubr.bf16.mxu1 %v7323_v1  ;;  %v3446_v1 = vpack.c.bf16 %v6475_v39, %v6474_v22  ;;  %v7331_v22 = vld [vmem:[%s8037_s9 + $0xe4] ss:$16 sps:$4 sm:$0xff]   ;;  %v3443_v39 = vpack.c.bf16 %v3317_v40, %v3314_v45  ;;  %v3441_v45 = vpack.c.bf16 %v9200_v49, %v9194_v25 }
 0x50b   : > { %3522 = vmatmul.mubr.bf16.gmra.mxu1 %v7324_v33  ;;  %v7328_v33 = vld [vmem:[%s8037_s9 + $0xa0] ss:$16 sps:$4 sm:$0xff]  }
 0x50c   : > { %3529 = vmatprep.mubr.bf16.mxu1 %v7325_v54  ;;  %v7329_v54 = vld [vmem:[%s8037_s9 + $0xc4] ss:$16 sps:$4 sm:$0xff]  }
 0x50d   : > { %v6478_v59 = vpop.f32.mrf.mxu0 }
 0x50f   : > { %v3346_v37 = vpop.f32.mrf.mxu0 }
 0x511   : > { %v6479_v57 = vpop.f32.mrf.mxu0 }
 0x512   : > { %v3448_v18 = vpack.c.bf16 %v6479_v57, %v6478_v59  ;;  %v3445_v59 = vpack.c.bf16 %v3333_v0, %v3330_v53  ;;  %v3444_v57 = vpack.c.bf16 %v6471_v34, %v6470_v5  ;;  %v3442_v5 = vpack.c.bf16 %v9197_v58, %v9191_v50  ;;  %v7332_v53 = vld [vmem:[%s8037_s9 + $0xe0] ss:$16 sps:$4 sm:$0xff]   ;;  %v7333_v0 = vld [vmem:[%s8037_s9 + $0x104] ss:$16 sps:$4 sm:$0xff]  }
 0x513   : > { %v3349_v8 = vpop.f32.mrf.mxu0  ;;  %3530 = vmatmul.mubr.bf16.gmra.mxu1 %v7326_v14  ;;  %v7334_v50 = vld [vmem:[%s8037_s9 + $0x100] ss:$16 sps:$4 sm:$0xff]   ;;  %v7335_v58 = vld [vmem:[%s8037_s9 + $0x124] ss:$16 sps:$4 sm:$0xff]  }
 0x514   : > { %3755 = vmatpush1.bf16.msra.mxu0 %v3448_v18  ;;  %3537 = vmatprep.mubr.bf16.mxu1 %v7327_v24  ;;  %v3447_v48 = vpack.c.bf16 %v3349_v8, %v3346_v37  ;;  %v7330_v37 = vld [vmem:[%s8037_s9 + $0xc0] ss:$16 sps:$4 sm:$0xff]  }
 0x515   : > { %3756 = vmatprep.subr.bf16.mxu0 %v10986_v44 }
 0x518   : > { %3757 = vmatpush1.bf16.msra.mxu0 %v3447_v48 }
 0x519   : > { %3758 = vmatprep.subr.bf16.mxu0 %v10986_v44 }
 0x51b   : > { %3538 = vmatmul.mubr.bf16.gmra.mxu1 %v7328_v33  ;;  %v7337_v33 = vld [vmem:[%s8037_s9 + $0x144] ss:$16 sps:$4 sm:$0xff]  }
 0x51c   : > { %3759 = vmatpush1.bf16.msra.mxu0 %v3446_v1  ;;  %3545 = vmatprep.mubr.bf16.mxu1 %v7329_v54  ;;  %v7336_v1 = vld [vmem:[%s8037_s9 + $0x120] ss:$16 sps:$4 sm:$0xff]  }
 0x51d   : > { %3760 = vmatprep.subr.bf16.mxu0 %v10986_v44  ;;  %v9218_v18 = vpop.f32.mrf.mxu0 }
 0x51f   : > { %v9223_v8 = vpop.f32.mrf.mxu0 }
 0x520   : > { %3761 = vmatpush1.bf16.msra.mxu0 %v3445_v59  ;;  %v7338_v59 = vld [vmem:[%s8037_s9 + $0x140] ss:$16 sps:$4 sm:$0xff]  }
 0x521   : > { %3762 = vmatprep.subr.bf16.mxu0 %v10986_v44  ;;  %v9228_v34 = vpop.f32.mrf.mxu0 }
 0x523   : > { %3546 = vmatmul.mubr.bf16.gmra.mxu1 %v7330_v37  ;;  %v9235_v40 = vpop.f32.mrf.mxu0 }
 0x524   : > { %3763 = vmatpush1.bf16.msra.mxu0 %v3444_v57  ;;  %3553 = vmatprep.mubr.bf16.mxu1 %v7331_v22  ;;  %v7339_v57 = vld [vmem:[%s8037_s9 + $0x164] ss:$16 sps:$4 sm:$0xff]  }
 0x525   : > { %3764 = vmatprep.subr.bf16.mxu0 %v10986_v44 }
 0x528   : > { %3765 = vmatpush1.bf16.msra.mxu0 %v3443_v39  ;;  %v7340_v39 = vld [vmem:[%s8037_s9 + $0x160] ss:$16 sps:$4 sm:$0xff]  }
 0x529   : > { %3766 = vmatprep.subr.bf16.mxu0 %v10986_v44 }
 0x52b   : > { %3554 = vmatmul.mubr.bf16.gmra.mxu1 %v7332_v53 }
 0x52c   : > { %3767 = vmatpush1.bf16.msra.mxu0 %v3442_v5  ;;  %3561 = vmatprep.mubr.bf16.mxu1 %v7333_v0  ;;  %v7341_v5 = vld [vmem:[%s8037_s9 + $0x184] ss:$16 sps:$4 sm:$0xff]  }
 0x52d   : > { %3768 = vmatprep.subr.bf16.mxu0 %v10986_v44  ;;  %v6486_v14 = vpop.f32.mrf.mxu0 }
 0x52f   : > { %v3378_v24 = vpop.f32.mrf.mxu0 }
 0x530   : > { %3769 = vmatpush1.bf16.msra.mxu0 %v3441_v45 }
 0x531   : > { %3770 = vmatprep.subr.bf16.mxu0 %v10986_v44  ;;  %v6487_v48 = vpop.f32.mrf.mxu0 }
 0x533   : > { %3562 = vmatmul.mubr.bf16.gmra.mxu1 %v7334_v50  ;;  %v3381_v25 = vpop.f32.mrf.mxu0 }
 0x534   : > { %3569 = vmatprep.mubr.bf16.mxu1 %v7335_v58 }
 0x53b   : > { %3570 = vmatmul.mubr.bf16.gmra.mxu1 %v7336_v1  ;;  %v7342_v1 = vld [vmem:[%s8037_s9 + $0x180] ss:$16 sps:$4 sm:$0xff]  }
 0x53c   : > { %3577 = vmatprep.mubr.bf16.mxu1 %v7337_v33  ;;  %v7343_v33 = vld [vmem:[%s8037_s9 + $0x1a4] ss:$16 sps:$4 sm:$0xff]  }
 0x53d   : > { %v6490_v49 = vpop.f32.mrf.mxu0 }
 0x53f   : > { %v3394_v54 = vpop.f32.mrf.mxu0 }
 0x541   : > { %v6491_v37 = vpop.f32.mrf.mxu0 }
 0x543   : > { %3578 = vmatmul.mubr.bf16.gmra.mxu1 %v7338_v59  ;;  %v3397_v22 = vpop.f32.mrf.mxu0 }
 0x544   : > { %3585 = vmatprep.mubr.bf16.mxu1 %v7339_v57  ;;  %v3454_v57 = vpack.c.bf16 %v6491_v37, %v6490_v49  ;;  %v3451_v49 = vpack.c.bf16 %v3381_v25, %v3378_v24  ;;  %v7348_v37 = vld [vmem:[%s8037_s9 + $0x1e0] ss:$16 sps:$4 sm:$0xff]   ;;  %v3449_v24 = vpack.c.bf16 %v9235_v40, %v9223_v8  ;;  %v7353_v25 = vld [vmem:[%s8037_s9 + $0x224] ss:$16 sps:$4 sm:$0xff]   ;;  %v7356_v40 = vld [vmem:[%s8037_s9 + $0x4c] ss:$16 sps:$4 sm:$0xff]  }
 0x545   : > { %v7355_v8 = vld [vmem:[%s8037_s9 + $0x220] ss:$16 sps:$4 sm:$0xff]  }
 0x54b   : > { %3586 = vmatmul.mubr.bf16.gmra.mxu1 %v7340_v39  ;;  %v7344_v39 = vld [vmem:[%s8037_s9 + $0x1a0] ss:$16 sps:$4 sm:$0xff]  }
 0x54c   : > { %3593 = vmatprep.mubr.bf16.mxu1 %v7341_v5  ;;  %v7345_v5 = vld [vmem:[%s8037_s9 + $0x1c4] ss:$16 sps:$4 sm:$0xff]  }
 0x54d   : > { %v6494_v53 = vpop.f32.mrf.mxu0 }
 0x54f   : > { %v3410_v0 = vpop.f32.mrf.mxu0 }
 0x551   : > { %v6495_v45 = vpop.f32.mrf.mxu0 }
 0x552   : > { %v3456_v50 = vpack.c.bf16 %v6495_v45, %v6494_v53  ;;  %v3453_v53 = vpack.c.bf16 %v3397_v22, %v3394_v54  ;;  %v3452_v45 = vpack.c.bf16 %v6487_v48, %v6486_v14  ;;  %v3450_v54 = vpack.c.bf16 %v9228_v34, %v9218_v18  ;;  %v7349_v14 = vld [vmem:[%s8037_s9 + $0x204] ss:$16 sps:$4 sm:$0xff]   ;;  %v7350_v48 = vld [vmem:[%s8037_s9 + $0x8] ss:$16 sps:$4 sm:$0xff]   ;;  %v7351_v18 = vld [vmem:[%s8037_s9 + $0x200] ss:$16 sps:$4 sm:$0xff]  }
 0x553   : > { %v3413_v58 = vpop.f32.mrf.mxu0  ;;  %3594 = vmatmul.mubr.bf16.gmra.mxu1 %v7342_v1  ;;  %v7352_v34 = vld [vmem:[%s8037_s9 + $0x2c] ss:$16 sps:$4 sm:$0xff]   ;;  %v7354_v22 = vld [vmem:[%s8037_s9 + $0x28] ss:$16 sps:$4 sm:$0xff]  }
 0x554   : > { %3771 = vmatpush2.bf16.msra.mxu0 %v3456_v50  ;;  %3601 = vmatprep.mubr.bf16.mxu1 %v7343_v33  ;;  %v3455_v59 = vpack.c.bf16 %v3413_v58, %v3410_v0  ;;  %v7346_v0 = vld [vmem:[%s8037_s9 + $0x1c0] ss:$16 sps:$4 sm:$0xff]   ;;  %v7347_v50 = vld [vmem:[%s8037_s9 + $0x1e4] ss:$16 sps:$4 sm:$0xff]   ;;  %v7358_v1 = vld [vmem:[%s8037_s9 + $0x48] ss:$16 sps:$4 sm:$0xff]  }
 0x555   : > { %3772 = vmatprep.subr.bf16.mxu0 %v10986_v44  ;;  %v7357_v58 = vld [vmem:[%s8037_s9 + $0x244] ss:$16 sps:$4 sm:$0xff]   ;;  %v7359_v33 = vld [vmem:[%s8037_s9 + $0x240] ss:$16 sps:$4 sm:$0xff]  }
 0x558   : > { %3773 = vmatpush2.bf16.msra.mxu0 %v3455_v59  ;;  %v7360_v59 = vld [vmem:[%s8037_s9 + $0x6c] ss:$16 sps:$4 sm:$0xff]  }
 0x559   : > { %3774 = vmatprep.subr.bf16.mxu0 %v10986_v44 }
 0x55b   : > { %3602 = vmatmul.mubr.bf16.gmra.mxu1 %v7344_v39  ;;  %v7362_v39 = vld [vmem:[%s8037_s9 + $0x68] ss:$16 sps:$4 sm:$0xff]  }
 0x55c   : > { %3775 = vmatpush2.bf16.msra.mxu0 %v3454_v57  ;;  %3609 = vmatprep.mubr.bf16.mxu1 %v7345_v5  ;;  %v7361_v57 = vld [vmem:[%s8037_s9 + $0x264] ss:$16 sps:$4 sm:$0xff]   ;;  %v7363_v5 = vld [vmem:[%s8037_s9 + $0x260] ss:$16 sps:$4 sm:$0xff]  }
 0x55d   : > { %3776 = vmatprep.subr.bf16.mxu0 %v10986_v44 }
 0x560   : > { %3777 = vmatpush2.bf16.msra.mxu0 %v3453_v53  ;;  %v7364_v53 = vld [vmem:[%s8037_s9 + $0x8c] ss:$16 sps:$4 sm:$0xff]  }
 0x561   : > { %3778 = vmatprep.subr.bf16.mxu0 %v10986_v44 }
 0x563   : > { %3610 = vmatmul.mubr.bf16.gmra.mxu1 %v7346_v0  ;;  %v7366_v0 = vld [vmem:[%s8037_s9 + $0x88] ss:$16 sps:$4 sm:$0xff]  }
 0x564   : > { %3779 = vmatpush2.bf16.msra.mxu0 %v3452_v45  ;;  %3617 = vmatprep.mubr.bf16.mxu1 %v7347_v50  ;;  %v7365_v45 = vld [vmem:[%s8037_s9 + $0x284] ss:$16 sps:$4 sm:$0xff]   ;;  %v7367_v50 = vld [vmem:[%s8037_s9 + $0x280] ss:$16 sps:$4 sm:$0xff]  }
 0x565   : > { %3780 = vmatprep.subr.bf16.mxu0 %v10986_v44 }
 0x568   : > { %3781 = vmatpush2.bf16.msra.mxu0 %v3451_v49  ;;  %v7368_v49 = vld [vmem:[%s8037_s9 + $0xac] ss:$16 sps:$4 sm:$0xff]  }
 0x569   : > { %3782 = vmatprep.subr.bf16.mxu0 %v10986_v44 }
 0x56b   : > { %3618 = vmatmul.mubr.bf16.gmra.mxu1 %v7348_v37  ;;  %v7370_v37 = vld [vmem:[%s8037_s9 + $0xa8] ss:$16 sps:$4 sm:$0xff]  }
 0x56c   : > { %3783 = vmatpush2.bf16.msra.mxu0 %v3450_v54  ;;  %3625 = vmatprep.mubr.bf16.mxu1 %v7349_v14  ;;  %v7369_v54 = vld [vmem:[%s8037_s9 + $0x2a4] ss:$16 sps:$4 sm:$0xff]   ;;  %v7371_v14 = vld [vmem:[%s8037_s9 + $0x2a0] ss:$16 sps:$4 sm:$0xff]  }
 0x56d   : > { %3784 = vmatprep.subr.bf16.mxu0 %v10986_v44 }
 0x570   : > { %3785 = vmatpush2.bf16.msra.mxu0 %v3449_v24  ;;  %v7372_v24 = vld [vmem:[%s8037_s9 + $0xcc] ss:$16 sps:$4 sm:$0xff]  }
 0x571   : > { %4645 = vmatprep.subr.bf16.mxu0 %v10986_v44 }
 0x573   : > { %3787 = vmatmul.mubr.bf16.vlgmr.msra.gmra.mxu0 %v7350_v48  ;;  %3626 = vmatmul.mubr.bf16.gmra.mxu1 %v7351_v18  ;;  %v7373_v48 = vld [vmem:[%s8037_s9 + $0x2c4] ss:$16 sps:$4 sm:$0xff]   ;;  %v7374_v18 = vld [vmem:[%s8037_s9 + $0xc8] ss:$16 sps:$4 sm:$0xff]  }
 0x574   : > { %3794 = vmatprep.mubr.bf16.mxu0 %v7352_v34  ;;  %3633 = vmatprep.mubr.bf16.mxu1 %v7353_v25  ;;  %v7375_v34 = vld [vmem:[%s8037_s9 + $0x2c0] ss:$16 sps:$4 sm:$0xff]   ;;  %v7376_v25 = vld [vmem:[%s8037_s9 + $0xec] ss:$16 sps:$4 sm:$0xff]  }
 0x57b   : > { %3795 = vmatmul.mubr.bf16.gmra.mxu0 %v7354_v22  ;;  %3634 = vmatmul.mubr.bf16.gmra.mxu1 %v7355_v8  ;;  %v7377_v22 = vld [vmem:[%s8037_s9 + $0x2e4] ss:$16 sps:$4 sm:$0xff]   ;;  %v7378_v8 = vld [vmem:[%s8037_s9 + $0xe8] ss:$16 sps:$4 sm:$0xff]  }
 0x57c   : > { %3802 = vmatprep.mubr.bf16.mxu0 %v7356_v40  ;;  %3641 = vmatprep.mubr.bf16.mxu1 %v7357_v58  ;;  %v7379_v40 = vld [vmem:[%s8037_s9 + $0x2e0] ss:$16 sps:$4 sm:$0xff]   ;;  %v7380_v58 = vld [vmem:[%s8037_s9 + $0x10c] ss:$16 sps:$4 sm:$0xff]  }
 0x583   : > { %3803 = vmatmul.mubr.bf16.gmra.mxu0 %v7358_v1  ;;  %3642 = vmatmul.mubr.bf16.gmra.mxu1 %v7359_v33  ;;  %v7381_v1 = vld [vmem:[%s8037_s9 + $0x304] ss:$16 sps:$4 sm:$0xff]   ;;  %v7382_v33 = vld [vmem:[%s8037_s9 + $0x108] ss:$16 sps:$4 sm:$0xff]  }
 0x584   : > { %3810 = vmatprep.mubr.bf16.mxu0 %v7360_v59  ;;  %3649 = vmatprep.mubr.bf16.mxu1 %v7361_v57  ;;  %v7383_v59 = vld [vmem:[%s8037_s9 + $0x300] ss:$16 sps:$4 sm:$0xff]  }
 0x58b   : > { %3811 = vmatmul.mubr.bf16.gmra.mxu0 %v7362_v39  ;;  %3650 = vmatmul.mubr.bf16.gmra.mxu1 %v7363_v5  ;;  %v7384_v39 = vld [vmem:[%s8037_s9 + $0x12c] ss:$16 sps:$4 sm:$0xff]   ;;  %v7385_v5 = vld [vmem:[%s8037_s9 + $0x324] ss:$16 sps:$4 sm:$0xff]  }
 0x58c   : > { %3818 = vmatprep.mubr.bf16.mxu0 %v7364_v53  ;;  %3657 = vmatprep.mubr.bf16.mxu1 %v7365_v45 }
 0x593   : > { %3819 = vmatmul.mubr.bf16.gmra.mxu0 %v7366_v0  ;;  %3658 = vmatmul.mubr.bf16.gmra.mxu1 %v7367_v50  ;;  %v7386_v50 = vld [vmem:[%s8037_s9 + $0x128] ss:$16 sps:$4 sm:$0xff]  }
 0x594   : > { %3826 = vmatprep.mubr.bf16.mxu0 %v7368_v49  ;;  %3665 = vmatprep.mubr.bf16.mxu1 %v7369_v54  ;;  %v7387_v49 = vld [vmem:[%s8037_s9 + $0x320] ss:$16 sps:$4 sm:$0xff]  }
 0x59b   : > { %3827 = vmatmul.mubr.bf16.gmra.mxu0 %v7370_v37  ;;  %3666 = vmatmul.mubr.bf16.gmra.mxu1 %v7371_v14  ;;  %v7388_v37 = vld [vmem:[%s8037_s9 + $0x14c] ss:$16 sps:$4 sm:$0xff]   ;;  %v7389_v14 = vld [vmem:[%s8037_s9 + $0x344] ss:$16 sps:$4 sm:$0xff]  }
 0x59c   : > { %3834 = vmatprep.mubr.bf16.mxu0 %v7372_v24  ;;  %3673 = vmatprep.mubr.bf16.mxu1 %v7373_v48 }
 0x5a3   : > { %3835 = vmatmul.mubr.bf16.gmra.mxu0 %v7374_v18  ;;  %3674 = vmatmul.mubr.bf16.gmra.mxu1 %v7375_v34  ;;  %v7390_v34 = vld [vmem:[%s8037_s9 + $0x148] ss:$16 sps:$4 sm:$0xff]  }
 0x5a4   : > { %3842 = vmatprep.mubr.bf16.mxu0 %v7376_v25  ;;  %3681 = vmatprep.mubr.bf16.mxu1 %v7377_v22  ;;  %v7391_v25 = vld [vmem:[%s8037_s9 + $0x340] ss:$16 sps:$4 sm:$0xff]  }
 0x5ab   : > { %3843 = vmatmul.mubr.bf16.gmra.mxu0 %v7378_v8  ;;  %3682 = vmatmul.mubr.bf16.gmra.mxu1 %v7379_v40  ;;  %v7392_v8 = vld [vmem:[%s8037_s9 + $0x16c] ss:$16 sps:$4 sm:$0xff]   ;;  %v7393_v40 = vld [vmem:[%s8037_s9 + $0x364] ss:$16 sps:$4 sm:$0xff]  }
 0x5ac   : > { %3850 = vmatprep.mubr.bf16.mxu0 %v7380_v58  ;;  %3689 = vmatprep.mubr.bf16.mxu1 %v7381_v1 }
 0x5b3   : > { %3851 = vmatmul.mubr.bf16.gmra.mxu0 %v7382_v33  ;;  %3690 = vmatmul.mubr.bf16.gmra.mxu1 %v7383_v59  ;;  %v9300_v57 = vpop.f32.mrf.mxu1  ;;  %v6913_v59 = vld [vmem:[#allocation8 + $0x28] sm:$0xff]  }
 0x5b4   : > { %3858 = vmatprep.mubr.bf16.mxu0 %v7384_v39  ;;  %3697 = vmatprep.mubr.bf16.mxu1 %v7385_v5  ;;  %v7394_v39 = vld [vmem:[%s8037_s9 + $0x168] ss:$16 sps:$4 sm:$0xff]   ;;  %v7395_v5 = vld [vmem:[%s8037_s9 + $0x360] ss:$16 sps:$4 sm:$0xff]  }
 0x5b5   : > { %v3501_v53 = vpop.f32.mrf.mxu1  ;;  %6496 = vmatprep.subr.bf16.mxu1 %v6913_v59 }
 0x5b6   : > { %6497 = vmatpush3.bf16.msra.mxu1 %v6913_v59 }
 0x5b7   : > { %v9304_v45 = vpop.f32.mrf.mxu1 }
 0x5b9   : > { %v3504_v0 = vpop.f32.mrf.mxu1 }
 0x5ba   : > { %v7396_v0 = vld [vmem:[%s8037_s9 + $0x18c] ss:$16 sps:$4 sm:$0xff]  }
 0x5bb   : > { %3859 = vmatmul.mubr.bf16.gmra.mxu0 %v7386_v50  ;;  %3698 = vmatmul.mubr.bf16.gmra.mxu1 %v7387_v49  ;;  %v9308_v54 = vpop.f32.mrf.mxu1  ;;  %v7397_v50 = vld [vmem:[%s8037_s9 + $0x384] ss:$16 sps:$4 sm:$0xff]  }
 0x5bc   : > { %3866 = vmatprep.mubr.bf16.mxu0 %v7388_v37  ;;  %3705 = vmatprep.mubr.bf16.mxu1 %v7389_v14  ;;  %v6914_v37 = vld [vmem:[#allocation8 + $0x20] sm:$0xff]  }
 0x5bd   : > { %v3509_v24 = vpop.f32.mrf.mxu1  ;;  %6498 = vmatprep.subr.bf16.mxu1 %v6914_v37 }
 0x5be   : > { %6499 = vmatpush3.bf16.msra.mxu1 %v6914_v37 }
 0x5bf   : > { %v9312_v48 = vpop.f32.mrf.mxu1  ;;  %4934 = vmatprep.subr.bf16.mxu1 %v10986_v44 }
 0x5c1   : > { %v3512_v18 = vpop.f32.mrf.mxu1 }
 0x5c2   : > { %v7398_v18 = vld [vmem:[%s8037_s9 + $0x188] ss:$16 sps:$4 sm:$0xff]  }
 0x5c3   : > { %3867 = vmatmul.mubr.bf16.gmra.mxu0 %v7390_v34  ;;  %3706 = vmatmul.mubr.bf16.gmra.mxu1 %v7391_v25  ;;  %v9316_v22 = vpop.f32.mrf.mxu1  ;;  %v7399_v34 = vld [vmem:[%s8037_s9 + $0x380] ss:$16 sps:$4 sm:$0xff]  }
 0x5c4   : > { %3874 = vmatprep.mubr.bf16.mxu0 %v7392_v8  ;;  %3713 = vmatprep.mubr.bf16.mxu1 %v7393_v40  ;;  %v7400_v8 = vld [vmem:[%s8037_s9 + $0x1ac] ss:$16 sps:$4 sm:$0xff]   ;;  %v7401_v40 = vld [vmem:[%s8037_s9 + $0x3a4] ss:$16 sps:$4 sm:$0xff]  }
 0x5c5   : > { %v3517_v58 = vpop.f32.mrf.mxu1 }
 0x5c7   : > { %v9320_v1 = vpop.f32.mrf.mxu1 }
 0x5c9   : > { %v3520_v33 = vpop.f32.mrf.mxu1 }
 0x5cb   : > { %3875 = vmatmul.mubr.bf16.gmra.mxu0 %v7394_v39  ;;  %3714 = vmatmul.mubr.bf16.gmra.mxu1 %v7395_v5  ;;  %v9324_v53 = vpop.f32.mrf.mxu1  ;;  %v7402_v39 = vld [vmem:[%s8037_s9 + $0x1a8] ss:$16 sps:$4 sm:$0xff]   ;;  %v7403_v5 = vld [vmem:[%s8037_s9 + $0x3a0] ss:$16 sps:$4 sm:$0xff]  }
 0x5cc   : > { %3882 = vmatprep.mubr.bf16.mxu0 %v7396_v0  ;;  %3721 = vmatprep.mubr.bf16.mxu1 %v7397_v50  ;;  %v7404_v50 = vld [vmem:[%s8037_s9 + $0x1cc] ss:$16 sps:$4 sm:$0xff]  }
 0x5cd   : > { %v3525_v49 = vpop.f32.mrf.mxu1 }
 0x5ce   : > { %v7405_v49 = vld [vmem:[%s8037_s9 + $0x3c4] ss:$16 sps:$4 sm:$0xff]  }
 0x5cf   : > { %v9328_v14 = vpop.f32.mrf.mxu1 }
 0x5d1   : > { %v3528_v24 = vpop.f32.mrf.mxu1 }
 0x5d3   : > { %3883 = vmatmul.mubr.bf16.gmra.mxu0 %v7398_v18  ;;  %3722 = vmatmul.mubr.bf16.gmra.mxu1 %v7399_v34  ;;  %v9332_v25 = vpop.f32.mrf.mxu1  ;;  %v7406_v34 = vld [vmem:[%s8037_s9 + $0x1c8] ss:$16 sps:$4 sm:$0xff]  }
 0x5d4   : > { %3890 = vmatprep.mubr.bf16.mxu0 %v7400_v8  ;;  %3729 = vmatprep.mubr.bf16.mxu1 %v7401_v40  ;;  %v7407_v8 = vld [vmem:[%s8037_s9 + $0x3c0] ss:$16 sps:$4 sm:$0xff]  }
 0x5d5   : > { %v3533_v58 = vpop.f32.mrf.mxu1 }
 0x5d6   : > { %v7408_v58 = vld [vmem:[%s8037_s9 + $0x1ec] ss:$16 sps:$4 sm:$0xff]  }
 0x5d7   : > { %v9337_v33 = vpop.f32.mrf.mxu1 }
 0x5d9   : > { %v3536_v59 = vpop.f32.mrf.mxu1 }
 0x5da   : > { %v7409_v59 = vld [vmem:[%s8037_s9 + $0x3e4] ss:$16 sps:$4 sm:$0xff]  }
 0x5db   : > { %3891 = vmatmul.mubr.bf16.gmra.mxu0 %v7402_v39  ;;  %3730 = vmatmul.mubr.bf16.gmra.mxu1 %v7403_v5  ;;  %v9341_v0 = vpop.f32.mrf.mxu1 }
 0x5dc   : > { %3898 = vmatprep.mubr.bf16.mxu0 %v7404_v50  ;;  %3737 = vmatprep.mubr.bf16.mxu1 %v7405_v49  ;;  %v7410_v49 = vld [vmem:[%s8037_s9 + $0x1e8] ss:$16 sps:$4 sm:$0xff]  }
 0x5dd   : > { %v3541_v37 = vpop.f32.mrf.mxu1 }
 0x5de   : > { %v7411_v37 = vld [vmem:[%s8037_s9 + $0x3e0] ss:$16 sps:$4 sm:$0xff]  }
 0x5df   : > { %v9345_v24 = vpop.f32.mrf.mxu1 }
 0x5e1   : > { %v3544_v18 = vpop.f32.mrf.mxu1 }
 0x5e3   : > { %3899 = vmatmul.mubr.bf16.gmra.mxu0 %v7406_v34  ;;  %3738 = vmatmul.mubr.bf16.gmra.mxu1 %v7407_v8  ;;  %v9349_v40 = vpop.f32.mrf.mxu1  ;;  %v7412_v34 = vld [vmem:[%s8037_s9 + $0x20c] ss:$16 sps:$4 sm:$0xff]  }
 0x5e4   : > { %3906 = vmatprep.mubr.bf16.mxu0 %v7408_v58  ;;  %3745 = vmatprep.mubr.bf16.mxu1 %v7409_v59  ;;  %v7413_v59 = vld [vmem:[%s8037_s9 + $0x208] ss:$16 sps:$4 sm:$0xff]  }
 0x5e5   : > { %v3549_v39 = vpop.f32.mrf.mxu1 }
 0x5e7   : > { %v9353_v5 = vpop.f32.mrf.mxu1 }
 0x5e9   : > { %v3552_v50 = vpop.f32.mrf.mxu1 }
 0x5ea   : > { %v7414_v50 = vld [vmem:[%s8037_s9 + $0x22c] ss:$16 sps:$4 sm:$0xff]  }
 0x5eb   : > { %3907 = vmatmul.mubr.bf16.gmra.mxu0 %v7410_v49  ;;  %3746 = vmatmul.mubr.bf16.gmra.mxu1 %v7411_v37  ;;  %v9357_v18 = vpop.f32.mrf.mxu1 }
 0x5ec   : > { %3914 = vmatprep.mubr.bf16.mxu0 %v7412_v34 }
 0x5ed   : > { %v3557_v8 = vpop.f32.mrf.mxu1 }
 0x5ee   : > { %v7416_v8 = vld [vmem:[%s8037_s9 + $0x24c] ss:$16 sps:$4 sm:$0xff]  }
 0x5ef   : > { %v9360_v58 = vpop.f32.mrf.mxu1 }
 0x5f1   : > { %v3560_v44 = vpop.f32.mrf.mxu1 }
 0x5f3   : > { %3915 = vmatmul.mubr.bf16.gmra.mxu0 %v7413_v59  ;;  %v9363_v39 = vpop.f32.mrf.mxu1 }
 0x5f4   : > { %3922 = vmatprep.mubr.bf16.mxu0 %v7414_v50 }
 0x5f5   : > { %v3565_v49 = vpop.f32.mrf.mxu1 }
 0x5f6   : > { %v7418_v49 = vld [vmem:[%s8037_s9 + $0x26c] ss:$16 sps:$4 sm:$0xff]  }
 0x5f7   : > { %v9366_v29 = vpop.f32.mrf.mxu1 }
 0x5f9   : > { %v3568_v37 = vpop.f32.mrf.mxu1 }
 0x5fb   : > { %3923 = vmatmul.mubr.bf16.gmra.mxu0 %v7415_v35  ;;  %v9369_v34 = vpop.f32.mrf.mxu1 }
 0x5fc   : > { %3930 = vmatprep.mubr.bf16.mxu0 %v7416_v8 }
 0x5fd   : > { %v3573_v44 = vpop.f32.mrf.mxu1 }
 0x5fe   : > { %v7420_v44 = vld [vmem:[%s8037_s9 + $0x28c] ss:$16 sps:$4 sm:$0xff]  }
 0x5ff   : > { %v9372_v11 = vpop.f32.mrf.mxu1 }
 0x601   : > { %v3576_v59 = vpop.f32.mrf.mxu1 }
 0x603   : > { %3931 = vmatmul.mubr.bf16.gmra.mxu0 %v7417_v55  ;;  %v9375_v50 = vpop.f32.mrf.mxu1 }
 0x604   : > { %3938 = vmatprep.mubr.bf16.mxu0 %v7418_v49 }
 0x605   : > { %v3581_v37 = vpop.f32.mrf.mxu1 }
 0x606   : > { %v7422_v37 = vld [vmem:[%s8037_s9 + $0x2ac] ss:$16 sps:$4 sm:$0xff]  }
 0x607   : > { %v9378_v60 = vpop.f32.mrf.mxu1 }
 0x609   : > { %v3584_v35 = vpop.f32.mrf.mxu1 }
 0x60b   : > { %3939 = vmatmul.mubr.bf16.gmra.mxu0 %v7419_v52  ;;  %v9381_v8 = vpop.f32.mrf.mxu1 }
 0x60c   : > { %3946 = vmatprep.mubr.bf16.mxu0 %v7420_v44 }
 0x60d   : > { %v3589_v59 = vpop.f32.mrf.mxu1 }
 0x60e   : > { %v7424_v59 = vld [vmem:[%s8037_s9 + $0x2cc] ss:$16 sps:$4 sm:$0xff]  }
 0x60f   : > { %v9384_v56 = vpop.f32.mrf.mxu1 }
 0x611   : > { %v3592_v55 = vpop.f32.mrf.mxu1 }
 0x613   : > { %3947 = vmatmul.mubr.bf16.gmra.mxu0 %v7421_v12  ;;  %v9387_v49 = vpop.f32.mrf.mxu1 }
 0x614   : > { %3954 = vmatprep.mubr.bf16.mxu0 %v7422_v37  ;;  %v7426_v37 = vld [vmem:[%s8037_s9 + $0x2ec] ss:$16 sps:$4 sm:$0xff]  }
 0x615   : > { %v3597_v35 = vpop.f32.mrf.mxu1 }
 0x617   : > { %v9390_v28 = vpop.f32.mrf.mxu1 }
 0x619   : > { %v3600_v52 = vpop.f32.mrf.mxu1 }
 0x61b   : > { %3955 = vmatmul.mubr.bf16.gmra.mxu0 %v7423_v15  ;;  %v9393_v44 = vpop.f32.mrf.mxu1 }
 0x61c   : > { %3962 = vmatprep.mubr.bf16.mxu0 %v7424_v59  ;;  %v7428_v59 = vld [vmem:[%s8037_s9 + $0x30c] ss:$16 sps:$4 sm:$0xff]  }
 0x61d   : > { %v3605_v55 = vpop.f32.mrf.mxu1 }
 0x61e   : > { %v9408_v55 = vld [vmem:[#allocation10 + $0x1] ss:$0 sm:$0xff] }
 0x61f   : > { %v9396_v43 = vpop.f32.mrf.mxu1  ;;  %v3500_v17 = vadd.f32 %v9408_v55, %v9300_v57  ;;  %v3508_v57 = vadd.f32 %v9408_v55, %v9308_v54  ;;  %v3511_v54 = vadd.f32 %v9408_v55, %v9312_v48 }
 0x621   : > { %v3608_v12 = vpop.f32.mrf.mxu1 }
 0x623   : > { %3963 = vmatmul.mubr.bf16.gmra.mxu0 %v7425_v27  ;;  %v9399_v42 = vpop.f32.mrf.mxu1 }
 0x624   : > { %3970 = vmatprep.mubr.bf16.mxu0 %v7426_v37 }
 0x625   : > { %v3613_v35 = vpop.f32.mrf.mxu1 }
 0x627   : > { %v9402_v52 = vpop.f32.mrf.mxu1 }
 0x628   : > { %10987 = vst [vmem:[#allocation61_spill] sm:$0xff] %v9402_v52  ;;  %v7430_v52 = vld [vmem:[%s8037_s9 + $0x32c] ss:$16 sps:$4 sm:$0xff]  }
 0x629   : > { %v3616_v15 = vpop.f32.mrf.mxu1 }
 0x62b   : > { %3971 = vmatmul.mubr.bf16.gmra.mxu0 %v7427_v19  ;;  %v9405_v13 = vpop.f32.mrf.mxu1 }
 0x62c   : > { %10988 = vst [vmem:[#allocation62_spill] sm:$0xff] %v9405_v13  ;;  %3978 = vmatprep.mubr.bf16.mxu0 %v7428_v59 }
 0x62d   : > { %v3621_v12 = vpop.f32.mrf.mxu1 }
 0x62e   : > { %v3503_v12 = vadd.f32 %v9408_v55, %v9304_v45 }
 0x62f   : > { %v9410_v27 = vpop.f32.mrf.mxu1 }
 0x630   : > { %10989 = vst [vmem:[#allocation63_spill] sm:$0xff] %v9410_v27 }
 0x631   : > { %v3624_v37 = vpop.f32.mrf.mxu1 }
 0x633   : > { %v3788_v35 = vpop.f32.mrf.mxu0  ;;  %3979 = vmatmul.mubr.bf16.gmra.mxu0 %v7429_v2  ;;  %v9415_v15 = vpop.f32.mrf.mxu1 }
 0x634   : > { %10990 = vst [vmem:[#allocation64_spill] sm:$0xff] %v9415_v15  ;;  %v3789_v19 = vadd.f32 %v3788_v35, %v3500_v17  ;;  %3986 = vmatprep.mubr.bf16.mxu0 %v7430_v52  ;;  %v7431_v35 = vld [vmem:[%s8037_s9 + $0x328] ss:$16 sps:$4 sm:$0xff]  }
 0x635   : > { %v3790_v13 = vpop.f32.mrf.mxu0  ;;  %v3629_v59 = vpop.f32.mrf.mxu1 }
 0x636   : > { %7043 = vtanh.f32 %v3789_v19  ;;  %v7432_v59 = vld [vmem:[%s8037_s9 + $0x34c] ss:$16 sps:$4 sm:$0xff]  }
 0x637   : > { %v3791_v27 = vpop.f32.mrf.mxu0  ;;  %v9420_v9 = vpop.f32.mrf.mxu1 }
 0x638   : > { %10991 = vst [vmem:[#allocation65_spill] sm:$0xff] %v9420_v9  ;;  %v3792_v2 = vadd.f32 %v3791_v27, %v3503_v12 }
 0x639   : > { %v3793_v37 = vpop.f32.mrf.mxu0  ;;  %v3632_v15 = vpop.f32.mrf.mxu1 }
 0x63a   : > { %7045 = vtanh.f32 %v3792_v2  ;;  %v3516_v15 = vadd.f32 %v9408_v55, %v9316_v22  ;;  %v3519_v22 = vadd.f32 %v9408_v55, %v9320_v1 }
 0x63b   : > { %v3796_v17 = vpop.f32.mrf.mxu0  ;;  %3987 = vmatmul.mubr.bf16.gmra.mxu0 %v7431_v35  ;;  %v9425_v13 = vpop.f32.mrf.mxu1 }
 0x63c   : > { %v3797_v52 = vadd.f32 %v3796_v17, %v3508_v57  ;;  %3994 = vmatprep.mubr.bf16.mxu0 %v7432_v59  ;;  %v7433_v17 = vld [vmem:[%s8037_s9 + $0x348] ss:$16 sps:$4 sm:$0xff]   ;;  %v7434_v59 = vld [vmem:[%s8037_s9 + $0x36c] ss:$16 sps:$4 sm:$0xff]  }
 0x63d   : > { %v3798_v45 = vpop.f32.mrf.mxu0  ;;  %v3637_v9 = vpop.f32.mrf.mxu1 }
 0x63e   : > { %7047 = vtanh.f32 %v3797_v52 }
 0x63f   : > { %v3799_v19 = vpop.f32.mrf.mxu0  ;;  %v9430_v27 = vpop.f32.mrf.mxu1 }
 0x640   : > { %10992 = vst [vmem:[#allocation66_spill] sm:$0xff] %v9430_v27  ;;  %v3800_v12 = vadd.f32 %v3799_v19, %v3511_v54  ;;  %v3524_v54 = vadd.f32 %v9408_v55, %v9324_v53  ;;  %v7435_v53 = vld [vmem:[%s8037_s9 + $0x368] ss:$16 sps:$4 sm:$0xff]  }
 0x641   : > { %v3801_v2 = vpop.f32.mrf.mxu0  ;;  %v3640_v37 = vpop.f32.mrf.mxu1 }
 0x642   : > { %7049 = vtanh.f32 %v3800_v12 }
 0x643   : > { %v3804_v57 = vpop.f32.mrf.mxu0  ;;  %3995 = vmatmul.mubr.bf16.gmra.mxu0 %v7433_v17  ;;  %v9435_v35 = vpop.f32.mrf.mxu1 }
 0x644   : > { %v3805_v9 = vadd.f32 %v3804_v57, %v3516_v15  ;;  %4002 = vmatprep.mubr.bf16.mxu0 %v7434_v59  ;;  %v7044_v48 = vpop.eup %7043 }
 0x645   : > { %v3806_v45 = vpop.f32.mrf.mxu0  ;;  %v3645_v27 = vpop.f32.mrf.mxu1  ;;  %v9445_v15 = vadd.f32 %v7044_v48, %v8670_v4 }
 0x646   : > { %7051 = vtanh.f32 %v3805_v9  ;;  %v7436_v9 = vld [vmem:[%s8037_s9 + $0x38c] ss:$16 sps:$4 sm:$0xff]  }
 0x647   : > { %v7046_v52 = vpop.eup %7045  ;;  %v3807_v19 = vpop.f32.mrf.mxu0 }
 0x648   : > { %v9442_v12 = vpop.f32.mrf.mxu1  ;;  %v3808_v2 = vadd.f32 %v3807_v19, %v3519_v22  ;;  %v9448_v37 = vadd.f32 %v7046_v52, %v8673_v10  ;;  %v3527_v22 = vadd.f32 %v9408_v55, %v9328_v14  ;;  %v3532_v19 = vadd.f32 %v9408_v55, %v9332_v25  ;;  %v7437_v25 = vld [vmem:[%s8037_s9 + $0x388] ss:$16 sps:$4 sm:$0xff]  }
 0x649   : > { %v3809_v27 = vpop.f32.mrf.mxu0 }
 0x64a   : > { %v3648_v57 = vpop.f32.mrf.mxu1  ;;  %7053 = vtanh.f32 %v3808_v2  ;;  %v4171_v1 = vpack.c.bf16 %v9448_v37, %v9445_v15 }
 0x64b   : > { %v3812_v17 = vpop.f32.mrf.mxu0  ;;  %4003 = vmatmul.mubr.bf16.gmra.mxu0 %v7435_v53  ;;  %v7048_v4 = vpop.eup %7047 }
 0x64c   : > { %v9453_v59 = vpop.f32.mrf.mxu1  ;;  %v3813_v45 = vadd.f32 %v3812_v17, %v3524_v54  ;;  %6500 = vmatprep.mubr.msk.bf16.mxu1 %vm1220_vm1, %v4171_v1  ;;  %4010 = vmatprep.mubr.bf16.mxu0 %v7436_v9  ;;  %v9464_v54 = vadd.f32 %v7048_v4, %v8689_v16  ;;  %v7438_v16 = vld [vmem:[%s8037_s9 + $0x3ac] ss:$16 sps:$4 sm:$0xff]  }
 0x64d   : > { %v3814_v48 = vpop.f32.mrf.mxu0 }
 0x64e   : > { %v3653_v10 = vpop.f32.mrf.mxu1  ;;  %7055 = vtanh.f32 %v3813_v45 }
 0x64f   : > { %v7050_v52 = vpop.eup %7049  ;;  %v3815_v2 = vpop.f32.mrf.mxu0 }
 0x650   : > { %v9461_v27 = vpop.f32.mrf.mxu1  ;;  %v9467_v57 = vadd.f32 %v7050_v52, %v8692_v36  ;;  %v3816_v1 = vadd.f32 %v3815_v2, %v3527_v22  ;;  %v3535_v22 = vadd.f32 %v9408_v55, %v9337_v33  ;;  %v3540_v2 = vadd.f32 %v9408_v55, %v9341_v0  ;;  %v7439_v0 = vld [vmem:[%s8037_s9 + $0x3a8] ss:$16 sps:$4 sm:$0xff]  }
 0x651   : > { %v3817_v17 = vpop.f32.mrf.mxu0 }
 0x652   : > { %v3656_v53 = vpop.f32.mrf.mxu1  ;;  %v4172_v14 = vpack.c.bf16 %v9467_v57, %v9464_v54  ;;  %7057 = vtanh.f32 %v3816_v1 }
 0x653   : > { %v3820_v9 = vpop.f32.mrf.mxu0  ;;  %4011 = vmatmul.mubr.bf16.gmra.mxu0 %v7437_v25  ;;  %v7052_v36 = vpop.eup %7051 }
 0x654   : > { %v9472_v48 = vpop.f32.mrf.mxu1  ;;  %v3821_v10 = vadd.f32 %v3820_v9, %v3532_v19  ;;  %6501 = vmatmul.mubr.msk.bf16.vlgmr.msra.gmra.mxu1 %vm1220_vm1, %v4172_v14  ;;  %4018 = vmatprep.mubr.bf16.mxu0 %v7438_v16  ;;  %v9483_v53 = vadd.f32 %v7052_v36, %v8708_v46 }
 0x655   : > { %v3822_v4 = vpop.f32.mrf.mxu0 }
 0x656   : > { %v3661_v45 = vpop.f32.mrf.mxu1  ;;  %7059 = vtanh.f32 %v3821_v10  ;;  %v7440_v10 = vld [vmem:[%s8037_s9 + $0x3cc] ss:$16 sps:$4 sm:$0xff]  }
 0x657   : > { %v7054_v52 = vpop.eup %7053  ;;  %v3823_v1 = vpop.f32.mrf.mxu0 }
 0x658   : > { %v9480_v17 = vpop.f32.mrf.mxu1  ;;  %v3824_v19 = vadd.f32 %v3823_v1, %v3535_v22  ;;  %v9486_v14 = vadd.f32 %v7054_v52, %v8711_v38  ;;  %v3543_v22 = vadd.f32 %v9408_v55, %v9345_v24  ;;  %v3548_v1 = vadd.f32 %v9408_v55, %v9349_v40  ;;  %v7441_v40 = vld [vmem:[%s8037_s9 + $0x3c8] ss:$16 sps:$4 sm:$0xff]  }
 0x659   : > { %v3825_v9 = vpop.f32.mrf.mxu0 }
 0x65a   : > { %v3664_v25 = vpop.f32.mrf.mxu1  ;;  %7061 = vtanh.f32 %v3824_v19  ;;  %v4173_v33 = vpack.c.bf16 %v9486_v14, %v9483_v53 }
 0x65b   : > { %v3828_v16 = vpop.f32.mrf.mxu0  ;;  %4019 = vmatmul.mubr.bf16.gmra.mxu0 %v7439_v0  ;;  %v7056_v46 = vpop.eup %7055 }
 0x65c   : > { %v9491_v4 = vpop.f32.mrf.mxu1  ;;  %v3829_v45 = vadd.f32 %v3828_v16, %v3540_v2  ;;  %6504 = vmatprep.mubr.msk.bf16.mxu1 %vm1220_vm1, %v4173_v33  ;;  %4026 = vmatprep.mubr.bf16.mxu0 %v7440_v10  ;;  %v9502_v25 = vadd.f32 %v7056_v46, %v8727_v3 }
 0x65d   : > { %v3830_v36 = vpop.f32.mrf.mxu0 }
 0x65e   : > { %v3669_v38 = vpop.f32.mrf.mxu1  ;;  %7063 = vtanh.f32 %v3829_v45  ;;  %v7442_v45 = vld [vmem:[%s8037_s9 + $0x3ec] ss:$16 sps:$4 sm:$0xff]  }
 0x65f   : > { %v7058_v52 = vpop.eup %7057  ;;  %v3831_v19 = vpop.f32.mrf.mxu0 }
 0x660   : > { %v9499_v9 = vpop.f32.mrf.mxu1  ;;  %v3832_v2 = vadd.f32 %v3831_v19, %v3543_v22  ;;  %v9505_v33 = vadd.f32 %v7058_v52, %v8730_v21  ;;  %v3551_v22 = vadd.f32 %v9408_v55, %v9353_v5  ;;  %v3556_v19 = vadd.f32 %v9408_v55, %v9357_v18  ;;  %v7443_v18 = vld [vmem:[%s8037_s9 + $0x3e8] ss:$16 sps:$4 sm:$0xff]  }
 0x661   : > { %v3833_v16 = vpop.f32.mrf.mxu0 }
 0x662   : > { %v3672_v0 = vpop.f32.mrf.mxu1  ;;  %7065 = vtanh.f32 %v3832_v2  ;;  %v4174_v24 = vpack.c.bf16 %v9505_v33, %v9502_v25 }
 0x663   : > { %v3836_v10 = vpop.f32.mrf.mxu0  ;;  %4027 = vmatmul.mubr.bf16.gmra.mxu0 %v7441_v40  ;;  %v7060_v3 = vpop.eup %7059 }
 0x664   : > { %v9510_v36 = vpop.f32.mrf.mxu1  ;;  %v3837_v38 = vadd.f32 %v3836_v10, %v3548_v1  ;;  %6505 = vmatmul.mubr.msk.bf16.gmra.mxu1 %vm1220_vm1, %v4174_v24  ;;  %4034 = vmatprep.mubr.bf16.mxu0 %v7442_v45  ;;  %v9521_v0 = vadd.f32 %v7060_v3, %v8746_v26 }
 0x665   : > { %v3838_v46 = vpop.f32.mrf.mxu0 }
 0x666   : > { %v3677_v21 = vpop.f32.mrf.mxu1  ;;  %7067 = vtanh.f32 %v3837_v38  ;;  %v7444_v38 = vld [vmem:[%s8037_s9 + $0x4] ss:$16 sps:$4 sm:$0xff]  }
 0x667   : > { %v7062_v52 = vpop.eup %7061  ;;  %v3839_v2 = vpop.f32.mrf.mxu0 }
 0x668   : > { %v9518_v16 = vpop.f32.mrf.mxu1  ;;  %v3840_v1 = vadd.f32 %v3839_v2, %v3551_v22  ;;  %v9524_v24 = vadd.f32 %v7062_v52, %v8749_v6  ;;  %v3559_v22 = vadd.f32 %v9408_v55, %v9360_v58  ;;  %v3564_v2 = vadd.f32 %v9408_v55, %v9363_v39 }
 0x669   : > { %v3841_v10 = vpop.f32.mrf.mxu0 }
 0x66a   : > { %v3680_v40 = vpop.f32.mrf.mxu1  ;;  %7069 = vtanh.f32 %v3840_v1  ;;  %v4175_v5 = vpack.c.bf16 %v9524_v24, %v9521_v0 }
 0x66b   : > { %v3844_v45 = vpop.f32.mrf.mxu0  ;;  %4035 = vmatmul.mubr.bf16.gmra.mxu0 %v7443_v18  ;;  %v7064_v26 = vpop.eup %7063 }
 0x66c   : > { %v9529_v46 = vpop.f32.mrf.mxu1  ;;  %v3845_v21 = vadd.f32 %v3844_v45, %v3556_v19  ;;  %6508 = vmatprep.mubr.msk.bf16.mxu1 %vm1220_vm1, %v4175_v5  ;;  %4677 = vmatprep.mubr.bf16.mxu0 %v7444_v38  ;;  %v9540_v19 = vadd.f32 %v7064_v26, %v8764_v41  ;;  %v3567_v41 = vadd.f32 %v9408_v55, %v9366_v29 }
 0x66d   : > { %v3846_v3 = vpop.f32.mrf.mxu0  ;;  %v3572_v26 = vadd.f32 %v9408_v55, %v9369_v34 }
 0x66e   : > { %v3685_v6 = vpop.f32.mrf.mxu1  ;;  %7071 = vtanh.f32 %v3845_v21 }
 0x66f   : > { %v7066_v52 = vpop.eup %7065  ;;  %v3847_v1 = vpop.f32.mrf.mxu0 }
 0x670   : > { %v9537_v10 = vpop.f32.mrf.mxu1  ;;  %v3848_v40 = vadd.f32 %v3847_v1, %v3559_v22  ;;  %v9543_v5 = vadd.f32 %v7066_v52, %v8767_v23 }
 0x671   : > { %v3849_v45 = vpop.f32.mrf.mxu0 }
 0x672   : > { %v3688_v18 = vpop.f32.mrf.mxu1  ;;  %7073 = vtanh.f32 %v3848_v40  ;;  %v4176_v58 = vpack.c.bf16 %v9543_v5, %v9540_v19 }
 0x673   : > { %v3852_v38 = vpop.f32.mrf.mxu0  ;;  %v7068_v21 = vpop.eup %7067 }
 0x674   : > { %v9547_v3 = vpop.f32.mrf.mxu1  ;;  %v3853_v39 = vadd.f32 %v3852_v38, %v3564_v2  ;;  %6509 = vmatmul.mubr.msk.bf16.gmra.mxu1 %vm1220_vm1, %v4176_v58  ;;  %v9557_v45 = vadd.f32 %v7068_v21, %v8781_v32  ;;  %v3575_v32 = vadd.f32 %v9408_v55, %v9372_v11  ;;  %v3580_v21 = vadd.f32 %v9408_v55, %v9375_v50 }
 0x675   : > { %v3854_v6 = vpop.f32.mrf.mxu0 }
 0x676   : > { %v3693_v22 = vpop.f32.mrf.mxu1  ;;  %7075 = vtanh.f32 %v3853_v39 }
 0x677   : > { %v7070_v23 = vpop.eup %7069  ;;  %v3855_v52 = vpop.f32.mrf.mxu0 }
 0x678   : > { %v9554_v1 = vpop.f32.mrf.mxu1  ;;  %v3856_v40 = vadd.f32 %v3855_v52, %v3567_v41  ;;  %v9560_v2 = vadd.f32 %v7070_v23, %v8784_v31 }
 0x679   : > { %v3857_v18 = vpop.f32.mrf.mxu0 }
 0x67a   : > { %v3696_v58 = vpop.f32.mrf.mxu1  ;;  %7077 = vtanh.f32 %v3856_v40  ;;  %v4177_v29 = vpack.c.bf16 %v9560_v2, %v9557_v45 }
 0x67b   : > { %v3860_v38 = vpop.f32.mrf.mxu0  ;;  %v7072_v39 = vpop.eup %7071 }
 0x67c   : > { %v9564_v6 = vpop.f32.mrf.mxu1  ;;  %v3861_v34 = vadd.f32 %v3860_v38, %v3572_v26  ;;  %6512 = vmatprep.mubr.msk.bf16.mxu1 %vm1220_vm1, %v4177_v29  ;;  %v9574_v18 = vadd.f32 %v7072_v39, %v8798_v47  ;;  %v3583_v47 = vadd.f32 %v9408_v55, %v9378_v60  ;;  %v3588_v39 = vadd.f32 %v9408_v55, %v9381_v8 }
 0x67d   : > { %v3862_v22 = vpop.f32.mrf.mxu0 }
 0x67e   : > { %v3701_v41 = vpop.f32.mrf.mxu1  ;;  %7079 = vtanh.f32 %v3861_v34 }
 0x67f   : > { %v7074_v31 = vpop.eup %7073  ;;  %v3863_v23 = vpop.f32.mrf.mxu0 }
 0x680   : > { %v9571_v52 = vpop.f32.mrf.mxu1  ;;  %v3864_v40 = vadd.f32 %v3863_v23, %v3575_v32  ;;  %v9577_v26 = vadd.f32 %v7074_v31, %v8801_v61 }
 0x681   : > { %v3865_v58 = vpop.f32.mrf.mxu0 }
 0x682   : > { %v3704_v29 = vpop.f32.mrf.mxu1  ;;  %7081 = vtanh.f32 %v3864_v40  ;;  %v4178_v11 = vpack.c.bf16 %v9577_v26, %v9574_v18 }
 0x683   : > { %v3868_v38 = vpop.f32.mrf.mxu0  ;;  %v7076_v34 = vpop.eup %7075 }
 0x684   : > { %v9581_v22 = vpop.f32.mrf.mxu1  ;;  %v3869_v50 = vadd.f32 %v3868_v38, %v3580_v21  ;;  %6513 = vmatmul.mubr.msk.bf16.gmra.mxu1 %vm1220_vm1, %v4178_v11  ;;  %v9591_v58 = vadd.f32 %v7076_v34, %v8815_v62  ;;  %v3591_v62 = vadd.f32 %v9408_v55, %v9384_v56  ;;  %v3596_v34 = vadd.f32 %v9408_v55, %v9387_v49 }
 0x685   : > { %v3870_v41 = vpop.f32.mrf.mxu0 }
 0x686   : > { %v3709_v32 = vpop.f32.mrf.mxu1  ;;  %7083 = vtanh.f32 %v3869_v50  ;;  %10993 = vst [vmem:[#allocation67_spill] sm:$0xff] %v9591_v58 }
 0x687   : > { %v7078_v61 = vpop.eup %7077  ;;  %v3871_v31 = vpop.f32.mrf.mxu0 }
 0x688   : > { %v9588_v23 = vpop.f32.mrf.mxu1  ;;  %v3872_v40 = vadd.f32 %v3871_v31, %v3583_v47  ;;  %v9594_v21 = vadd.f32 %v7078_v61, %v8818_v51 }
 0x689   : > { %v3873_v29 = vpop.f32.mrf.mxu0 }
 0x68a   : > { %10994 = vst [vmem:[#allocation68_spill] sm:$0xff] %v9594_v21  ;;  %v3712_v11 = vpop.f32.mrf.mxu1  ;;  %7085 = vtanh.f32 %v3872_v40  ;;  %v4179_v60 = vpack.c.bf16 %v9594_v21, %v9591_v58 }
 0x68b   : > { %v3876_v38 = vpop.f32.mrf.mxu0  ;;  %v7080_v50 = vpop.eup %7079 }
 0x68c   : > { %v9598_v41 = vpop.f32.mrf.mxu1  ;;  %v3877_v8 = vadd.f32 %v3876_v38, %v3588_v39  ;;  %6516 = vmatprep.mubr.msk.bf16.mxu1 %vm1220_vm1, %v4179_v60  ;;  %v9608_v29 = vadd.f32 %v7080_v50, %v8832_v63  ;;  %v3599_v63 = vadd.f32 %v9408_v55, %v9390_v28  ;;  %v3604_v50 = vadd.f32 %v9408_v55, %v9393_v44 }
 0x68d   : > { %v3878_v32 = vpop.f32.mrf.mxu0 }
 0x68e   : > { %v3717_v47 = vpop.f32.mrf.mxu1  ;;  %7087 = vtanh.f32 %v3877_v8  ;;  %10995 = vst [vmem:[#allocation69_spill] sm:$0xff] %v9608_v29 }
 0x68f   : > { %v7082_v51 = vpop.eup %7081  ;;  %v3879_v61 = vpop.f32.mrf.mxu0 }
 0x690   : > { %v9605_v31 = vpop.f32.mrf.mxu1  ;;  %v3880_v40 = vadd.f32 %v3879_v61, %v3591_v62  ;;  %v9611_v39 = vadd.f32 %v7082_v51, %v8835_v20 }
 0x691   : > { %v3881_v11 = vpop.f32.mrf.mxu0 }
 0x692   : > { %10996 = vst [vmem:[#allocation70_spill] sm:$0xff] %v9611_v39  ;;  %v3720_v60 = vpop.f32.mrf.mxu1  ;;  %7089 = vtanh.f32 %v3880_v40  ;;  %v4180_v56 = vpack.c.bf16 %v9611_v39, %v9608_v29 }
 0x693   : > { %v3884_v38 = vpop.f32.mrf.mxu0  ;;  %v7084_v8 = vpop.eup %7083 }
 0x694   : > { %v9615_v32 = vpop.f32.mrf.mxu1  ;;  %v3885_v49 = vadd.f32 %v3884_v38, %v3596_v34  ;;  %6517 = vmatmul.mubr.msk.bf16.gmra.mxu1 %vm1220_vm1, %v4180_v56  ;;  %v9625_v11 = vadd.f32 %v7084_v8, %v8849_v7  ;;  %v3607_v7 = vadd.f32 %v9408_v55, %v9396_v43  ;;  %v3612_v8 = vadd.f32 %v9408_v55, %v9399_v42 }
 0x695   : > { %v3886_v47 = vpop.f32.mrf.mxu0 }
 0x696   : > { %v3725_v62 = vpop.f32.mrf.mxu1  ;;  %7091 = vtanh.f32 %v3885_v49  ;;  %10997 = vst [vmem:[#allocation71_spill] sm:$0xff] %v9625_v11 }
 0x697   : > { %v7086_v20 = vpop.eup %7085  ;;  %v3887_v51 = vpop.f32.mrf.mxu0 }
 0x698   : > { %v9622_v61 = vpop.f32.mrf.mxu1  ;;  %v3888_v40 = vadd.f32 %v3887_v51, %v3599_v63  ;;  %v9628_v34 = vadd.f32 %v7086_v20, %v8852_v30 }
 0x699   : > { %v3889_v60 = vpop.f32.mrf.mxu0 }
 0x69a   : > { %10998 = vst [vmem:[#allocation72_spill] sm:$0xff] %v9628_v34  ;;  %v3728_v56 = vpop.f32.mrf.mxu1  ;;  %7093 = vtanh.f32 %v3888_v40  ;;  %v4181_v28 = vpack.c.bf16 %v9628_v34, %v9625_v11  ;;  %v10999_v60 = vld [vmem:[#allocation52_spill] sm:$0xff] }
 0x69b   : > { %v3892_v38 = vpop.f32.mrf.mxu0  ;;  %v7088_v49 = vpop.eup %7087 }
 0x69c   : > { %v9632_v47 = vpop.f32.mrf.mxu1  ;;  %v3893_v44 = vadd.f32 %v3892_v38, %v3604_v50  ;;  %6520 = vmatprep.mubr.msk.bf16.mxu1 %vm1220_vm1, %v4181_v28  ;;  %v9642_v56 = vadd.f32 %v7088_v49, %v10999_v60  ;;  %v11001_v50 = vld [vmem:[#allocation53_spill] sm:$0xff] }
 0x69d   : > { %v3894_v62 = vpop.f32.mrf.mxu0  ;;  %v11003_v49 = vld [vmem:[#allocation61_spill] sm:$0xff] }
 0x69e   : > { %v3733_v63 = vpop.f32.mrf.mxu1  ;;  %7095 = vtanh.f32 %v3893_v44  ;;  %11000 = vst [vmem:[#allocation52_spill] sm:$0xff] %v9642_v56  ;;  %v3615_v60 = vadd.f32 %v9408_v55, %v11003_v49 }
 0x69f   : > { %v7090_v30 = vpop.eup %7089  ;;  %v3895_v20 = vpop.f32.mrf.mxu0 }
 0x6a0   : > { %v9639_v51 = vpop.f32.mrf.mxu1  ;;  %v3896_v40 = vadd.f32 %v3895_v20, %v3607_v7  ;;  %v9645_v28 = vadd.f32 %v7090_v30, %v11001_v50  ;;  %v11004_v50 = vld [vmem:[#allocation62_spill] sm:$0xff] }
 0x6a1   : > { %v3897_v38 = vpop.f32.mrf.mxu0 }
 0x6a2   : > { %11002 = vst [vmem:[#allocation53_spill] sm:$0xff] %v9645_v28  ;;  %v3736_v62 = vpop.f32.mrf.mxu1  ;;  %7097 = vtanh.f32 %v3896_v40  ;;  %v4182_v43 = vpack.c.bf16 %v9645_v28, %v9642_v56  ;;  %v3620_v38 = vadd.f32 %v9408_v55, %v11004_v50  ;;  %v11005_v56 = vld [vmem:[#allocation54_spill] sm:$0xff] }
 0x6a3   : > { %v3900_v63 = vpop.f32.mrf.mxu0  ;;  %v7092_v44 = vpop.eup %7091 }
 0x6a4   : > { %v9649_v34 = vpop.f32.mrf.mxu1  ;;  %v3901_v42 = vadd.f32 %v3900_v63, %v3612_v8  ;;  %6521 = vmatmul.mubr.msk.bf16.gmra.mxu1 %vm1220_vm1, %v4182_v43  ;;  %v9659_v11 = vadd.f32 %v7092_v44, %v11005_v56  ;;  %v11007_v8 = vld [vmem:[#allocation55_spill] sm:$0xff] }
 0x6a5   : > { %v3902_v7 = vpop.f32.mrf.mxu0  ;;  %v11009_v56 = vld [vmem:[#allocation63_spill] sm:$0xff] }
 0x6a6   : > { %v3741_v20 = vpop.f32.mrf.mxu1  ;;  %7099 = vtanh.f32 %v3901_v42  ;;  %11006 = vst [vmem:[#allocation61_spill] sm:$0xff] %v9659_v11  ;;  %v3623_v44 = vadd.f32 %v9408_v55, %v11009_v56 }
 0x6a7   : > { %v7094_v30 = vpop.eup %7093  ;;  %v3903_v40 = vpop.f32.mrf.mxu0 }
 0x6a8   : > { %v9656_v62 = vpop.f32.mrf.mxu1  ;;  %v3904_v28 = vadd.f32 %v3903_v40, %v3615_v60  ;;  %v9662_v43 = vadd.f32 %v7094_v30, %v11007_v8  ;;  %v11010_v8 = vld [vmem:[#allocation64_spill] sm:$0xff] }
 0x6a9   : > { %v3905_v63 = vpop.f32.mrf.mxu0 }
 0x6aa   : > { %11008 = vst [vmem:[#allocation62_spill] sm:$0xff] %v9662_v43  ;;  %v3744_v7 = vpop.f32.mrf.mxu1  ;;  %7101 = vtanh.f32 %v3904_v28  ;;  %v4183_v20 = vpack.c.bf16 %v9662_v43, %v9659_v11  ;;  %v3628_v63 = vadd.f32 %v9408_v55, %v11010_v8  ;;  %v11011_v11 = vld [vmem:[#allocation56_spill] sm:$0xff] }
 0x6ab   : > { %v3908_v49 = vpop.f32.mrf.mxu0  ;;  %v7096_v42 = vpop.eup %7095 }
 0x6ac   : > { %v9666_v39 = vpop.f32.mrf.mxu1  ;;  %v3909_v50 = vadd.f32 %v3908_v49, %v3620_v38  ;;  %6524 = vmatprep.mubr.msk.bf16.mxu1 %vm1220_vm1, %v4183_v20  ;;  %v9676_v29 = vadd.f32 %v7096_v42, %v11011_v11  ;;  %v11012_v38 = vld [vmem:[#allocation57_spill] sm:$0xff]  ;;  %v3636_v42 = vadd.f32 %v9408_v55, %v9425_v13 }
 0x6ad   : > { %v3910_v60 = vpop.f32.mrf.mxu0 }
 0x6ae   : > { %v3749_v40 = vpop.f32.mrf.mxu1  ;;  %7103 = vtanh.f32 %v3909_v50  ;;  %v11014_v50 = vld [vmem:[#allocation65_spill] sm:$0xff] }
 0x6af   : > { %v7098_v30 = vpop.eup %7097  ;;  %v3911_v28 = vpop.f32.mrf.mxu0 }
 0x6b0   : > { %v9673_v7 = vpop.f32.mrf.mxu1  ;;  %v3912_v43 = vadd.f32 %v3911_v28, %v3623_v44  ;;  %v9679_v20 = vadd.f32 %v7098_v30, %v11012_v38  ;;  %v3631_v44 = vadd.f32 %v9408_v55, %v11014_v50 }
 0x6b1   : > { %v3913_v49 = vpop.f32.mrf.mxu0 }
 0x6b2   : > { %11013 = vst [vmem:[#allocation54_spill] sm:$0xff] %v9679_v20  ;;  %v3752_v60 = vpop.f32.mrf.mxu1  ;;  %7105 = vtanh.f32 %v3912_v43  ;;  %v4184_v40 = vpack.c.bf16 %v9679_v20, %v9676_v29  ;;  %v11015_v43 = vld [vmem:[#allocation58_spill] sm:$0xff]  ;;  %v11017_v49 = vld [vmem:[#allocation59_spill] sm:$0xff] }
 0x6b3   : > { %v3916_v56 = vpop.f32.mrf.mxu0  ;;  %v7100_v8 = vpop.eup %7099  ;;  %v11019_v20 = vld [vmem:[#allocation66_spill] sm:$0xff] }
 0x6b4   : > { %v3917_v21 = vadd.f32 %v3916_v56, %v3628_v63  ;;  %6525 = vmatmul.mubr.msk.bf16.gmra.mxu1 %vm1220_vm1, %v4184_v40  ;;  %v9689_v38 = vadd.f32 %v7100_v8, %v11015_v43  ;;  %v3644_v8 = vadd.f32 %v9408_v55, %v9435_v35 }
 0x6b5   : > { %v3918_v58 = vpop.f32.mrf.mxu0 }
 0x6b6   : > { %7107 = vtanh.f32 %v3917_v21  ;;  %11016 = vst [vmem:[#allocation55_spill] sm:$0xff] %v9689_v38  ;;  %v3639_v21 = vadd.f32 %v9408_v55, %v11019_v20 }
 0x6b7   : > { %v7102_v11 = vpop.eup %7101  ;;  %v3919_v30 = vpop.f32.mrf.mxu0 }
 0x6b8   : > { %v3920_v28 = vadd.f32 %v3919_v30, %v3631_v44  ;;  %v9692_v60 = vadd.f32 %v7102_v11, %v11017_v49  ;;  %v11022_v49 = vld [vmem:[#allocation19_spill] sm:$0xff] }
 0x6b9   : > { %v3921_v63 = vpop.f32.mrf.mxu0 }
 0x6ba   : > { %11018 = vst [vmem:[#allocation63_spill] sm:$0xff] %v9692_v60  ;;  %7109 = vtanh.f32 %v3920_v28  ;;  %v4185_v58 = vpack.c.bf16 %v9692_v60, %v9689_v38  ;;  %v11020_v28 = vld [vmem:[#allocation60_spill] sm:$0xff] }
 0x6bb   : > { %v3924_v40 = vpop.f32.mrf.mxu0  ;;  %v7104_v50 = vpop.eup %7103 }
 0x6bc   : > { %v3925_v56 = vadd.f32 %v3924_v40, %v3636_v42  ;;  %6528 = vmatprep.mubr.msk.bf16.mxu1 %vm1220_vm1, %v4185_v58  ;;  %v9702_v43 = vadd.f32 %v7104_v50, %v11020_v28  ;;  %v3652_v50 = vadd.f32 %v9408_v55, %v9453_v59 }
 0x6bd   : > { %v3926_v13 = vpop.f32.mrf.mxu0 }
 0x6be   : > { %7111 = vtanh.f32 %v3925_v56  ;;  %11021 = vst [vmem:[#allocation64_spill] sm:$0xff] %v9702_v43  ;;  %v3647_v56 = vadd.f32 %v9408_v55, %v9442_v12 }
 0x6bf   : > { %v7106_v44 = vpop.eup %7105  ;;  %v3927_v11 = vpop.f32.mrf.mxu0 }
 0x6c0   : > { %v3928_v30 = vadd.f32 %v3927_v11, %v3639_v21  ;;  %v9705_v63 = vadd.f32 %v7106_v44, %v11022_v49  ;;  %v11026_v49 = vld [vmem:[#allocation22_spill] sm:$0xff] }
 0x6c1   : > { %v3929_v42 = vpop.f32.mrf.mxu0 }
 0x6c2   : > { %11023 = vst [vmem:[#allocation56_spill] sm:$0xff] %v9705_v63  ;;  %7113 = vtanh.f32 %v3928_v30  ;;  %v4186_v58 = vpack.c.bf16 %v9705_v63, %v9702_v43  ;;  %v11024_v30 = vld [vmem:[#allocation21_spill] sm:$0xff] }
 0x6c3   : > { %v3932_v40 = vpop.f32.mrf.mxu0  ;;  %v7108_v13 = vpop.eup %7107 }
 0x6c4   : > { %v3933_v20 = vadd.f32 %v3932_v40, %v3644_v8  ;;  %6529 = vmatmul.mubr.msk.bf16.gmra.mxu1 %vm1220_vm1, %v4186_v58  ;;  %v9715_v28 = vadd.f32 %v7108_v13, %v11024_v30  ;;  %v3660_v13 = vadd.f32 %v9408_v55, %v9472_v48 }
 0x6c5   : > { %v3934_v35 = vpop.f32.mrf.mxu0 }
 0x6c6   : > { %7115 = vtanh.f32 %v3933_v20  ;;  %11025 = vst [vmem:[#allocation57_spill] sm:$0xff] %v9715_v28  ;;  %v3655_v20 = vadd.f32 %v9408_v55, %v9461_v27 }
 0x6c7   : > { %v7110_v21 = vpop.eup %7109  ;;  %v3935_v44 = vpop.f32.mrf.mxu0 }
 0x6c8   : > { %v3936_v11 = vadd.f32 %v3935_v44, %v3647_v56  ;;  %v9718_v42 = vadd.f32 %v7110_v21, %v11026_v49  ;;  %v11030_v49 = vld [vmem:[#allocation20_spill] sm:$0xff] }
 0x6c9   : > { %v3937_v8 = vpop.f32.mrf.mxu0 }
 0x6ca   : > { %11027 = vst [vmem:[#allocation65_spill] sm:$0xff] %v9718_v42  ;;  %7117 = vtanh.f32 %v3936_v11  ;;  %v4187_v58 = vpack.c.bf16 %v9718_v42, %v9715_v28  ;;  %v11028_v11 = vld [vmem:[#allocation23_spill] sm:$0xff]  ;;  %v7559_v42 = vld [vmem:[%s8037_s9 + $0x32c] ss:$16 sps:$4 sm:$0xff]  }
 0x6cb   : > { %v3940_v40 = vpop.f32.mrf.mxu0  ;;  %v7112_v35 = vpop.eup %7111 }
 0x6cc   : > { %v3941_v12 = vadd.f32 %v3940_v40, %v3652_v50  ;;  %6532 = vmatprep.mubr.msk.bf16.mxu1 %vm1220_vm1, %v4187_v58  ;;  %v9728_v30 = vadd.f32 %v7112_v35, %v11028_v11  ;;  %v3668_v35 = vadd.f32 %v9408_v55, %v9491_v4 }
 0x6cd   : > { %v3942_v59 = vpop.f32.mrf.mxu0 }
 0x6ce   : > { %7119 = vtanh.f32 %v3941_v12  ;;  %11029 = vst [vmem:[#allocation58_spill] sm:$0xff] %v9728_v30  ;;  %v3663_v12 = vadd.f32 %v9408_v55, %v9480_v17 }
 0x6cf   : > { %v7114_v56 = vpop.eup %7113  ;;  %v3943_v21 = vpop.f32.mrf.mxu0 }
 0x6d0   : > { %v3944_v44 = vadd.f32 %v3943_v21, %v3655_v20  ;;  %v9731_v8 = vadd.f32 %v7114_v56, %v11030_v49  ;;  %v11034_v49 = vld [vmem:[#allocation26_spill] sm:$0xff] }
 0x6d1   : > { %v3945_v50 = vpop.f32.mrf.mxu0 }
 0x6d2   : > { %11031 = vst [vmem:[#allocation59_spill] sm:$0xff] %v9731_v8  ;;  %7121 = vtanh.f32 %v3944_v44  ;;  %v4188_v58 = vpack.c.bf16 %v9731_v8, %v9728_v30  ;;  %v11032_v44 = vld [vmem:[#allocation25_spill] sm:$0xff] }
 0x6d3   : > { %v3948_v40 = vpop.f32.mrf.mxu0  ;;  %v7116_v59 = vpop.eup %7115  ;;  %v7558_v30 = vld [vmem:[%s8037_s9 + $0x308] ss:$16 sps:$4 sm:$0xff]  }
 0x6d4   : > { %v3949_v27 = vadd.f32 %v3948_v40, %v3660_v13  ;;  %6533 = vmatmul.mubr.msk.bf16.gmra.mxu1 %vm1220_vm1, %v4188_v58  ;;  %v9741_v11 = vadd.f32 %v7116_v59, %v11032_v44  ;;  %v3676_v59 = vadd.f32 %v9408_v55, %v9510_v36 }
 0x6d5   : > { %v3950_v48 = vpop.f32.mrf.mxu0 }
 0x6d6   : > { %7123 = vtanh.f32 %v3949_v27  ;;  %11033 = vst [vmem:[#allocation66_spill] sm:$0xff] %v9741_v11  ;;  %v3671_v27 = vadd.f32 %v9408_v55, %v9499_v9 }
 0x6d7   : > { %v7118_v20 = vpop.eup %7117  ;;  %v3951_v56 = vpop.f32.mrf.mxu0 }
 0x6d8   : > { %v3952_v21 = vadd.f32 %v3951_v56, %v3663_v12  ;;  %v9744_v50 = vadd.f32 %v7118_v20, %v11034_v49  ;;  %v11038_v49 = vld [vmem:[#allocation24_spill] sm:$0xff] }
 0x6d9   : > { %v3953_v13 = vpop.f32.mrf.mxu0 }
 0x6da   : > { %11035 = vst [vmem:[#allocation60_spill] sm:$0xff] %v9744_v50  ;;  %7125 = vtanh.f32 %v3952_v21  ;;  %v4189_v58 = vpack.c.bf16 %v9744_v50, %v9741_v11  ;;  %v11036_v21 = vld [vmem:[#allocation27_spill] sm:$0xff] }
 0x6db   : > { %v3956_v40 = vpop.f32.mrf.mxu0  ;;  %v7120_v48 = vpop.eup %7119  ;;  %v7556_v50 = vld [vmem:[%s8037_s9 + $0x2e8] ss:$16 sps:$4 sm:$0xff]  }
 0x6dc   : > { %v3957_v17 = vadd.f32 %v3956_v40, %v3668_v35  ;;  %6536 = vmatprep.mubr.msk.bf16.mxu1 %vm1220_vm1, %v4189_v58  ;;  %v9754_v44 = vadd.f32 %v7120_v48, %v11036_v21  ;;  %v3684_v48 = vadd.f32 %v9408_v55, %v9529_v46 }
 0x6dd   : > { %v3958_v4 = vpop.f32.mrf.mxu0 }
 0x6de   : > { %7127 = vtanh.f32 %v3957_v17  ;;  %11037 = vst [vmem:[#allocation19_spill] sm:$0xff] %v9754_v44  ;;  %v3679_v17 = vadd.f32 %v9408_v55, %v9518_v16 }
 0x6df   : > { %v7122_v12 = vpop.eup %7121  ;;  %v3959_v20 = vpop.f32.mrf.mxu0 }
 0x6e0   : > { %v3960_v56 = vadd.f32 %v3959_v20, %v3671_v27  ;;  %v9757_v13 = vadd.f32 %v7122_v12, %v11038_v49  ;;  %v11042_v49 = vld [vmem:[#allocation30_spill] sm:$0xff] }
 0x6e1   : > { %v3961_v35 = vpop.f32.mrf.mxu0 }
 0x6e2   : > { %11039 = vst [vmem:[#allocation21_spill] sm:$0xff] %v9757_v13  ;;  %7129 = vtanh.f32 %v3960_v56  ;;  %v4190_v58 = vpack.c.bf16 %v9757_v13, %v9754_v44  ;;  %v11040_v56 = vld [vmem:[#allocation29_spill] sm:$0xff] }
 0x6e3   : > { %v3964_v40 = vpop.f32.mrf.mxu0  ;;  %v7124_v4 = vpop.eup %7123  ;;  %v7554_v13 = vld [vmem:[%s8037_s9 + $0x2c8] ss:$16 sps:$4 sm:$0xff]  }
 0x6e4   : > { %v3965_v9 = vadd.f32 %v3964_v40, %v3676_v59  ;;  %6537 = vmatmul.mubr.msk.bf16.gmra.mxu1 %vm1220_vm1, %v4190_v58  ;;  %v9767_v21 = vadd.f32 %v7124_v4, %v11040_v56  ;;  %v3692_v4 = vadd.f32 %v9408_v55, %v9547_v3 }
 0x6e5   : > { %v3966_v36 = vpop.f32.mrf.mxu0 }
 0x6e6   : > { %7131 = vtanh.f32 %v3965_v9  ;;  %11041 = vst [vmem:[#allocation22_spill] sm:$0xff] %v9767_v21  ;;  %v3687_v9 = vadd.f32 %v9408_v55, %v9537_v10 }
 0x6e7   : > { %v7126_v27 = vpop.eup %7125  ;;  %v3967_v12 = vpop.f32.mrf.mxu0 }
 0x6e8   : > { %v3968_v20 = vadd.f32 %v3967_v12, %v3679_v17  ;;  %v9770_v35 = vadd.f32 %v7126_v27, %v11042_v49  ;;  %v11046_v49 = vld [vmem:[#allocation28_spill] sm:$0xff] }
 0x6e9   : > { %v3969_v59 = vpop.f32.mrf.mxu0 }
 0x6ea   : > { %11043 = vst [vmem:[#allocation23_spill] sm:$0xff] %v9770_v35  ;;  %7133 = vtanh.f32 %v3968_v20  ;;  %v4191_v58 = vpack.c.bf16 %v9770_v35, %v9767_v21  ;;  %v11044_v20 = vld [vmem:[#allocation31_spill] sm:$0xff] }
 0x6eb   : > { %v3972_v40 = vpop.f32.mrf.mxu0  ;;  %v7128_v36 = vpop.eup %7127  ;;  %v7552_v35 = vld [vmem:[%s8037_s9 + $0x2a8] ss:$16 sps:$4 sm:$0xff]  }
 0x6ec   : > { %v3973_v16 = vadd.f32 %v3972_v40, %v3684_v48  ;;  %6540 = vmatprep.mubr.msk.bf16.mxu1 %vm1220_vm1, %v4191_v58  ;;  %v9780_v56 = vadd.f32 %v7128_v36, %v11044_v20  ;;  %v3700_v36 = vadd.f32 %v9408_v55, %v9564_v6 }
 0x6ed   : > { %v3974_v46 = vpop.f32.mrf.mxu0 }
 0x6ee   : > { %7135 = vtanh.f32 %v3973_v16  ;;  %11045 = vst [vmem:[#allocation20_spill] sm:$0xff] %v9780_v56  ;;  %v3695_v16 = vadd.f32 %v9408_v55, %v9554_v1 }
 0x6ef   : > { %v7130_v17 = vpop.eup %7129  ;;  %v3975_v27 = vpop.f32.mrf.mxu0 }
 0x6f0   : > { %v3976_v12 = vadd.f32 %v3975_v27, %v3687_v9  ;;  %v9783_v59 = vadd.f32 %v7130_v17, %v11046_v49  ;;  %v11050_v49 = vld [vmem:[#allocation34_spill] sm:$0xff] }
 0x6f1   : > { %v3977_v48 = vpop.f32.mrf.mxu0 }
 0x6f2   : > { %11047 = vst [vmem:[#allocation25_spill] sm:$0xff] %v9783_v59  ;;  %7137 = vtanh.f32 %v3976_v12  ;;  %v4192_v58 = vpack.c.bf16 %v9783_v59, %v9780_v56  ;;  %v11048_v12 = vld [vmem:[#allocation33_spill] sm:$0xff] }
 0x6f3   : > { %v3980_v40 = vpop.f32.mrf.mxu0  ;;  %v7132_v46 = vpop.eup %7131  ;;  %v7550_v59 = vld [vmem:[%s8037_s9 + $0x288] ss:$16 sps:$4 sm:$0xff]  }
 0x6f4   : > { %v3981_v10 = vadd.f32 %v3980_v40, %v3692_v4  ;;  %6541 = vmatmul.mubr.msk.bf16.gmra.mxu1 %vm1220_vm1, %v4192_v58  ;;  %v9793_v20 = vadd.f32 %v7132_v46, %v11048_v12  ;;  %v3708_v46 = vadd.f32 %v9408_v55, %v9581_v22 }
 0x6f5   : > { %v3982_v3 = vpop.f32.mrf.mxu0 }
 0x6f6   : > { %7139 = vtanh.f32 %v3981_v10  ;;  %11049 = vst [vmem:[#allocation26_spill] sm:$0xff] %v9793_v20  ;;  %v3703_v10 = vadd.f32 %v9408_v55, %v9571_v52 }
 0x6f7   : > { %v7134_v9 = vpop.eup %7133  ;;  %v3983_v17 = vpop.f32.mrf.mxu0 }
 0x6f8   : > { %v3984_v27 = vadd.f32 %v3983_v17, %v3695_v16  ;;  %v9796_v48 = vadd.f32 %v7134_v9, %v11050_v49  ;;  %v11054_v49 = vld [vmem:[#allocation32_spill] sm:$0xff] }
 0x6f9   : > { %v3985_v4 = vpop.f32.mrf.mxu0 }
 0x6fa   : > { %11051 = vst [vmem:[#allocation27_spill] sm:$0xff] %v9796_v48  ;;  %7141 = vtanh.f32 %v3984_v27  ;;  %v4193_v58 = vpack.c.bf16 %v9796_v48, %v9793_v20  ;;  %v11052_v27 = vld [vmem:[#allocation35_spill] sm:$0xff] }
 0x6fb   : > { %v3988_v40 = vpop.f32.mrf.mxu0  ;;  %v7136_v3 = vpop.eup %7135  ;;  %v7548_v48 = vld [vmem:[%s8037_s9 + $0x268] ss:$16 sps:$4 sm:$0xff]  }
 0x6fc   : > { %v3989_v1 = vadd.f32 %v3988_v40, %v3700_v36  ;;  %6544 = vmatprep.mubr.msk.bf16.mxu1 %vm1220_vm1, %v4193_v58  ;;  %v9806_v12 = vadd.f32 %v7136_v3, %v11052_v27  ;;  %v3716_v3 = vadd.f32 %v9408_v55, %v9598_v41 }
 0x6fd   : > { %v3990_v6 = vpop.f32.mrf.mxu0 }
 0x6fe   : > { %7143 = vtanh.f32 %v3989_v1  ;;  %11053 = vst [vmem:[#allocation24_spill] sm:$0xff] %v9806_v12  ;;  %v3711_v1 = vadd.f32 %v9408_v55, %v9588_v23 }
 0x6ff   : > { %v7138_v16 = vpop.eup %7137  ;;  %v3991_v9 = vpop.f32.mrf.mxu0 }
 0x700   : > { %v3992_v17 = vadd.f32 %v3991_v9, %v3703_v10  ;;  %v9809_v4 = vadd.f32 %v7138_v16, %v11054_v49  ;;  %v11058_v49 = vld [vmem:[#allocation38_spill] sm:$0xff] }
 0x701   : > { %v3993_v36 = vpop.f32.mrf.mxu0 }
 0x702   : > { %11055 = vst [vmem:[#allocation29_spill] sm:$0xff] %v9809_v4  ;;  %7145 = vtanh.f32 %v3992_v17  ;;  %v4194_v58 = vpack.c.bf16 %v9809_v4, %v9806_v12  ;;  %v11056_v17 = vld [vmem:[#allocation37_spill] sm:$0xff] }
 0x703   : > { %v3996_v40 = vpop.f32.mrf.mxu0  ;;  %v7140_v6 = vpop.eup %7139  ;;  %v7546_v4 = vld [vmem:[%s8037_s9 + $0x248] ss:$16 sps:$4 sm:$0xff]  }
 0x704   : > { %v3997_v52 = vadd.f32 %v3996_v40, %v3708_v46  ;;  %6545 = vmatmul.mubr.msk.bf16.gmra.mxu1 %vm1220_vm1, %v4194_v58  ;;  %v9819_v27 = vadd.f32 %v7140_v6, %v11056_v17  ;;  %v3724_v6 = vadd.f32 %v9408_v55, %v9615_v32  ;;  %v7445_v32 = vld [vmem:[#allocation10 + $0x1] ss:$0 sm:$0xff] }
 0x705   : > { %v3998_v22 = vpop.f32.mrf.mxu0 }
 0x706   : > { %7147 = vtanh.f32 %v3997_v52  ;;  %11057 = vst [vmem:[#allocation30_spill] sm:$0xff] %v9819_v27  ;;  %v3719_v52 = vadd.f32 %v9408_v55, %v9605_v31 }
 0x707   : > { %v7142_v10 = vpop.eup %7141  ;;  %v3999_v16 = vpop.f32.mrf.mxu0 }
 0x708   : > { %v4000_v9 = vadd.f32 %v3999_v16, %v3711_v1  ;;  %v9822_v36 = vadd.f32 %v7142_v10, %v11058_v49  ;;  %v11062_v49 = vld [vmem:[#allocation36_spill] sm:$0xff] }
 0x709   : > { %v4001_v46 = vpop.f32.mrf.mxu0 }
 0x70a   : > { %11059 = vst [vmem:[#allocation31_spill] sm:$0xff] %v9822_v36  ;;  %7149 = vtanh.f32 %v4000_v9  ;;  %v4195_v58 = vpack.c.bf16 %v9822_v36, %v9819_v27  ;;  %v11060_v9 = vld [vmem:[#allocation39_spill] sm:$0xff]  ;;  %v11088_v36 = vmov 0  }
 0x70b   : > { %v4004_v40 = vpop.f32.mrf.mxu0  ;;  %v7144_v22 = vpop.eup %7143 }
 0x70c   : > { %v4005_v23 = vadd.f32 %v4004_v40, %v3716_v3  ;;  %6548 = vmatprep.mubr.msk.bf16.mxu1 %vm1220_vm1, %v4195_v58  ;;  %v9832_v17 = vadd.f32 %v7144_v22, %v11060_v9  ;;  %v3732_v22 = vadd.f32 %v7445_v32, %v9632_v47  ;;  %v11064_v9 = vld [vmem:[#allocation41_spill] sm:$0xff] }
 0x70d   : > { %v4006_v41 = vpop.f32.mrf.mxu0 }
 0x70e   : > { %7151 = vtanh.f32 %v4005_v23  ;;  %11061 = vst [vmem:[#allocation28_spill] sm:$0xff] %v9832_v17  ;;  %v3727_v23 = vadd.f32 %v7445_v32, %v9622_v61 }
 0x70f   : > { %v7146_v1 = vpop.eup %7145  ;;  %v4007_v10 = vpop.f32.mrf.mxu0 }
 0x710   : > { %v4008_v16 = vadd.f32 %v4007_v10, %v3719_v52  ;;  %v9835_v46 = vadd.f32 %v7146_v1, %v11062_v49  ;;  %v11066_v49 = vld [vmem:[#allocation42_spill] sm:$0xff] }
 0x711   : > { %v4009_v3 = vpop.f32.mrf.mxu0 }
 0x712   : > { %11063 = vst [vmem:[#allocation33_spill] sm:$0xff] %v9835_v46  ;;  %7153 = vtanh.f32 %v4008_v16  ;;  %v4196_v58 = vpack.c.bf16 %v9835_v46, %v9832_v17 }
 0x713   : > { %v4012_v40 = vpop.f32.mrf.mxu0  ;;  %v7148_v41 = vpop.eup %7147 }
 0x714   : > { %v4013_v31 = vadd.f32 %v4012_v40, %v3724_v6  ;;  %6549 = vmatmul.mubr.msk.bf16.gmra.mxu1 %vm1220_vm1, %v4196_v58  ;;  %v9843_v16 = vadd.f32 %v7148_v41, %v11064_v9  ;;  %v9848_v40 = vpop.f32.mrf.mxu1 }
 0x715   : > { %v4014_v55 = vpop.f32.mrf.mxu0 }
 0x716   : > { %7155 = vtanh.f32 %v4013_v31  ;;  %11065 = vst [vmem:[#allocation34_spill] sm:$0xff] %v9843_v16  ;;  %v9854_v41 = vpop.f32.mrf.mxu1 }
 0x717   : > { %v7150_v52 = vpop.eup %7149  ;;  %v4015_v10 = vpop.f32.mrf.mxu0 }
 0x718   : > { %v4016_v1 = vadd.f32 %v4015_v10, %v3727_v23  ;;  %v9846_v3 = vadd.f32 %v7150_v52, %v11066_v49  ;;  %v3735_v23 = vadd.f32 %v7445_v32, %v9639_v51  ;;  %v3740_v52 = vadd.f32 %v7445_v32, %v9649_v34 }
 0x719   : > { %v4017_v6 = vpop.f32.mrf.mxu0 }
 0x71a   : > { %11067 = vst [vmem:[#allocation35_spill] sm:$0xff] %v9846_v3  ;;  %7157 = vtanh.f32 %v4016_v1  ;;  %v4197_v58 = vpack.c.bf16 %v9846_v3, %v9843_v16  ;;  %v11068_v1 = vld [vmem:[#allocation43_spill] sm:$0xff]  ;;  %v11070_v3 = vld [vmem:[#allocation40_spill] sm:$0xff] }
 0x71b   : > { %v4020_v61 = vpop.f32.mrf.mxu0  ;;  %v7152_v47 = vpop.eup %7151 }
 0x71c   : > { %v4021_v55 = vadd.f32 %v4020_v61, %v3732_v22  ;;  %6552 = vmatprep.mubr.msk.bf16.mxu1 %vm1220_vm1, %v4197_v58  ;;  %v9858_v6 = vadd.f32 %v7152_v47, %v11068_v1  ;;  %v9863_v58 = vpop.f32.mrf.mxu1 }
 0x71d   : > { %v4022_v31 = vpop.f32.mrf.mxu0 }
 0x71e   : > { %7159 = vtanh.f32 %v4021_v55  ;;  %11069 = vst [vmem:[#allocation32_spill] sm:$0xff] %v9858_v6  ;;  %v9869_v47 = vpop.f32.mrf.mxu1 }
 0x71f   : > { %v7154_v10 = vpop.eup %7153  ;;  %v4023_v9 = vpop.f32.mrf.mxu0 }
 0x720   : > { %v4024_v49 = vadd.f32 %v4023_v9, %v3735_v23  ;;  %v9861_v16 = vadd.f32 %v7154_v10, %v11070_v3  ;;  %v3743_v23 = vadd.f32 %v7445_v32, %v9656_v62  ;;  %v3748_v3 = vadd.f32 %v7445_v32, %v9666_v39 }
 0x721   : > { %v4025_v22 = vpop.f32.mrf.mxu0 }
 0x722   : > { %11071 = vst [vmem:[#allocation37_spill] sm:$0xff] %v9861_v16  ;;  %7161 = vtanh.f32 %v4024_v49  ;;  %v4198_v51 = vpack.c.bf16 %v9861_v16, %v9858_v6  ;;  %v11072_v22 = vld [vmem:[#allocation45_spill] sm:$0xff]  ;;  %v11074_v16 = vld [vmem:[#allocation46_spill] sm:$0xff] }
 0x723   : > { %v4028_v61 = vpop.f32.mrf.mxu0  ;;  %v7156_v34 = vpop.eup %7155 }
 0x724   : > { %v4029_v31 = vadd.f32 %v4028_v61, %v3740_v52  ;;  %6553 = vmatmul.mubr.msk.bf16.gmra.mxu1 %vm1220_vm1, %v4198_v51  ;;  %v6506_v1 = vpop.f32.mrf.mxu1  ;;  %v9873_v46 = vadd.f32 %v7156_v34, %v11072_v22 }
 0x725   : > { %v4030_v55 = vpop.f32.mrf.mxu0 }
 0x726   : > { %7163 = vtanh.f32 %v4029_v31  ;;  %11073 = vst [vmem:[#allocation38_spill] sm:$0xff] %v9873_v46  ;;  %v4366_v55 = vpop.f32.mrf.mxu1 }
 0x727   : > { %v7158_v9 = vpop.eup %7157  ;;  %v4031_v10 = vpop.f32.mrf.mxu0 }
 0x728   : > { %v4032_v49 = vadd.f32 %v4031_v10, %v3743_v23  ;;  %v9876_v52 = vadd.f32 %v7158_v9, %v11074_v16  ;;  %v3751_v23 = vadd.f32 %v7445_v32, %v9673_v7  ;;  %v6507_v22 = vpop.f32.mrf.mxu1  ;;  %v11076_v9 = vld [vmem:[#allocation47_spill] sm:$0xff] }
 0x729   : > { %v4033_v51 = vpop.f32.mrf.mxu0 }
 0x72a   : > { %11075 = vst [vmem:[#allocation39_spill] sm:$0xff] %v9876_v52  ;;  %7165 = vtanh.f32 %v4032_v49  ;;  %v4199_v62 = vpack.c.bf16 %v9876_v52, %v9873_v46  ;;  %v11078_v49 = vld [vmem:[#allocation44_spill] sm:$0xff] }
 0x72b   : > { %v4036_v61 = vpop.f32.mrf.mxu0  ;;  %v7160_v39 = vpop.eup %7159 }
 0x72c   : > { %v4037_v6 = vadd.f32 %v4036_v61, %v3748_v3  ;;  %6556 = vmatprep.mubr.msk.bf16.mxu1 %vm1220_vm1, %v4199_v62  ;;  %v9883_v51 = vadd.f32 %v7160_v39, %v11076_v9  ;;  %v4369_v62 = vpop.f32.mrf.mxu1  ;;  %v11082_v39 = vld [vmem:[#allocation50_spill] sm:$0xff] }
 0x72d   : > { %v4038_v31 = vpop.f32.mrf.mxu0 }
 0x72e   : > { %7167 = vtanh.f32 %v4037_v6  ;;  %11077 = vst [vmem:[#allocation36_spill] sm:$0xff] %v9883_v51  ;;  %v11080_v6 = vld [vmem:[#allocation49_spill] sm:$0xff] }
 0x72f   : > { %v7162_v10 = vpop.eup %7161  ;;  %v4039_v34 = vpop.f32.mrf.mxu0 }
 0x730   : > { %v4040_v16 = vadd.f32 %v4039_v34, %v3751_v23  ;;  %v9886_v17 = vadd.f32 %v7162_v10, %v11078_v49  ;;  %v11084_v49 = vld [vmem:[#allocation51_spill] sm:$0xff] }
 0x731   : > { %v4041_v52 = vpop.f32.mrf.mxu0 }
 0x732   : > { %11079 = vst [vmem:[#allocation41_spill] sm:$0xff] %v9886_v17  ;;  %7169 = vtanh.f32 %v4040_v16  ;;  %v4200_v3 = vpack.c.bf16 %v9886_v17, %v9883_v51  ;;  %v11086_v17 = vld [vmem:[#allocation48_spill] sm:$0xff] }
 0x733   : > { %v7164_v7 = vpop.eup %7163 }
 0x734   : > { %6557 = vmatmul.mubr.msk.bf16.gmra.mxu1 %vm1220_vm1, %v4200_v3  ;;  %v6510_v32 = vpop.f32.mrf.mxu1  ;;  %v9892_v31 = vadd.f32 %v7164_v7, %v11080_v6 }
 0x736   : > { %11081 = vst [vmem:[#allocation42_spill] sm:$0xff] %v9892_v31  ;;  %v4382_v10 = vpop.f32.mrf.mxu1 }
 0x737   : > { %v7166_v61 = vpop.eup %7165 }
 0x738   : > { %v9895_v23 = vadd.f32 %v7166_v61, %v11082_v39  ;;  %v6511_v16 = vpop.f32.mrf.mxu1  ;;  %v7446_v39 = vld [vmem:[%s8037_s9 + $0xc] ss:$16 sps:$4 sm:$0xff]  }
 0x73a   : > { %11083 = vst [vmem:[#allocation43_spill] sm:$0xff] %v9895_v23  ;;  %v4201_v52 = vpack.c.bf16 %v9895_v23, %v9892_v31  ;;  %v4385_v7 = vpop.f32.mrf.mxu1 }
 0x73b   : > { %v7168_v34 = vpop.eup %7167 }
 0x73c   : > { %6560 = vmatprep.mubr.msk.bf16.mxu1 %vm1220_vm1, %v4201_v52  ;;  %v9901_v3 = vadd.f32 %v7168_v34, %v11084_v49  ;;  %v4608_v49 = vpack.c.bf16 %v6507_v22, %v6506_v1 }
 0x73e   : > { %11085 = vst [vmem:[#allocation40_spill] sm:$0xff] %v9901_v3 }
 0x73f   : > { %v7170_v9 = vpop.eup %7169 }
 0x740   : > { %v9904_v51 = vadd.f32 %v7170_v9, %v11086_v17  ;;  %v4610_v17 = vpack.c.bf16 %v6511_v16, %v6510_v32  ;;  %v4609_v9 = vpack.c.bf16 %v4385_v7, %v4382_v10 }
 0x742   : > { %11087 = vst [vmem:[#allocation45_spill] sm:$0xff] %v9904_v51  ;;  %v4202_v61 = vpack.c.bf16 %v9904_v51, %v9901_v3 }
 0x744   : > { %v6514_v6 = vpop.f32.mrf.mxu1  ;;  %6561 = vmatmul.mubr.msk.bf16.gmra.mxu1 %vm1220_vm1, %v4202_v61 }
 0x745   : > { %4966 = vmatprep.mubr.bf16.mxu1 %v7446_v39 }
 0x746   : > { %v4398_v23 = vpop.f32.mrf.mxu1 }
 0x748   : > { %v6515_v52 = vpop.f32.mrf.mxu1 }
 0x749   : > { %v4612_v31 = vpack.c.bf16 %v6515_v52, %v6514_v6 }
 0x74a   : > { %v4401_v46 = vpop.f32.mrf.mxu1 }
 0x74b   : > { %4646 = vmatpush1.bf16.msra.mxu0 %v4612_v31  ;;  %v4611_v34 = vpack.c.bf16 %v4401_v46, %v4398_v23  ;;  %v4607_v31 = vpack.c.bf16 %v4369_v62, %v4366_v55  ;;  %v4606_v46 = vpack.c.bf16 %v9863_v58, %v9848_v40  ;;  %v4605_v23 = vpack.c.bf16 %v9869_v47, %v9854_v41 }
 0x74c   : > { %4647 = vmatprep.subr.bf16.mxu0 %v11088_v36 }
 0x74f   : > { %4648 = vmatpush1.bf16.msra.mxu0 %v4611_v34 }
 0x750   : > { %4649 = vmatprep.subr.bf16.mxu0 %v11088_v36 }
 0x753   : > { %4650 = vmatpush1.bf16.msra.mxu0 %v4610_v17 }
 0x754   : > { %4651 = vmatprep.subr.bf16.mxu0 %v11088_v36  ;;  %v6518_v61 = vpop.f32.mrf.mxu1 }
 0x756   : > { %v4414_v6 = vpop.f32.mrf.mxu1 }
 0x757   : > { %4652 = vmatpush1.bf16.msra.mxu0 %v4609_v9 }
 0x758   : > { %4653 = vmatprep.subr.bf16.mxu0 %v11088_v36  ;;  %v6519_v32 = vpop.f32.mrf.mxu1 }
 0x75a   : > { %v4417_v1 = vpop.f32.mrf.mxu1 }
 0x75b   : > { %4654 = vmatpush1.bf16.msra.mxu0 %v4608_v49 }
 0x75c   : > { %4655 = vmatprep.subr.bf16.mxu0 %v11088_v36 }
 0x75f   : > { %4656 = vmatpush1.bf16.msra.mxu0 %v4607_v31 }
 0x760   : > { %4657 = vmatprep.subr.bf16.mxu0 %v11088_v36 }
 0x763   : > { %4658 = vmatpush1.bf16.msra.mxu0 %v4606_v46 }
 0x764   : > { %4659 = vmatprep.subr.bf16.mxu0 %v11088_v36  ;;  %v6522_v22 = vpop.f32.mrf.mxu1 }
 0x766   : > { %v4430_v55 = vpop.f32.mrf.mxu1 }
 0x767   : > { %4660 = vmatpush1.bf16.msra.mxu0 %v4605_v23 }
 0x768   : > { %4661 = vmatprep.subr.bf16.mxu0 %v11088_v36  ;;  %v6523_v62 = vpop.f32.mrf.mxu1 }
 0x769   : > { %v4616_v31 = vpack.c.bf16 %v6523_v62, %v6522_v22  ;;  %v4613_v22 = vpack.c.bf16 %v4417_v1, %v4414_v6 }
 0x76a   : > { %v4433_v10 = vpop.f32.mrf.mxu1 }
 0x76b   : > { %v4615_v23 = vpack.c.bf16 %v4433_v10, %v4430_v55  ;;  %v7447_v55 = vld [vmem:[%s8037_s9] ss:$16 sps:$4 sm:$0xff]   ;;  %v7448_v10 = vld [vmem:[%s8037_s9 + $0x24] ss:$16 sps:$4 sm:$0xff]  }
 0x774   : > { %v6526_v16 = vpop.f32.mrf.mxu1 }
 0x776   : > { %v4446_v7 = vpop.f32.mrf.mxu1 }
 0x778   : > { %v6527_v39 = vpop.f32.mrf.mxu1 }
 0x779   : > { %v4618_v47 = vpack.c.bf16 %v6527_v39, %v6526_v16  ;;  %v4614_v16 = vpack.c.bf16 %v6519_v32, %v6518_v61  ;;  %v7449_v32 = vld [vmem:[%s8037_s9 + $0x20] ss:$16 sps:$4 sm:$0xff]  }
 0x77a   : > { %v4449_v52 = vpop.f32.mrf.mxu1 }
 0x77b   : > { %v4617_v49 = vpack.c.bf16 %v4449_v52, %v4446_v7 }
 0x784   : > { %v6530_v40 = vpop.f32.mrf.mxu1 }
 0x786   : > { %v4462_v58 = vpop.f32.mrf.mxu1 }
 0x788   : > { %v6531_v34 = vpop.f32.mrf.mxu1 }
 0x789   : > { %v4620_v17 = vpack.c.bf16 %v6531_v34, %v6530_v40 }
 0x78a   : > { %v4465_v9 = vpop.f32.mrf.mxu1 }
 0x78b   : > { %4662 = vmatpush2.bf16.msra.mxu0 %v4620_v17  ;;  %v4619_v41 = vpack.c.bf16 %v4465_v9, %v4462_v58  ;;  %v7450_v58 = vld [vmem:[%s8037_s9 + $0x44] ss:$16 sps:$4 sm:$0xff]   ;;  %v7451_v17 = vld [vmem:[%s8037_s9 + $0x40] ss:$16 sps:$4 sm:$0xff]  }
 0x78c   : > { %4663 = vmatprep.subr.bf16.mxu0 %v11088_v36  ;;  %v7452_v9 = vld [vmem:[%s8037_s9 + $0x64] ss:$16 sps:$4 sm:$0xff]  }
 0x78f   : > { %4664 = vmatpush2.bf16.msra.mxu0 %v4619_v41 }
 0x790   : > { %4665 = vmatprep.subr.bf16.mxu0 %v11088_v36 }
 0x793   : > { %4666 = vmatpush2.bf16.msra.mxu0 %v4618_v47 }
 0x794   : > { %4667 = vmatprep.subr.bf16.mxu0 %v11088_v36  ;;  %v9926_v46 = vpop.f32.mrf.mxu1 }
 0x796   : > { %v9929_v40 = vpop.f32.mrf.mxu1 }
 0x797   : > { %4668 = vmatpush2.bf16.msra.mxu0 %v4617_v49  ;;  %v7453_v49 = vld [vmem:[%s8037_s9 + $0x60] ss:$16 sps:$4 sm:$0xff]  }
 0x798   : > { %4669 = vmatprep.subr.bf16.mxu0 %v11088_v36  ;;  %v9932_v7 = vpop.f32.mrf.mxu1 }
 0x79a   : > { %v9935_v62 = vpop.f32.mrf.mxu1 }
 0x79b   : > { %4670 = vmatpush2.bf16.msra.mxu0 %v4616_v31  ;;  %v7454_v31 = vld [vmem:[%s8037_s9 + $0x84] ss:$16 sps:$4 sm:$0xff]  }
 0x79c   : > { %4671 = vmatprep.subr.bf16.mxu0 %v11088_v36 }
 0x79f   : > { %4672 = vmatpush2.bf16.msra.mxu0 %v4615_v23 }
 0x7a0   : > { %4673 = vmatprep.subr.bf16.mxu0 %v11088_v36 }
 0x7a3   : > { %4674 = vmatpush2.bf16.msra.mxu0 %v4614_v16 }
 0x7a4   : > { %4675 = vmatprep.subr.bf16.mxu0 %v11088_v36  ;;  %v6538_v39 = vpop.f32.mrf.mxu1 }
 0x7a6   : > { %v4494_v52 = vpop.f32.mrf.mxu1 }
 0x7a7   : > { %4676 = vmatpush2.bf16.msra.mxu0 %v4613_v22 }
 0x7a8   : > { %v6539_v61 = vpop.f32.mrf.mxu1 }
 0x7aa   : > { %4678 = vmatmul.mubr.bf16.vlgmr.msra.gmra.mxu0 %v7447_v55  ;;  %v4497_v34 = vpop.f32.mrf.mxu1 }
 0x7ab   : > { %4685 = vmatprep.mubr.bf16.mxu0 %v7448_v10 }
 0x7b2   : > { %4686 = vmatmul.mubr.bf16.gmra.mxu0 %v7449_v32  ;;  %v7455_v32 = vld [vmem:[%s8037_s9 + $0x80] ss:$16 sps:$4 sm:$0xff]  }
 0x7b3   : > { %4693 = vmatprep.mubr.bf16.mxu0 %v7450_v58  ;;  %v7456_v58 = vld [vmem:[%s8037_s9 + $0xa4] ss:$16 sps:$4 sm:$0xff]  }
 0x7b4   : > { %v6542_v6 = vpop.f32.mrf.mxu1 }
 0x7b6   : > { %v4510_v1 = vpop.f32.mrf.mxu1 }
 0x7b8   : > { %v6543_v41 = vpop.f32.mrf.mxu1 }
 0x7ba   : > { %4694 = vmatmul.mubr.bf16.gmra.mxu0 %v7451_v17  ;;  %v4513_v47 = vpop.f32.mrf.mxu1 }
 0x7bb   : > { %4701 = vmatprep.mubr.bf16.mxu0 %v7452_v9  ;;  %v4626_v9 = vpack.c.bf16 %v6543_v41, %v6542_v6  ;;  %v7460_v6 = vld [vmem:[%s8037_s9 + $0xe4] ss:$16 sps:$4 sm:$0xff]   ;;  %v4623_v41 = vpack.c.bf16 %v4497_v34, %v4494_v52  ;;  %v4621_v52 = vpack.c.bf16 %v9935_v62, %v9929_v40 }
 0x7c2   : > { %4702 = vmatmul.mubr.bf16.gmra.mxu0 %v7453_v49  ;;  %v7457_v49 = vld [vmem:[%s8037_s9 + $0xa0] ss:$16 sps:$4 sm:$0xff]  }
 0x7c3   : > { %4709 = vmatprep.mubr.bf16.mxu0 %v7454_v31  ;;  %v7458_v31 = vld [vmem:[%s8037_s9 + $0xc4] ss:$16 sps:$4 sm:$0xff]  }
 0x7c4   : > { %v6546_v23 = vpop.f32.mrf.mxu1 }
 0x7c6   : > { %v4526_v16 = vpop.f32.mrf.mxu1 }
 0x7c8   : > { %v6547_v22 = vpop.f32.mrf.mxu1 }
 0x7c9   : > { %v4628_v55 = vpack.c.bf16 %v6547_v22, %v6546_v23  ;;  %v4625_v23 = vpack.c.bf16 %v4513_v47, %v4510_v1  ;;  %v4624_v22 = vpack.c.bf16 %v6539_v61, %v6538_v39  ;;  %v4622_v39 = vpack.c.bf16 %v9932_v7, %v9926_v46  ;;  %v7461_v1 = vld [vmem:[%s8037_s9 + $0xe0] ss:$16 sps:$4 sm:$0xff]   ;;  %v7462_v47 = vld [vmem:[%s8037_s9 + $0x104] ss:$16 sps:$4 sm:$0xff]  }
 0x7ca   : > { %v4529_v10 = vpop.f32.mrf.mxu1  ;;  %4710 = vmatmul.mubr.bf16.gmra.mxu0 %v7455_v32  ;;  %v7463_v46 = vld [vmem:[%s8037_s9 + $0x100] ss:$16 sps:$4 sm:$0xff]   ;;  %v7464_v7 = vld [vmem:[%s8037_s9 + $0x124] ss:$16 sps:$4 sm:$0xff]  }
 0x7cb   : > { %4935 = vmatpush1.bf16.msra.mxu1 %v4628_v55  ;;  %4717 = vmatprep.mubr.bf16.mxu0 %v7456_v58  ;;  %v4627_v17 = vpack.c.bf16 %v4529_v10, %v4526_v16  ;;  %v7459_v16 = vld [vmem:[%s8037_s9 + $0xc0] ss:$16 sps:$4 sm:$0xff]  }
 0x7cc   : > { %4936 = vmatprep.subr.bf16.mxu1 %v11088_v36 }
 0x7cf   : > { %4937 = vmatpush1.bf16.msra.mxu1 %v4627_v17 }
 0x7d0   : > { %4938 = vmatprep.subr.bf16.mxu1 %v11088_v36 }
 0x7d2   : > { %4718 = vmatmul.mubr.bf16.gmra.mxu0 %v7457_v49  ;;  %v7466_v49 = vld [vmem:[%s8037_s9 + $0x144] ss:$16 sps:$4 sm:$0xff]  }
 0x7d3   : > { %4939 = vmatpush1.bf16.msra.mxu1 %v4626_v9  ;;  %4725 = vmatprep.mubr.bf16.mxu0 %v7458_v31  ;;  %v7465_v9 = vld [vmem:[%s8037_s9 + $0x120] ss:$16 sps:$4 sm:$0xff]  }
 0x7d4   : > { %4940 = vmatprep.subr.bf16.mxu1 %v11088_v36  ;;  %v9953_v55 = vpop.f32.mrf.mxu1 }
 0x7d6   : > { %v9958_v10 = vpop.f32.mrf.mxu1 }
 0x7d7   : > { %4941 = vmatpush1.bf16.msra.mxu1 %v4625_v23  ;;  %v7467_v23 = vld [vmem:[%s8037_s9 + $0x140] ss:$16 sps:$4 sm:$0xff]  }
 0x7d8   : > { %4942 = vmatprep.subr.bf16.mxu1 %v11088_v36  ;;  %v9963_v61 = vpop.f32.mrf.mxu1 }
 0x7da   : > { %4726 = vmatmul.mubr.bf16.gmra.mxu0 %v7459_v16  ;;  %v9970_v34 = vpop.f32.mrf.mxu1 }
 0x7db   : > { %4943 = vmatpush1.bf16.msra.mxu1 %v4624_v22  ;;  %4733 = vmatprep.mubr.bf16.mxu0 %v7460_v6  ;;  %v7468_v22 = vld [vmem:[%s8037_s9 + $0x164] ss:$16 sps:$4 sm:$0xff]  }
 0x7dc   : > { %4944 = vmatprep.subr.bf16.mxu1 %v11088_v36 }
 0x7df   : > { %4945 = vmatpush1.bf16.msra.mxu1 %v4623_v41  ;;  %v7469_v41 = vld [vmem:[%s8037_s9 + $0x160] ss:$16 sps:$4 sm:$0xff]  }
 0x7e0   : > { %4946 = vmatprep.subr.bf16.mxu1 %v11088_v36 }
 0x7e2   : > { %4734 = vmatmul.mubr.bf16.gmra.mxu0 %v7461_v1 }
 0x7e3   : > { %4947 = vmatpush1.bf16.msra.mxu1 %v4622_v39  ;;  %4741 = vmatprep.mubr.bf16.mxu0 %v7462_v47  ;;  %v7470_v39 = vld [vmem:[%s8037_s9 + $0x184] ss:$16 sps:$4 sm:$0xff]  }
 0x7e4   : > { %4948 = vmatprep.subr.bf16.mxu1 %v11088_v36  ;;  %v6554_v32 = vpop.f32.mrf.mxu1 }
 0x7e6   : > { %v4558_v58 = vpop.f32.mrf.mxu1 }
 0x7e7   : > { %4949 = vmatpush1.bf16.msra.mxu1 %v4621_v52 }
 0x7e8   : > { %4950 = vmatprep.subr.bf16.mxu1 %v11088_v36  ;;  %v6555_v17 = vpop.f32.mrf.mxu1 }
 0x7ea   : > { %4742 = vmatmul.mubr.bf16.gmra.mxu0 %v7463_v46  ;;  %v4561_v40 = vpop.f32.mrf.mxu1 }
 0x7eb   : > { %4749 = vmatprep.mubr.bf16.mxu0 %v7464_v7 }
 0x7f2   : > { %4750 = vmatmul.mubr.bf16.gmra.mxu0 %v7465_v9  ;;  %v7471_v9 = vld [vmem:[%s8037_s9 + $0x180] ss:$16 sps:$4 sm:$0xff]  }
 0x7f3   : > { %4757 = vmatprep.mubr.bf16.mxu0 %v7466_v49  ;;  %v7472_v49 = vld [vmem:[%s8037_s9 + $0x1a4] ss:$16 sps:$4 sm:$0xff]  }
 0x7f4   : > { %v6558_v62 = vpop.f32.mrf.mxu1 }
 0x7f6   : > { %v4574_v31 = vpop.f32.mrf.mxu1 }
 0x7f8   : > { %v6559_v16 = vpop.f32.mrf.mxu1 }
 0x7fa   : > { %4758 = vmatmul.mubr.bf16.gmra.mxu0 %v7467_v23  ;;  %v4577_v6 = vpop.f32.mrf.mxu1 }
 0x7fb   : > { %4765 = vmatprep.mubr.bf16.mxu0 %v7468_v22  ;;  %v4634_v22 = vpack.c.bf16 %v6559_v16, %v6558_v62  ;;  %v4631_v62 = vpack.c.bf16 %v4561_v40, %v4558_v58  ;;  %v7477_v16 = vld [vmem:[%s8037_s9 + $0x1e0] ss:$16 sps:$4 sm:$0xff]   ;;  %v4629_v58 = vpack.c.bf16 %v9970_v34, %v9958_v10  ;;  %v7485_v10 = vld [vmem:[%s8037_s9 + $0x4c] ss:$16 sps:$4 sm:$0xff]   ;;  %v7486_v34 = vld [vmem:[%s8037_s9 + $0x244] ss:$16 sps:$4 sm:$0xff]  }
 0x7fc   : > { %v7480_v40 = vld [vmem:[%s8037_s9 + $0x200] ss:$16 sps:$4 sm:$0xff]  }
 0x802   : > { %4766 = vmatmul.mubr.bf16.gmra.mxu0 %v7469_v41  ;;  %v7473_v41 = vld [vmem:[%s8037_s9 + $0x1a0] ss:$16 sps:$4 sm:$0xff]  }
 0x803   : > { %4773 = vmatprep.mubr.bf16.mxu0 %v7470_v39  ;;  %v7474_v39 = vld [vmem:[%s8037_s9 + $0x1c4] ss:$16 sps:$4 sm:$0xff]  }
 0x804   : > { %v6562_v1 = vpop.f32.mrf.mxu1 }
 0x806   : > { %v4590_v47 = vpop.f32.mrf.mxu1 }
 0x808   : > { %v6563_v52 = vpop.f32.mrf.mxu1 }
 0x809   : > { %v4636_v46 = vpack.c.bf16 %v6563_v52, %v6562_v1  ;;  %v4633_v1 = vpack.c.bf16 %v4577_v6, %v4574_v31  ;;  %v4632_v52 = vpack.c.bf16 %v6555_v17, %v6554_v32  ;;  %v4630_v31 = vpack.c.bf16 %v9963_v61, %v9953_v55  ;;  %v7478_v32 = vld [vmem:[%s8037_s9 + $0x204] ss:$16 sps:$4 sm:$0xff]   ;;  %v7479_v17 = vld [vmem:[%s8037_s9 + $0x8] ss:$16 sps:$4 sm:$0xff]   ;;  %v7481_v55 = vld [vmem:[%s8037_s9 + $0x2c] ss:$16 sps:$4 sm:$0xff]  }
 0x80a   : > { %v4593_v7 = vpop.f32.mrf.mxu1  ;;  %4774 = vmatmul.mubr.bf16.gmra.mxu0 %v7471_v9  ;;  %v7482_v61 = vld [vmem:[%s8037_s9 + $0x224] ss:$16 sps:$4 sm:$0xff]   ;;  %v7483_v6 = vld [vmem:[%s8037_s9 + $0x28] ss:$16 sps:$4 sm:$0xff]   ;;  %v7488_v9 = vld [vmem:[%s8037_s9 + $0x240] ss:$16 sps:$4 sm:$0xff]  }
 0x80b   : > { %4951 = vmatpush2.bf16.msra.mxu1 %v4636_v46  ;;  %4781 = vmatprep.mubr.bf16.mxu0 %v7472_v49  ;;  %v4635_v23 = vpack.c.bf16 %v4593_v7, %v4590_v47  ;;  %v7475_v47 = vld [vmem:[%s8037_s9 + $0x1c0] ss:$16 sps:$4 sm:$0xff]   ;;  %v7476_v46 = vld [vmem:[%s8037_s9 + $0x1e4] ss:$16 sps:$4 sm:$0xff]   ;;  %v7487_v7 = vld [vmem:[%s8037_s9 + $0x48] ss:$16 sps:$4 sm:$0xff]  }
 0x80c   : > { %4952 = vmatprep.subr.bf16.mxu1 %v11088_v36  ;;  %v7489_v49 = vld [vmem:[%s8037_s9 + $0x6c] ss:$16 sps:$4 sm:$0xff]  }
 0x80f   : > { %4953 = vmatpush2.bf16.msra.mxu1 %v4635_v23  ;;  %v7490_v23 = vld [vmem:[%s8037_s9 + $0x264] ss:$16 sps:$4 sm:$0xff]  }
 0x810   : > { %4954 = vmatprep.subr.bf16.mxu1 %v11088_v36 }
 0x812   : > { %4782 = vmatmul.mubr.bf16.gmra.mxu0 %v7473_v41  ;;  %v7492_v41 = vld [vmem:[%s8037_s9 + $0x260] ss:$16 sps:$4 sm:$0xff]  }
 0x813   : > { %4955 = vmatpush2.bf16.msra.mxu1 %v4634_v22  ;;  %4789 = vmatprep.mubr.bf16.mxu0 %v7474_v39  ;;  %v7491_v22 = vld [vmem:[%s8037_s9 + $0x68] ss:$16 sps:$4 sm:$0xff]   ;;  %v7493_v39 = vld [vmem:[%s8037_s9 + $0x8c] ss:$16 sps:$4 sm:$0xff]  }
 0x814   : > { %4956 = vmatprep.subr.bf16.mxu1 %v11088_v36 }
 0x817   : > { %4957 = vmatpush2.bf16.msra.mxu1 %v4633_v1  ;;  %v7494_v1 = vld [vmem:[%s8037_s9 + $0x284] ss:$16 sps:$4 sm:$0xff]  }
 0x818   : > { %4958 = vmatprep.subr.bf16.mxu1 %v11088_v36 }
 0x81a   : > { %4790 = vmatmul.mubr.bf16.gmra.mxu0 %v7475_v47  ;;  %v7496_v47 = vld [vmem:[%s8037_s9 + $0x280] ss:$16 sps:$4 sm:$0xff]  }
 0x81b   : > { %4959 = vmatpush2.bf16.msra.mxu1 %v4632_v52  ;;  %4797 = vmatprep.mubr.bf16.mxu0 %v7476_v46  ;;  %v7495_v52 = vld [vmem:[%s8037_s9 + $0x88] ss:$16 sps:$4 sm:$0xff]   ;;  %v7497_v46 = vld [vmem:[%s8037_s9 + $0xac] ss:$16 sps:$4 sm:$0xff]  }
 0x81c   : > { %4960 = vmatprep.subr.bf16.mxu1 %v11088_v36 }
 0x81f   : > { %4961 = vmatpush2.bf16.msra.mxu1 %v4631_v62  ;;  %v7498_v62 = vld [vmem:[%s8037_s9 + $0x2a4] ss:$16 sps:$4 sm:$0xff]  }
 0x820   : > { %4962 = vmatprep.subr.bf16.mxu1 %v11088_v36 }
 0x822   : > { %4798 = vmatmul.mubr.bf16.gmra.mxu0 %v7477_v16  ;;  %v7500_v16 = vld [vmem:[%s8037_s9 + $0x2a0] ss:$16 sps:$4 sm:$0xff]  }
 0x823   : > { %4963 = vmatpush2.bf16.msra.mxu1 %v4630_v31  ;;  %4805 = vmatprep.mubr.bf16.mxu0 %v7478_v32  ;;  %v7499_v31 = vld [vmem:[%s8037_s9 + $0xa8] ss:$16 sps:$4 sm:$0xff]   ;;  %v7501_v32 = vld [vmem:[%s8037_s9 + $0xcc] ss:$16 sps:$4 sm:$0xff]  }
 0x824   : > { %4964 = vmatprep.subr.bf16.mxu1 %v11088_v36  ;;  %v7484_v36 = vld [vmem:[%s8037_s9 + $0x220] ss:$16 sps:$4 sm:$0xff]  }
 0x827   : > { %4965 = vmatpush2.bf16.msra.mxu1 %v4629_v58  ;;  %v7502_v58 = vld [vmem:[%s8037_s9 + $0x2c4] ss:$16 sps:$4 sm:$0xff]  }
 0x82a   : > { %4967 = vmatmul.mubr.bf16.vlgmr.msra.gmra.mxu1 %v7479_v17  ;;  %4806 = vmatmul.mubr.bf16.gmra.mxu0 %v7480_v40  ;;  %v7503_v17 = vld [vmem:[%s8037_s9 + $0xc8] ss:$16 sps:$4 sm:$0xff]   ;;  %v7504_v40 = vld [vmem:[%s8037_s9 + $0x2c0] ss:$16 sps:$4 sm:$0xff]  }
 0x82b   : > { %4974 = vmatprep.mubr.bf16.mxu1 %v7481_v55  ;;  %4813 = vmatprep.mubr.bf16.mxu0 %v7482_v61  ;;  %v7505_v55 = vld [vmem:[%s8037_s9 + $0xec] ss:$16 sps:$4 sm:$0xff]   ;;  %v7506_v61 = vld [vmem:[%s8037_s9 + $0x2e4] ss:$16 sps:$4 sm:$0xff]  }
 0x832   : > { %4975 = vmatmul.mubr.bf16.gmra.mxu1 %v7483_v6  ;;  %4814 = vmatmul.mubr.bf16.gmra.mxu0 %v7484_v36  ;;  %v7507_v6 = vld [vmem:[%s8037_s9 + $0xe8] ss:$16 sps:$4 sm:$0xff]   ;;  %v7508_v36 = vld [vmem:[%s8037_s9 + $0x2e0] ss:$16 sps:$4 sm:$0xff]  }
 0x833   : > { %4982 = vmatprep.mubr.bf16.mxu1 %v7485_v10  ;;  %4821 = vmatprep.mubr.bf16.mxu0 %v7486_v34  ;;  %v7509_v10 = vld [vmem:[%s8037_s9 + $0x10c] ss:$16 sps:$4 sm:$0xff]   ;;  %v7510_v34 = vld [vmem:[%s8037_s9 + $0x304] ss:$16 sps:$4 sm:$0xff]  }
 0x83a   : > { %4983 = vmatmul.mubr.bf16.gmra.mxu1 %v7487_v7  ;;  %4822 = vmatmul.mubr.bf16.gmra.mxu0 %v7488_v9  ;;  %v7511_v7 = vld [vmem:[%s8037_s9 + $0x108] ss:$16 sps:$4 sm:$0xff]  }
 0x83b   : > { %4990 = vmatprep.mubr.bf16.mxu1 %v7489_v49  ;;  %4829 = vmatprep.mubr.bf16.mxu0 %v7490_v23  ;;  %v7512_v49 = vld [vmem:[%s8037_s9 + $0x300] ss:$16 sps:$4 sm:$0xff]   ;;  %v7513_v23 = vld [vmem:[%s8037_s9 + $0x12c] ss:$16 sps:$4 sm:$0xff]  }
 0x842   : > { %4991 = vmatmul.mubr.bf16.gmra.mxu1 %v7491_v22  ;;  %4830 = vmatmul.mubr.bf16.gmra.mxu0 %v7492_v41  ;;  %v7514_v22 = vld [vmem:[%s8037_s9 + $0x324] ss:$16 sps:$4 sm:$0xff]  }
 0x843   : > { %4998 = vmatprep.mubr.bf16.mxu1 %v7493_v39  ;;  %4837 = vmatprep.mubr.bf16.mxu0 %v7494_v1 }
 0x84a   : > { %4999 = vmatmul.mubr.bf16.gmra.mxu1 %v7495_v52  ;;  %4838 = vmatmul.mubr.bf16.gmra.mxu0 %v7496_v47  ;;  %v7515_v52 = vld [vmem:[%s8037_s9 + $0x128] ss:$16 sps:$4 sm:$0xff]  }
 0x84b   : > { %5006 = vmatprep.mubr.bf16.mxu1 %v7497_v46  ;;  %4845 = vmatprep.mubr.bf16.mxu0 %v7498_v62  ;;  %v7516_v46 = vld [vmem:[%s8037_s9 + $0x320] ss:$16 sps:$4 sm:$0xff]   ;;  %v7517_v62 = vld [vmem:[%s8037_s9 + $0x14c] ss:$16 sps:$4 sm:$0xff]  }
 0x852   : > { %5007 = vmatmul.mubr.bf16.gmra.mxu1 %v7499_v31  ;;  %4846 = vmatmul.mubr.bf16.gmra.mxu0 %v7500_v16  ;;  %v7518_v31 = vld [vmem:[%s8037_s9 + $0x344] ss:$16 sps:$4 sm:$0xff]  }
 0x853   : > { %5014 = vmatprep.mubr.bf16.mxu1 %v7501_v32  ;;  %4853 = vmatprep.mubr.bf16.mxu0 %v7502_v58 }
 0x85a   : > { %5015 = vmatmul.mubr.bf16.gmra.mxu1 %v7503_v17  ;;  %4854 = vmatmul.mubr.bf16.gmra.mxu0 %v7504_v40  ;;  %v7519_v17 = vld [vmem:[%s8037_s9 + $0x148] ss:$16 sps:$4 sm:$0xff]  }
 0x85b   : > { %5022 = vmatprep.mubr.bf16.mxu1 %v7505_v55  ;;  %4861 = vmatprep.mubr.bf16.mxu0 %v7506_v61  ;;  %v7520_v55 = vld [vmem:[%s8037_s9 + $0x340] ss:$16 sps:$4 sm:$0xff]   ;;  %v7521_v61 = vld [vmem:[%s8037_s9 + $0x16c] ss:$16 sps:$4 sm:$0xff]  }
 0x862   : > { %5023 = vmatmul.mubr.bf16.gmra.mxu1 %v7507_v6  ;;  %4862 = vmatmul.mubr.bf16.gmra.mxu0 %v7508_v36  ;;  %v7522_v6 = vld [vmem:[%s8037_s9 + $0x364] ss:$16 sps:$4 sm:$0xff]  }
 0x863   : > { %5030 = vmatprep.mubr.bf16.mxu1 %v7509_v10  ;;  %4869 = vmatprep.mubr.bf16.mxu0 %v7510_v34 }
 0x86a   : > { %5031 = vmatmul.mubr.bf16.gmra.mxu1 %v7511_v7  ;;  %v10033_v9 = vpop.f32.mrf.mxu0  ;;  %4870 = vmatmul.mubr.bf16.gmra.mxu0 %v7512_v49  ;;  %v7523_v7 = vld [vmem:[%s8037_s9 + $0x168] ss:$16 sps:$4 sm:$0xff]  }
 0x86b   : > { %5038 = vmatprep.mubr.bf16.mxu1 %v7513_v23  ;;  %4877 = vmatprep.mubr.bf16.mxu0 %v7514_v22  ;;  %v7524_v23 = vld [vmem:[%s8037_s9 + $0x360] ss:$16 sps:$4 sm:$0xff]   ;;  %v7525_v22 = vld [vmem:[%s8037_s9 + $0x18c] ss:$16 sps:$4 sm:$0xff]  }
 0x86c   : > { %v4681_v41 = vpop.f32.mrf.mxu0 }
 0x86d   : > { %v7526_v41 = vld [vmem:[%s8037_s9 + $0x384] ss:$16 sps:$4 sm:$0xff]  }
 0x86e   : > { %v10038_v39 = vpop.f32.mrf.mxu0 }
 0x870   : > { %v4684_v1 = vpop.f32.mrf.mxu0 }
 0x872   : > { %5039 = vmatmul.mubr.bf16.gmra.mxu1 %v7515_v52  ;;  %v10041_v47 = vpop.f32.mrf.mxu0  ;;  %4878 = vmatmul.mubr.bf16.gmra.mxu0 %v7516_v46 }
 0x873   : > { %5046 = vmatprep.mubr.bf16.mxu1 %v7517_v62  ;;  %4885 = vmatprep.mubr.bf16.mxu0 %v7518_v31  ;;  %v7527_v62 = vld [vmem:[%s8037_s9 + $0x188] ss:$16 sps:$4 sm:$0xff]  }
 0x874   : > { %v4689_v16 = vpop.f32.mrf.mxu0 }
 0x875   : > { %v7528_v16 = vld [vmem:[%s8037_s9 + $0x380] ss:$16 sps:$4 sm:$0xff]  }
 0x876   : > { %v10046_v32 = vpop.f32.mrf.mxu0 }
 0x878   : > { %v4692_v58 = vpop.f32.mrf.mxu0 }
 0x879   : > { %v7529_v58 = vld [vmem:[%s8037_s9 + $0x1ac] ss:$16 sps:$4 sm:$0xff]  }
 0x87a   : > { %5047 = vmatmul.mubr.bf16.gmra.mxu1 %v7519_v17  ;;  %v10049_v40 = vpop.f32.mrf.mxu0  ;;  %4886 = vmatmul.mubr.bf16.gmra.mxu0 %v7520_v55  ;;  %v7530_v17 = vld [vmem:[%s8037_s9 + $0x3a4] ss:$16 sps:$4 sm:$0xff]  }
 0x87b   : > { %5054 = vmatprep.mubr.bf16.mxu1 %v7521_v61  ;;  %4893 = vmatprep.mubr.bf16.mxu0 %v7522_v6 }
 0x87c   : > { %v4697_v36 = vpop.f32.mrf.mxu0 }
 0x87d   : > { %v7531_v36 = vld [vmem:[%s8037_s9 + $0x1a8] ss:$16 sps:$4 sm:$0xff]  }
 0x87e   : > { %v10054_v10 = vpop.f32.mrf.mxu0 }
 0x880   : > { %v4700_v34 = vpop.f32.mrf.mxu0 }
 0x882   : > { %5055 = vmatmul.mubr.bf16.gmra.mxu1 %v7523_v7  ;;  %v10057_v49 = vpop.f32.mrf.mxu0  ;;  %4894 = vmatmul.mubr.bf16.gmra.mxu0 %v7524_v23  ;;  %v7532_v7 = vld [vmem:[%s8037_s9 + $0x3a0] ss:$16 sps:$4 sm:$0xff]   ;;  %v7533_v23 = vld [vmem:[%s8037_s9 + $0x1cc] ss:$16 sps:$4 sm:$0xff]  }
 0x883   : > { %5062 = vmatprep.mubr.bf16.mxu1 %v7525_v22  ;;  %4901 = vmatprep.mubr.bf16.mxu0 %v7526_v41  ;;  %v7534_v22 = vld [vmem:[%s8037_s9 + $0x3c4] ss:$16 sps:$4 sm:$0xff]  }
 0x884   : > { %v4705_v1 = vpop.f32.mrf.mxu0 }
 0x886   : > { %v10062_v52 = vpop.f32.mrf.mxu0 }
 0x888   : > { %v4708_v46 = vpop.f32.mrf.mxu0 }
 0x88a   : > { %5063 = vmatmul.mubr.bf16.gmra.mxu1 %v7527_v62  ;;  %v10065_v31 = vpop.f32.mrf.mxu0  ;;  %4902 = vmatmul.mubr.bf16.gmra.mxu0 %v7528_v16  ;;  %v7535_v62 = vld [vmem:[%s8037_s9 + $0x1c8] ss:$16 sps:$4 sm:$0xff]  }
 0x88b   : > { %5070 = vmatprep.mubr.bf16.mxu1 %v7529_v58  ;;  %4909 = vmatprep.mubr.bf16.mxu0 %v7530_v17  ;;  %v7536_v58 = vld [vmem:[%s8037_s9 + $0x3c0] ss:$16 sps:$4 sm:$0xff]   ;;  %v7537_v17 = vld [vmem:[%s8037_s9 + $0x1ec] ss:$16 sps:$4 sm:$0xff]  }
 0x88c   : > { %v4713_v55 = vpop.f32.mrf.mxu0 }
 0x88d   : > { %v7538_v55 = vld [vmem:[%s8037_s9 + $0x3e4] ss:$16 sps:$4 sm:$0xff]  }
 0x88e   : > { %v10070_v61 = vpop.f32.mrf.mxu0 }
 0x890   : > { %v4716_v6 = vpop.f32.mrf.mxu0 }
 0x892   : > { %5071 = vmatmul.mubr.bf16.gmra.mxu1 %v7531_v36  ;;  %v10073_v34 = vpop.f32.mrf.mxu0  ;;  %4910 = vmatmul.mubr.bf16.gmra.mxu0 %v7532_v7 }
 0x893   : > { %5078 = vmatprep.mubr.bf16.mxu1 %v7533_v23  ;;  %4917 = vmatprep.mubr.bf16.mxu0 %v7534_v22  ;;  %v7539_v23 = vld [vmem:[%s8037_s9 + $0x1e8] ss:$16 sps:$4 sm:$0xff]  }
 0x894   : > { %v4721_v41 = vpop.f32.mrf.mxu0 }
 0x895   : > { %v7540_v41 = vld [vmem:[%s8037_s9 + $0x3e0] ss:$16 sps:$4 sm:$0xff]  }
 0x896   : > { %v10078_v1 = vpop.f32.mrf.mxu0 }
 0x898   : > { %v4724_v46 = vpop.f32.mrf.mxu0 }
 0x899   : > { %v7541_v46 = vld [vmem:[%s8037_s9 + $0x20c] ss:$16 sps:$4 sm:$0xff]  }
 0x89a   : > { %5079 = vmatmul.mubr.bf16.gmra.mxu1 %v7535_v62  ;;  %v10081_v16 = vpop.f32.mrf.mxu0  ;;  %4918 = vmatmul.mubr.bf16.gmra.mxu0 %v7536_v58 }
 0x89b   : > { %5086 = vmatprep.mubr.bf16.mxu1 %v7537_v17  ;;  %4925 = vmatprep.mubr.bf16.mxu0 %v7538_v55  ;;  %v7542_v55 = vld [vmem:[%s8037_s9 + $0x208] ss:$16 sps:$4 sm:$0xff]  }
 0x89c   : > { %v4729_v6 = vpop.f32.mrf.mxu0 }
 0x89e   : > { %v10086_v36 = vpop.f32.mrf.mxu0 }
 0x8a0   : > { %v4732_v7 = vpop.f32.mrf.mxu0 }
 0x8a1   : > { %v7543_v7 = vld [vmem:[%s8037_s9 + $0x22c] ss:$16 sps:$4 sm:$0xff]  }
 0x8a2   : > { %5087 = vmatmul.mubr.bf16.gmra.mxu1 %v7539_v23  ;;  %v10089_v22 = vpop.f32.mrf.mxu0  ;;  %4926 = vmatmul.mubr.bf16.gmra.mxu0 %v7540_v41  ;;  %v7544_v41 = vld [vmem:[%s8037_s9 + $0x228] ss:$16 sps:$4 sm:$0xff]  }
 0x8a3   : > { %5094 = vmatprep.mubr.bf16.mxu1 %v7541_v46 }
 0x8a4   : > { %v4737_v62 = vpop.f32.mrf.mxu0 }
 0x8a5   : > { %v7545_v62 = vld [vmem:[%s8037_s9 + $0x24c] ss:$16 sps:$4 sm:$0xff]  }
 0x8a6   : > { %v10093_v58 = vpop.f32.mrf.mxu0 }
 0x8a8   : > { %v4740_v17 = vpop.f32.mrf.mxu0 }
 0x8aa   : > { %5095 = vmatmul.mubr.bf16.gmra.mxu1 %v7542_v55  ;;  %v10096_v6 = vpop.f32.mrf.mxu0 }
 0x8ab   : > { %5102 = vmatprep.mubr.bf16.mxu1 %v7543_v7 }
 0x8ac   : > { %v4745_v23 = vpop.f32.mrf.mxu0 }
 0x8ad   : > { %v7547_v23 = vld [vmem:[%s8037_s9 + $0x26c] ss:$16 sps:$4 sm:$0xff]  }
 0x8ae   : > { %v10099_v51 = vpop.f32.mrf.mxu0 }
 0x8b0   : > { %v4748_v3 = vpop.f32.mrf.mxu0 }
 0x8b2   : > { %5103 = vmatmul.mubr.bf16.gmra.mxu1 %v7544_v41  ;;  %v10102_v46 = vpop.f32.mrf.mxu0 }
 0x8b3   : > { %5110 = vmatprep.mubr.bf16.mxu1 %v7545_v62 }
 0x8b4   : > { %v4753_v17 = vpop.f32.mrf.mxu0 }
 0x8b5   : > { %v7549_v17 = vld [vmem:[%s8037_s9 + $0x28c] ss:$16 sps:$4 sm:$0xff]  }
 0x8b6   : > { %v10105_v27 = vpop.f32.mrf.mxu0 }
 0x8b8   : > { %v4756_v55 = vpop.f32.mrf.mxu0 }
 0x8ba   : > { %5111 = vmatmul.mubr.bf16.gmra.mxu1 %v7546_v4  ;;  %v10108_v7 = vpop.f32.mrf.mxu0 }
 0x8bb   : > { %5118 = vmatprep.mubr.bf16.mxu1 %v7547_v23 }
 0x8bc   : > { %v4761_v3 = vpop.f32.mrf.mxu0 }
 0x8bd   : > { %v7551_v3 = vld [vmem:[%s8037_s9 + $0x2ac] ss:$16 sps:$4 sm:$0xff]  }
 0x8be   : > { %v10111_v12 = vpop.f32.mrf.mxu0 }
 0x8c0   : > { %v4764_v41 = vpop.f32.mrf.mxu0 }
 0x8c2   : > { %5119 = vmatmul.mubr.bf16.gmra.mxu1 %v7548_v48  ;;  %v10114_v62 = vpop.f32.mrf.mxu0 }
 0x8c3   : > { %5126 = vmatprep.mubr.bf16.mxu1 %v7549_v17 }
 0x8c4   : > { %v4769_v55 = vpop.f32.mrf.mxu0 }
 0x8c5   : > { %v7553_v55 = vld [vmem:[%s8037_s9 + $0x2cc] ss:$16 sps:$4 sm:$0xff]  }
 0x8c6   : > { %v10117_v20 = vpop.f32.mrf.mxu0 }
 0x8c8   : > { %v4772_v4 = vpop.f32.mrf.mxu0 }
 0x8ca   : > { %5127 = vmatmul.mubr.bf16.gmra.mxu1 %v7550_v59  ;;  %v10120_v23 = vpop.f32.mrf.mxu0 }
 0x8cb   : > { %5134 = vmatprep.mubr.bf16.mxu1 %v7551_v3  ;;  %v7555_v3 = vld [vmem:[%s8037_s9 + $0x2ec] ss:$16 sps:$4 sm:$0xff]  }
 0x8cc   : > { %v4777_v41 = vpop.f32.mrf.mxu0 }
 0x8ce   : > { %v10123_v56 = vpop.f32.mrf.mxu0 }
 0x8d0   : > { %v4780_v48 = vpop.f32.mrf.mxu0 }
 0x8d2   : > { %5135 = vmatmul.mubr.bf16.gmra.mxu1 %v7552_v35  ;;  %v10126_v17 = vpop.f32.mrf.mxu0 }
 0x8d3   : > { %5142 = vmatprep.mubr.bf16.mxu1 %v7553_v55  ;;  %v7557_v55 = vld [vmem:[%s8037_s9 + $0x30c] ss:$16 sps:$4 sm:$0xff]  }
 0x8d4   : > { %v4785_v4 = vpop.f32.mrf.mxu0 }
 0x8d5   : > { %v10141_v4 = vld [vmem:[#allocation10 + $0x2] ss:$0 sm:$0xff] }
 0x8d6   : > { %v10129_v21 = vpop.f32.mrf.mxu0  ;;  %v4680_v8 = vadd.f32 %v10141_v4, %v10033_v9  ;;  %v4688_v9 = vadd.f32 %v10141_v4, %v10041_v47  ;;  %v4691_v47 = vadd.f32 %v10141_v4, %v10046_v32 }
 0x8d8   : > { %v4788_v59 = vpop.f32.mrf.mxu0 }
 0x8da   : > { %5143 = vmatmul.mubr.bf16.gmra.mxu1 %v7554_v13  ;;  %v10132_v44 = vpop.f32.mrf.mxu0 }
 0x8db   : > { %5150 = vmatprep.mubr.bf16.mxu1 %v7555_v3 }
 0x8dc   : > { %v4793_v41 = vpop.f32.mrf.mxu0 }
 0x8de   : > { %v10135_v48 = vpop.f32.mrf.mxu0 }
 0x8e0   : > { %v4796_v35 = vpop.f32.mrf.mxu0 }
 0x8e2   : > { %5151 = vmatmul.mubr.bf16.gmra.mxu1 %v7556_v50  ;;  %v10138_v11 = vpop.f32.mrf.mxu0 }
 0x8e3   : > { %5158 = vmatprep.mubr.bf16.mxu1 %v7557_v55 }
 0x8e4   : > { %v4801_v59 = vpop.f32.mrf.mxu0 }
 0x8e5   : > { %v4683_v59 = vadd.f32 %v10141_v4, %v10038_v39 }
 0x8e6   : > { %v10143_v13 = vpop.f32.mrf.mxu0 }
 0x8e8   : > { %v4804_v3 = vpop.f32.mrf.mxu0 }
 0x8ea   : > { %v4968_v41 = vpop.f32.mrf.mxu1  ;;  %5159 = vmatmul.mubr.bf16.gmra.mxu1 %v7558_v30  ;;  %v10148_v35 = vpop.f32.mrf.mxu0 }
 0x8eb   : > { %v4969_v50 = vadd.f32 %v4968_v41, %v4680_v8  ;;  %5166 = vmatprep.mubr.bf16.mxu1 %v7559_v42  ;;  %v7560_v41 = vld [vmem:[%s8037_s9 + $0x328] ss:$16 sps:$4 sm:$0xff]  }
 0x8ec   : > { %v4970_v28 = vpop.f32.mrf.mxu1  ;;  %v4809_v55 = vpop.f32.mrf.mxu0 }
 0x8ed   : > { %7171 = vtanh.f32 %v4969_v50  ;;  %v7561_v55 = vld [vmem:[%s8037_s9 + $0x34c] ss:$16 sps:$4 sm:$0xff]  }
 0x8ee   : > { %v4971_v63 = vpop.f32.mrf.mxu1  ;;  %v10153_v43 = vpop.f32.mrf.mxu0 }
 0x8ef   : > { %v4972_v30 = vadd.f32 %v4971_v63, %v4683_v59 }
 0x8f0   : > { %v4973_v3 = vpop.f32.mrf.mxu1  ;;  %v4812_v60 = vpop.f32.mrf.mxu0 }
 0x8f1   : > { %7173 = vtanh.f32 %v4972_v30  ;;  %v4696_v60 = vadd.f32 %v10141_v4, %v10049_v40  ;;  %v4699_v40 = vadd.f32 %v10141_v4, %v10054_v10 }
 0x8f2   : > { %v4976_v8 = vpop.f32.mrf.mxu1  ;;  %5167 = vmatmul.mubr.bf16.gmra.mxu1 %v7560_v41  ;;  %v10158_v28 = vpop.f32.mrf.mxu0 }
 0x8f3   : > { %v4977_v42 = vadd.f32 %v4976_v8, %v4688_v9  ;;  %5174 = vmatprep.mubr.bf16.mxu1 %v7561_v55  ;;  %v7562_v8 = vld [vmem:[%s8037_s9 + $0x348] ss:$16 sps:$4 sm:$0xff]   ;;  %v7563_v55 = vld [vmem:[%s8037_s9 + $0x36c] ss:$16 sps:$4 sm:$0xff]  }
 0x8f4   : > { %v4978_v39 = vpop.f32.mrf.mxu1  ;;  %v4817_v38 = vpop.f32.mrf.mxu0 }
 0x8f5   : > { %7175 = vtanh.f32 %v4977_v42 }
 0x8f6   : > { %v4979_v50 = vpop.f32.mrf.mxu1  ;;  %v10163_v63 = vpop.f32.mrf.mxu0 }
 0x8f7   : > { %11089 = vst [vmem:[#allocation46_spill] sm:$0xff] %v10163_v63  ;;  %v4980_v59 = vadd.f32 %v4979_v50, %v4691_v47  ;;  %v4704_v47 = vadd.f32 %v10141_v4, %v10057_v49  ;;  %v7564_v49 = vld [vmem:[%s8037_s9 + $0x368] ss:$16 sps:$4 sm:$0xff]  }
 0x8f8   : > { %v4981_v30 = vpop.f32.mrf.mxu1  ;;  %v4820_v3 = vpop.f32.mrf.mxu0 }
 0x8f9   : > { %7177 = vtanh.f32 %v4980_v59 }
 0x8fa   : > { %v4984_v9 = vpop.f32.mrf.mxu1  ;;  %5175 = vmatmul.mubr.bf16.gmra.mxu1 %v7562_v8  ;;  %v10168_v41 = vpop.f32.mrf.mxu0 }
 0x8fb   : > { %v4985_v38 = vadd.f32 %v4984_v9, %v4696_v60  ;;  %5182 = vmatprep.mubr.bf16.mxu1 %v7563_v55  ;;  %v7172_v32 = vpop.eup %7171 }
 0x8fc   : > { %v4986_v39 = vpop.f32.mrf.mxu1  ;;  %v4825_v63 = vpop.f32.mrf.mxu0  ;;  %v10178_v60 = vadd.f32 %v7172_v32, %v9445_v15 }
 0x8fd   : > { %7179 = vtanh.f32 %v4985_v38  ;;  %v7565_v38 = vld [vmem:[%s8037_s9 + $0x38c] ss:$16 sps:$4 sm:$0xff]  }
 0x8fe   : > { %v7174_v42 = vpop.eup %7173  ;;  %v4987_v50 = vpop.f32.mrf.mxu1  ;;  %11090 = vst [vmem:[#allocation47_spill] sm:$0xff] %v10178_v60 }
 0x8ff   : > { %v10175_v59 = vpop.f32.mrf.mxu0  ;;  %v4988_v30 = vadd.f32 %v4987_v50, %v4699_v40  ;;  %v10181_v3 = vadd.f32 %v7174_v42, %v9448_v37  ;;  %v4707_v37 = vadd.f32 %v10141_v4, %v10062_v52  ;;  %v4712_v50 = vadd.f32 %v10141_v4, %v10065_v31  ;;  %v7566_v31 = vld [vmem:[%s8037_s9 + $0x388] ss:$16 sps:$4 sm:$0xff]  }
 0x900   : > { %v4989_v63 = vpop.f32.mrf.mxu1 }
 0x901   : > { %v4828_v9 = vpop.f32.mrf.mxu0  ;;  %7181 = vtanh.f32 %v4988_v30 }
 0x902   : > { %v4992_v8 = vpop.f32.mrf.mxu1  ;;  %5183 = vmatmul.mubr.bf16.gmra.mxu1 %v7564_v49  ;;  %v7176_v40 = vpop.eup %7175 }
 0x903   : > { %v10186_v55 = vpop.f32.mrf.mxu0  ;;  %v4993_v39 = vadd.f32 %v4992_v8, %v4704_v47  ;;  %5190 = vmatprep.mubr.bf16.mxu1 %v7565_v38  ;;  %v10196_v47 = vadd.f32 %v7176_v40, %v9464_v54 }
 0x904   : > { %v4994_v15 = vpop.f32.mrf.mxu1 }
 0x905   : > { %v4833_v32 = vpop.f32.mrf.mxu0  ;;  %7183 = vtanh.f32 %v4993_v39  ;;  %v7567_v39 = vld [vmem:[%s8037_s9 + $0x3ac] ss:$16 sps:$4 sm:$0xff]  }
 0x906   : > { %v7178_v42 = vpop.eup %7177  ;;  %v4995_v30 = vpop.f32.mrf.mxu1 }
 0x907   : > { %v10193_v63 = vpop.f32.mrf.mxu0  ;;  %v4996_v9 = vadd.f32 %v4995_v30, %v4707_v37  ;;  %v10199_v8 = vadd.f32 %v7178_v42, %v9467_v57  ;;  %v4715_v57 = vadd.f32 %v10141_v4, %v10070_v61  ;;  %v4720_v30 = vadd.f32 %v10141_v4, %v10073_v34  ;;  %v7568_v34 = vld [vmem:[%s8037_s9 + $0x3a8] ss:$16 sps:$4 sm:$0xff]  }
 0x908   : > { %v4997_v49 = vpop.f32.mrf.mxu1 }
 0x909   : > { %v4836_v38 = vpop.f32.mrf.mxu0  ;;  %7185 = vtanh.f32 %v4996_v9 }
 0x90a   : > { %v5000_v15 = vpop.f32.mrf.mxu1  ;;  %5191 = vmatmul.mubr.bf16.gmra.mxu1 %v7566_v31  ;;  %v7180_v37 = vpop.eup %7179 }
 0x90b   : > { %v10204_v32 = vpop.f32.mrf.mxu0  ;;  %v5001_v10 = vadd.f32 %v5000_v15, %v4712_v50  ;;  %5198 = vmatprep.mubr.bf16.mxu1 %v7567_v39  ;;  %v10214_v50 = vadd.f32 %v7180_v37, %v9483_v53 }
 0x90c   : > { %v5002_v54 = vpop.f32.mrf.mxu1 }
 0x90d   : > { %v4841_v40 = vpop.f32.mrf.mxu0  ;;  %7187 = vtanh.f32 %v5001_v10  ;;  %v7569_v10 = vld [vmem:[%s8037_s9 + $0x3cc] ss:$16 sps:$4 sm:$0xff]  }
 0x90e   : > { %v7182_v42 = vpop.eup %7181  ;;  %v5003_v9 = vpop.f32.mrf.mxu1 }
 0x90f   : > { %v10211_v49 = vpop.f32.mrf.mxu0  ;;  %v5004_v38 = vadd.f32 %v5003_v9, %v4715_v57  ;;  %v10217_v15 = vadd.f32 %v7182_v42, %v9486_v14  ;;  %v4723_v14 = vadd.f32 %v10141_v4, %v10078_v1  ;;  %v4728_v9 = vadd.f32 %v10141_v4, %v10081_v16  ;;  %v7570_v16 = vld [vmem:[%s8037_s9 + $0x3c8] ss:$16 sps:$4 sm:$0xff]  }
 0x910   : > { %v5005_v31 = vpop.f32.mrf.mxu1 }
 0x911   : > { %v4844_v39 = vpop.f32.mrf.mxu0  ;;  %7189 = vtanh.f32 %v5004_v38 }
 0x912   : > { %v5008_v54 = vpop.f32.mrf.mxu1  ;;  %5199 = vmatmul.mubr.bf16.gmra.mxu1 %v7568_v34  ;;  %v7184_v57 = vpop.eup %7183 }
 0x913   : > { %v10222_v40 = vpop.f32.mrf.mxu0  ;;  %v5009_v52 = vadd.f32 %v5008_v54, %v4720_v30  ;;  %5206 = vmatprep.mubr.bf16.mxu1 %v7569_v10  ;;  %v10232_v30 = vadd.f32 %v7184_v57, %v9502_v25 }
 0x914   : > { %v5010_v53 = vpop.f32.mrf.mxu1 }
 0x915   : > { %v4849_v37 = vpop.f32.mrf.mxu0  ;;  %7191 = vtanh.f32 %v5009_v52  ;;  %v7571_v52 = vld [vmem:[%s8037_s9 + $0x3ec] ss:$16 sps:$4 sm:$0xff]  }
 0x916   : > { %v7186_v42 = vpop.eup %7185  ;;  %v5011_v38 = vpop.f32.mrf.mxu1 }
 0x917   : > { %v10229_v31 = vpop.f32.mrf.mxu0  ;;  %v5012_v39 = vadd.f32 %v5011_v38, %v4723_v14  ;;  %v10235_v54 = vadd.f32 %v7186_v42, %v9505_v33  ;;  %v4731_v33 = vadd.f32 %v10141_v4, %v10086_v36  ;;  %v4736_v38 = vadd.f32 %v10141_v4, %v10089_v22 }
 0x918   : > { %v5013_v34 = vpop.f32.mrf.mxu1 }
 0x919   : > { %v4852_v10 = vpop.f32.mrf.mxu0  ;;  %7193 = vtanh.f32 %v5012_v39 }
 0x91a   : > { %v5016_v53 = vpop.f32.mrf.mxu1  ;;  %5207 = vmatmul.mubr.bf16.gmra.mxu1 %v7570_v16  ;;  %v7188_v14 = vpop.eup %7187 }
 0x91b   : > { %v10240_v37 = vpop.f32.mrf.mxu0  ;;  %v5017_v61 = vadd.f32 %v5016_v53, %v4728_v9  ;;  %5214 = vmatprep.mubr.bf16.mxu1 %v7571_v52  ;;  %v10250_v9 = vadd.f32 %v7188_v14, %v9521_v0  ;;  %v4739_v0 = vadd.f32 %v10141_v4, %v10093_v58  ;;  %v4744_v14 = vadd.f32 %v10141_v4, %v10096_v6 }
 0x91c   : > { %v5018_v25 = vpop.f32.mrf.mxu1 }
 0x91d   : > { %v4857_v57 = vpop.f32.mrf.mxu0  ;;  %7195 = vtanh.f32 %v5017_v61 }
 0x91e   : > { %v7190_v42 = vpop.eup %7189  ;;  %v5019_v39 = vpop.f32.mrf.mxu1  ;;  %v7572_v57 = vld [vmem:[%s8037_s9 + $0x3e8] ss:$16 sps:$4 sm:$0xff]   ;;  %s5660_s9 = scalar_lea.hbm %s10724_s8, %s6122_s22 }
 0x91f   : > { %v10247_v34 = vpop.f32.mrf.mxu0  ;;  %v5020_v10 = vadd.f32 %v5019_v39, %v4731_v33  ;;  %v10253_v53 = vadd.f32 %v7190_v42, %v9524_v24 }
 0x920   : > { %v5021_v16 = vpop.f32.mrf.mxu1 }
 0x921   : > { %v4860_v52 = vpop.f32.mrf.mxu0  ;;  %7197 = vtanh.f32 %v5020_v10 }
 0x922   : > { %v5024_v25 = vpop.f32.mrf.mxu1  ;;  %5215 = vmatmul.mubr.bf16.gmra.mxu1 %v7572_v57  ;;  %v7192_v61 = vpop.eup %7191 }
 0x923   : > { %v10258_v22 = vpop.f32.mrf.mxu0  ;;  %v5025_v1 = vadd.f32 %v5024_v25, %v4736_v38  ;;  %v10267_v52 = vadd.f32 %v7192_v61, %v9540_v19  ;;  %v4747_v19 = vadd.f32 %v10141_v4, %v10099_v51 }
 0x924   : > { %v5026_v33 = vpop.f32.mrf.mxu1 }
 0x925   : > { %v4865_v39 = vpop.f32.mrf.mxu0  ;;  %7199 = vtanh.f32 %v5025_v1 }
 0x926   : > { %v7194_v24 = vpop.eup %7193  ;;  %v5027_v42 = vpop.f32.mrf.mxu1 }
 0x927   : > { %v10264_v10 = vpop.f32.mrf.mxu0  ;;  %v5028_v16 = vadd.f32 %v5027_v42, %v4739_v0  ;;  %v10270_v38 = vadd.f32 %v7194_v24, %v9543_v5  ;;  %v4752_v5 = vadd.f32 %v10141_v4, %v10102_v46 }
 0x928   : > { %v5029_v25 = vpop.f32.mrf.mxu1 }
 0x929   : > { %v4868_v57 = vpop.f32.mrf.mxu0  ;;  %7201 = vtanh.f32 %v5028_v16 }
 0x92a   : > { %v5032_v33 = vpop.f32.mrf.mxu1  ;;  %v7196_v36 = vpop.eup %7195 }
 0x92b   : > { %v10274_v39 = vpop.f32.mrf.mxu0  ;;  %v5033_v6 = vadd.f32 %v5032_v33, %v4744_v14  ;;  %v10283_v16 = vadd.f32 %v7196_v36, %v9557_v45  ;;  %v4755_v45 = vadd.f32 %v10141_v4, %v10105_v27 }
 0x92c   : > { %v5034_v60 = vpop.f32.mrf.mxu1 }
 0x92d   : > { %v4873_v1 = vpop.f32.mrf.mxu0  ;;  %7203 = vtanh.f32 %v5033_v6 }
 0x92e   : > { %v7198_v61 = vpop.eup %7197  ;;  %v5035_v0 = vpop.f32.mrf.mxu1 }
 0x92f   : > { %v10280_v24 = vpop.f32.mrf.mxu0  ;;  %v5036_v42 = vadd.f32 %v5035_v0, %v4747_v19  ;;  %v10286_v14 = vadd.f32 %v7198_v61, %v9560_v2  ;;  %v4760_v2 = vadd.f32 %v10141_v4, %v10108_v7 }
 0x930   : > { %v5037_v60 = vpop.f32.mrf.mxu1 }
 0x931   : > { %v4876_v25 = vpop.f32.mrf.mxu0  ;;  %7205 = vtanh.f32 %v5036_v42 }
 0x932   : > { %v5040_v57 = vpop.f32.mrf.mxu1  ;;  %v7200_v1 = vpop.eup %7199 }
 0x933   : > { %v10290_v33 = vpop.f32.mrf.mxu0  ;;  %v5041_v46 = vadd.f32 %v5040_v57, %v4752_v5  ;;  %v10299_v42 = vadd.f32 %v7200_v1, %v9574_v18  ;;  %v4763_v18 = vadd.f32 %v10141_v4, %v10111_v12 }
 0x934   : > { %v5042_v58 = vpop.f32.mrf.mxu1 }
 0x935   : > { %v4881_v6 = vpop.f32.mrf.mxu0  ;;  %7207 = vtanh.f32 %v5041_v46 }
 0x936   : > { %v7202_v36 = vpop.eup %7201  ;;  %v5043_v19 = vpop.f32.mrf.mxu1 }
 0x937   : > { %v10296_v61 = vpop.f32.mrf.mxu0  ;;  %v5044_v0 = vadd.f32 %v5043_v19, %v4755_v45  ;;  %v10302_v5 = vadd.f32 %v7202_v36, %v9577_v26  ;;  %v4768_v26 = vadd.f32 %v10141_v4, %v10114_v62 }
 0x938   : > { %v5045_v58 = vpop.f32.mrf.mxu1 }
 0x939   : > { %v4884_v60 = vpop.f32.mrf.mxu0  ;;  %7209 = vtanh.f32 %v5044_v0  ;;  %v11093_v0 = vld [vmem:[#allocation67_spill] sm:$0xff] }
 0x93a   : > { %v5048_v25 = vpop.f32.mrf.mxu1  ;;  %v7204_v6 = vpop.eup %7203  ;;  %v11094_v60 = vld [vmem:[#allocation68_spill] sm:$0xff] }
 0x93b   : > { %v10306_v57 = vpop.f32.mrf.mxu0  ;;  %v5049_v7 = vadd.f32 %v5048_v25, %v4760_v2  ;;  %v10315_v58 = vadd.f32 %v7204_v6, %v11093_v0  ;;  %v4771_v6 = vadd.f32 %v10141_v4, %v10117_v20 }
 0x93c   : > { %11091 = vst [vmem:[#allocation44_spill] sm:$0xff] %v10306_v57  ;;  %v5050_v51 = vpop.f32.mrf.mxu1 }
 0x93d   : > { %v4889_v46 = vpop.f32.mrf.mxu0  ;;  %7211 = vtanh.f32 %v5049_v7 }
 0x93e   : > { %v7206_v1 = vpop.eup %7205  ;;  %v5051_v45 = vpop.f32.mrf.mxu1 }
 0x93f   : > { %v10312_v36 = vpop.f32.mrf.mxu0  ;;  %v5052_v19 = vadd.f32 %v5051_v45, %v4763_v18  ;;  %v10318_v2 = vadd.f32 %v7206_v1, %v11094_v60  ;;  %v4776_v1 = vadd.f32 %v10141_v4, %v10120_v23  ;;  %v11097_v60 = vld [vmem:[#allocation69_spill] sm:$0xff] }
 0x940   : > { %11092 = vst [vmem:[#allocation49_spill] sm:$0xff] %v10312_v36  ;;  %v5053_v51 = vpop.f32.mrf.mxu1 }
 0x941   : > { %v4892_v25 = vpop.f32.mrf.mxu0  ;;  %7213 = vtanh.f32 %v5052_v19 }
 0x942   : > { %v5056_v46 = vpop.f32.mrf.mxu1  ;;  %v7208_v57 = vpop.eup %7207  ;;  %v11098_v25 = vld [vmem:[#allocation70_spill] sm:$0xff] }
 0x943   : > { %v10322_v27 = vpop.f32.mrf.mxu0  ;;  %v5057_v62 = vadd.f32 %v5056_v46, %v4768_v26  ;;  %v10331_v51 = vadd.f32 %v7208_v57, %v11097_v60  ;;  %v4779_v57 = vadd.f32 %v10141_v4, %v10123_v56 }
 0x944   : > { %11095 = vst [vmem:[#allocation50_spill] sm:$0xff] %v10322_v27  ;;  %v5058_v36 = vpop.f32.mrf.mxu1 }
 0x945   : > { %v4897_v7 = vpop.f32.mrf.mxu0  ;;  %7215 = vtanh.f32 %v5057_v62 }
 0x946   : > { %v7210_v18 = vpop.eup %7209  ;;  %v5059_v45 = vpop.f32.mrf.mxu1 }
 0x947   : > { %v10328_v0 = vpop.f32.mrf.mxu0  ;;  %v5060_v19 = vadd.f32 %v5059_v45, %v4771_v6  ;;  %v10334_v26 = vadd.f32 %v7210_v18, %v11098_v25  ;;  %v4784_v18 = vadd.f32 %v10141_v4, %v10126_v17  ;;  %v11101_v25 = vld [vmem:[#allocation71_spill] sm:$0xff] }
 0x948   : > { %11096 = vst [vmem:[#allocation51_spill] sm:$0xff] %v10328_v0  ;;  %v5061_v36 = vpop.f32.mrf.mxu1 }
 0x949   : > { %v4900_v46 = vpop.f32.mrf.mxu0  ;;  %7217 = vtanh.f32 %v5060_v19 }
 0x94a   : > { %v5064_v7 = vpop.f32.mrf.mxu1  ;;  %v7212_v27 = vpop.eup %7211  ;;  %v11102_v46 = vld [vmem:[#allocation72_spill] sm:$0xff] }
 0x94b   : > { %v10338_v12 = vpop.f32.mrf.mxu0  ;;  %v5065_v23 = vadd.f32 %v5064_v7, %v4776_v1  ;;  %v10347_v36 = vadd.f32 %v7212_v27, %v11101_v25  ;;  %v4787_v27 = vadd.f32 %v10141_v4, %v10129_v21 }
 0x94c   : > { %11099 = vst [vmem:[#allocation48_spill] sm:$0xff] %v10338_v12  ;;  %v5066_v0 = vpop.f32.mrf.mxu1 }
 0x94d   : > { %v4905_v62 = vpop.f32.mrf.mxu0  ;;  %7219 = vtanh.f32 %v5065_v23 }
 0x94e   : > { %v7214_v6 = vpop.eup %7213  ;;  %v5067_v45 = vpop.f32.mrf.mxu1 }
 0x94f   : > { %v10344_v60 = vpop.f32.mrf.mxu0  ;;  %v5068_v19 = vadd.f32 %v5067_v45, %v4779_v57  ;;  %v10350_v1 = vadd.f32 %v7214_v6, %v11102_v46  ;;  %v4792_v6 = vadd.f32 %v10141_v4, %v10132_v44  ;;  %v11105_v46 = vld [vmem:[#allocation52_spill] sm:$0xff] }
 0x950   : > { %11100 = vst [vmem:[#allocation67_spill] sm:$0xff] %v10344_v60  ;;  %v5069_v0 = vpop.f32.mrf.mxu1 }
 0x951   : > { %v4908_v7 = vpop.f32.mrf.mxu0  ;;  %7221 = vtanh.f32 %v5068_v19 }
 0x952   : > { %v5072_v62 = vpop.f32.mrf.mxu1  ;;  %v7216_v12 = vpop.eup %7215  ;;  %v11106_v7 = vld [vmem:[#allocation53_spill] sm:$0xff] }
 0x953   : > { %v10354_v20 = vpop.f32.mrf.mxu0  ;;  %v5073_v17 = vadd.f32 %v5072_v62, %v4784_v18  ;;  %v10363_v0 = vadd.f32 %v7216_v12, %v11105_v46  ;;  %v4795_v12 = vadd.f32 %v10141_v4, %v10135_v48 }
 0x954   : > { %11103 = vst [vmem:[#allocation68_spill] sm:$0xff] %v10354_v20  ;;  %v5074_v60 = vpop.f32.mrf.mxu1 }
 0x955   : > { %v4913_v23 = vpop.f32.mrf.mxu0  ;;  %7223 = vtanh.f32 %v5073_v17 }
 0x956   : > { %v7218_v57 = vpop.eup %7217  ;;  %v5075_v45 = vpop.f32.mrf.mxu1 }
 0x957   : > { %v10360_v25 = vpop.f32.mrf.mxu0  ;;  %v5076_v19 = vadd.f32 %v5075_v45, %v4787_v27  ;;  %v10366_v18 = vadd.f32 %v7218_v57, %v11106_v7  ;;  %v4800_v57 = vadd.f32 %v10141_v4, %v10138_v11  ;;  %v11109_v7 = vld [vmem:[#allocation61_spill] sm:$0xff] }
 0x958   : > { %11104 = vst [vmem:[#allocation69_spill] sm:$0xff] %v10360_v25  ;;  %v5077_v60 = vpop.f32.mrf.mxu1 }
 0x959   : > { %v4916_v62 = vpop.f32.mrf.mxu0  ;;  %7225 = vtanh.f32 %v5076_v19 }
 0x95a   : > { %v5080_v23 = vpop.f32.mrf.mxu1  ;;  %v7220_v20 = vpop.eup %7219  ;;  %v11110_v62 = vld [vmem:[#allocation62_spill] sm:$0xff] }
 0x95b   : > { %v10370_v56 = vpop.f32.mrf.mxu0  ;;  %v5081_v44 = vadd.f32 %v5080_v23, %v4792_v6  ;;  %v10379_v60 = vadd.f32 %v7220_v20, %v11109_v7  ;;  %v4803_v20 = vadd.f32 %v10141_v4, %v10143_v13 }
 0x95c   : > { %11107 = vst [vmem:[#allocation70_spill] sm:$0xff] %v10370_v56  ;;  %v5082_v25 = vpop.f32.mrf.mxu1 }
 0x95d   : > { %v4921_v17 = vpop.f32.mrf.mxu0  ;;  %7227 = vtanh.f32 %v5081_v44 }
 0x95e   : > { %v7222_v27 = vpop.eup %7221  ;;  %v5083_v45 = vpop.f32.mrf.mxu1 }
 0x95f   : > { %v10376_v46 = vpop.f32.mrf.mxu0  ;;  %v5084_v19 = vadd.f32 %v5083_v45, %v4795_v12  ;;  %v10382_v6 = vadd.f32 %v7222_v27, %v11110_v62  ;;  %v4808_v27 = vadd.f32 %v10141_v4, %v10148_v35 }
 0x960   : > { %11108 = vst [vmem:[#allocation71_spill] sm:$0xff] %v10376_v46  ;;  %v5085_v25 = vpop.f32.mrf.mxu1 }
 0x961   : > { %v4924_v23 = vpop.f32.mrf.mxu0  ;;  %7229 = vtanh.f32 %v5084_v19  ;;  %v11113_v25 = vld [vmem:[#allocation54_spill] sm:$0xff] }
 0x962   : > { %v5088_v17 = vpop.f32.mrf.mxu1  ;;  %v7224_v56 = vpop.eup %7223 }
 0x963   : > { %v10386_v21 = vpop.f32.mrf.mxu0  ;;  %v5089_v11 = vadd.f32 %v5088_v17, %v4800_v57  ;;  %v10395_v62 = vadd.f32 %v7224_v56, %v9676_v29  ;;  %v4816_v29 = vadd.f32 %v10141_v4, %v10158_v28  ;;  %v4824_v28 = vadd.f32 %v10141_v4, %v10168_v41 }
 0x964   : > { %11111 = vst [vmem:[#allocation72_spill] sm:$0xff] %v10386_v21  ;;  %v5090_v46 = vpop.f32.mrf.mxu1 }
 0x965   : > { %v4929_v44 = vpop.f32.mrf.mxu0  ;;  %7231 = vtanh.f32 %v5089_v11  ;;  %v4811_v11 = vadd.f32 %v10141_v4, %v10153_v43 }
 0x966   : > { %v7226_v12 = vpop.eup %7225  ;;  %v5091_v45 = vpop.f32.mrf.mxu1 }
 0x967   : > { %v10392_v7 = vpop.f32.mrf.mxu0  ;;  %v5092_v19 = vadd.f32 %v5091_v45, %v4803_v20  ;;  %v10398_v57 = vadd.f32 %v7226_v12, %v11113_v25  ;;  %v11114_v45 = vld [vmem:[#allocation55_spill] sm:$0xff] }
 0x968   : > { %11112 = vst [vmem:[#allocation52_spill] sm:$0xff] %v10392_v7  ;;  %v5093_v46 = vpop.f32.mrf.mxu1  ;;  %v11116_v7 = vld [vmem:[#allocation46_spill] sm:$0xff] }
 0x969   : > { %v4932_v23 = vpop.f32.mrf.mxu0  ;;  %7233 = vtanh.f32 %v5092_v19  ;;  %v5365_v13 = vpack.c.bf16 %v10398_v57, %v10395_v62  ;;  %v11115_v19 = vld [vmem:[#allocation63_spill] sm:$0xff]  ;;  %v4819_v43 = vadd.f32 %v10141_v4, %v11116_v7  ;;  %v11119_v7 = vpack.c.bf16 %v10302_v5, %v10299_v42  ;;  %v11121_v42 = vld [vmem:[#allocation65_spill] sm:$0xff] }
 0x96a   : > { %v5096_v17 = vpop.f32.mrf.mxu1  ;;  %v7228_v35 = vpop.eup %7227 }
 0x96b   : > { %v5097_v44 = vadd.f32 %v5096_v17, %v4808_v27  ;;  %v5315_v25 = vadd.f32 %v7228_v35, %v11114_v45  ;;  %v11117_v35 = vld [vmem:[#allocation64_spill] sm:$0xff] }
 0x96c   : > { %v5098_v48 = vpop.f32.mrf.mxu1 }
 0x96d   : > { %7235 = vtanh.f32 %v5097_v44 }
 0x96e   : > { %v7230_v20 = vpop.eup %7229  ;;  %v5099_v56 = vpop.f32.mrf.mxu1 }
 0x96f   : > { %v5100_v12 = vadd.f32 %v5099_v56, %v4811_v11  ;;  %v5316_v46 = vadd.f32 %v7230_v20, %v11115_v19  ;;  %v11118_v20 = vld [vmem:[#allocation56_spill] sm:$0xff] }
 0x970   : > { %v5101_v23 = vpop.f32.mrf.mxu1 }
 0x971   : > { %7237 = vtanh.f32 %v5100_v12  ;;  %v5366_v62 = vpack.c.bf16 %v5316_v46, %v5315_v25  ;;  %v5415_v46 = vsel %vm1220_vm1, %v11119_v7, 0 }
 0x972   : > { %v5104_v27 = vpop.f32.mrf.mxu1  ;;  %v7232_v48 = vpop.eup %7231 }
 0x973   : > { %v5105_v57 = vadd.f32 %v5104_v27, %v4816_v29  ;;  %v5317_v56 = vadd.f32 %v7232_v48, %v11117_v35  ;;  %v4827_v27 = vadd.f32 %v10141_v4, %v10175_v59  ;;  %v11122_v35 = vpack.c.bf16 %v10286_v14, %v10283_v16  ;;  %v11124_v16 = vld [vmem:[#allocation59_spill] sm:$0xff] }
 0x974   : > { %v5106_v17 = vpop.f32.mrf.mxu1 }
 0x975   : > { %7239 = vtanh.f32 %v5105_v57  ;;  %v4832_v57 = vadd.f32 %v10141_v4, %v10186_v55 }
 0x976   : > { %v7234_v21 = vpop.eup %7233  ;;  %v5107_v44 = vpop.f32.mrf.mxu1 }
 0x977   : > { %v5108_v11 = vadd.f32 %v5107_v44, %v4819_v43  ;;  %v5318_v45 = vadd.f32 %v7234_v21, %v11118_v20  ;;  %v11120_v43 = vld [vmem:[#allocation57_spill] sm:$0xff]  ;;  %v10430_v44 = vld [vmem:[#allocation11] sm:$0xf] }
 0x978   : > { %v5109_v12 = vpop.f32.mrf.mxu1  ;;  %6274 = vmatprep.mubr.msk.bf16.mxu0 %vm1220_vm1, %v10430_v44  ;;  %6292 = vmatprep.mubr.msk.bf16.mxu1 %vm1220_vm1, %v10430_v44 }
 0x979   : > { %7241 = vtanh.f32 %v5108_v11  ;;  %v5367_v25 = vpack.c.bf16 %v5318_v45, %v5317_v56  ;;  %v5412_v56 = vsel %vm1220_vm1, %v11122_v35, 0  ;;  %v4835_v12 = vadd.f32 %v10141_v4, %v10193_v63  ;;  %v11128_v35 = vld [vmem:[#allocation60_spill] sm:$0xff] }
 0x97a   : > { %v5112_v29 = vpop.f32.mrf.mxu1  ;;  %v7236_v41 = vpop.eup %7235 }
 0x97b   : > { %v5113_v19 = vadd.f32 %v5112_v29, %v4824_v28  ;;  %6564 = vmatprep.subr.msk.bf16.mxu0 %vm1220_vm1, %v5367_v25  ;;  %v10425_v28 = vadd.f32 %v7236_v41, %v11120_v43  ;;  %v4840_v29 = vadd.f32 %v10141_v4, %v10204_v32  ;;  %v11126_v43 = vpack.c.bf16 %v10382_v6, %v10379_v60 }
 0x97c   : > { %v5114_v23 = vpop.f32.mrf.mxu1  ;;  %6259 = vmatpush3.bf16.xpose.msra.mxu0 %v5415_v46  ;;  %v11123_v46 = vld [vmem:[#allocation58_spill] sm:$0xff] }
 0x97d   : > { %6565 = vmatprep.subr.msk.bf16.mxu0 %vm1220_vm1, %v5366_v62  ;;  %7243 = vtanh.f32 %v5113_v19 }
 0x97e   : > { %v7238_v21 = vpop.eup %7237  ;;  %v5115_v48 = vpop.f32.mrf.mxu1 }
 0x97f   : > { %v5116_v17 = vadd.f32 %v5115_v48, %v4827_v27  ;;  %v10428_v5 = vadd.f32 %v7238_v21, %v11121_v42  ;;  %v11125_v21 = vpack.c.bf16 %v10270_v38, %v10267_v52  ;;  %v11127_v38 = vld [vmem:[#allocation66_spill] sm:$0xff] }
 0x980   : > { %v5117_v11 = vpop.f32.mrf.mxu1 }
 0x981   : > { %7245 = vtanh.f32 %v5116_v17  ;;  %v5368_v59 = vpack.c.bf16 %v10428_v5, %v10425_v28  ;;  %v5409_v32 = vsel %vm1220_vm1, %v11125_v21, 0  ;;  %v4843_v17 = vadd.f32 %v10141_v4, %v10211_v49 }
 0x982   : > { %v5120_v55 = vpop.f32.mrf.mxu1  ;;  %v7240_v20 = vpop.eup %7239  ;;  %v4848_v11 = vadd.f32 %v10141_v4, %v10222_v40 }
 0x983   : > { %v5121_v62 = vadd.f32 %v5120_v55, %v4832_v57  ;;  %v10448_v41 = vadd.f32 %v7240_v20, %v11123_v46  ;;  %v4856_v46 = vadd.f32 %v10141_v4, %v10240_v37 }
 0x984   : > { %v5122_v45 = vpop.f32.mrf.mxu1  ;;  %6261 = vmatpush3.bf16.xpose.msra.mxu0 %v5412_v56 }
 0x985   : > { %6566 = vmatprep.subr.msk.bf16.mxu0 %vm1220_vm1, %v5365_v13  ;;  %7247 = vtanh.f32 %v5121_v62  ;;  %v11129_v45 = vpack.c.bf16 %v10253_v53, %v10250_v9  ;;  %v11131_v53 = vld [vmem:[#allocation19_spill] sm:$0xff] }
 0x986   : > { %v7242_v25 = vpop.eup %7241  ;;  %v5123_v19 = vpop.f32.mrf.mxu1 }
 0x987   : > { %v5124_v7 = vadd.f32 %v5123_v19, %v4835_v12  ;;  %v10451_v14 = vadd.f32 %v7242_v25, %v11124_v16  ;;  %v5406_v40 = vsel %vm1220_vm1, %v11129_v45, 0  ;;  %v11130_v19 = vpack.c.bf16 %v10366_v18, %v10363_v0 }
 0x988   : > { %v5125_v23 = vpop.f32.mrf.mxu1 }
 0x989   : > { %7249 = vtanh.f32 %v5124_v7  ;;  %v5369_v63 = vpack.c.bf16 %v10451_v14, %v10448_v41 }
 0x98a   : > { %v5128_v27 = vpop.f32.mrf.mxu1  ;;  %v7244_v57 = vpop.eup %7243 }
 0x98b   : > { %v5129_v13 = vadd.f32 %v5128_v27, %v4840_v29  ;;  %v10468_v62 = vadd.f32 %v7244_v57, %v11127_v38  ;;  %v4851_v29 = vadd.f32 %v10141_v4, %v10229_v31  ;;  %v11132_v27 = vld [vmem:[#allocation21_spill] sm:$0xff]  ;;  %v11136_v38 = vld [vmem:[#allocation23_spill] sm:$0xff] }
 0x98c   : > { %v5130_v48 = vpop.f32.mrf.mxu1  ;;  %6263 = vmatpush3.bf16.xpose.msra.mxu0 %v5409_v32  ;;  %v11133_v32 = vpack.c.bf16 %v10235_v54, %v10232_v30  ;;  %v11135_v54 = vld [vmem:[#allocation22_spill] sm:$0xff] }
 0x98d   : > { %6567 = vmatprep.subr.msk.bf16.mxu0 %vm1220_vm1, %v11126_v43  ;;  %7251 = vtanh.f32 %v5129_v13  ;;  %v11134_v43 = vpack.c.bf16 %v10350_v1, %v10347_v36 }
 0x98e   : > { %v7246_v42 = vpop.eup %7245  ;;  %v5131_v55 = vpop.f32.mrf.mxu1  ;;  %v5403_v37 = vsel %vm1220_vm1, %v11133_v32, 0 }
 0x98f   : > { %v5132_v52 = vadd.f32 %v5131_v55, %v4843_v17  ;;  %v10471_v56 = vadd.f32 %v7246_v42, %v11128_v35  ;;  %v4859_v17 = vadd.f32 %v10141_v4, %v10247_v34 }
 0x990   : > { %v5133_v20 = vpop.f32.mrf.mxu1 }
 0x991   : > { %7253 = vtanh.f32 %v5132_v52  ;;  %v5370_v49 = vpack.c.bf16 %v10471_v56, %v10468_v62  ;;  %v5442_v62 = vsel %vm1220_vm1, %v5368_v59, 0 }
 0x992   : > { %v5136_v60 = vpop.f32.mrf.mxu1  ;;  %v7248_v12 = vpop.eup %7247 }
 0x993   : > { %v5137_v6 = vadd.f32 %v5136_v60, %v4848_v11  ;;  %v10488_v23 = vadd.f32 %v7248_v12, %v11131_v53  ;;  %v4864_v11 = vadd.f32 %v10141_v4, %v10258_v22  ;;  %v11137_v60 = vpack.c.bf16 %v10217_v15, %v10214_v50  ;;  %v11139_v15 = vld [vmem:[#allocation20_spill] sm:$0xff] }
 0x994   : > { %v5138_v25 = vpop.f32.mrf.mxu1  ;;  %6265 = vmatpush3.bf16.xpose.msra.mxu0 %v5406_v40  ;;  %v4867_v40 = vadd.f32 %v10141_v4, %v10264_v10  ;;  %v11138_v12 = vpack.c.bf16 %v10334_v26, %v10331_v51  ;;  %v11141_v53 = vpack.c.bf16 %v10199_v8, %v10196_v47  ;;  %v11143_v8 = vld [vmem:[#allocation26_spill] sm:$0xff] }
 0x995   : > { %6568 = vmatprep.subr.msk.bf16.mxu0 %vm1220_vm1, %v11130_v19  ;;  %7255 = vtanh.f32 %v5137_v6  ;;  %v5400_v22 = vsel %vm1220_vm1, %v11137_v60, 0 }
 0x996   : > { %v7250_v7 = vpop.eup %7249  ;;  %v5139_v16 = vpop.f32.mrf.mxu1 }
 0x997   : > { %v5140_v9 = vadd.f32 %v5139_v16, %v4851_v29  ;;  %v10491_v13 = vadd.f32 %v7250_v7, %v11132_v27  ;;  %v4872_v29 = vadd.f32 %v10141_v4, %v10274_v39  ;;  %v5397_v39 = vsel %vm1220_vm1, %v11141_v53, 0 }
 0x998   : > { %v5141_v21 = vpop.f32.mrf.mxu1 }
 0x999   : > { %7257 = vtanh.f32 %v5140_v9  ;;  %v5371_v31 = vpack.c.bf16 %v10491_v13, %v10488_v23  ;;  %v5445_v23 = vsel %vm1220_vm1, %v5369_v63, 0 }
 0x99a   : > { %v5144_v0 = vpop.f32.mrf.mxu1  ;;  %v7252_v57 = vpop.eup %7251 }
 0x99b   : > { %v5145_v18 = vadd.f32 %v5144_v0, %v4856_v46  ;;  %v10508_v52 = vadd.f32 %v7252_v57, %v11135_v54  ;;  %v11140_v46 = vld [vmem:[#allocation25_spill] sm:$0xff]  ;;  %v4875_v0 = vadd.f32 %v10141_v4, %v10280_v24 }
 0x99c   : > { %v5146_v48 = vpop.f32.mrf.mxu1  ;;  %6267 = vmatpush3.bf16.xpose.msra.mxu0 %v5403_v37  ;;  %v4880_v37 = vadd.f32 %v10141_v4, %v10290_v33 }
 0x99d   : > { %6569 = vmatprep.subr.msk.bf16.mxu0 %vm1220_vm1, %v11134_v43  ;;  %7259 = vtanh.f32 %v5145_v18  ;;  %v11142_v18 = vpack.c.bf16 %v10318_v2, %v10315_v58 }
 0x99e   : > { %v7254_v42 = vpop.eup %7253  ;;  %v5147_v55 = vpop.f32.mrf.mxu1 }
 0x99f   : > { %v5148_v30 = vadd.f32 %v5147_v55, %v4859_v17  ;;  %v10511_v35 = vadd.f32 %v7254_v42, %v11136_v38  ;;  %v11144_v17 = vld [vmem:[#allocation27_spill] sm:$0xff]  ;;  %v4883_v38 = vadd.f32 %v10141_v4, %v10296_v61 }
 0x9a0   : > { %v5149_v20 = vpop.f32.mrf.mxu1 }
 0x9a1   : > { %7261 = vtanh.f32 %v5148_v30  ;;  %v5372_v34 = vpack.c.bf16 %v10511_v35, %v10508_v52  ;;  %v5448_v52 = vsel %vm1220_vm1, %v5370_v49, 0 }
 0x9a2   : > { %v5152_v36 = vpop.f32.mrf.mxu1  ;;  %v7256_v6 = vpop.eup %7255 }
 0x9a3   : > { %v5153_v1 = vadd.f32 %v5152_v36, %v4864_v11  ;;  %v10528_v7 = vadd.f32 %v7256_v6, %v11139_v15  ;;  %v11145_v11 = vld [vmem:[#allocation47_spill] sm:$0xff]  ;;  %v11147_v36 = vld [vmem:[#allocation44_spill] sm:$0xff] }
 0x9a4   : > { %v5154_v45 = vpop.f32.mrf.mxu1  ;;  %6269 = vmatpush3.bf16.xpose.msra.mxu0 %v5400_v22  ;;  %v11146_v55 = vpack.c.bf16 %v10181_v3, %v11145_v11  ;;  %v11148_v6 = vld [vmem:[#allocation24_spill] sm:$0xff] }
 0x9a5   : > { %6570 = vmatprep.subr.msk.bf16.mxu0 %vm1220_vm1, %v11138_v12  ;;  %7263 = vtanh.f32 %v5153_v1  ;;  %v4888_v1 = vadd.f32 %v10141_v4, %v11147_v36  ;;  %v11157_v36 = vld [vmem:[#allocation33_spill] sm:$0xff] }
 0x9a6   : > { %v7258_v25 = vpop.eup %7257  ;;  %v5155_v19 = vpop.f32.mrf.mxu1  ;;  %v5394_v33 = vsel %vm1220_vm1, %v11146_v55, 0  ;;  %v11155_v55 = vld [vmem:[#allocation48_spill] sm:$0xff] }
 0x9a7   : > { %v5156_v50 = vadd.f32 %v5155_v19, %v4867_v40  ;;  %v10531_v16 = vadd.f32 %v7258_v25, %v11140_v46  ;;  %v11149_v40 = vld [vmem:[#allocation29_spill] sm:$0xff]  ;;  %v5384_v19 = vld [vmem:[%s10723_s7] sm:$0xff] }
 0x9a8   : > { %v5157_v9 = vpop.f32.mrf.mxu1  ;;  %5387 = vperm.xlu0 %6683, %v5384_v19   ;;  %v11150_v46 = vld [vmem:[#allocation49_spill] sm:$0xff] }
 0x9a9   : > { %7265 = vtanh.f32 %v5156_v50  ;;  %v5373_v10 = vpack.c.bf16 %v10531_v16, %v10528_v7  ;;  %v4891_v9 = vadd.f32 %v10141_v4, %v11150_v46 }
 0x9aa   : > { %v5160_v51 = vpop.f32.mrf.mxu1  ;;  %v7260_v27 = vpop.eup %7259 }
 0x9ab   : > { %v5161_v26 = vadd.f32 %v5160_v51, %v4872_v29  ;;  %v10548_v48 = vadd.f32 %v7260_v27, %v11143_v8 }
 0x9ac   : > { %v5162_v21 = vpop.f32.mrf.mxu1  ;;  %6271 = vmatpush3.bf16.xpose.msra.mxu0 %v5397_v39 }
 0x9ad   : > { %6571 = vmatprep.subr.msk.bf16.mxu0 %vm1220_vm1, %v11142_v18  ;;  %7267 = vtanh.f32 %v5161_v26  ;;  %v11151_v26 = vld [vmem:[#allocation50_spill] sm:$0xff]  ;;  %v11153_v18 = vld [vmem:[#allocation31_spill] sm:$0xff] }
 0x9ae   : > { %v7262_v32 = vpop.eup %7261  ;;  %v5163_v57 = vpop.f32.mrf.mxu1  ;;  %v4896_v53 = vadd.f32 %v10141_v4, %v11151_v26  ;;  %v11152_v21 = vld [vmem:[#allocation30_spill] sm:$0xff]  ;;  %v11154_v4 = vld [vmem:[#allocation51_spill] sm:$0xff] }
 0x9af   : > { %v5164_v47 = vadd.f32 %v5163_v57, %v4875_v0  ;;  %v10551_v43 = vadd.f32 %v7262_v32, %v11144_v17  ;;  %v11160_v26 = vld [vmem:[#allocation34_spill] sm:$0xff] }
 0x9b0   : > { %v5165_v42 = vpop.f32.mrf.mxu1 }
 0x9b1   : > { %7269 = vtanh.f32 %v5164_v47  ;;  %v5374_v24 = vpack.c.bf16 %v10551_v43, %v10548_v48  ;;  %v5451_v48 = vsel %vm1220_vm1, %v5371_v31, 0 }
 0x9b2   : > { %v5168_v58 = vpop.f32.mrf.mxu1  ;;  %v7264_v30 = vpop.eup %7263 }
 0x9b3   : > { %v5169_v2 = vadd.f32 %v5168_v58, %v4880_v37  ;;  %v10564_v45 = vadd.f32 %v7264_v30, %v11148_v6  ;;  %v7573_v58 = vld [vmem:[#allocation10 + $0x2] ss:$0 sm:$0xff] }
 0x9b4   : > { %v5170_v54 = vpop.f32.mrf.mxu1  ;;  %6273 = vmatpush3.bf16.xpose.msra.mxu0 %v5394_v33  ;;  %v4904_v33 = vadd.f32 %v7573_v58, %v11155_v55 }
 0x9b5   : > { %7271 = vtanh.f32 %v5169_v2  ;;  %v4899_v2 = vadd.f32 %v7573_v58, %v11154_v4 }
 0x9b6   : > { %v7266_v20 = vpop.eup %7265  ;;  %v5171_v60 = vpop.f32.mrf.mxu1 }
 0x9b7   : > { %v5172_v22 = vadd.f32 %v5171_v60, %v4883_v38  ;;  %v10567_v3 = vadd.f32 %v7266_v20, %v11149_v40  ;;  %v11156_v38 = vld [vmem:[#allocation28_spill] sm:$0xff] }
 0x9b8   : > { %v5173_v12 = vpop.f32.mrf.mxu1 }
 0x9b9   : > { %7273 = vtanh.f32 %v5172_v22  ;;  %v5375_v25 = vpack.c.bf16 %v10567_v3, %v10564_v45  ;;  %v5454_v45 = vsel %vm1220_vm1, %v5372_v34, 0 }
 0x9ba   : > { %v5176_v29 = vpop.f32.mrf.mxu1  ;;  %v7268_v50 = vpop.eup %7267 }
 0x9bb   : > { %v5177_v61 = vadd.f32 %v5176_v29, %v4888_v1  ;;  %6275 = vmatmul.mubr.msk.bf16.vlgmr.msra.gmra.mxu0 %vm1220_vm1, %v10430_v44  ;;  %v10581_v0 = vadd.f32 %v7268_v50, %v11152_v21 }
 0x9bc   : > { %v5178_v15 = vpop.f32.mrf.mxu1 }
 0x9bd   : > { %7275 = vtanh.f32 %v5177_v61  ;;  %v11158_v61 = vld [vmem:[#allocation67_spill] sm:$0xff]  ;;  %v11159_v15 = vld [vmem:[#allocation68_spill] sm:$0xff] }
 0x9be   : > { %v7270_v51 = vpop.eup %7269  ;;  %v5179_v39 = vpop.f32.mrf.mxu1  ;;  %v4907_v19 = vadd.f32 %v7573_v58, %v11158_v61  ;;  %v4912_v46 = vadd.f32 %v7573_v58, %v11159_v15 }
 0x9bf   : > { %v5180_v27 = vadd.f32 %v5179_v39, %v4891_v9  ;;  %v10584_v32 = vadd.f32 %v7270_v51, %v11153_v18  ;;  %v11161_v39 = vld [vmem:[#allocation35_spill] sm:$0xff] }
 0x9c0   : > { %v5181_v37 = vpop.f32.mrf.mxu1 }
 0x9c1   : > { %7277 = vtanh.f32 %v5180_v27  ;;  %v5376_v57 = vpack.c.bf16 %v10584_v32, %v10581_v0 }
 0x9c2   : > { %v5184_v47 = vpop.f32.mrf.mxu1  ;;  %v7272_v17 = vpop.eup %7271 }
 0x9c3   : > { %v5185_v8 = vadd.f32 %v5184_v47, %v4896_v53  ;;  %v10591_v20 = vadd.f32 %v7272_v17, %v11156_v38 }
 0x9c4   : > { %v5186_v42 = vpop.f32.mrf.mxu1 }
 0x9c5   : > { %7279 = vtanh.f32 %v5185_v8  ;;  %v11162_v42 = vld [vmem:[#allocation69_spill] sm:$0xff] }
 0x9c6   : > { %v7274_v11 = vpop.eup %7273  ;;  %v5187_v30 = vpop.f32.mrf.mxu1  ;;  %v4915_v4 = vadd.f32 %v7573_v58, %v11162_v42 }
 0x9c7   : > { %v5188_v54 = vadd.f32 %v5187_v30, %v4899_v2  ;;  %v10594_v1 = vadd.f32 %v7274_v11, %v11157_v36  ;;  %v11163_v11 = vld [vmem:[#allocation70_spill] sm:$0xff]  ;;  %v11165_v36 = vld [vmem:[#allocation37_spill] sm:$0xff] }
 0x9c8   : > { %v5189_v60 = vpop.f32.mrf.mxu1  ;;  %v4920_v55 = vadd.f32 %v7573_v58, %v11163_v11 }
 0x9c9   : > { %7281 = vtanh.f32 %v5188_v54  ;;  %v5377_v22 = vpack.c.bf16 %v10594_v1, %v10591_v20  ;;  %v11164_v54 = vld [vmem:[#allocation32_spill] sm:$0xff] }
 0x9ca   : > { %v5192_v6 = vpop.f32.mrf.mxu1  ;;  %v7276_v12 = vpop.eup %7275 }
 0x9cb   : > { %v5193_v40 = vadd.f32 %v5192_v6, %v4904_v33  ;;  %v10601_v53 = vadd.f32 %v7276_v12, %v11160_v26 }
 0x9cc   : > { %v5194_v29 = vpop.f32.mrf.mxu1 }
 0x9cd   : > { %7283 = vtanh.f32 %v5193_v40 }
 0x9ce   : > { %v7278_v50 = vpop.eup %7277  ;;  %v5195_v9 = vpop.f32.mrf.mxu1 }
 0x9cf   : > { %v5196_v51 = vadd.f32 %v5195_v9, %v4907_v19  ;;  %v10604_v27 = vadd.f32 %v7278_v50, %v11161_v39  ;;  %v11166_v50 = vld [vmem:[#allocation71_spill] sm:$0xff]  ;;  %v11167_v9 = vld [vmem:[#allocation72_spill] sm:$0xff] }
 0x9d0   : > { %v5197_v21 = vpop.f32.mrf.mxu1  ;;  %v4923_v15 = vadd.f32 %v7573_v58, %v11166_v50 }
 0x9d1   : > { %7285 = vtanh.f32 %v5196_v51  ;;  %v5378_v18 = vpack.c.bf16 %v10604_v27, %v10601_v53  ;;  %v4928_v51 = vadd.f32 %v7573_v58, %v11167_v9  ;;  %v11168_v21 = vld [vmem:[#allocation38_spill] sm:$0xff] }
 0x9d2   : > { %v5200_v37 = vpop.f32.mrf.mxu1  ;;  %v7280_v8 = vpop.eup %7279 }
 0x9d3   : > { %v5201_v47 = vadd.f32 %v5200_v37, %v4912_v46  ;;  %v5341_v38 = vadd.f32 %v7280_v8, %v11164_v54 }
 0x9d4   : > { %v5202_v17 = vpop.f32.mrf.mxu1 }
 0x9d5   : > { %7287 = vtanh.f32 %v5201_v47  ;;  %v11169_v47 = vld [vmem:[#allocation39_spill] sm:$0xff] }
 0x9d6   : > { %v7282_v2 = vpop.eup %7281  ;;  %v5203_v33 = vpop.f32.mrf.mxu1 }
 0x9d7   : > { %v5204_v30 = vadd.f32 %v5203_v33, %v4915_v4  ;;  %v5342_v60 = vadd.f32 %v7282_v2, %v11165_v36  ;;  %v11170_v33 = vld [vmem:[#allocation52_spill] sm:$0xff] }
 0x9d8   : > { %v5205_v6 = vpop.f32.mrf.mxu1 }
 0x9d9   : > { %7289 = vtanh.f32 %v5204_v30  ;;  %v5379_v40 = vpack.c.bf16 %v5342_v60, %v5341_v38  ;;  %v4931_v30 = vadd.f32 %v7573_v58, %v11170_v33  ;;  %v11171_v60 = vld [vmem:[#allocation36_spill] sm:$0xff] }
 0x9da   : > { %v5208_v12 = vpop.f32.mrf.mxu1  ;;  %v7284_v61 = vpop.eup %7283 }
 0x9db   : > { %v5209_v29 = vadd.f32 %v5208_v12, %v4920_v55  ;;  %v5343_v37 = vadd.f32 %v7284_v61, %v11168_v21  ;;  %v11172_v12 = vld [vmem:[#allocation41_spill] sm:$0xff] }
 0x9dc   : > { %v5210_v19 = vpop.f32.mrf.mxu1 }
 0x9dd   : > { %7291 = vtanh.f32 %v5209_v29 }
 0x9de   : > { %v7286_v46 = vpop.eup %7285  ;;  %v5211_v26 = vpop.f32.mrf.mxu1 }
 0x9df   : > { %v5212_v39 = vadd.f32 %v5211_v26, %v4923_v15  ;;  %v5344_v8 = vadd.f32 %v7286_v46, %v11169_v47  ;;  %v11173_v46 = vld [vmem:[#allocation42_spill] sm:$0xff] }
 0x9e0   : > { %v5213_v17 = vpop.f32.mrf.mxu1 }
 0x9e1   : > { %7293 = vtanh.f32 %v5212_v39  ;;  %v5380_v42 = vpack.c.bf16 %v5344_v8, %v5343_v37  ;;  %v11175_v37 = vld [vmem:[#allocation40_spill] sm:$0xff]  ;;  %v11176_v8 = vld [vmem:[#allocation45_spill] sm:$0xff] }
 0x9e2   : > { %v5216_v4 = vpop.f32.mrf.mxu1  ;;  %v7288_v11 = vpop.eup %7287 }
 0x9e3   : > { %v5217_v2 = vadd.f32 %v5216_v4, %v4928_v51  ;;  %v5345_v6 = vadd.f32 %v7288_v11, %v11171_v60  ;;  %v11174_v51 = vld [vmem:[#allocation43_spill] sm:$0xff]  ;;  %v5460_v11 = vsel %vm1220_vm1, %v5374_v24, 0 }
 0x9e4   : > { %v5218_v55 = vpop.f32.mrf.mxu1 }
 0x9e5   : > { %7295 = vtanh.f32 %v5217_v2  ;;  %v5463_v2 = vsel %vm1220_vm1, %v5375_v25, 0  ;;  %v5457_v55 = vsel %vm1220_vm1, %v5373_v10, 0 }
 0x9e6   : > { %v7290_v54 = vpop.eup %7289  ;;  %v5219_v38 = vpop.f32.mrf.mxu1 }
 0x9e7   : > { %v5220_v36 = vadd.f32 %v5219_v38, %v4931_v30  ;;  %v5346_v29 = vadd.f32 %v7290_v54, %v11172_v12 }
 0x9e8   : > { %v5221_v61 = vpop.f32.mrf.mxu1 }
 0x9e9   : > { %7297 = vtanh.f32 %v5220_v36  ;;  %v5381_v19 = vpack.c.bf16 %v5346_v29, %v5345_v6 }
 0x9ea   : > { %v7292_v50 = vpop.eup %7291 }
 0x9eb   : > { %v5347_v9 = vadd.f32 %v7292_v50, %v11173_v46 }
 0x9ee   : > { %v7294_v15 = vpop.eup %7293 }
 0x9ef   : > { %v5348_v26 = vadd.f32 %v7294_v15, %v11174_v51 }
 0x9f1   : > { %v5382_v39 = vpack.c.bf16 %v5348_v26, %v5347_v9 }
 0x9f2   : > { %v7296_v21 = vpop.eup %7295 }
 0x9f3   : > { %v5349_v47 = vadd.f32 %v7296_v21, %v11175_v37 }
 0x9f6   : > { %v7298_v58 = vpop.eup %7297 }
 0x9f7   : > { %v5350_v17 = vadd.f32 %v7298_v58, %v11176_v8 }
 0x9f9   : > { %v5383_v4 = vpack.c.bf16 %v5350_v17, %v5349_v47 }
 0x9fb   : > { %6572 = vmatprep.subr.msk.bf16.mxu1 %vm1220_vm1, %v5383_v4 }
 0x9fc   : > { %6277 = vmatpush3.bf16.xpose.msra.mxu1 %v5463_v2 }
 0x9fd   : > { %6573 = vmatprep.subr.msk.bf16.mxu1 %vm1220_vm1, %v5382_v39 }
 0xa04   : > { %6279 = vmatpush3.bf16.xpose.msra.mxu1 %v5460_v11 }
 0xa05   : > { %6574 = vmatprep.subr.msk.bf16.mxu1 %vm1220_vm1, %v5381_v19 }
 0xa0c   : > { %6281 = vmatpush3.bf16.xpose.msra.mxu1 %v5457_v55 }
 0xa0d   : > { %6575 = vmatprep.subr.msk.bf16.mxu1 %vm1220_vm1, %v5380_v42 }
 0xa14   : > { %6283 = vmatpush3.bf16.xpose.msra.mxu1 %v5454_v45 }
 0xa15   : > { %6576 = vmatprep.subr.msk.bf16.mxu1 %vm1220_vm1, %v5379_v40 }
 0xa1c   : > { %6285 = vmatpush3.bf16.xpose.msra.mxu1 %v5451_v48 }
 0xa1d   : > { %6577 = vmatprep.subr.msk.bf16.mxu1 %vm1220_vm1, %v5378_v18 }
 0xa23   : > { %v5388_v56 = vpop.permute.xlu0 %5387 }
 0xa24   : > { %6287 = vmatpush3.bf16.xpose.msra.mxu1 %v5448_v52 }
 0xa25   : > { %6578 = vmatprep.subr.msk.bf16.mxu1 %vm1220_vm1, %v5377_v22 }
 0xa2c   : > { %6289 = vmatpush3.bf16.xpose.msra.mxu1 %v5445_v23 }
 0xa2d   : > { %6579 = vmatprep.subr.msk.bf16.mxu1 %vm1220_vm1, %v5376_v57 }
 0xa34   : > { %6291 = vmatpush3.bf16.xpose.msra.mxu1 %v5442_v62 }
 0xa3b   : > { %6293 = vmatmul.mubr.msk.bf16.vlgmr.msra.gmra.mxu1 %vm1220_vm1, %v10430_v44 }
 0xa7b   : > { %v5523_v49 = vpop.f32.mrf.mxu0 }
 0xa7c   : > { %v5524_v41 = vadd.f32 %v5523_v49, %v5388_v56 }
 0xa7d   : > { %v5525_v14 = vpop.f32.mrf.mxu0 }
 0xa7e   : > { %v5571_v63 = vrot.slane %v5524_v41, 4  ;;  %v5526_v13 = vadd.f32 %v5525_v14, %v5388_v56 }
 0xa7f   : > { %v5527_v31 = vpop.f32.mrf.mxu0 }
 0xa80   : > { %v5572_v35 = vmax.f32 %v5524_v41, %v5571_v63  ;;  %v5577_v34 = vrot.slane %v5526_v13, 4 }
 0xa81   : > { %v5528_v7 = vpop.f32.mrf.mxu0 }
 0xa82   : > { %v5573_v16 = vrot.slane %v5572_v35, 2  ;;  %v5578_v10 = vmax.f32 %v5526_v13, %v5577_v34 }
 0xa84   : > { %v5574_v43 = vmax.f32 %v5572_v35, %v5573_v16  ;;  %v5579_v28 = vrot.slane %v5578_v10, 2 }
 0xa86   : > { %v5575_v5 = vrot.slane %v5574_v43, 1  ;;  %v5580_v59 = vmax.f32 %v5578_v10, %v5579_v28 }
 0xa88   : > { %v5576_v24 = vmax.f32 %v5574_v43, %v5575_v5  ;;  %v5581_v3 = vrot.slane %v5580_v59, 1 }
 0xa8a   : > { %v5595_v25 = vsub.f32 %v5524_v41, %v5576_v24  ;;  %v5582_v44 = vmax.f32 %v5580_v59, %v5581_v3 }
 0xa8c   : > { %v5599_v0 = vmul.f32 1.442695, %v5595_v25  ;;  %v5596_v32 = vsub.f32 %v5526_v13, %v5582_v44 }
 0xa8e   : > { %7299 = vpow2.f32 %v5599_v0  ;;  %v5601_v57 = vmul.f32 1.442695, %v5596_v32 }
 0xa90   : > { %7301 = vpow2.f32 %v5601_v57 }
 0xa9b   : > { %v7300_v20 = vpop.eup %7299 }
 0xa9c   : > { %v5607_v1 = vrot.slane %v7300_v20, 4 }
 0xa9d   : > { %v7302_v22 = vpop.eup %7301 }
 0xa9e   : > { %v5608_v53 = vadd.f32 %v7300_v20, %v5607_v1  ;;  %v5613_v27 = vrot.slane %v7302_v22, 4 }
 0xaa0   : > { %v5609_v18 = vrot.slane %v5608_v53, 2  ;;  %v5614_v40 = vadd.f32 %v7302_v22, %v5613_v27 }
 0xaa2   : > { %v5610_v42 = vadd.f32 %v5609_v18, %v5608_v53  ;;  %v5615_v33 = vrot.slane %v5614_v40, 2 }
 0xaa4   : > { %v5611_v30 = vrot.slane %v5610_v42, 1  ;;  %v5616_v54 = vadd.f32 %v5615_v33, %v5614_v40 }
 0xaa6   : > { %v5612_v38 = vadd.f32 %v5611_v30, %v5610_v42  ;;  %v5617_v36 = vrot.slane %v5616_v54, 1 }
 0xaa8   : > { %7303 = vlog2.f32 %v5612_v38  ;;  %v5618_v60 = vadd.f32 %v5617_v36, %v5616_v54 }
 0xaaa   : > { %7305 = vlog2.f32 %v5618_v60 }
 0xab5   : > { %v7304_v6 = vpop.eup %7303 }
 0xab6   : > { %v5632_v12 = vmul.f32 0.6931472, %v7304_v6 }
 0xab7   : > { %v7306_v29 = vpop.eup %7305 }
 0xab8   : > { %v5639_v61 = vsub.f32 %v5595_v25, %v5632_v12  ;;  %v5634_v19 = vmul.f32 0.6931472, %v7306_v29 }
 0xaba   : > { %5643 = vst [vmem:[%s10675_s25] sm:$0xff] %v5639_v61  ;;  %v5640_v50 = vsub.f32 %v5596_v32, %v5634_v19 }
 0xabc   : > { %5644 = vst [vmem:[%s10675_s25 + $0x8] sm:$0xff] %v5640_v50 }
 0xafb   : > { %v5564_v15 = vpop.f32.mrf.mxu1 }
 0xafc   : > { %v5565_v46 = vadd.f32 %v5564_v15, %v5388_v56 }
 0xafd   : > { %v5566_v9 = vpop.f32.mrf.mxu1 }
 0xafe   : > { %v5583_v51 = vrot.slane %v5565_v46, 4  ;;  %v5567_v26 = vadd.f32 %v5566_v9, %v5388_v56 }
 0xaff   : > { %v5568_v39 = vpop.f32.mrf.mxu1 }
 0xb00   : > { %v5584_v21 = vmax.f32 %v5565_v46, %v5583_v51  ;;  %v5589_v58 = vrot.slane %v5567_v26, 4 }
 0xb01   : > { %v5569_v37 = vpop.f32.mrf.mxu1 }
 0xb02   : > { %v5585_v47 = vrot.slane %v5584_v21, 2  ;;  %v5590_v8 = vmax.f32 %v5567_v26, %v5589_v58 }
 0xb04   : > { %v5586_v17 = vmax.f32 %v5584_v21, %v5585_v47  ;;  %v5591_v4 = vrot.slane %v5590_v8, 2 }
 0xb06   : > { %v5587_v2 = vrot.slane %v5586_v17, 1  ;;  %v5592_v11 = vmax.f32 %v5590_v8, %v5591_v4 }
 0xb08   : > { %v5588_v55 = vmax.f32 %v5586_v17, %v5587_v2  ;;  %v5593_v45 = vrot.slane %v5592_v11, 1 }
 0xb0a   : > { %v5597_v48 = vsub.f32 %v5565_v46, %v5588_v55  ;;  %v5594_v52 = vmax.f32 %v5592_v11, %v5593_v45 }
 0xb0c   : > { %v5603_v23 = vmul.f32 1.442695, %v5597_v48  ;;  %v5598_v62 = vsub.f32 %v5567_v26, %v5594_v52 }
 0xb0e   : > { %7307 = vpow2.f32 %v5603_v23  ;;  %v5605_v49 = vmul.f32 1.442695, %v5598_v62 }
 0xb10   : > { %7309 = vpow2.f32 %v5605_v49 }
 0xb1b   : > { %v7308_v56 = vpop.eup %7307 }
 0xb1c   : > { %v5619_v41 = vrot.slane %v7308_v56, 4 }
 0xb1d   : > { %v7310_v14 = vpop.eup %7309 }
 0xb1e   : > { %v5620_v63 = vadd.f32 %v7308_v56, %v5619_v41  ;;  %v5625_v13 = vrot.slane %v7310_v14, 4 }
 0xb20   : > { %v5621_v31 = vrot.slane %v5620_v63, 2  ;;  %v5626_v35 = vadd.f32 %v7310_v14, %v5625_v13 }
 0xb22   : > { %v5622_v34 = vadd.f32 %v5621_v31, %v5620_v63  ;;  %v5627_v7 = vrot.slane %v5626_v35, 2 }
 0xb24   : > { %v5623_v16 = vrot.slane %v5622_v34, 1  ;;  %v5628_v10 = vadd.f32 %v5627_v7, %v5626_v35 }
 0xb26   : > { %v5624_v43 = vadd.f32 %v5623_v16, %v5622_v34  ;;  %v5629_v28 = vrot.slane %v5628_v10, 1 }
 0xb28   : > { %7311 = vlog2.f32 %v5624_v43  ;;  %v5630_v5 = vadd.f32 %v5629_v28, %v5628_v10 }
 0xb2a   : > { %7313 = vlog2.f32 %v5630_v5 }
 0xb35   : > { %v7312_v59 = vpop.eup %7311 }
 0xb36   : > { %v5636_v24 = vmul.f32 0.6931472, %v7312_v59 }
 0xb37   : > { %v7314_v3 = vpop.eup %7313 }
 0xb38   : > { %v5641_v25 = vsub.f32 %v5597_v48, %v5636_v24  ;;  %v5638_v44 = vmul.f32 0.6931472, %v7314_v3 }
 0xb3a   : > { %5645 = vst [vmem:[%s10675_s25 + $0x10] sm:$0xff] %v5641_v25  ;;  %v5642_v0 = vsub.f32 %v5598_v62, %v5638_v44 }
 0xb3c   : > { %5646 = vst [vmem:[%s10675_s25 + $0x18] sm:$0xff] %v5642_v0 }
 0xb3d   : > { %7745 = shalt.err (!%p7742_p7)
}
 0xb3e   : > { %s7746_s18 = scalar_lea.hbm %s5660_s9, 512  ;;  %s7750_s13 = scalar_lea.hbm %s10724_s8, 4096 }
 0xb3f   : > { %p7747_p5 = scmp.ne.s32.totalorder %s5660_s9, %s7746_s18  ;;  %p7751_p12 = scmp.lt.s32.totalorder %s5660_s9, %s10724_s8 }
 0xb40   : > { %p7752_p0 = scmp.lt.s32.totalorder %s7750_s13, %s7746_s18 }
 0xb41   : > { %p7748_p10 = pnand %p7747_p5, %p11177_p8 }
 0xb42   : > { %p7753_p2 = por %p7752_p0, %p7751_p12 }
 0xb43   : > { %p7749_p11 = pneg %p7748_p10 }
 0xb45   : > { %p7754_p4 = pnand %p7753_p2, %p7749_p11 }
 0xb47   : > { %7757 = shalt.err (!%p7754_p4)
}
 0xb48   : > { %6602 = dma.vmem_to_hbm [thread:$0]  (%p11177_p8), %s5663_s26, 512, %s5660_s9, %s5648_s12  }
 0xb49 PF: > { %p6639_p9 = scmp.ge.s32.totalorder %s7808_s30, 2  ;;  %s5674_s22 = sand.u32 1, %s7796_s27  }
 0xb4a   : > { %p11178_p6 = scmp.ne.s32.totalorder %s10866_s17, 0  ;;  %s5675_s3 = scalar_lea.sflag [#allocation4], %s5674_s22 }
 0xb4c   : > { %p6625_p13 = pnand %p6639_p9, %p11178_p6 }
 0xb4e   : > { %p6626_p1 = pneg %p6625_p13 }
 0xb50   : > { %7791 = dma.done.wait (%p6626_p1), %s5675_s3, 512  }
 0xb51   : > { %7793 = vsyncadd (%p6626_p1), %s5675_s3, 4294966784  ;;  %p24_p3 = scmp.ge.s32.totalorder %s7966_s15, 10   ;;  %s11179_s27 = smov %s7800_s28 }
 0xb52   : > { %s11180_s28 = smov %s7804_s29  ;;  %s11181_s29 = smov %s7978_s19 }
 0xb53   : > { %s11182_s30 = smov %s7966_s15  ;;  %26 = sbr.rel (!%p24_p3) target bundleno = 11 (0xb), region = 124 }
 0xb58   :  { %5680 = vsyncpa [#allocation3], 1 }
 0xb59   :  { %5682 = vsyncpa [#allocation3 + $0x1], 1 }
 0xb5a   :  { %5683 = vsyncpa [#allocation6], 1 }
 0xb5b   :  { %5684 = vsyncpa [#allocation9], 1 }
 0xb5c   :  { %5685 = vsyncpa [#allocation12], 1 }
 0xb5d   :  { %5686 = vsyncpa [#allocation4], 1 }
 0xb5e   :  { %5688 = vsyncpa [#allocation4 + $0x1], 1 }

</bundles_post_ra>
